<compile_context>
chip_gen: v7x
topology: tpu7x:2x2x1
jax: 0.10.0
libtpu: 0.0.40
codegen_flags: <defaults>
</compile_context>

<pallas_src>
import functools

import jax
import jax.numpy as jnp
from jax import lax
from jax.experimental import pallas as pl
from jax.experimental.pallas import tpu as pltpu


# ----------------------------------------------------------------------------
# Fused conv3x3 + (folded BN) shift + ReLU (+ optional fused 2x2 maxpool)
# ----------------------------------------------------------------------------
def _conv_kernel(x_ref, w_ref, shift_ref, o_ref, xf_ref, *pool_scratch,
                 H, W, Cin, Cout, pool):
    """One batch image per grid step.

    x_ref:     (1, H, W, Cin)        activation tile (bf16 or f32)
    w_ref:     (9, Cin, Cout)        scale-folded conv weights, (kh*3+kw) major
    shift_ref: (1, Cout)             f32 per-channel shift (BN + conv bias)
    o_ref:     (1, OH', OW', Cout)   bf16 output (OH'=OH//2 etc. if pool)
    xf_ref:    (H, W, Cin) f32 VMEM  unpacked activation tile
    pool_scratch: [(OW, Cout) f32]   row buffer, only when pool=True
    """
    OH, OW = H - 2, W - 2

    # Unpack the (possibly bf16) tile once; all shifted slices below read f32.
    xf_ref[...] = x_ref[0].astype(jnp.float32)

    shift = shift_ref[...]                                   # (1, Cout) f32
    wk = [w_ref[k] for k in range(9)]                        # 9 x (Cin, Cout)

    def conv_row(oh):
        acc = jnp.zeros((OW, Cout), jnp.float32)
        for kh in range(3):
            for kw in range(3):
                xs = xf_ref[oh + kh, pl.ds(kw, OW), :]       # (OW, Cin) f32
                w_kk = wk[kh * 3 + kw]                       # (Cin, Cout)
                if Cin == 1:
                    # Degenerate K=1 contraction: broadcast multiply on the VPU.
                    acc = acc + xs * w_kk.astype(jnp.float32)
                else:
                    acc = acc + jnp.dot(xs, w_kk,
                                        preferred_element_type=jnp.float32)
        return jnp.maximum(acc + shift, 0.0)                 # (OW, Cout) f32

    if pool:
        (row_buf,) = pool_scratch                            # (OW, Cout) f32
        OWp = OW // 2

        def body(p, carry):
            # H-pool: max of the two conv rows of this pooling window.
            y = jnp.maximum(conv_row(2 * p), conv_row(2 * p + 1))
            row_buf[...] = y
            # W-pool: strided reads of even / odd columns from VMEM.
            even = row_buf[pl.ds(0, OWp, 2), :]
            odd = row_buf[pl.ds(1, OWp, 2), :]
            o_ref[0, p, :, :] = jnp.maximum(even, odd).astype(o_ref.dtype)
            return carry

        lax.fori_loop(0, OH // 2, body, 0)
    else:
        def body(oh, carry):
            o_ref[0, oh, :, :] = conv_row(oh).astype(o_ref.dtype)
            return carry

        lax.fori_loop(0, OH, body, 0)


def conv_block(x, w_eff, shift, *, pool):
    """x: (B, H, W, Cin) NHWC; w_eff: (9, Cin, Cout); shift: (1, Cout) f32."""
    B, H, W, Cin = x.shape
    Cout = w_eff.shape[-1]
    OH, OW = H - 2, W - 2
    OHo, OWo = (OH // 2, OW // 2) if pool else (OH, OW)

    kernel = functools.partial(_conv_kernel, H=H, W=W, Cin=Cin, Cout=Cout,
                               pool=pool)
    scratch_shapes = [pltpu.VMEM((H, W, Cin), jnp.float32)]
    if pool:
        scratch_shapes.append(pltpu.VMEM((OW, Cout), jnp.float32))

    return pl.pallas_call(
        kernel,
        out_shape=jax.ShapeDtypeStruct((B, OHo, OWo, Cout), jnp.bfloat16),
        grid=(B,),
        in_specs=[
            pl.BlockSpec((1, H, W, Cin), lambda b: (b, 0, 0, 0)),
            pl.BlockSpec((9, Cin, Cout), lambda b: (0, 0, 0)),
            pl.BlockSpec((1, Cout), lambda b: (0, 0)),
        ],
        out_specs=pl.BlockSpec((1, OHo, OWo, Cout), lambda b: (b, 0, 0, 0)),
        scratch_shapes=scratch_shapes,
        compiler_params=pltpu.CompilerParams(
            dimension_semantics=("parallel",)),
    )(x, w_eff, shift)


# ----------------------------------------------------------------------------
# Dense head: fused matmul + bias (+ ReLU), tiled over output columns
# ----------------------------------------------------------------------------
def _dense_kernel(x_ref, w_ref, b_ref, o_ref, *, relu):
    y = jnp.dot(x_ref[...], w_ref[...], preferred_element_type=jnp.float32)
    y = y + b_ref[...]
    if relu:
        y = jnp.maximum(y, 0.0)
    o_ref[...] = y.astype(o_ref.dtype)


def dense(x, w, bias, *, relu, out_dtype=jnp.bfloat16):
    """x: (B, K); w: (K, N) bf16; bias: (1, N) f32.  Grid tiles N so the
    weight stream is pipelined and both v7x TensorCores get work."""
    B, K = x.shape
    K2, N = w.shape
    assert K == K2
    if N % 256 == 0:
        TN = 256
    elif N % 128 == 0:
        TN = 128
    else:
        TN = N
    grid_n = N // TN
    kernel = functools.partial(_dense_kernel, relu=relu)
    return pl.pallas_call(
        kernel,
        out_shape=jax.ShapeDtypeStruct((B, N), out_dtype),
        grid=(grid_n,),
        in_specs=[
            pl.BlockSpec((B, K), lambda j: (0, 0)),     # stays VMEM-resident
            pl.BlockSpec((K, TN), lambda j: (0, j)),    # streamed weight tile
            pl.BlockSpec((1, TN), lambda j: (0, j)),
        ],
        out_specs=pl.BlockSpec((B, TN), lambda j: (0, j)),
        compiler_params=pltpu.CompilerParams(
            dimension_semantics=("parallel",)),
    )(x, w, bias)


# ----------------------------------------------------------------------------
# Parameter init (deterministic, PyTorch-layout synthetic) and preparation
# ----------------------------------------------------------------------------
def _init_conv(key, cin, cout):
    kw_, kb = jax.random.split(key)
    fan_in = 3 * 3 * cin
    bound = 1.0 / jnp.sqrt(fan_in)
    w = jax.random.uniform(kw_, (3, 3, cin, cout), jnp.float32, -bound, bound)
    b = jax.random.uniform(kb, (cout,), jnp.float32, -bound, bound)
    return dict(
        w=w, b=b,
        gamma=jnp.ones((cout,), jnp.float32),
        beta=jnp.zeros((cout,), jnp.float32),
        rmean=jnp.zeros((cout,), jnp.float32),
        rvar=jnp.ones((cout,), jnp.float32),
    )


def _init_linear(key, fin, fout):
    kw_, kb = jax.random.split(key)
    bound = 1.0 / jnp.sqrt(fin)
    w = jax.random.uniform(kw_, (fin, fout), jnp.float32, -bound, bound)
    b = jax.random.uniform(kb, (fout,), jnp.float32, -bound, bound)
    return dict(w=w, b=b)


def init_params(key):
    ks = jax.random.split(key, 7)
    return dict(
        c1=_init_conv(ks[0], 1, 16),
        c2=_init_conv(ks[1], 16, 32),
        c3=_init_conv(ks[2], 32, 64),
        c4=_init_conv(ks[3], 64, 128),
        d1=_init_linear(ks[4], 4 * 4 * 128, 1024),  # rows in PyTorch (C,H,W) order
        d2=_init_linear(ks[5], 1024, 128),
        d3=_init_linear(ks[6], 128, 10),
    )


def _prep_conv(p, eps=1e-5):
    # Eval-mode BN fold:  y = scale*conv + shift,  scale folded into weights.
    scale = p["gamma"] / jnp.sqrt(p["rvar"] + eps)                 # (Cout,)
    shift = p["beta"] + scale * (p["b"] - p["rmean"])              # (Cout,)
    cin, cout = p["w"].shape[2], p["w"].shape[3]
    w_eff = (p["w"] * scale[None, None, None, :]).reshape(9, cin, cout)
    # Conv weights are tiny (<0.3 MiB); keep f32 so the conv matmuls run on
    # the alignment-friendly f32 path (activations are still streamed bf16).
    return dict(w=w_eff.astype(jnp.float32),
                shift=shift.reshape(1, cout).astype(jnp.float32))


def prepare_params(params):
    """Fold BN, cast dense-head MXU operands to bf16, and permute d1's rows
    from PyTorch's (C,H,W) flatten order to NHWC (H,W,C) flatten order so no
    runtime transpose is needed before the flatten."""
    prepped = dict(
        c1=_prep_conv(params["c1"]),
        c2=_prep_conv(params["c2"]),
        c3=_prep_conv(params["c3"]),
        c4=_prep_conv(params["c4"]),
    )
    h = jnp.arange(4)[:, None, None]
    w = jnp.arange(4)[None, :, None]
    c = jnp.arange(128)[None, None, :]
    perm = (c * 16 + h * 4 + w).reshape(-1)          # NHWC row -> torch row
    w1 = params["d1"]["w"][perm, :]
    prepped["d1"] = dict(w=w1.astype(jnp.bfloat16),
                         b=params["d1"]["b"].reshape(1, -1).astype(jnp.float32))
    for name in ("d2", "d3"):
        prepped[name] = dict(
            w=params[name]["w"].astype(jnp.bfloat16),
            b=params[name]["b"].reshape(1, -1).astype(jnp.float32))
    return prepped


# ----------------------------------------------------------------------------
# Forward pass (matches Conv1.forward; BatchNorm in eval mode)
# ----------------------------------------------------------------------------
def conv1_forward(prepped, x_nchw):
    x = jnp.transpose(x_nchw, (0, 2, 3, 1)).astype(jnp.float32)   # NCHW -> NHWC

    x = conv_block(x, prepped["c1"]["w"], prepped["c1"]["shift"], pool=False)  # (B,26,26, 16)
    x = conv_block(x, prepped["c2"]["w"], prepped["c2"]["shift"], pool=True)   # (B,12,12, 32)
    x = conv_block(x, prepped["c3"]["w"], prepped["c3"]["shift"], pool=False)  # (B,10,10, 64)
    x = conv_block(x, prepped["c4"]["w"], prepped["c4"]["shift"], pool=True)   # (B, 4, 4,128)

    B = x.shape[0]
    x = x.reshape(B, -1)        # NHWC flatten; d1 rows were pre-permuted to match

    x = dense(x, prepped["d1"]["w"], prepped["d1"]["b"], relu=True)            # (B,1024)
    x = dense(x, prepped["d2"]["w"], prepped["d2"]["b"], relu=False)           # (B, 128)
    x = dense(x, prepped["d3"]["w"], prepped["d3"]["b"], relu=False,
              out_dtype=jnp.float32)                                           # (B,  10)
    return x


if __name__ == "__main__":
    key = jax.random.PRNGKey(0)
    kx, kp = jax.random.split(key)
    # 28x28 spatial input is implied by the dense head (4*4*128 after 2x (conv,conv,pool)).
    x = jax.random.normal(kx, (2, 1, 28, 28), dtype=jnp.float32)
    params = init_params(kp)
    prepped = prepare_params(params)

    fwd = jax.jit(conv1_forward)
    out = fwd(prepped, x)
    out = jax.block_until_ready(out)

    assert out.shape == (2, 10), out.shape
    assert out.dtype == jnp.float32
    assert bool(jnp.all(jnp.isfinite(out)))
    print("KERNEL_OK")
</pallas_src>

<mosaic_0001>
module attributes {stable_mosaic.version = 11 : i64} {
  func.func @_conv_kernel(%arg0: i32, %arg1: memref<1x26x26x16xbf16, #tpu.memory_space<vmem>>, %arg2: memref<9x16x32xf32, #tpu.memory_space<vmem>>, %arg3: memref<1x32xf32, #tpu.memory_space<vmem>>, %arg4: memref<1x12x12x32xbf16, #tpu.memory_space<vmem>>, %arg5: memref<26x26x16xf32, #tpu.memory_space<vmem>>, %arg6: memref<24x32xf32, #tpu.memory_space<vmem>>) attributes {dimension_semantics = [#tpu.dimension_semantics<parallel>], iteration_bounds = array<i64: 2>, scalar_prefetch = 0 : i64, scratch_operands = 2 : i64, tpu.core_type = #tpu.core_type<tc>, window_params = [{transform_indices = @transform_0, window_bounds = array<i64: 1, 26, 26, 16>}, {pipeline_mode = #tpu.pipeline_mode<synchronous>, transform_indices = @transform_1, window_bounds = array<i64: 9, 16, 32>}, {pipeline_mode = #tpu.pipeline_mode<synchronous>, transform_indices = @transform_2, window_bounds = array<i64: 1, 32>}, {transform_indices = @transform_3, window_bounds = array<i64: 1, 12, 12, 32>}]} {
    %c0 = arith.constant 0 : index
    %c0_0 = arith.constant 0 : index
    %c0_1 = arith.constant 0 : index
    %c0_2 = arith.constant 0 : index
    %0 = vector.load %arg1[%c0, %c0_0, %c0_1, %c0_2] : memref<1x26x26x16xbf16, #tpu.memory_space<vmem>>, vector<1x26x26x16xbf16>
    %1 = vector.shape_cast %0 : vector<1x26x26x16xbf16> to vector<26x26x16xbf16>
    %2 = arith.extf %1 : vector<26x26x16xbf16> to vector<26x26x16xf32>
    %c0_3 = arith.constant 0 : index
    %c0_4 = arith.constant 0 : index
    %c0_5 = arith.constant 0 : index
    %3 = vector.load %arg5[%c0_3, %c0_4, %c0_5] : memref<26x26x16xf32, #tpu.memory_space<vmem>>, vector<26x26x16xf32>
    tpu.vector_store %arg5[%c0_3, %c0_4, %c0_5], %2 {strides = array<i32>} : memref<26x26x16xf32, #tpu.memory_space<vmem>>, vector<26x26x16xf32>,
    %c0_6 = arith.constant 0 : index
    %c0_7 = arith.constant 0 : index
    %4 = vector.load %arg3[%c0_6, %c0_7] : memref<1x32xf32, #tpu.memory_space<vmem>>, vector<1x32xf32>
    %c0_8 = arith.constant 0 : index
    %c0_9 = arith.constant 0 : index
    %c0_10 = arith.constant 0 : index
    %5 = vector.load %arg2[%c0_8, %c0_9, %c0_10] : memref<9x16x32xf32, #tpu.memory_space<vmem>>, vector<1x16x32xf32>
    %6 = vector.shape_cast %5 : vector<1x16x32xf32> to vector<16x32xf32>
    %c1 = arith.constant 1 : index
    %c0_11 = arith.constant 0 : index
    %c0_12 = arith.constant 0 : index
    %7 = vector.load %arg2[%c1, %c0_11, %c0_12] : memref<9x16x32xf32, #tpu.memory_space<vmem>>, vector<1x16x32xf32>
    %8 = vector.shape_cast %7 : vector<1x16x32xf32> to vector<16x32xf32>
    %c2 = arith.constant 2 : index
    %c0_13 = arith.constant 0 : index
    %c0_14 = arith.constant 0 : index
    %9 = vector.load %arg2[%c2, %c0_13, %c0_14] : memref<9x16x32xf32, #tpu.memory_space<vmem>>, vector<1x16x32xf32>
    %10 = vector.shape_cast %9 : vector<1x16x32xf32> to vector<16x32xf32>
    %c3 = arith.constant 3 : index
    %c0_15 = arith.constant 0 : index
    %c0_16 = arith.constant 0 : index
    %11 = vector.load %arg2[%c3, %c0_15, %c0_16] : memref<9x16x32xf32, #tpu.memory_space<vmem>>, vector<1x16x32xf32>
    %12 = vector.shape_cast %11 : vector<1x16x32xf32> to vector<16x32xf32>
    %c4 = arith.constant 4 : index
    %c0_17 = arith.constant 0 : index
    %c0_18 = arith.constant 0 : index
    %13 = vector.load %arg2[%c4, %c0_17, %c0_18] : memref<9x16x32xf32, #tpu.memory_space<vmem>>, vector<1x16x32xf32>
    %14 = vector.shape_cast %13 : vector<1x16x32xf32> to vector<16x32xf32>
    %c5 = arith.constant 5 : index
    %c0_19 = arith.constant 0 : index
    %c0_20 = arith.constant 0 : index
    %15 = vector.load %arg2[%c5, %c0_19, %c0_20] : memref<9x16x32xf32, #tpu.memory_space<vmem>>, vector<1x16x32xf32>
    %16 = vector.shape_cast %15 : vector<1x16x32xf32> to vector<16x32xf32>
    %c6 = arith.constant 6 : index
    %c0_21 = arith.constant 0 : index
    %c0_22 = arith.constant 0 : index
    %17 = vector.load %arg2[%c6, %c0_21, %c0_22] : memref<9x16x32xf32, #tpu.memory_space<vmem>>, vector<1x16x32xf32>
    %18 = vector.shape_cast %17 : vector<1x16x32xf32> to vector<16x32xf32>
    %c7 = arith.constant 7 : index
    %c0_23 = arith.constant 0 : index
    %c0_24 = arith.constant 0 : index
    %19 = vector.load %arg2[%c7, %c0_23, %c0_24] : memref<9x16x32xf32, #tpu.memory_space<vmem>>, vector<1x16x32xf32>
    %20 = vector.shape_cast %19 : vector<1x16x32xf32> to vector<16x32xf32>
    %c8 = arith.constant 8 : index
    %c0_25 = arith.constant 0 : index
    %c0_26 = arith.constant 0 : index
    %21 = vector.load %arg2[%c8, %c0_25, %c0_26] : memref<9x16x32xf32, #tpu.memory_space<vmem>>, vector<1x16x32xf32>
    %22 = vector.shape_cast %21 : vector<1x16x32xf32> to vector<16x32xf32>
    %c0_i32 = arith.constant 0 : i32
    %c12_i32 = arith.constant 12 : i32
    %23 = arith.addi %c0_i32, %c12_i32 : i32
    %c1_i32 = arith.constant 1 : i32
    scf.for %arg7 = %c0_i32 to %23 step %c1_i32  : i32 {
      %c2_i32 = arith.constant 2 : i32
      %24 = arith.muli %c2_i32, %arg7 : i32
      %cst = arith.constant 0.000000e+00 : f32
      %25 = vector.broadcast %cst : f32 to vector<24x32xf32>
      %c0_i32_28 = arith.constant 0 : i32
      %26 = arith.addi %24, %c0_i32_28 : i32
      %27 = arith.index_cast %26 : i32 to index
      %c0_29 = arith.constant 0 : index
      %c0_30 = arith.constant 0 : index
      %28 = vector.load %arg5[%27, %c0_29, %c0_30] : memref<26x26x16xf32, #tpu.memory_space<vmem>>, vector<1x24x16xf32>
      %29 = vector.shape_cast %28 : vector<1x24x16xf32> to vector<24x16xf32>
      %cst_31 = arith.constant dense<0.000000e+00> : vector<24x32xf32>
      %30 = tpu.matmul %29, %6, %cst_31 {dimension_numbers = #tpu.dot_dimension_numbers<[1], [0], [0], [1], [0, 0, 1, 1], [], []>} : vector<24x16xf32>, vector<16x32xf32>, vector<24x32xf32> -> vector<24x32xf32>
      %31 = arith.addf %25, %30 : vector<24x32xf32>
      %c0_i32_32 = arith.constant 0 : i32
      %32 = arith.addi %24, %c0_i32_32 : i32
      %33 = arith.index_cast %32 : i32 to index
      %c1_33 = arith.constant 1 : index
      %c0_34 = arith.constant 0 : index
      %34 = vector.load %arg5[%33, %c1_33, %c0_34] : memref<26x26x16xf32, #tpu.memory_space<vmem>>, vector<1x24x16xf32>
      %35 = vector.shape_cast %34 : vector<1x24x16xf32> to vector<24x16xf32>
      %cst_35 = arith.constant dense<0.000000e+00> : vector<24x32xf32>
      %36 = tpu.matmul %35, %8, %cst_35 {dimension_numbers = #tpu.dot_dimension_numbers<[1], [0], [0], [1], [0, 0, 1, 1], [], []>} : vector<24x16xf32>, vector<16x32xf32>, vector<24x32xf32> -> vector<24x32xf32>
      %37 = arith.addf %31, %36 : vector<24x32xf32>
      %c0_i32_36 = arith.constant 0 : i32
      %38 = arith.addi %24, %c0_i32_36 : i32
      %39 = arith.index_cast %38 : i32 to index
      %c2_37 = arith.constant 2 : index
      %c0_38 = arith.constant 0 : index
      %40 = vector.load %arg5[%39, %c2_37, %c0_38] : memref<26x26x16xf32, #tpu.memory_space<vmem>>, vector<1x24x16xf32>
      %41 = vector.shape_cast %40 : vector<1x24x16xf32> to vector<24x16xf32>
      %cst_39 = arith.constant dense<0.000000e+00> : vector<24x32xf32>
      %42 = tpu.matmul %41, %10, %cst_39 {dimension_numbers = #tpu.dot_dimension_numbers<[1], [0], [0], [1], [0, 0, 1, 1], [], []>} : vector<24x16xf32>, vector<16x32xf32>, vector<24x32xf32> -> vector<24x32xf32>
      %43 = arith.addf %37, %42 : vector<24x32xf32>
      %c1_i32_40 = arith.constant 1 : i32
      %44 = arith.addi %24, %c1_i32_40 : i32
      %45 = arith.index_cast %44 : i32 to index
      %c0_41 = arith.constant 0 : index
      %c0_42 = arith.constant 0 : index
      %46 = vector.load %arg5[%45, %c0_41, %c0_42] : memref<26x26x16xf32, #tpu.memory_space<vmem>>, vector<1x24x16xf32>
      %47 = vector.shape_cast %46 : vector<1x24x16xf32> to vector<24x16xf32>
      %cst_43 = arith.constant dense<0.000000e+00> : vector<24x32xf32>
      %48 = tpu.matmul %47, %12, %cst_43 {dimension_numbers = #tpu.dot_dimension_numbers<[1], [0], [0], [1], [0, 0, 1, 1], [], []>} : vector<24x16xf32>, vector<16x32xf32>, vector<24x32xf32> -> vector<24x32xf32>
      %49 = arith.addf %43, %48 : vector<24x32xf32>
      %c1_i32_44 = arith.constant 1 : i32
      %50 = arith.addi %24, %c1_i32_44 : i32
      %51 = arith.index_cast %50 : i32 to index
      %c1_45 = arith.constant 1 : index
      %c0_46 = arith.constant 0 : index
      %52 = vector.load %arg5[%51, %c1_45, %c0_46] : memref<26x26x16xf32, #tpu.memory_space<vmem>>, vector<1x24x16xf32>
      %53 = vector.shape_cast %52 : vector<1x24x16xf32> to vector<24x16xf32>
      %cst_47 = arith.constant dense<0.000000e+00> : vector<24x32xf32>
      %54 = tpu.matmul %53, %14, %cst_47 {dimension_numbers = #tpu.dot_dimension_numbers<[1], [0], [0], [1], [0, 0, 1, 1], [], []>} : vector<24x16xf32>, vector<16x32xf32>, vector<24x32xf32> -> vector<24x32xf32>
      %55 = arith.addf %49, %54 : vector<24x32xf32>
      %c1_i32_48 = arith.constant 1 : i32
      %56 = arith.addi %24, %c1_i32_48 : i32
      %57 = arith.index_cast %56 : i32 to index
      %c2_49 = arith.constant 2 : index
      %c0_50 = arith.constant 0 : index
      %58 = vector.load %arg5[%57, %c2_49, %c0_50] : memref<26x26x16xf32, #tpu.memory_space<vmem>>, vector<1x24x16xf32>
      %59 = vector.shape_cast %58 : vector<1x24x16xf32> to vector<24x16xf32>
      %cst_51 = arith.constant dense<0.000000e+00> : vector<24x32xf32>
      %60 = tpu.matmul %59, %16, %cst_51 {dimension_numbers = #tpu.dot_dimension_numbers<[1], [0], [0], [1], [0, 0, 1, 1], [], []>} : vector<24x16xf32>, vector<16x32xf32>, vector<24x32xf32> -> vector<24x32xf32>
      %61 = arith.addf %55, %60 : vector<24x32xf32>
      %c2_i32_52 = arith.constant 2 : i32
      %62 = arith.addi %24, %c2_i32_52 : i32
      %63 = arith.index_cast %62 : i32 to index
      %c0_53 = arith.constant 0 : index
      %c0_54 = arith.constant 0 : index
      %64 = vector.load %arg5[%63, %c0_53, %c0_54] : memref<26x26x16xf32, #tpu.memory_space<vmem>>, vector<1x24x16xf32>
      %65 = vector.shape_cast %64 : vector<1x24x16xf32> to vector<24x16xf32>
      %cst_55 = arith.constant dense<0.000000e+00> : vector<24x32xf32>
      %66 = tpu.matmul %65, %18, %cst_55 {dimension_numbers = #tpu.dot_dimension_numbers<[1], [0], [0], [1], [0, 0, 1, 1], [], []>} : vector<24x16xf32>, vector<16x32xf32>, vector<24x32xf32> -> vector<24x32xf32>
      %67 = arith.addf %61, %66 : vector<24x32xf32>
      %c2_i32_56 = arith.constant 2 : i32
      %68 = arith.addi %24, %c2_i32_56 : i32
      %69 = arith.index_cast %68 : i32 to index
      %c1_57 = arith.constant 1 : index
      %c0_58 = arith.constant 0 : index
      %70 = vector.load %arg5[%69, %c1_57, %c0_58] : memref<26x26x16xf32, #tpu.memory_space<vmem>>, vector<1x24x16xf32>
      %71 = vector.shape_cast %70 : vector<1x24x16xf32> to vector<24x16xf32>
      %cst_59 = arith.constant dense<0.000000e+00> : vector<24x32xf32>
      %72 = tpu.matmul %71, %20, %cst_59 {dimension_numbers = #tpu.dot_dimension_numbers<[1], [0], [0], [1], [0, 0, 1, 1], [], []>} : vector<24x16xf32>, vector<16x32xf32>, vector<24x32xf32> -> vector<24x32xf32>
      %73 = arith.addf %67, %72 : vector<24x32xf32>
      %c2_i32_60 = arith.constant 2 : i32
      %74 = arith.addi %24, %c2_i32_60 : i32
      %75 = arith.index_cast %74 : i32 to index
      %c2_61 = arith.constant 2 : index
      %c0_62 = arith.constant 0 : index
      %76 = vector.load %arg5[%75, %c2_61, %c0_62] : memref<26x26x16xf32, #tpu.memory_space<vmem>>, vector<1x24x16xf32>
      %77 = vector.shape_cast %76 : vector<1x24x16xf32> to vector<24x16xf32>
      %cst_63 = arith.constant dense<0.000000e+00> : vector<24x32xf32>
      %78 = tpu.matmul %77, %22, %cst_63 {dimension_numbers = #tpu.dot_dimension_numbers<[1], [0], [0], [1], [0, 0, 1, 1], [], []>} : vector<24x16xf32>, vector<16x32xf32>, vector<24x32xf32> -> vector<24x32xf32>
      %79 = arith.addf %73, %78 : vector<24x32xf32>
      %80 = vector.broadcast %4 : vector<1x32xf32> to vector<24x32xf32>
      %81 = arith.addf %79, %80 : vector<24x32xf32>
      %cst_64 = arith.constant 0.000000e+00 : f32
      %82 = vector.broadcast %cst_64 : f32 to vector<24x32xf32>
      %83 = arith.maximumf %81, %82 : vector<24x32xf32>
      %c2_i32_65 = arith.constant 2 : i32
      %84 = arith.muli %c2_i32_65, %arg7 : i32
      %c1_i32_66 = arith.constant 1 : i32
      %85 = arith.addi %84, %c1_i32_66 : i32
      %cst_67 = arith.constant 0.000000e+00 : f32
      %86 = vector.broadcast %cst_67 : f32 to vector<24x32xf32>
      %c0_i32_68 = arith.constant 0 : i32
      %87 = arith.addi %85, %c0_i32_68 : i32
      %88 = arith.index_cast %87 : i32 to index
      %c0_69 = arith.constant 0 : index
      %c0_70 = arith.constant 0 : index
      %89 = vector.load %arg5[%88, %c0_69, %c0_70] : memref<26x26x16xf32, #tpu.memory_space<vmem>>, vector<1x24x16xf32>
      %90 = vector.shape_cast %89 : vector<1x24x16xf32> to vector<24x16xf32>
      %cst_71 = arith.constant dense<0.000000e+00> : vector<24x32xf32>
      %91 = tpu.matmul %90, %6, %cst_71 {dimension_numbers = #tpu.dot_dimension_numbers<[1], [0], [0], [1], [0, 0, 1, 1], [], []>} : vector<24x16xf32>, vector<16x32xf32>, vector<24x32xf32> -> vector<24x32xf32>
      %92 = arith.addf %86, %91 : vector<24x32xf32>
      %c0_i32_72 = arith.constant 0 : i32
      %93 = arith.addi %85, %c0_i32_72 : i32
      %94 = arith.index_cast %93 : i32 to index
      %c1_73 = arith.constant 1 : index
      %c0_74 = arith.constant 0 : index
      %95 = vector.load %arg5[%94, %c1_73, %c0_74] : memref<26x26x16xf32, #tpu.memory_space<vmem>>, vector<1x24x16xf32>
      %96 = vector.shape_cast %95 : vector<1x24x16xf32> to vector<24x16xf32>
      %cst_75 = arith.constant dense<0.000000e+00> : vector<24x32xf32>
      %97 = tpu.matmul %96, %8, %cst_75 {dimension_numbers = #tpu.dot_dimension_numbers<[1], [0], [0], [1], [0, 0, 1, 1], [], []>} : vector<24x16xf32>, vector<16x32xf32>, vector<24x32xf32> -> vector<24x32xf32>
      %98 = arith.addf %92, %97 : vector<24x32xf32>
      %c0_i32_76 = arith.constant 0 : i32
      %99 = arith.addi %85, %c0_i32_76 : i32
      %100 = arith.index_cast %99 : i32 to index
      %c2_77 = arith.constant 2 : index
      %c0_78 = arith.constant 0 : index
      %101 = vector.load %arg5[%100, %c2_77, %c0_78] : memref<26x26x16xf32, #tpu.memory_space<vmem>>, vector<1x24x16xf32>
      %102 = vector.shape_cast %101 : vector<1x24x16xf32> to vector<24x16xf32>
      %cst_79 = arith.constant dense<0.000000e+00> : vector<24x32xf32>
      %103 = tpu.matmul %102, %10, %cst_79 {dimension_numbers = #tpu.dot_dimension_numbers<[1], [0], [0], [1], [0, 0, 1, 1], [], []>} : vector<24x16xf32>, vector<16x32xf32>, vector<24x32xf32> -> vector<24x32xf32>
      %104 = arith.addf %98, %103 : vector<24x32xf32>
      %c1_i32_80 = arith.constant 1 : i32
      %105 = arith.addi %85, %c1_i32_80 : i32
      %106 = arith.index_cast %105 : i32 to index
      %c0_81 = arith.constant 0 : index
      %c0_82 = arith.constant 0 : index
      %107 = vector.load %arg5[%106, %c0_81, %c0_82] : memref<26x26x16xf32, #tpu.memory_space<vmem>>, vector<1x24x16xf32>
      %108 = vector.shape_cast %107 : vector<1x24x16xf32> to vector<24x16xf32>
      %cst_83 = arith.constant dense<0.000000e+00> : vector<24x32xf32>
      %109 = tpu.matmul %108, %12, %cst_83 {dimension_numbers = #tpu.dot_dimension_numbers<[1], [0], [0], [1], [0, 0, 1, 1], [], []>} : vector<24x16xf32>, vector<16x32xf32>, vector<24x32xf32> -> vector<24x32xf32>
      %110 = arith.addf %104, %109 : vector<24x32xf32>
      %c1_i32_84 = arith.constant 1 : i32
      %111 = arith.addi %85, %c1_i32_84 : i32
      %112 = arith.index_cast %111 : i32 to index
      %c1_85 = arith.constant 1 : index
      %c0_86 = arith.constant 0 : index
      %113 = vector.load %arg5[%112, %c1_85, %c0_86] : memref<26x26x16xf32, #tpu.memory_space<vmem>>, vector<1x24x16xf32>
      %114 = vector.shape_cast %113 : vector<1x24x16xf32> to vector<24x16xf32>
      %cst_87 = arith.constant dense<0.000000e+00> : vector<24x32xf32>
      %115 = tpu.matmul %114, %14, %cst_87 {dimension_numbers = #tpu.dot_dimension_numbers<[1], [0], [0], [1], [0, 0, 1, 1], [], []>} : vector<24x16xf32>, vector<16x32xf32>, vector<24x32xf32> -> vector<24x32xf32>
      %116 = arith.addf %110, %115 : vector<24x32xf32>
      %c1_i32_88 = arith.constant 1 : i32
      %117 = arith.addi %85, %c1_i32_88 : i32
      %118 = arith.index_cast %117 : i32 to index
      %c2_89 = arith.constant 2 : index
      %c0_90 = arith.constant 0 : index
      %119 = vector.load %arg5[%118, %c2_89, %c0_90] : memref<26x26x16xf32, #tpu.memory_space<vmem>>, vector<1x24x16xf32>
      %120 = vector.shape_cast %119 : vector<1x24x16xf32> to vector<24x16xf32>
      %cst_91 = arith.constant dense<0.000000e+00> : vector<24x32xf32>
      %121 = tpu.matmul %120, %16, %cst_91 {dimension_numbers = #tpu.dot_dimension_numbers<[1], [0], [0], [1], [0, 0, 1, 1], [], []>} : vector<24x16xf32>, vector<16x32xf32>, vector<24x32xf32> -> vector<24x32xf32>
      %122 = arith.addf %116, %121 : vector<24x32xf32>
      %c2_i32_92 = arith.constant 2 : i32
      %123 = arith.addi %85, %c2_i32_92 : i32
      %124 = arith.index_cast %123 : i32 to index
      %c0_93 = arith.constant 0 : index
      %c0_94 = arith.constant 0 : index
      %125 = vector.load %arg5[%124, %c0_93, %c0_94] : memref<26x26x16xf32, #tpu.memory_space<vmem>>, vector<1x24x16xf32>
      %126 = vector.shape_cast %125 : vector<1x24x16xf32> to vector<24x16xf32>
      %cst_95 = arith.constant dense<0.000000e+00> : vector<24x32xf32>
      %127 = tpu.matmul %126, %18, %cst_95 {dimension_numbers = #tpu.dot_dimension_numbers<[1], [0], [0], [1], [0, 0, 1, 1], [], []>} : vector<24x16xf32>, vector<16x32xf32>, vector<24x32xf32> -> vector<24x32xf32>
      %128 = arith.addf %122, %127 : vector<24x32xf32>
      %c2_i32_96 = arith.constant 2 : i32
      %129 = arith.addi %85, %c2_i32_96 : i32
      %130 = arith.index_cast %129 : i32 to index
      %c1_97 = arith.constant 1 : index
      %c0_98 = arith.constant 0 : index
      %131 = vector.load %arg5[%130, %c1_97, %c0_98] : memref<26x26x16xf32, #tpu.memory_space<vmem>>, vector<1x24x16xf32>
      %132 = vector.shape_cast %131 : vector<1x24x16xf32> to vector<24x16xf32>
      %cst_99 = arith.constant dense<0.000000e+00> : vector<24x32xf32>
      %133 = tpu.matmul %132, %20, %cst_99 {dimension_numbers = #tpu.dot_dimension_numbers<[1], [0], [0], [1], [0, 0, 1, 1], [], []>} : vector<24x16xf32>, vector<16x32xf32>, vector<24x32xf32> -> vector<24x32xf32>
      %134 = arith.addf %128, %133 : vector<24x32xf32>
      %c2_i32_100 = arith.constant 2 : i32
      %135 = arith.addi %85, %c2_i32_100 : i32
      %136 = arith.index_cast %135 : i32 to index
      %c2_101 = arith.constant 2 : index
      %c0_102 = arith.constant 0 : index
      %137 = vector.load %arg5[%136, %c2_101, %c0_102] : memref<26x26x16xf32, #tpu.memory_space<vmem>>, vector<1x24x16xf32>
      %138 = vector.shape_cast %137 : vector<1x24x16xf32> to vector<24x16xf32>
      %cst_103 = arith.constant dense<0.000000e+00> : vector<24x32xf32>
      %139 = tpu.matmul %138, %22, %cst_103 {dimension_numbers = #tpu.dot_dimension_numbers<[1], [0], [0], [1], [0, 0, 1, 1], [], []>} : vector<24x16xf32>, vector<16x32xf32>, vector<24x32xf32> -> vector<24x32xf32>
      %140 = arith.addf %134, %139 : vector<24x32xf32>
      %141 = vector.broadcast %4 : vector<1x32xf32> to vector<24x32xf32>
      %142 = arith.addf %140, %141 : vector<24x32xf32>
      %cst_104 = arith.constant 0.000000e+00 : f32
      %143 = vector.broadcast %cst_104 : f32 to vector<24x32xf32>
      %144 = arith.maximumf %142, %143 : vector<24x32xf32>
      %145 = arith.maximumf %83, %144 : vector<24x32xf32>
      %c0_105 = arith.constant 0 : index
      %c0_106 = arith.constant 0 : index
      %146 = vector.load %arg6[%c0_105, %c0_106] : memref<24x32xf32, #tpu.memory_space<vmem>>, vector<24x32xf32>
      tpu.vector_store %arg6[%c0_105, %c0_106], %145 {strides = array<i32>} : memref<24x32xf32, #tpu.memory_space<vmem>>, vector<24x32xf32>,
      %c0_107 = arith.constant 0 : index
      %c0_108 = arith.constant 0 : index
      %147 = tpu.strided_load %arg6[%c0_107, %c0_108] {strides = array<i32: 2, 1>} : memref<24x32xf32, #tpu.memory_space<vmem>>, vector<12x32xf32>
      %c1_109 = arith.constant 1 : index
      %c0_110 = arith.constant 0 : index
      %148 = tpu.strided_load %arg6[%c1_109, %c0_110] {strides = array<i32: 2, 1>} : memref<24x32xf32, #tpu.memory_space<vmem>>, vector<12x32xf32>
      %149 = arith.maximumf %147, %148 : vector<12x32xf32>
      %150 = arith.truncf %149 : vector<12x32xf32> to vector<12x32xbf16>
      %c0_111 = arith.constant 0 : index
      %151 = arith.index_cast %arg7 : i32 to index
      %c0_112 = arith.constant 0 : index
      %c0_113 = arith.constant 0 : index
      %152 = vector.load %arg4[%c0_111, %151, %c0_112, %c0_113] : memref<1x12x12x32xbf16, #tpu.memory_space<vmem>>, vector<1x1x12x32xbf16>
      %153 = vector.shape_cast %152 : vector<1x1x12x32xbf16> to vector<12x32xbf16>
      %154 = vector.shape_cast %150 : vector<12x32xbf16> to vector<1x1x12x32xbf16>
      tpu.vector_store %arg4[%c0_111, %151, %c0_112, %c0_113], %154 {strides = array<i32>} : memref<1x12x12x32xbf16, #tpu.memory_space<vmem>>, vector<1x1x12x32xbf16>,
    }
    %c12_i32_27 = arith.constant 12 : i32
    return
  }
  func.func @transform_0(%arg0: i32) -> (i32, i32, i32, i32) {
    %c0_i32 = arith.constant 0 : i32
    %c0_i32_0 = arith.constant 0 : i32
    %c0_i32_1 = arith.constant 0 : i32
    %c0_i32_2 = arith.constant 0 : i32
    return %arg0, %c0_i32, %c0_i32_0, %c0_i32_1 : i32, i32, i32, i32
  }
  func.func @transform_1(%arg0: i32) -> (i32, i32, i32) {
    %c0_i32 = arith.constant 0 : i32
    %c0_i32_0 = arith.constant 0 : i32
    %c0_i32_1 = arith.constant 0 : i32
    %c0_i32_2 = arith.constant 0 : i32
    return %c0_i32, %c0_i32_0, %c0_i32_1 : i32, i32, i32
  }
  func.func @transform_2(%arg0: i32) -> (i32, i32) {
    %c0_i32 = arith.constant 0 : i32
    %c0_i32_0 = arith.constant 0 : i32
    %c0_i32_1 = arith.constant 0 : i32
    return %c0_i32, %c0_i32_0 : i32, i32
  }
  func.func @transform_3(%arg0: i32) -> (i32, i32, i32, i32) {
    %c0_i32 = arith.constant 0 : i32
    %c0_i32_0 = arith.constant 0 : i32
    %c0_i32_1 = arith.constant 0 : i32
    %c0_i32_2 = arith.constant 0 : i32
    return %arg0, %c0_i32, %c0_i32_0, %c0_i32_1 : i32, i32, i32, i32
  }
}

module attributes {stable_mosaic.version = 11 : i64} {
  func.func @_conv_kernel(%arg0: i32, %arg1: memref<1x28x28x1xf32, #tpu.memory_space<vmem>>, %arg2: memref<9x1x16xf32, #tpu.memory_space<vmem>>, %arg3: memref<1x16xf32, #tpu.memory_space<vmem>>, %arg4: memref<1x26x26x16xbf16, #tpu.memory_space<vmem>>, %arg5: memref<28x28x1xf32, #tpu.memory_space<vmem>>) attributes {dimension_semantics = [#tpu.dimension_semantics<parallel>], iteration_bounds = array<i64: 2>, scalar_prefetch = 0 : i64, scratch_operands = 1 : i64, tpu.core_type = #tpu.core_type<tc>, window_params = [{transform_indices = @transform_0, window_bounds = array<i64: 1, 28, 28, 1>}, {pipeline_mode = #tpu.pipeline_mode<synchronous>, transform_indices = @transform_1, window_bounds = array<i64: 9, 1, 16>}, {pipeline_mode = #tpu.pipeline_mode<synchronous>, transform_indices = @transform_2, window_bounds = array<i64: 1, 16>}, {transform_indices = @transform_3, window_bounds = array<i64: 1, 26, 26, 16>}]} {
    %c0 = arith.constant 0 : index
    %c0_0 = arith.constant 0 : index
    %c0_1 = arith.constant 0 : index
    %c0_2 = arith.constant 0 : index
    %0 = vector.load %arg1[%c0, %c0_0, %c0_1, %c0_2] : memref<1x28x28x1xf32, #tpu.memory_space<vmem>>, vector<1x28x28x1xf32>
    %1 = vector.shape_cast %0 : vector<1x28x28x1xf32> to vector<28x28x1xf32>
    %c0_3 = arith.constant 0 : index
    %c0_4 = arith.constant 0 : index
    %c0_5 = arith.constant 0 : index
    %2 = vector.load %arg5[%c0_3, %c0_4, %c0_5] : memref<28x28x1xf32, #tpu.memory_space<vmem>>, vector<28x28x1xf32>
    tpu.vector_store %arg5[%c0_3, %c0_4, %c0_5], %1 {strides = array<i32>} : memref<28x28x1xf32, #tpu.memory_space<vmem>>, vector<28x28x1xf32>,
    %c0_6 = arith.constant 0 : index
    %c0_7 = arith.constant 0 : index
    %3 = vector.load %arg3[%c0_6, %c0_7] : memref<1x16xf32, #tpu.memory_space<vmem>>, vector<1x16xf32>
    %c0_8 = arith.constant 0 : index
    %c0_9 = arith.constant 0 : index
    %c0_10 = arith.constant 0 : index
    %4 = vector.load %arg2[%c0_8, %c0_9, %c0_10] : memref<9x1x16xf32, #tpu.memory_space<vmem>>, vector<1x1x16xf32>
    %5 = vector.shape_cast %4 : vector<1x1x16xf32> to vector<1x16xf32>
    %c1 = arith.constant 1 : index
    %c0_11 = arith.constant 0 : index
    %c0_12 = arith.constant 0 : index
    %6 = vector.load %arg2[%c1, %c0_11, %c0_12] : memref<9x1x16xf32, #tpu.memory_space<vmem>>, vector<1x1x16xf32>
    %7 = vector.shape_cast %6 : vector<1x1x16xf32> to vector<1x16xf32>
    %c2 = arith.constant 2 : index
    %c0_13 = arith.constant 0 : index
    %c0_14 = arith.constant 0 : index
    %8 = vector.load %arg2[%c2, %c0_13, %c0_14] : memref<9x1x16xf32, #tpu.memory_space<vmem>>, vector<1x1x16xf32>
    %9 = vector.shape_cast %8 : vector<1x1x16xf32> to vector<1x16xf32>
    %c3 = arith.constant 3 : index
    %c0_15 = arith.constant 0 : index
    %c0_16 = arith.constant 0 : index
    %10 = vector.load %arg2[%c3, %c0_15, %c0_16] : memref<9x1x16xf32, #tpu.memory_space<vmem>>, vector<1x1x16xf32>
    %11 = vector.shape_cast %10 : vector<1x1x16xf32> to vector<1x16xf32>
    %c4 = arith.constant 4 : index
    %c0_17 = arith.constant 0 : index
    %c0_18 = arith.constant 0 : index
    %12 = vector.load %arg2[%c4, %c0_17, %c0_18] : memref<9x1x16xf32, #tpu.memory_space<vmem>>, vector<1x1x16xf32>
    %13 = vector.shape_cast %12 : vector<1x1x16xf32> to vector<1x16xf32>
    %c5 = arith.constant 5 : index
    %c0_19 = arith.constant 0 : index
    %c0_20 = arith.constant 0 : index
    %14 = vector.load %arg2[%c5, %c0_19, %c0_20] : memref<9x1x16xf32, #tpu.memory_space<vmem>>, vector<1x1x16xf32>
    %15 = vector.shape_cast %14 : vector<1x1x16xf32> to vector<1x16xf32>
    %c6 = arith.constant 6 : index
    %c0_21 = arith.constant 0 : index
    %c0_22 = arith.constant 0 : index
    %16 = vector.load %arg2[%c6, %c0_21, %c0_22] : memref<9x1x16xf32, #tpu.memory_space<vmem>>, vector<1x1x16xf32>
    %17 = vector.shape_cast %16 : vector<1x1x16xf32> to vector<1x16xf32>
    %c7 = arith.constant 7 : index
    %c0_23 = arith.constant 0 : index
    %c0_24 = arith.constant 0 : index
    %18 = vector.load %arg2[%c7, %c0_23, %c0_24] : memref<9x1x16xf32, #tpu.memory_space<vmem>>, vector<1x1x16xf32>
    %19 = vector.shape_cast %18 : vector<1x1x16xf32> to vector<1x16xf32>
    %c8 = arith.constant 8 : index
    %c0_25 = arith.constant 0 : index
    %c0_26 = arith.constant 0 : index
    %20 = vector.load %arg2[%c8, %c0_25, %c0_26] : memref<9x1x16xf32, #tpu.memory_space<vmem>>, vector<1x1x16xf32>
    %21 = vector.shape_cast %20 : vector<1x1x16xf32> to vector<1x16xf32>
    %c0_i32 = arith.constant 0 : i32
    %c26_i32 = arith.constant 26 : i32
    %22 = arith.addi %c0_i32, %c26_i32 : i32
    %c1_i32 = arith.constant 1 : i32
    scf.for %arg6 = %c0_i32 to %22 step %c1_i32  : i32 {
      %cst = arith.constant 0.000000e+00 : f32
      %23 = vector.broadcast %cst : f32 to vector<26x16xf32>
      %c0_i32_28 = arith.constant 0 : i32
      %24 = arith.addi %arg6, %c0_i32_28 : i32
      %25 = arith.index_cast %24 : i32 to index
      %c0_29 = arith.constant 0 : index
      %c0_30 = arith.constant 0 : index
      %26 = vector.load %arg5[%25, %c0_29, %c0_30] : memref<28x28x1xf32, #tpu.memory_space<vmem>>, vector<1x26x1xf32>
      %27 = vector.shape_cast %26 : vector<1x26x1xf32> to vector<26x1xf32>
      %28 = vector.broadcast %27 : vector<26x1xf32> to vector<26x16xf32>
      %29 = vector.broadcast %5 : vector<1x16xf32> to vector<26x16xf32>
      %30 = arith.mulf %28, %29 : vector<26x16xf32>
      %31 = arith.addf %23, %30 : vector<26x16xf32>
      %c0_i32_31 = arith.constant 0 : i32
      %32 = arith.addi %arg6, %c0_i32_31 : i32
      %33 = arith.index_cast %32 : i32 to index
      %c1_32 = arith.constant 1 : index
      %c0_33 = arith.constant 0 : index
      %34 = vector.load %arg5[%33, %c1_32, %c0_33] : memref<28x28x1xf32, #tpu.memory_space<vmem>>, vector<1x26x1xf32>
      %35 = vector.shape_cast %34 : vector<1x26x1xf32> to vector<26x1xf32>
      %36 = vector.broadcast %35 : vector<26x1xf32> to vector<26x16xf32>
      %37 = vector.broadcast %7 : vector<1x16xf32> to vector<26x16xf32>
      %38 = arith.mulf %36, %37 : vector<26x16xf32>
      %39 = arith.addf %31, %38 : vector<26x16xf32>
      %c0_i32_34 = arith.constant 0 : i32
      %40 = arith.addi %arg6, %c0_i32_34 : i32
      %41 = arith.index_cast %40 : i32 to index
      %c2_35 = arith.constant 2 : index
      %c0_36 = arith.constant 0 : index
      %42 = vector.load %arg5[%41, %c2_35, %c0_36] : memref<28x28x1xf32, #tpu.memory_space<vmem>>, vector<1x26x1xf32>
      %43 = vector.shape_cast %42 : vector<1x26x1xf32> to vector<26x1xf32>
      %44 = vector.broadcast %43 : vector<26x1xf32> to vector<26x16xf32>
      %45 = vector.broadcast %9 : vector<1x16xf32> to vector<26x16xf32>
      %46 = arith.mulf %44, %45 : vector<26x16xf32>
      %47 = arith.addf %39, %46 : vector<26x16xf32>
      %c1_i32_37 = arith.constant 1 : i32
      %48 = arith.addi %arg6, %c1_i32_37 : i32
      %49 = arith.index_cast %48 : i32 to index
      %c0_38 = arith.constant 0 : index
      %c0_39 = arith.constant 0 : index
      %50 = vector.load %arg5[%49, %c0_38, %c0_39] : memref<28x28x1xf32, #tpu.memory_space<vmem>>, vector<1x26x1xf32>
      %51 = vector.shape_cast %50 : vector<1x26x1xf32> to vector<26x1xf32>
      %52 = vector.broadcast %51 : vector<26x1xf32> to vector<26x16xf32>
      %53 = vector.broadcast %11 : vector<1x16xf32> to vector<26x16xf32>
      %54 = arith.mulf %52, %53 : vector<26x16xf32>
      %55 = arith.addf %47, %54 : vector<26x16xf32>
      %c1_i32_40 = arith.constant 1 : i32
      %56 = arith.addi %arg6, %c1_i32_40 : i32
      %57 = arith.index_cast %56 : i32 to index
      %c1_41 = arith.constant 1 : index
      %c0_42 = arith.constant 0 : index
      %58 = vector.load %arg5[%57, %c1_41, %c0_42] : memref<28x28x1xf32, #tpu.memory_space<vmem>>, vector<1x26x1xf32>
      %59 = vector.shape_cast %58 : vector<1x26x1xf32> to vector<26x1xf32>
      %60 = vector.broadcast %59 : vector<26x1xf32> to vector<26x16xf32>
      %61 = vector.broadcast %13 : vector<1x16xf32> to vector<26x16xf32>
      %62 = arith.mulf %60, %61 : vector<26x16xf32>
      %63 = arith.addf %55, %62 : vector<26x16xf32>
      %c1_i32_43 = arith.constant 1 : i32
      %64 = arith.addi %arg6, %c1_i32_43 : i32
      %65 = arith.index_cast %64 : i32 to index
      %c2_44 = arith.constant 2 : index
      %c0_45 = arith.constant 0 : index
      %66 = vector.load %arg5[%65, %c2_44, %c0_45] : memref<28x28x1xf32, #tpu.memory_space<vmem>>, vector<1x26x1xf32>
      %67 = vector.shape_cast %66 : vector<1x26x1xf32> to vector<26x1xf32>
      %68 = vector.broadcast %67 : vector<26x1xf32> to vector<26x16xf32>
      %69 = vector.broadcast %15 : vector<1x16xf32> to vector<26x16xf32>
      %70 = arith.mulf %68, %69 : vector<26x16xf32>
      %71 = arith.addf %63, %70 : vector<26x16xf32>
      %c2_i32 = arith.constant 2 : i32
      %72 = arith.addi %arg6, %c2_i32 : i32
      %73 = arith.index_cast %72 : i32 to index
      %c0_46 = arith.constant 0 : index
      %c0_47 = arith.constant 0 : index
      %74 = vector.load %arg5[%73, %c0_46, %c0_47] : memref<28x28x1xf32, #tpu.memory_space<vmem>>, vector<1x26x1xf32>
      %75 = vector.shape_cast %74 : vector<1x26x1xf32> to vector<26x1xf32>
      %76 = vector.broadcast %75 : vector<26x1xf32> to vector<26x16xf32>
      %77 = vector.broadcast %17 : vector<1x16xf32> to vector<26x16xf32>
      %78 = arith.mulf %76, %77 : vector<26x16xf32>
      %79 = arith.addf %71, %78 : vector<26x16xf32>
      %c2_i32_48 = arith.constant 2 : i32
      %80 = arith.addi %arg6, %c2_i32_48 : i32
      %81 = arith.index_cast %80 : i32 to index
      %c1_49 = arith.constant 1 : index
      %c0_50 = arith.constant 0 : index
      %82 = vector.load %arg5[%81, %c1_49, %c0_50] : memref<28x28x1xf32, #tpu.memory_space<vmem>>, vector<1x26x1xf32>
      %83 = vector.shape_cast %82 : vector<1x26x1xf32> to vector<26x1xf32>
      %84 = vector.broadcast %83 : vector<26x1xf32> to vector<26x16xf32>
      %85 = vector.broadcast %19 : vector<1x16xf32> to vector<26x16xf32>
      %86 = arith.mulf %84, %85 : vector<26x16xf32>
      %87 = arith.addf %79, %86 : vector<26x16xf32>
      %c2_i32_51 = arith.constant 2 : i32
      %88 = arith.addi %arg6, %c2_i32_51 : i32
      %89 = arith.index_cast %88 : i32 to index
      %c2_52 = arith.constant 2 : index
      %c0_53 = arith.constant 0 : index
      %90 = vector.load %arg5[%89, %c2_52, %c0_53] : memref<28x28x1xf32, #tpu.memory_space<vmem>>, vector<1x26x1xf32>
      %91 = vector.shape_cast %90 : vector<1x26x1xf32> to vector<26x1xf32>
      %92 = vector.broadcast %91 : vector<26x1xf32> to vector<26x16xf32>
      %93 = vector.broadcast %21 : vector<1x16xf32> to vector<26x16xf32>
      %94 = arith.mulf %92, %93 : vector<26x16xf32>
      %95 = arith.addf %87, %94 : vector<26x16xf32>
      %96 = vector.broadcast %3 : vector<1x16xf32> to vector<26x16xf32>
      %97 = arith.addf %95, %96 : vector<26x16xf32>
      %cst_54 = arith.constant 0.000000e+00 : f32
      %98 = vector.broadcast %cst_54 : f32 to vector<26x16xf32>
      %99 = arith.maximumf %97, %98 : vector<26x16xf32>
      %100 = arith.truncf %99 : vector<26x16xf32> to vector<26x16xbf16>
      %c0_55 = arith.constant 0 : index
      %101 = arith.index_cast %arg6 : i32 to index
      %c0_56 = arith.constant 0 : index
      %c0_57 = arith.constant 0 : index
      %102 = vector.load %arg4[%c0_55, %101, %c0_56, %c0_57] : memref<1x26x26x16xbf16, #tpu.memory_space<vmem>>, vector<1x1x26x16xbf16>
      %103 = vector.shape_cast %102 : vector<1x1x26x16xbf16> to vector<26x16xbf16>
      %104 = vector.shape_cast %100 : vector<26x16xbf16> to vector<1x1x26x16xbf16>
      tpu.vector_store %arg4[%c0_55, %101, %c0_56, %c0_57], %104 {strides = array<i32>} : memref<1x26x26x16xbf16, #tpu.memory_space<vmem>>, vector<1x1x26x16xbf16>,
    }
    %c26_i32_27 = arith.constant 26 : i32
    return
  }
  func.func @transform_0(%arg0: i32) -> (i32, i32, i32, i32) {
    %c0_i32 = arith.constant 0 : i32
    %c0_i32_0 = arith.constant 0 : i32
    %c0_i32_1 = arith.constant 0 : i32
    %c0_i32_2 = arith.constant 0 : i32
    return %arg0, %c0_i32, %c0_i32_0, %c0_i32_1 : i32, i32, i32, i32
  }
  func.func @transform_1(%arg0: i32) -> (i32, i32, i32) {
    %c0_i32 = arith.constant 0 : i32
    %c0_i32_0 = arith.constant 0 : i32
    %c0_i32_1 = arith.constant 0 : i32
    %c0_i32_2 = arith.constant 0 : i32
    return %c0_i32, %c0_i32_0, %c0_i32_1 : i32, i32, i32
  }
  func.func @transform_2(%arg0: i32) -> (i32, i32) {
    %c0_i32 = arith.constant 0 : i32
    %c0_i32_0 = arith.constant 0 : i32
    %c0_i32_1 = arith.constant 0 : i32
    return %c0_i32, %c0_i32_0 : i32, i32
  }
  func.func @transform_3(%arg0: i32) -> (i32, i32, i32, i32) {
    %c0_i32 = arith.constant 0 : i32
    %c0_i32_0 = arith.constant 0 : i32
    %c0_i32_1 = arith.constant 0 : i32
    %c0_i32_2 = arith.constant 0 : i32
    return %arg0, %c0_i32, %c0_i32_0, %c0_i32_1 : i32, i32, i32, i32
  }
}

module attributes {stable_mosaic.version = 11 : i64} {
  func.func @_conv_kernel(%arg0: i32, %arg1: memref<1x12x12x32xbf16, #tpu.memory_space<vmem>>, %arg2: memref<9x32x64xf32, #tpu.memory_space<vmem>>, %arg3: memref<1x64xf32, #tpu.memory_space<vmem>>, %arg4: memref<1x10x10x64xbf16, #tpu.memory_space<vmem>>, %arg5: memref<12x12x32xf32, #tpu.memory_space<vmem>>) attributes {dimension_semantics = [#tpu.dimension_semantics<parallel>], iteration_bounds = array<i64: 2>, scalar_prefetch = 0 : i64, scratch_operands = 1 : i64, tpu.core_type = #tpu.core_type<tc>, window_params = [{transform_indices = @transform_0, window_bounds = array<i64: 1, 12, 12, 32>}, {pipeline_mode = #tpu.pipeline_mode<synchronous>, transform_indices = @transform_1, window_bounds = array<i64: 9, 32, 64>}, {pipeline_mode = #tpu.pipeline_mode<synchronous>, transform_indices = @transform_2, window_bounds = array<i64: 1, 64>}, {transform_indices = @transform_3, window_bounds = array<i64: 1, 10, 10, 64>}]} {
    %c0 = arith.constant 0 : index
    %c0_0 = arith.constant 0 : index
    %c0_1 = arith.constant 0 : index
    %c0_2 = arith.constant 0 : index
    %0 = vector.load %arg1[%c0, %c0_0, %c0_1, %c0_2] : memref<1x12x12x32xbf16, #tpu.memory_space<vmem>>, vector<1x12x12x32xbf16>
    %1 = vector.shape_cast %0 : vector<1x12x12x32xbf16> to vector<12x12x32xbf16>
    %2 = arith.extf %1 : vector<12x12x32xbf16> to vector<12x12x32xf32>
    %c0_3 = arith.constant 0 : index
    %c0_4 = arith.constant 0 : index
    %c0_5 = arith.constant 0 : index
    %3 = vector.load %arg5[%c0_3, %c0_4, %c0_5] : memref<12x12x32xf32, #tpu.memory_space<vmem>>, vector<12x12x32xf32>
    tpu.vector_store %arg5[%c0_3, %c0_4, %c0_5], %2 {strides = array<i32>} : memref<12x12x32xf32, #tpu.memory_space<vmem>>, vector<12x12x32xf32>,
    %c0_6 = arith.constant 0 : index
    %c0_7 = arith.constant 0 : index
    %4 = vector.load %arg3[%c0_6, %c0_7] : memref<1x64xf32, #tpu.memory_space<vmem>>, vector<1x64xf32>
    %c0_8 = arith.constant 0 : index
    %c0_9 = arith.constant 0 : index
    %c0_10 = arith.constant 0 : index
    %5 = vector.load %arg2[%c0_8, %c0_9, %c0_10] : memref<9x32x64xf32, #tpu.memory_space<vmem>>, vector<1x32x64xf32>
    %6 = vector.shape_cast %5 : vector<1x32x64xf32> to vector<32x64xf32>
    %c1 = arith.constant 1 : index
    %c0_11 = arith.constant 0 : index
    %c0_12 = arith.constant 0 : index
    %7 = vector.load %arg2[%c1, %c0_11, %c0_12] : memref<9x32x64xf32, #tpu.memory_space<vmem>>, vector<1x32x64xf32>
    %8 = vector.shape_cast %7 : vector<1x32x64xf32> to vector<32x64xf32>
    %c2 = arith.constant 2 : index
    %c0_13 = arith.constant 0 : index
    %c0_14 = arith.constant 0 : index
    %9 = vector.load %arg2[%c2, %c0_13, %c0_14] : memref<9x32x64xf32, #tpu.memory_space<vmem>>, vector<1x32x64xf32>
    %10 = vector.shape_cast %9 : vector<1x32x64xf32> to vector<32x64xf32>
    %c3 = arith.constant 3 : index
    %c0_15 = arith.constant 0 : index
    %c0_16 = arith.constant 0 : index
    %11 = vector.load %arg2[%c3, %c0_15, %c0_16] : memref<9x32x64xf32, #tpu.memory_space<vmem>>, vector<1x32x64xf32>
    %12 = vector.shape_cast %11 : vector<1x32x64xf32> to vector<32x64xf32>
    %c4 = arith.constant 4 : index
    %c0_17 = arith.constant 0 : index
    %c0_18 = arith.constant 0 : index
    %13 = vector.load %arg2[%c4, %c0_17, %c0_18] : memref<9x32x64xf32, #tpu.memory_space<vmem>>, vector<1x32x64xf32>
    %14 = vector.shape_cast %13 : vector<1x32x64xf32> to vector<32x64xf32>
    %c5 = arith.constant 5 : index
    %c0_19 = arith.constant 0 : index
    %c0_20 = arith.constant 0 : index
    %15 = vector.load %arg2[%c5, %c0_19, %c0_20] : memref<9x32x64xf32, #tpu.memory_space<vmem>>, vector<1x32x64xf32>
    %16 = vector.shape_cast %15 : vector<1x32x64xf32> to vector<32x64xf32>
    %c6 = arith.constant 6 : index
    %c0_21 = arith.constant 0 : index
    %c0_22 = arith.constant 0 : index
    %17 = vector.load %arg2[%c6, %c0_21, %c0_22] : memref<9x32x64xf32, #tpu.memory_space<vmem>>, vector<1x32x64xf32>
    %18 = vector.shape_cast %17 : vector<1x32x64xf32> to vector<32x64xf32>
    %c7 = arith.constant 7 : index
    %c0_23 = arith.constant 0 : index
    %c0_24 = arith.constant 0 : index
    %19 = vector.load %arg2[%c7, %c0_23, %c0_24] : memref<9x32x64xf32, #tpu.memory_space<vmem>>, vector<1x32x64xf32>
    %20 = vector.shape_cast %19 : vector<1x32x64xf32> to vector<32x64xf32>
    %c8 = arith.constant 8 : index
    %c0_25 = arith.constant 0 : index
    %c0_26 = arith.constant 0 : index
    %21 = vector.load %arg2[%c8, %c0_25, %c0_26] : memref<9x32x64xf32, #tpu.memory_space<vmem>>, vector<1x32x64xf32>
    %22 = vector.shape_cast %21 : vector<1x32x64xf32> to vector<32x64xf32>
    %c0_i32 = arith.constant 0 : i32
    %c10_i32 = arith.constant 10 : i32
    %23 = arith.addi %c0_i32, %c10_i32 : i32
    %c1_i32 = arith.constant 1 : i32
    scf.for %arg6 = %c0_i32 to %23 step %c1_i32  : i32 {
      %cst = arith.constant 0.000000e+00 : f32
      %24 = vector.broadcast %cst : f32 to vector<10x64xf32>
      %c0_i32_28 = arith.constant 0 : i32
      %25 = arith.addi %arg6, %c0_i32_28 : i32
      %26 = arith.index_cast %25 : i32 to index
      %c0_29 = arith.constant 0 : index
      %c0_30 = arith.constant 0 : index
      %27 = vector.load %arg5[%26, %c0_29, %c0_30] : memref<12x12x32xf32, #tpu.memory_space<vmem>>, vector<1x10x32xf32>
      %28 = vector.shape_cast %27 : vector<1x10x32xf32> to vector<10x32xf32>
      %cst_31 = arith.constant dense<0.000000e+00> : vector<10x64xf32>
      %29 = tpu.matmul %28, %6, %cst_31 {dimension_numbers = #tpu.dot_dimension_numbers<[1], [0], [0], [1], [0, 0, 1, 1], [], []>} : vector<10x32xf32>, vector<32x64xf32>, vector<10x64xf32> -> vector<10x64xf32>
      %30 = arith.addf %24, %29 : vector<10x64xf32>
      %c0_i32_32 = arith.constant 0 : i32
      %31 = arith.addi %arg6, %c0_i32_32 : i32
      %32 = arith.index_cast %31 : i32 to index
      %c1_33 = arith.constant 1 : index
      %c0_34 = arith.constant 0 : index
      %33 = vector.load %arg5[%32, %c1_33, %c0_34] : memref<12x12x32xf32, #tpu.memory_space<vmem>>, vector<1x10x32xf32>
      %34 = vector.shape_cast %33 : vector<1x10x32xf32> to vector<10x32xf32>
      %cst_35 = arith.constant dense<0.000000e+00> : vector<10x64xf32>
      %35 = tpu.matmul %34, %8, %cst_35 {dimension_numbers = #tpu.dot_dimension_numbers<[1], [0], [0], [1], [0, 0, 1, 1], [], []>} : vector<10x32xf32>, vector<32x64xf32>, vector<10x64xf32> -> vector<10x64xf32>
      %36 = arith.addf %30, %35 : vector<10x64xf32>
      %c0_i32_36 = arith.constant 0 : i32
      %37 = arith.addi %arg6, %c0_i32_36 : i32
      %38 = arith.index_cast %37 : i32 to index
      %c2_37 = arith.constant 2 : index
      %c0_38 = arith.constant 0 : index
      %39 = vector.load %arg5[%38, %c2_37, %c0_38] : memref<12x12x32xf32, #tpu.memory_space<vmem>>, vector<1x10x32xf32>
      %40 = vector.shape_cast %39 : vector<1x10x32xf32> to vector<10x32xf32>
      %cst_39 = arith.constant dense<0.000000e+00> : vector<10x64xf32>
      %41 = tpu.matmul %40, %10, %cst_39 {dimension_numbers = #tpu.dot_dimension_numbers<[1], [0], [0], [1], [0, 0, 1, 1], [], []>} : vector<10x32xf32>, vector<32x64xf32>, vector<10x64xf32> -> vector<10x64xf32>
      %42 = arith.addf %36, %41 : vector<10x64xf32>
      %c1_i32_40 = arith.constant 1 : i32
      %43 = arith.addi %arg6, %c1_i32_40 : i32
      %44 = arith.index_cast %43 : i32 to index
      %c0_41 = arith.constant 0 : index
      %c0_42 = arith.constant 0 : index
      %45 = vector.load %arg5[%44, %c0_41, %c0_42] : memref<12x12x32xf32, #tpu.memory_space<vmem>>, vector<1x10x32xf32>
      %46 = vector.shape_cast %45 : vector<1x10x32xf32> to vector<10x32xf32>
      %cst_43 = arith.constant dense<0.000000e+00> : vector<10x64xf32>
      %47 = tpu.matmul %46, %12, %cst_43 {dimension_numbers = #tpu.dot_dimension_numbers<[1], [0], [0], [1], [0, 0, 1, 1], [], []>} : vector<10x32xf32>, vector<32x64xf32>, vector<10x64xf32> -> vector<10x64xf32>
      %48 = arith.addf %42, %47 : vector<10x64xf32>
      %c1_i32_44 = arith.constant 1 : i32
      %49 = arith.addi %arg6, %c1_i32_44 : i32
      %50 = arith.index_cast %49 : i32 to index
      %c1_45 = arith.constant 1 : index
      %c0_46 = arith.constant 0 : index
      %51 = vector.load %arg5[%50, %c1_45, %c0_46] : memref<12x12x32xf32, #tpu.memory_space<vmem>>, vector<1x10x32xf32>
      %52 = vector.shape_cast %51 : vector<1x10x32xf32> to vector<10x32xf32>
      %cst_47 = arith.constant dense<0.000000e+00> : vector<10x64xf32>
      %53 = tpu.matmul %52, %14, %cst_47 {dimension_numbers = #tpu.dot_dimension_numbers<[1], [0], [0], [1], [0, 0, 1, 1], [], []>} : vector<10x32xf32>, vector<32x64xf32>, vector<10x64xf32> -> vector<10x64xf32>
      %54 = arith.addf %48, %53 : vector<10x64xf32>
      %c1_i32_48 = arith.constant 1 : i32
      %55 = arith.addi %arg6, %c1_i32_48 : i32
      %56 = arith.index_cast %55 : i32 to index
      %c2_49 = arith.constant 2 : index
      %c0_50 = arith.constant 0 : index
      %57 = vector.load %arg5[%56, %c2_49, %c0_50] : memref<12x12x32xf32, #tpu.memory_space<vmem>>, vector<1x10x32xf32>
      %58 = vector.shape_cast %57 : vector<1x10x32xf32> to vector<10x32xf32>
      %cst_51 = arith.constant dense<0.000000e+00> : vector<10x64xf32>
      %59 = tpu.matmul %58, %16, %cst_51 {dimension_numbers = #tpu.dot_dimension_numbers<[1], [0], [0], [1], [0, 0, 1, 1], [], []>} : vector<10x32xf32>, vector<32x64xf32>, vector<10x64xf32> -> vector<10x64xf32>
      %60 = arith.addf %54, %59 : vector<10x64xf32>
      %c2_i32 = arith.constant 2 : i32
      %61 = arith.addi %arg6, %c2_i32 : i32
      %62 = arith.index_cast %61 : i32 to index
      %c0_52 = arith.constant 0 : index
      %c0_53 = arith.constant 0 : index
      %63 = vector.load %arg5[%62, %c0_52, %c0_53] : memref<12x12x32xf32, #tpu.memory_space<vmem>>, vector<1x10x32xf32>
      %64 = vector.shape_cast %63 : vector<1x10x32xf32> to vector<10x32xf32>
      %cst_54 = arith.constant dense<0.000000e+00> : vector<10x64xf32>
      %65 = tpu.matmul %64, %18, %cst_54 {dimension_numbers = #tpu.dot_dimension_numbers<[1], [0], [0], [1], [0, 0, 1, 1], [], []>} : vector<10x32xf32>, vector<32x64xf32>, vector<10x64xf32> -> vector<10x64xf32>
      %66 = arith.addf %60, %65 : vector<10x64xf32>
      %c2_i32_55 = arith.constant 2 : i32
      %67 = arith.addi %arg6, %c2_i32_55 : i32
      %68 = arith.index_cast %67 : i32 to index
      %c1_56 = arith.constant 1 : index
      %c0_57 = arith.constant 0 : index
      %69 = vector.load %arg5[%68, %c1_56, %c0_57] : memref<12x12x32xf32, #tpu.memory_space<vmem>>, vector<1x10x32xf32>
      %70 = vector.shape_cast %69 : vector<1x10x32xf32> to vector<10x32xf32>
      %cst_58 = arith.constant dense<0.000000e+00> : vector<10x64xf32>
      %71 = tpu.matmul %70, %20, %cst_58 {dimension_numbers = #tpu.dot_dimension_numbers<[1], [0], [0], [1], [0, 0, 1, 1], [], []>} : vector<10x32xf32>, vector<32x64xf32>, vector<10x64xf32> -> vector<10x64xf32>
      %72 = arith.addf %66, %71 : vector<10x64xf32>
      %c2_i32_59 = arith.constant 2 : i32
      %73 = arith.addi %arg6, %c2_i32_59 : i32
      %74 = arith.index_cast %73 : i32 to index
      %c2_60 = arith.constant 2 : index
      %c0_61 = arith.constant 0 : index
      %75 = vector.load %arg5[%74, %c2_60, %c0_61] : memref<12x12x32xf32, #tpu.memory_space<vmem>>, vector<1x10x32xf32>
      %76 = vector.shape_cast %75 : vector<1x10x32xf32> to vector<10x32xf32>
      %cst_62 = arith.constant dense<0.000000e+00> : vector<10x64xf32>
      %77 = tpu.matmul %76, %22, %cst_62 {dimension_numbers = #tpu.dot_dimension_numbers<[1], [0], [0], [1], [0, 0, 1, 1], [], []>} : vector<10x32xf32>, vector<32x64xf32>, vector<10x64xf32> -> vector<10x64xf32>
      %78 = arith.addf %72, %77 : vector<10x64xf32>
      %79 = vector.broadcast %4 : vector<1x64xf32> to vector<10x64xf32>
      %80 = arith.addf %78, %79 : vector<10x64xf32>
      %cst_63 = arith.constant 0.000000e+00 : f32
      %81 = vector.broadcast %cst_63 : f32 to vector<10x64xf32>
      %82 = arith.maximumf %80, %81 : vector<10x64xf32>
      %83 = arith.truncf %82 : vector<10x64xf32> to vector<10x64xbf16>
      %c0_64 = arith.constant 0 : index
      %84 = arith.index_cast %arg6 : i32 to index
      %c0_65 = arith.constant 0 : index
      %c0_66 = arith.constant 0 : index
      %85 = vector.load %arg4[%c0_64, %84, %c0_65, %c0_66] : memref<1x10x10x64xbf16, #tpu.memory_space<vmem>>, vector<1x1x10x64xbf16>
      %86 = vector.shape_cast %85 : vector<1x1x10x64xbf16> to vector<10x64xbf16>
      %87 = vector.shape_cast %83 : vector<10x64xbf16> to vector<1x1x10x64xbf16>
      tpu.vector_store %arg4[%c0_64, %84, %c0_65, %c0_66], %87 {strides = array<i32>} : memref<1x10x10x64xbf16, #tpu.memory_space<vmem>>, vector<1x1x10x64xbf16>,
    }
    %c10_i32_27 = arith.constant 10 : i32
    return
  }
  func.func @transform_0(%arg0: i32) -> (i32, i32, i32, i32) {
    %c0_i32 = arith.constant 0 : i32
    %c0_i32_0 = arith.constant 0 : i32
    %c0_i32_1 = arith.constant 0 : i32
    %c0_i32_2 = arith.constant 0 : i32
    return %arg0, %c0_i32, %c0_i32_0, %c0_i32_1 : i32, i32, i32, i32
  }
  func.func @transform_1(%arg0: i32) -> (i32, i32, i32) {
    %c0_i32 = arith.constant 0 : i32
    %c0_i32_0 = arith.constant 0 : i32
    %c0_i32_1 = arith.constant 0 : i32
    %c0_i32_2 = arith.constant 0 : i32
    return %c0_i32, %c0_i32_0, %c0_i32_1 : i32, i32, i32
  }
  func.func @transform_2(%arg0: i32) -> (i32, i32) {
    %c0_i32 = arith.constant 0 : i32
    %c0_i32_0 = arith.constant 0 : i32
    %c0_i32_1 = arith.constant 0 : i32
    return %c0_i32, %c0_i32_0 : i32, i32
  }
  func.func @transform_3(%arg0: i32) -> (i32, i32, i32, i32) {
    %c0_i32 = arith.constant 0 : i32
    %c0_i32_0 = arith.constant 0 : i32
    %c0_i32_1 = arith.constant 0 : i32
    %c0_i32_2 = arith.constant 0 : i32
    return %arg0, %c0_i32, %c0_i32_0, %c0_i32_1 : i32, i32, i32, i32
  }
}

module attributes {stable_mosaic.version = 11 : i64} {
  func.func @_conv_kernel(%arg0: i32, %arg1: memref<1x10x10x64xbf16, #tpu.memory_space<vmem>>, %arg2: memref<9x64x128xf32, #tpu.memory_space<vmem>>, %arg3: memref<1x128xf32, #tpu.memory_space<vmem>>, %arg4: memref<1x4x4x128xbf16, #tpu.memory_space<vmem>>, %arg5: memref<10x10x64xf32, #tpu.memory_space<vmem>>, %arg6: memref<8x128xf32, #tpu.memory_space<vmem>>) attributes {dimension_semantics = [#tpu.dimension_semantics<parallel>], iteration_bounds = array<i64: 2>, scalar_prefetch = 0 : i64, scratch_operands = 2 : i64, tpu.core_type = #tpu.core_type<tc>, window_params = [{transform_indices = @transform_0, window_bounds = array<i64: 1, 10, 10, 64>}, {pipeline_mode = #tpu.pipeline_mode<synchronous>, transform_indices = @transform_1, window_bounds = array<i64: 9, 64, 128>}, {pipeline_mode = #tpu.pipeline_mode<synchronous>, transform_indices = @transform_2, window_bounds = array<i64: 1, 128>}, {transform_indices = @transform_3, window_bounds = array<i64: 1, 4, 4, 128>}]} {
    %c0 = arith.constant 0 : index
    %c0_0 = arith.constant 0 : index
    %c0_1 = arith.constant 0 : index
    %c0_2 = arith.constant 0 : index
    %0 = vector.load %arg1[%c0, %c0_0, %c0_1, %c0_2] : memref<1x10x10x64xbf16, #tpu.memory_space<vmem>>, vector<1x10x10x64xbf16>
    %1 = vector.shape_cast %0 : vector<1x10x10x64xbf16> to vector<10x10x64xbf16>
    %2 = arith.extf %1 : vector<10x10x64xbf16> to vector<10x10x64xf32>
    %c0_3 = arith.constant 0 : index
    %c0_4 = arith.constant 0 : index
    %c0_5 = arith.constant 0 : index
    %3 = vector.load %arg5[%c0_3, %c0_4, %c0_5] : memref<10x10x64xf32, #tpu.memory_space<vmem>>, vector<10x10x64xf32>
    tpu.vector_store %arg5[%c0_3, %c0_4, %c0_5], %2 {strides = array<i32>} : memref<10x10x64xf32, #tpu.memory_space<vmem>>, vector<10x10x64xf32>,
    %c0_6 = arith.constant 0 : index
    %c0_7 = arith.constant 0 : index
    %4 = vector.load %arg3[%c0_6, %c0_7] : memref<1x128xf32, #tpu.memory_space<vmem>>, vector<1x128xf32>
    %c0_8 = arith.constant 0 : index
    %c0_9 = arith.constant 0 : index
    %c0_10 = arith.constant 0 : index
    %5 = vector.load %arg2[%c0_8, %c0_9, %c0_10] : memref<9x64x128xf32, #tpu.memory_space<vmem>>, vector<1x64x128xf32>
    %6 = vector.shape_cast %5 : vector<1x64x128xf32> to vector<64x128xf32>
    %c1 = arith.constant 1 : index
    %c0_11 = arith.constant 0 : index
    %c0_12 = arith.constant 0 : index
    %7 = vector.load %arg2[%c1, %c0_11, %c0_12] : memref<9x64x128xf32, #tpu.memory_space<vmem>>, vector<1x64x128xf32>
    %8 = vector.shape_cast %7 : vector<1x64x128xf32> to vector<64x128xf32>
    %c2 = arith.constant 2 : index
    %c0_13 = arith.constant 0 : index
    %c0_14 = arith.constant 0 : index
    %9 = vector.load %arg2[%c2, %c0_13, %c0_14] : memref<9x64x128xf32, #tpu.memory_space<vmem>>, vector<1x64x128xf32>
    %10 = vector.shape_cast %9 : vector<1x64x128xf32> to vector<64x128xf32>
    %c3 = arith.constant 3 : index
    %c0_15 = arith.constant 0 : index
    %c0_16 = arith.constant 0 : index
    %11 = vector.load %arg2[%c3, %c0_15, %c0_16] : memref<9x64x128xf32, #tpu.memory_space<vmem>>, vector<1x64x128xf32>
    %12 = vector.shape_cast %11 : vector<1x64x128xf32> to vector<64x128xf32>
    %c4 = arith.constant 4 : index
    %c0_17 = arith.constant 0 : index
    %c0_18 = arith.constant 0 : index
    %13 = vector.load %arg2[%c4, %c0_17, %c0_18] : memref<9x64x128xf32, #tpu.memory_space<vmem>>, vector<1x64x128xf32>
    %14 = vector.shape_cast %13 : vector<1x64x128xf32> to vector<64x128xf32>
    %c5 = arith.constant 5 : index
    %c0_19 = arith.constant 0 : index
    %c0_20 = arith.constant 0 : index
    %15 = vector.load %arg2[%c5, %c0_19, %c0_20] : memref<9x64x128xf32, #tpu.memory_space<vmem>>, vector<1x64x128xf32>
    %16 = vector.shape_cast %15 : vector<1x64x128xf32> to vector<64x128xf32>
    %c6 = arith.constant 6 : index
    %c0_21 = arith.constant 0 : index
    %c0_22 = arith.constant 0 : index
    %17 = vector.load %arg2[%c6, %c0_21, %c0_22] : memref<9x64x128xf32, #tpu.memory_space<vmem>>, vector<1x64x128xf32>
    %18 = vector.shape_cast %17 : vector<1x64x128xf32> to vector<64x128xf32>
    %c7 = arith.constant 7 : index
    %c0_23 = arith.constant 0 : index
    %c0_24 = arith.constant 0 : index
    %19 = vector.load %arg2[%c7, %c0_23, %c0_24] : memref<9x64x128xf32, #tpu.memory_space<vmem>>, vector<1x64x128xf32>
    %20 = vector.shape_cast %19 : vector<1x64x128xf32> to vector<64x128xf32>
    %c8 = arith.constant 8 : index
    %c0_25 = arith.constant 0 : index
    %c0_26 = arith.constant 0 : index
    %21 = vector.load %arg2[%c8, %c0_25, %c0_26] : memref<9x64x128xf32, #tpu.memory_space<vmem>>, vector<1x64x128xf32>
    %22 = vector.shape_cast %21 : vector<1x64x128xf32> to vector<64x128xf32>
    %c0_i32 = arith.constant 0 : i32
    %c4_i32 = arith.constant 4 : i32
    %23 = arith.addi %c0_i32, %c4_i32 : i32
    %c1_i32 = arith.constant 1 : i32
    scf.for %arg7 = %c0_i32 to %23 step %c1_i32  : i32 {
      %c2_i32 = arith.constant 2 : i32
      %24 = arith.muli %c2_i32, %arg7 : i32
      %cst = arith.constant 0.000000e+00 : f32
      %25 = vector.broadcast %cst : f32 to vector<8x128xf32>
      %c0_i32_28 = arith.constant 0 : i32
      %26 = arith.addi %24, %c0_i32_28 : i32
      %27 = arith.index_cast %26 : i32 to index
      %c0_29 = arith.constant 0 : index
      %c0_30 = arith.constant 0 : index
      %28 = vector.load %arg5[%27, %c0_29, %c0_30] : memref<10x10x64xf32, #tpu.memory_space<vmem>>, vector<1x8x64xf32>
      %29 = vector.shape_cast %28 : vector<1x8x64xf32> to vector<8x64xf32>
      %cst_31 = arith.constant dense<0.000000e+00> : vector<8x128xf32>
      %30 = tpu.matmul %29, %6, %cst_31 {dimension_numbers = #tpu.dot_dimension_numbers<[1], [0], [0], [1], [0, 0, 1, 1], [], []>} : vector<8x64xf32>, vector<64x128xf32>, vector<8x128xf32> -> vector<8x128xf32>
      %31 = arith.addf %25, %30 : vector<8x128xf32>
      %c0_i32_32 = arith.constant 0 : i32
      %32 = arith.addi %24, %c0_i32_32 : i32
      %33 = arith.index_cast %32 : i32 to index
      %c1_33 = arith.constant 1 : index
      %c0_34 = arith.constant 0 : index
      %34 = vector.load %arg5[%33, %c1_33, %c0_34] : memref<10x10x64xf32, #tpu.memory_space<vmem>>, vector<1x8x64xf32>
      %35 = vector.shape_cast %34 : vector<1x8x64xf32> to vector<8x64xf32>
      %cst_35 = arith.constant dense<0.000000e+00> : vector<8x128xf32>
      %36 = tpu.matmul %35, %8, %cst_35 {dimension_numbers = #tpu.dot_dimension_numbers<[1], [0], [0], [1], [0, 0, 1, 1], [], []>} : vector<8x64xf32>, vector<64x128xf32>, vector<8x128xf32> -> vector<8x128xf32>
      %37 = arith.addf %31, %36 : vector<8x128xf32>
      %c0_i32_36 = arith.constant 0 : i32
      %38 = arith.addi %24, %c0_i32_36 : i32
      %39 = arith.index_cast %38 : i32 to index
      %c2_37 = arith.constant 2 : index
      %c0_38 = arith.constant 0 : index
      %40 = vector.load %arg5[%39, %c2_37, %c0_38] : memref<10x10x64xf32, #tpu.memory_space<vmem>>, vector<1x8x64xf32>
      %41 = vector.shape_cast %40 : vector<1x8x64xf32> to vector<8x64xf32>
      %cst_39 = arith.constant dense<0.000000e+00> : vector<8x128xf32>
      %42 = tpu.matmul %41, %10, %cst_39 {dimension_numbers = #tpu.dot_dimension_numbers<[1], [0], [0], [1], [0, 0, 1, 1], [], []>} : vector<8x64xf32>, vector<64x128xf32>, vector<8x128xf32> -> vector<8x128xf32>
      %43 = arith.addf %37, %42 : vector<8x128xf32>
      %c1_i32_40 = arith.constant 1 : i32
      %44 = arith.addi %24, %c1_i32_40 : i32
      %45 = arith.index_cast %44 : i32 to index
      %c0_41 = arith.constant 0 : index
      %c0_42 = arith.constant 0 : index
      %46 = vector.load %arg5[%45, %c0_41, %c0_42] : memref<10x10x64xf32, #tpu.memory_space<vmem>>, vector<1x8x64xf32>
      %47 = vector.shape_cast %46 : vector<1x8x64xf32> to vector<8x64xf32>
      %cst_43 = arith.constant dense<0.000000e+00> : vector<8x128xf32>
      %48 = tpu.matmul %47, %12, %cst_43 {dimension_numbers = #tpu.dot_dimension_numbers<[1], [0], [0], [1], [0, 0, 1, 1], [], []>} : vector<8x64xf32>, vector<64x128xf32>, vector<8x128xf32> -> vector<8x128xf32>
      %49 = arith.addf %43, %48 : vector<8x128xf32>
      %c1_i32_44 = arith.constant 1 : i32
      %50 = arith.addi %24, %c1_i32_44 : i32
      %51 = arith.index_cast %50 : i32 to index
      %c1_45 = arith.constant 1 : index
      %c0_46 = arith.constant 0 : index
      %52 = vector.load %arg5[%51, %c1_45, %c0_46] : memref<10x10x64xf32, #tpu.memory_space<vmem>>, vector<1x8x64xf32>
      %53 = vector.shape_cast %52 : vector<1x8x64xf32> to vector<8x64xf32>
      %cst_47 = arith.constant dense<0.000000e+00> : vector<8x128xf32>
      %54 = tpu.matmul %53, %14, %cst_47 {dimension_numbers = #tpu.dot_dimension_numbers<[1], [0], [0], [1], [0, 0, 1, 1], [], []>} : vector<8x64xf32>, vector<64x128xf32>, vector<8x128xf32> -> vector<8x128xf32>
      %55 = arith.addf %49, %54 : vector<8x128xf32>
      %c1_i32_48 = arith.constant 1 : i32
      %56 = arith.addi %24, %c1_i32_48 : i32
      %57 = arith.index_cast %56 : i32 to index
      %c2_49 = arith.constant 2 : index
      %c0_50 = arith.constant 0 : index
      %58 = vector.load %arg5[%57, %c2_49, %c0_50] : memref<10x10x64xf32, #tpu.memory_space<vmem>>, vector<1x8x64xf32>
      %59 = vector.shape_cast %58 : vector<1x8x64xf32> to vector<8x64xf32>
      %cst_51 = arith.constant dense<0.000000e+00> : vector<8x128xf32>
      %60 = tpu.matmul %59, %16, %cst_51 {dimension_numbers = #tpu.dot_dimension_numbers<[1], [0], [0], [1], [0, 0, 1, 1], [], []>} : vector<8x64xf32>, vector<64x128xf32>, vector<8x128xf32> -> vector<8x128xf32>
      %61 = arith.addf %55, %60 : vector<8x128xf32>
      %c2_i32_52 = arith.constant 2 : i32
      %62 = arith.addi %24, %c2_i32_52 : i32
      %63 = arith.index_cast %62 : i32 to index
      %c0_53 = arith.constant 0 : index
      %c0_54 = arith.constant 0 : index
      %64 = vector.load %arg5[%63, %c0_53, %c0_54] : memref<10x10x64xf32, #tpu.memory_space<vmem>>, vector<1x8x64xf32>
      %65 = vector.shape_cast %64 : vector<1x8x64xf32> to vector<8x64xf32>
      %cst_55 = arith.constant dense<0.000000e+00> : vector<8x128xf32>
      %66 = tpu.matmul %65, %18, %cst_55 {dimension_numbers = #tpu.dot_dimension_numbers<[1], [0], [0], [1], [0, 0, 1, 1], [], []>} : vector<8x64xf32>, vector<64x128xf32>, vector<8x128xf32> -> vector<8x128xf32>
      %67 = arith.addf %61, %66 : vector<8x128xf32>
      %c2_i32_56 = arith.constant 2 : i32
      %68 = arith.addi %24, %c2_i32_56 : i32
      %69 = arith.index_cast %68 : i32 to index
      %c1_57 = arith.constant 1 : index
      %c0_58 = arith.constant 0 : index
      %70 = vector.load %arg5[%69, %c1_57, %c0_58] : memref<10x10x64xf32, #tpu.memory_space<vmem>>, vector<1x8x64xf32>
      %71 = vector.shape_cast %70 : vector<1x8x64xf32> to vector<8x64xf32>
      %cst_59 = arith.constant dense<0.000000e+00> : vector<8x128xf32>
      %72 = tpu.matmul %71, %20, %cst_59 {dimension_numbers = #tpu.dot_dimension_numbers<[1], [0], [0], [1], [0, 0, 1, 1], [], []>} : vector<8x64xf32>, vector<64x128xf32>, vector<8x128xf32> -> vector<8x128xf32>
      %73 = arith.addf %67, %72 : vector<8x128xf32>
      %c2_i32_60 = arith.constant 2 : i32
      %74 = arith.addi %24, %c2_i32_60 : i32
      %75 = arith.index_cast %74 : i32 to index
      %c2_61 = arith.constant 2 : index
      %c0_62 = arith.constant 0 : index
      %76 = vector.load %arg5[%75, %c2_61, %c0_62] : memref<10x10x64xf32, #tpu.memory_space<vmem>>, vector<1x8x64xf32>
      %77 = vector.shape_cast %76 : vector<1x8x64xf32> to vector<8x64xf32>
      %cst_63 = arith.constant dense<0.000000e+00> : vector<8x128xf32>
      %78 = tpu.matmul %77, %22, %cst_63 {dimension_numbers = #tpu.dot_dimension_numbers<[1], [0], [0], [1], [0, 0, 1, 1], [], []>} : vector<8x64xf32>, vector<64x128xf32>, vector<8x128xf32> -> vector<8x128xf32>
      %79 = arith.addf %73, %78 : vector<8x128xf32>
      %80 = vector.broadcast %4 : vector<1x128xf32> to vector<8x128xf32>
      %81 = arith.addf %79, %80 : vector<8x128xf32>
      %cst_64 = arith.constant 0.000000e+00 : f32
      %82 = vector.broadcast %cst_64 : f32 to vector<8x128xf32>
      %83 = arith.maximumf %81, %82 : vector<8x128xf32>
      %c2_i32_65 = arith.constant 2 : i32
      %84 = arith.muli %c2_i32_65, %arg7 : i32
      %c1_i32_66 = arith.constant 1 : i32
      %85 = arith.addi %84, %c1_i32_66 : i32
      %cst_67 = arith.constant 0.000000e+00 : f32
      %86 = vector.broadcast %cst_67 : f32 to vector<8x128xf32>
      %c0_i32_68 = arith.constant 0 : i32
      %87 = arith.addi %85, %c0_i32_68 : i32
      %88 = arith.index_cast %87 : i32 to index
      %c0_69 = arith.constant 0 : index
      %c0_70 = arith.constant 0 : index
      %89 = vector.load %arg5[%88, %c0_69, %c0_70] : memref<10x10x64xf32, #tpu.memory_space<vmem>>, vector<1x8x64xf32>
      %90 = vector.shape_cast %89 : vector<1x8x64xf32> to vector<8x64xf32>
      %cst_71 = arith.constant dense<0.000000e+00> : vector<8x128xf32>
      %91 = tpu.matmul %90, %6, %cst_71 {dimension_numbers = #tpu.dot_dimension_numbers<[1], [0], [0], [1], [0, 0, 1, 1], [], []>} : vector<8x64xf32>, vector<64x128xf32>, vector<8x128xf32> -> vector<8x128xf32>
      %92 = arith.addf %86, %91 : vector<8x128xf32>
      %c0_i32_72 = arith.constant 0 : i32
      %93 = arith.addi %85, %c0_i32_72 : i32
      %94 = arith.index_cast %93 : i32 to index
      %c1_73 = arith.constant 1 : index
      %c0_74 = arith.constant 0 : index
      %95 = vector.load %arg5[%94, %c1_73, %c0_74] : memref<10x10x64xf32, #tpu.memory_space<vmem>>, vector<1x8x64xf32>
      %96 = vector.shape_cast %95 : vector<1x8x64xf32> to vector<8x64xf32>
      %cst_75 = arith.constant dense<0.000000e+00> : vector<8x128xf32>
      %97 = tpu.matmul %96, %8, %cst_75 {dimension_numbers = #tpu.dot_dimension_numbers<[1], [0], [0], [1], [0, 0, 1, 1], [], []>} : vector<8x64xf32>, vector<64x128xf32>, vector<8x128xf32> -> vector<8x128xf32>
      %98 = arith.addf %92, %97 : vector<8x128xf32>
      %c0_i32_76 = arith.constant 0 : i32
      %99 = arith.addi %85, %c0_i32_76 : i32
      %100 = arith.index_cast %99 : i32 to index
      %c2_77 = arith.constant 2 : index
      %c0_78 = arith.constant 0 : index
      %101 = vector.load %arg5[%100, %c2_77, %c0_78] : memref<10x10x64xf32, #tpu.memory_space<vmem>>, vector<1x8x64xf32>
      %102 = vector.shape_cast %101 : vector<1x8x64xf32> to vector<8x64xf32>
      %cst_79 = arith.constant dense<0.000000e+00> : vector<8x128xf32>
      %103 = tpu.matmul %102, %10, %cst_79 {dimension_numbers = #tpu.dot_dimension_numbers<[1], [0], [0], [1], [0, 0, 1, 1], [], []>} : vector<8x64xf32>, vector<64x128xf32>, vector<8x128xf32> -> vector<8x128xf32>
      %104 = arith.addf %98, %103 : vector<8x128xf32>
      %c1_i32_80 = arith.constant 1 : i32
      %105 = arith.addi %85, %c1_i32_80 : i32
      %106 = arith.index_cast %105 : i32 to index
      %c0_81 = arith.constant 0 : index
      %c0_82 = arith.constant 0 : index
      %107 = vector.load %arg5[%106, %c0_81, %c0_82] : memref<10x10x64xf32, #tpu.memory_space<vmem>>, vector<1x8x64xf32>
      %108 = vector.shape_cast %107 : vector<1x8x64xf32> to vector<8x64xf32>
      %cst_83 = arith.constant dense<0.000000e+00> : vector<8x128xf32>
      %109 = tpu.matmul %108, %12, %cst_83 {dimension_numbers = #tpu.dot_dimension_numbers<[1], [0], [0], [1], [0, 0, 1, 1], [], []>} : vector<8x64xf32>, vector<64x128xf32>, vector<8x128xf32> -> vector<8x128xf32>
      %110 = arith.addf %104, %109 : vector<8x128xf32>
      %c1_i32_84 = arith.constant 1 : i32
      %111 = arith.addi %85, %c1_i32_84 : i32
      %112 = arith.index_cast %111 : i32 to index
      %c1_85 = arith.constant 1 : index
      %c0_86 = arith.constant 0 : index
      %113 = vector.load %arg5[%112, %c1_85, %c0_86] : memref<10x10x64xf32, #tpu.memory_space<vmem>>, vector<1x8x64xf32>
      %114 = vector.shape_cast %113 : vector<1x8x64xf32> to vector<8x64xf32>
      %cst_87 = arith.constant dense<0.000000e+00> : vector<8x128xf32>
      %115 = tpu.matmul %114, %14, %cst_87 {dimension_numbers = #tpu.dot_dimension_numbers<[1], [0], [0], [1], [0, 0, 1, 1], [], []>} : vector<8x64xf32>, vector<64x128xf32>, vector<8x128xf32> -> vector<8x128xf32>
      %116 = arith.addf %110, %115 : vector<8x128xf32>
      %c1_i32_88 = arith.constant 1 : i32
      %117 = arith.addi %85, %c1_i32_88 : i32
      %118 = arith.index_cast %117 : i32 to index
      %c2_89 = arith.constant 2 : index
      %c0_90 = arith.constant 0 : index
      %119 = vector.load %arg5[%118, %c2_89, %c0_90] : memref<10x10x64xf32, #tpu.memory_space<vmem>>, vector<1x8x64xf32>
      %120 = vector.shape_cast %119 : vector<1x8x64xf32> to vector<8x64xf32>
      %cst_91 = arith.constant dense<0.000000e+00> : vector<8x128xf32>
      %121 = tpu.matmul %120, %16, %cst_91 {dimension_numbers = #tpu.dot_dimension_numbers<[1], [0], [0], [1], [0, 0, 1, 1], [], []>} : vector<8x64xf32>, vector<64x128xf32>, vector<8x128xf32> -> vector<8x128xf32>
      %122 = arith.addf %116, %121 : vector<8x128xf32>
      %c2_i32_92 = arith.constant 2 : i32
      %123 = arith.addi %85, %c2_i32_92 : i32
      %124 = arith.index_cast %123 : i32 to index
      %c0_93 = arith.constant 0 : index
      %c0_94 = arith.constant 0 : index
      %125 = vector.load %arg5[%124, %c0_93, %c0_94] : memref<10x10x64xf32, #tpu.memory_space<vmem>>, vector<1x8x64xf32>
      %126 = vector.shape_cast %125 : vector<1x8x64xf32> to vector<8x64xf32>
      %cst_95 = arith.constant dense<0.000000e+00> : vector<8x128xf32>
      %127 = tpu.matmul %126, %18, %cst_95 {dimension_numbers = #tpu.dot_dimension_numbers<[1], [0], [0], [1], [0, 0, 1, 1], [], []>} : vector<8x64xf32>, vector<64x128xf32>, vector<8x128xf32> -> vector<8x128xf32>
      %128 = arith.addf %122, %127 : vector<8x128xf32>
      %c2_i32_96 = arith.constant 2 : i32
      %129 = arith.addi %85, %c2_i32_96 : i32
      %130 = arith.index_cast %129 : i32 to index
      %c1_97 = arith.constant 1 : index
      %c0_98 = arith.constant 0 : index
      %131 = vector.load %arg5[%130, %c1_97, %c0_98] : memref<10x10x64xf32, #tpu.memory_space<vmem>>, vector<1x8x64xf32>
      %132 = vector.shape_cast %131 : vector<1x8x64xf32> to vector<8x64xf32>
      %cst_99 = arith.constant dense<0.000000e+00> : vector<8x128xf32>
      %133 = tpu.matmul %132, %20, %cst_99 {dimension_numbers = #tpu.dot_dimension_numbers<[1], [0], [0], [1], [0, 0, 1, 1], [], []>} : vector<8x64xf32>, vector<64x128xf32>, vector<8x128xf32> -> vector<8x128xf32>
      %134 = arith.addf %128, %133 : vector<8x128xf32>
      %c2_i32_100 = arith.constant 2 : i32
      %135 = arith.addi %85, %c2_i32_100 : i32
      %136 = arith.index_cast %135 : i32 to index
      %c2_101 = arith.constant 2 : index
      %c0_102 = arith.constant 0 : index
      %137 = vector.load %arg5[%136, %c2_101, %c0_102] : memref<10x10x64xf32, #tpu.memory_space<vmem>>, vector<1x8x64xf32>
      %138 = vector.shape_cast %137 : vector<1x8x64xf32> to vector<8x64xf32>
      %cst_103 = arith.constant dense<0.000000e+00> : vector<8x128xf32>
      %139 = tpu.matmul %138, %22, %cst_103 {dimension_numbers = #tpu.dot_dimension_numbers<[1], [0], [0], [1], [0, 0, 1, 1], [], []>} : vector<8x64xf32>, vector<64x128xf32>, vector<8x128xf32> -> vector<8x128xf32>
      %140 = arith.addf %134, %139 : vector<8x128xf32>
      %141 = vector.broadcast %4 : vector<1x128xf32> to vector<8x128xf32>
      %142 = arith.addf %140, %141 : vector<8x128xf32>
      %cst_104 = arith.constant 0.000000e+00 : f32
      %143 = vector.broadcast %cst_104 : f32 to vector<8x128xf32>
      %144 = arith.maximumf %142, %143 : vector<8x128xf32>
      %145 = arith.maximumf %83, %144 : vector<8x128xf32>
      %c0_105 = arith.constant 0 : index
      %c0_106 = arith.constant 0 : index
      %146 = vector.load %arg6[%c0_105, %c0_106] : memref<8x128xf32, #tpu.memory_space<vmem>>, vector<8x128xf32>
      tpu.vector_store %arg6[%c0_105, %c0_106], %145 {strides = array<i32>} : memref<8x128xf32, #tpu.memory_space<vmem>>, vector<8x128xf32>,
      %c0_107 = arith.constant 0 : index
      %c0_108 = arith.constant 0 : index
      %147 = tpu.strided_load %arg6[%c0_107, %c0_108] {strides = array<i32: 2, 1>} : memref<8x128xf32, #tpu.memory_space<vmem>>, vector<4x128xf32>
      %c1_109 = arith.constant 1 : index
      %c0_110 = arith.constant 0 : index
      %148 = tpu.strided_load %arg6[%c1_109, %c0_110] {strides = array<i32: 2, 1>} : memref<8x128xf32, #tpu.memory_space<vmem>>, vector<4x128xf32>
      %149 = arith.maximumf %147, %148 : vector<4x128xf32>
      %150 = arith.truncf %149 : vector<4x128xf32> to vector<4x128xbf16>
      %c0_111 = arith.constant 0 : index
      %151 = arith.index_cast %arg7 : i32 to index
      %c0_112 = arith.constant 0 : index
      %c0_113 = arith.constant 0 : index
      %152 = vector.load %arg4[%c0_111, %151, %c0_112, %c0_113] : memref<1x4x4x128xbf16, #tpu.memory_space<vmem>>, vector<1x1x4x128xbf16>
      %153 = vector.shape_cast %152 : vector<1x1x4x128xbf16> to vector<4x128xbf16>
      %154 = vector.shape_cast %150 : vector<4x128xbf16> to vector<1x1x4x128xbf16>
      tpu.vector_store %arg4[%c0_111, %151, %c0_112, %c0_113], %154 {strides = array<i32>} : memref<1x4x4x128xbf16, #tpu.memory_space<vmem>>, vector<1x1x4x128xbf16>,
    }
    %c4_i32_27 = arith.constant 4 : i32
    return
  }
  func.func @transform_0(%arg0: i32) -> (i32, i32, i32, i32) {
    %c0_i32 = arith.constant 0 : i32
    %c0_i32_0 = arith.constant 0 : i32
    %c0_i32_1 = arith.constant 0 : i32
    %c0_i32_2 = arith.constant 0 : i32
    return %arg0, %c0_i32, %c0_i32_0, %c0_i32_1 : i32, i32, i32, i32
  }
  func.func @transform_1(%arg0: i32) -> (i32, i32, i32) {
    %c0_i32 = arith.constant 0 : i32
    %c0_i32_0 = arith.constant 0 : i32
    %c0_i32_1 = arith.constant 0 : i32
    %c0_i32_2 = arith.constant 0 : i32
    return %c0_i32, %c0_i32_0, %c0_i32_1 : i32, i32, i32
  }
  func.func @transform_2(%arg0: i32) -> (i32, i32) {
    %c0_i32 = arith.constant 0 : i32
    %c0_i32_0 = arith.constant 0 : i32
    %c0_i32_1 = arith.constant 0 : i32
    return %c0_i32, %c0_i32_0 : i32, i32
  }
  func.func @transform_3(%arg0: i32) -> (i32, i32, i32, i32) {
    %c0_i32 = arith.constant 0 : i32
    %c0_i32_0 = arith.constant 0 : i32
    %c0_i32_1 = arith.constant 0 : i32
    %c0_i32_2 = arith.constant 0 : i32
    return %arg0, %c0_i32, %c0_i32_0, %c0_i32_1 : i32, i32, i32, i32
  }
}

module attributes {stable_mosaic.version = 11 : i64} {
  func.func @_dense_kernel(%arg0: i32, %arg1: memref<2x1024xbf16, #tpu.memory_space<vmem>>, %arg2: memref<1024x128xbf16, #tpu.memory_space<vmem>>, %arg3: memref<1x128xf32, #tpu.memory_space<vmem>>, %arg4: memref<2x128xbf16, #tpu.memory_space<vmem>>) attributes {dimension_semantics = [#tpu.dimension_semantics<parallel>], iteration_bounds = array<i64: 1>, scalar_prefetch = 0 : i64, scratch_operands = 0 : i64, tpu.core_type = #tpu.core_type<tc>, window_params = [{pipeline_mode = #tpu.pipeline_mode<synchronous>, transform_indices = @transform_0, window_bounds = array<i64: 2, 1024>}, {transform_indices = @transform_1, window_bounds = array<i64: 1024, 128>}, {transform_indices = @transform_2, window_bounds = array<i64: 1, 128>}, {transform_indices = @transform_3, window_bounds = array<i64: 2, 128>}]} {
    %c0 = arith.constant 0 : index
    %c0_0 = arith.constant 0 : index
    %0 = vector.load %arg1[%c0, %c0_0] : memref<2x1024xbf16, #tpu.memory_space<vmem>>, vector<2x1024xbf16>
    %c0_1 = arith.constant 0 : index
    %c0_2 = arith.constant 0 : index
    %1 = vector.load %arg2[%c0_1, %c0_2] : memref<1024x128xbf16, #tpu.memory_space<vmem>>, vector<1024x128xbf16>
    %cst = arith.constant dense<0.000000e+00> : vector<2x128xf32>
    %2 = tpu.matmul %0, %1, %cst {dimension_numbers = #tpu.dot_dimension_numbers<[1], [0], [0], [1], [0, 0, 1, 1], [], []>} : vector<2x1024xbf16>, vector<1024x128xbf16>, vector<2x128xf32> -> vector<2x128xf32>
    %c0_3 = arith.constant 0 : index
    %c0_4 = arith.constant 0 : index
    %3 = vector.load %arg3[%c0_3, %c0_4] : memref<1x128xf32, #tpu.memory_space<vmem>>, vector<1x128xf32>
    %4 = vector.broadcast %3 : vector<1x128xf32> to vector<2x128xf32>
    %5 = arith.addf %2, %4 : vector<2x128xf32>
    %6 = arith.truncf %5 : vector<2x128xf32> to vector<2x128xbf16>
    %c0_5 = arith.constant 0 : index
    %c0_6 = arith.constant 0 : index
    %7 = vector.load %arg4[%c0_5, %c0_6] : memref<2x128xbf16, #tpu.memory_space<vmem>>, vector<2x128xbf16>
    tpu.vector_store %arg4[%c0_5, %c0_6], %6 {strides = array<i32>} : memref<2x128xbf16, #tpu.memory_space<vmem>>, vector<2x128xbf16>,
    return
  }
  func.func @transform_0(%arg0: i32) -> (i32, i32) {
    %c0_i32 = arith.constant 0 : i32
    %c0_i32_0 = arith.constant 0 : i32
    %c0_i32_1 = arith.constant 0 : i32
    return %c0_i32, %c0_i32_0 : i32, i32
  }
  func.func @transform_1(%arg0: i32) -> (i32, i32) {
    %c0_i32 = arith.constant 0 : i32
    %c0_i32_0 = arith.constant 0 : i32
    return %c0_i32, %arg0 : i32, i32
  }
  func.func @transform_2(%arg0: i32) -> (i32, i32) {
    %c0_i32 = arith.constant 0 : i32
    %c0_i32_0 = arith.constant 0 : i32
    return %c0_i32, %arg0 : i32, i32
  }
  func.func @transform_3(%arg0: i32) -> (i32, i32) {
    %c0_i32 = arith.constant 0 : i32
    %c0_i32_0 = arith.constant 0 : i32
    return %c0_i32, %arg0 : i32, i32
  }
}

module attributes {stable_mosaic.version = 11 : i64} {
  func.func @_dense_kernel(%arg0: i32, %arg1: memref<2x2048xbf16, #tpu.memory_space<vmem>>, %arg2: memref<2048x256xbf16, #tpu.memory_space<vmem>>, %arg3: memref<1x256xf32, #tpu.memory_space<vmem>>, %arg4: memref<2x256xbf16, #tpu.memory_space<vmem>>) attributes {dimension_semantics = [#tpu.dimension_semantics<parallel>], iteration_bounds = array<i64: 4>, scalar_prefetch = 0 : i64, scratch_operands = 0 : i64, tpu.core_type = #tpu.core_type<tc>, window_params = [{pipeline_mode = #tpu.pipeline_mode<synchronous>, transform_indices = @transform_0, window_bounds = array<i64: 2, 2048>}, {transform_indices = @transform_1, window_bounds = array<i64: 2048, 256>}, {transform_indices = @transform_2, window_bounds = array<i64: 1, 256>}, {transform_indices = @transform_3, window_bounds = array<i64: 2, 256>}]} {
    %c0 = arith.constant 0 : index
    %c0_0 = arith.constant 0 : index
    %0 = vector.load %arg1[%c0, %c0_0] : memref<2x2048xbf16, #tpu.memory_space<vmem>>, vector<2x2048xbf16>
    %c0_1 = arith.constant 0 : index
    %c0_2 = arith.constant 0 : index
    %1 = vector.load %arg2[%c0_1, %c0_2] : memref<2048x256xbf16, #tpu.memory_space<vmem>>, vector<2048x256xbf16>
    %cst = arith.constant dense<0.000000e+00> : vector<2x256xf32>
    %2 = tpu.matmul %0, %1, %cst {dimension_numbers = #tpu.dot_dimension_numbers<[1], [0], [0], [1], [0, 0, 1, 1], [], []>} : vector<2x2048xbf16>, vector<2048x256xbf16>, vector<2x256xf32> -> vector<2x256xf32>
    %c0_3 = arith.constant 0 : index
    %c0_4 = arith.constant 0 : index
    %3 = vector.load %arg3[%c0_3, %c0_4] : memref<1x256xf32, #tpu.memory_space<vmem>>, vector<1x256xf32>
    %4 = vector.broadcast %3 : vector<1x256xf32> to vector<2x256xf32>
    %5 = arith.addf %2, %4 : vector<2x256xf32>
    %cst_5 = arith.constant 0.000000e+00 : f32
    %6 = vector.broadcast %cst_5 : f32 to vector<2x256xf32>
    %7 = arith.maximumf %5, %6 : vector<2x256xf32>
    %8 = arith.truncf %7 : vector<2x256xf32> to vector<2x256xbf16>
    %c0_6 = arith.constant 0 : index
    %c0_7 = arith.constant 0 : index
    %9 = vector.load %arg4[%c0_6, %c0_7] : memref<2x256xbf16, #tpu.memory_space<vmem>>, vector<2x256xbf16>
    tpu.vector_store %arg4[%c0_6, %c0_7], %8 {strides = array<i32>} : memref<2x256xbf16, #tpu.memory_space<vmem>>, vector<2x256xbf16>,
    return
  }
  func.func @transform_0(%arg0: i32) -> (i32, i32) {
    %c0_i32 = arith.constant 0 : i32
    %c0_i32_0 = arith.constant 0 : i32
    %c0_i32_1 = arith.constant 0 : i32
    return %c0_i32, %c0_i32_0 : i32, i32
  }
  func.func @transform_1(%arg0: i32) -> (i32, i32) {
    %c0_i32 = arith.constant 0 : i32
    %c0_i32_0 = arith.constant 0 : i32
    return %c0_i32, %arg0 : i32, i32
  }
  func.func @transform_2(%arg0: i32) -> (i32, i32) {
    %c0_i32 = arith.constant 0 : i32
    %c0_i32_0 = arith.constant 0 : i32
    return %c0_i32, %arg0 : i32, i32
  }
  func.func @transform_3(%arg0: i32) -> (i32, i32) {
    %c0_i32 = arith.constant 0 : i32
    %c0_i32_0 = arith.constant 0 : i32
    return %c0_i32, %arg0 : i32, i32
  }
}

module attributes {stable_mosaic.version = 11 : i64} {
  func.func @_dense_kernel(%arg0: i32, %arg1: memref<2x128xbf16, #tpu.memory_space<vmem>>, %arg2: memref<128x10xbf16, #tpu.memory_space<vmem>>, %arg3: memref<1x10xf32, #tpu.memory_space<vmem>>, %arg4: memref<2x10xf32, #tpu.memory_space<vmem>>) attributes {dimension_semantics = [#tpu.dimension_semantics<parallel>], iteration_bounds = array<i64: 1>, scalar_prefetch = 0 : i64, scratch_operands = 0 : i64, tpu.core_type = #tpu.core_type<tc>, window_params = [{pipeline_mode = #tpu.pipeline_mode<synchronous>, transform_indices = @transform_0, window_bounds = array<i64: 2, 128>}, {transform_indices = @transform_1, window_bounds = array<i64: 128, 10>}, {transform_indices = @transform_2, window_bounds = array<i64: 1, 10>}, {transform_indices = @transform_3, window_bounds = array<i64: 2, 10>}]} {
    %c0 = arith.constant 0 : index
    %c0_0 = arith.constant 0 : index
    %0 = vector.load %arg1[%c0, %c0_0] : memref<2x128xbf16, #tpu.memory_space<vmem>>, vector<2x128xbf16>
    %c0_1 = arith.constant 0 : index
    %c0_2 = arith.constant 0 : index
    %1 = vector.load %arg2[%c0_1, %c0_2] : memref<128x10xbf16, #tpu.memory_space<vmem>>, vector<128x10xbf16>
    %cst = arith.constant dense<0.000000e+00> : vector<2x10xf32>
    %2 = tpu.matmul %0, %1, %cst {dimension_numbers = #tpu.dot_dimension_numbers<[1], [0], [0], [1], [0, 0, 1, 1], [], []>} : vector<2x128xbf16>, vector<128x10xbf16>, vector<2x10xf32> -> vector<2x10xf32>
    %c0_3 = arith.constant 0 : index
    %c0_4 = arith.constant 0 : index
    %3 = vector.load %arg3[%c0_3, %c0_4] : memref<1x10xf32, #tpu.memory_space<vmem>>, vector<1x10xf32>
    %4 = vector.broadcast %3 : vector<1x10xf32> to vector<2x10xf32>
    %5 = arith.addf %2, %4 : vector<2x10xf32>
    %c0_5 = arith.constant 0 : index
    %c0_6 = arith.constant 0 : index
    %6 = vector.load %arg4[%c0_5, %c0_6] : memref<2x10xf32, #tpu.memory_space<vmem>>, vector<2x10xf32>
    tpu.vector_store %arg4[%c0_5, %c0_6], %5 {strides = array<i32>} : memref<2x10xf32, #tpu.memory_space<vmem>>, vector<2x10xf32>,
    return
  }
  func.func @transform_0(%arg0: i32) -> (i32, i32) {
    %c0_i32 = arith.constant 0 : i32
    %c0_i32_0 = arith.constant 0 : i32
    %c0_i32_1 = arith.constant 0 : i32
    return %c0_i32, %c0_i32_0 : i32, i32
  }
  func.func @transform_1(%arg0: i32) -> (i32, i32) {
    %c0_i32 = arith.constant 0 : i32
    %c0_i32_0 = arith.constant 0 : i32
    return %c0_i32, %arg0 : i32, i32
  }
  func.func @transform_2(%arg0: i32) -> (i32, i32) {
    %c0_i32 = arith.constant 0 : i32
    %c0_i32_0 = arith.constant 0 : i32
    return %c0_i32, %arg0 : i32, i32
  }
  func.func @transform_3(%arg0: i32) -> (i32, i32) {
    %c0_i32 = arith.constant 0 : i32
    %c0_i32_0 = arith.constant 0 : i32
    return %c0_i32, %arg0 : i32, i32
  }
}

</mosaic_0001>

<bundles_post_ra>
// kernel: conv1_forward.9
= control target key start
LH: loop header
LB: loop body
LE: loop exit
PB: predicated region body
PF: predicated region fallthrough
CT: control target
= control target key end

     0   :  { %8 = vsyncpa [#allocation4], 0  ;;  %s1955_s0 = inlined_call_operand.vmem [shape: bf16[2,12,12,32], index: 0, kind: input, shape index: {}]   ;;  %s1956_s1 = inlined_call_operand.hbm [shape: f32[9,32,64], index: 1, kind: input, shape index: {}]   ;;  %s1957_s2 = inlined_call_operand.hbm [shape: f32[1,64], index: 2, kind: input, shape index: {}]   ;;  %s1958_s3 = inlined_call_operand.vmem [shape: bf16[2,10,10,64], index: 3, kind: output, shape index: {}]  }
   0x1   :  { %9 = vsyncpa [#allocation6], 0  ;;  %s1650_s12 = smov 0  }
   0x2 LB: > { %s1656_s13 = sadd.s32 4294967295, %s1620_s12   ;;  %p1212_p0 = scmp.ge.s32.totalorder %s1620_s12, 1  ;;  %s1620_s12 = sphi %s1650_s12, %s15_s12  }
   0x3   : > { %p114_p1 = scmp.lt.s32.totalorder %s1620_s12, 3  ;;  %s1626_s14 = smov [#allocation3]  }
   0x4   : > { %s126_s15 = sshll.u32 %s1626_s14, 4  ;;  %p1959_p3 = scmp.eq.s32.totalorder %s1656_s13, 0  ;;  %s127_s15 = int_to_ptr.vmem [resolvable:$true] %s126_s15 }
   0x5   : > { %p1660_p2 = pnand %p1212_p0, %p114_p1  ;;  %s1627_s17 = smov [#allocation5]  }
   0x6   : > { %s140_s18 = sshll.u32 %s1627_s17, 4  ;;  %s1546_s22 = scalar_lea.hbm %s1956_s1, 4608  ;;  %s1673_s18 = int_to_ptr.vmem [resolvable:$true] %s140_s18 }
   0x7   : > { %s1961_s16 = scalar_select %p1660_p2, 1, 0 }
   0x8   : > { %p1515_p4 = pneg %p1660_p2  ;;  %p1547_p6 = scmp.ne.s32.totalorder %s1956_s1, %s1546_s22 }
   0x9   : > { %p1553_p10 = scmp.lt.u32.totalorder %s1546_s22, %s1956_s1 }
   0xa   : > { %p1669_p5 = pnand %p1959_p3, %p1515_p4 }
   0xc   : > { %p1548_p7 = pneg %p1669_p5 }
   0xe   : > { %p1549_p8 = pnand %p1548_p7, %p1547_p6 }
  0x10   : > { %p1550_p9 = pneg %p1549_p8 }
  0x12   : > { %p1555_p11 = pnand %p1553_p10, %p1550_p9 }
  0x14   : > { %1558 = shalt.err (!%p1555_p11)
}
  0x15   : > { %s1559_s27 = scalar_lea.vmem %s127_s15, 4608  ;;  %p1567_p1 = scmp.lt.s32.totalorder %s127_s15, %s127_s15 }
  0x16   : > { %p1560_p12 = scmp.ne.s32.totalorder %s127_s15, %s1559_s27  ;;  %p1568_p4 = scmp.lt.s32.totalorder %s1559_s27, %s1559_s27 }
  0x18   : > { %p1562_p13 = pnand %p1560_p12, %p1548_p7  ;;  %p1569_p3 = por %p1568_p4, %p1567_p1 }
  0x1a   : > { %p1563_p0 = pneg %p1562_p13 }
  0x1c   : > { %p1570_p2 = pnand %p1569_p3, %p1563_p0 }
  0x1e   : > { %1573 = shalt.err (!%p1570_p2)
}
  0x1f   : > { %s1628_s28 = smov 128   ;;  %s1629_s29 = smov 8  }
  0x20   : > { %1518 = dma.hbm_to_vmem [thread:$0]  (!%p1669_p5), %s1956_s1, 4608, %s127_s15, [#allocation4], %s1628_s28, %s1628_s28, %s1629_s29  }
  0x21   : > { %s1574_s7 = scalar_lea.hbm %s1957_s2, 16 }
  0x22   : > { %p1575_p6 = scmp.ne.s32.totalorder %s1957_s2, %s1574_s7  ;;  %p1581_p8 = scmp.lt.u32.totalorder %s1574_s7, %s1957_s2 }
  0x24   : > { %p1577_p2 = pnand %p1575_p6, %p1548_p7 }
  0x26   : > { %p1578_p3 = pneg %p1577_p2 }
  0x28   : > { %p1583_p9 = pnand %p1581_p8, %p1578_p3 }
  0x2a   : > { %1586 = shalt.err (!%p1583_p9)
}
  0x2b   : > { %s1587_s14 = scalar_lea.vmem %s1673_s18, 16  ;;  %s1594_s15 = scalar_lea.vmem %s1673_s18, 32 }
  0x2c   : > { %p1588_p10 = scmp.ne.s32.totalorder %s1673_s18, %s1587_s14  ;;  %p1595_p13 = scmp.lt.s32.totalorder %s1673_s18, %s1673_s18 }
  0x2d   : > { %p1596_p0 = scmp.lt.s32.totalorder %s1594_s15, %s1587_s14 }
  0x2e   : > { %p1590_p11 = pnand %p1588_p10, %p1548_p7 }
  0x2f   : > { %p1597_p1 = por %p1596_p0, %p1595_p13 }
  0x30   : > { %p1591_p12 = pneg %p1590_p11 }
  0x32   : > { %p1598_p4 = pnand %p1597_p1, %p1591_p12 }
  0x34   : > { %1601 = shalt.err (!%p1598_p4)
}
  0x35   : > { %1521 = dma.hbm_to_vmem [thread:$0]  (!%p1669_p5), %s1957_s2, 16, %s1673_s18, [#allocation6]  }
  0x36   : > { %p1963_p6 = scmp.ne.s32.totalorder %s1961_s16, 0 }
  0x37   : > { %p1964_p7 = scmp.eq.s32.totalorder (!%p1963_p6), %s1656_s13, 0 }
  0x38   : > { %161 = sbr.rel (%p1963_p6) target bundleno = 361 (0x169), region = 32 }
  0x3f   : > { %1611 = dma.done.wait (%p1964_p7), [#allocation4], 4608   ;;  %p1965_p2 = pmov %p1964_p7 }
  0x41   : > { %1613 = vsyncadd (%p1965_p2), [#allocation4], 4294962688  ;;  %p1966_p3 = pmov %p1965_p2 }
  0x42   : > { %p1967_p8 = pmov %p1965_p2 }
  0x43   : > { %1615 = dma.done.wait (%p1966_p3), [#allocation6], 16  }
  0x44   : > { %1617 = vsyncadd (%p1967_p8), [#allocation6], 4294967280  ;;  %p189_p9 = scmp.lt.s32.totalorder %s1656_s13, 1  ;;  %v1738_v0 = vld [vmem:[#allocation5] ss:$0 sm:$0xff]  ;;  %v1742_v2 = vld [vmem:[#allocation3 + $0x8] sm:$0xff] }
  0x45   : > { %v1740_v1 = vld [vmem:[#allocation3] sm:$0xff]  ;;  %v1749_v3 = vld [vmem:[#allocation3 + $0x10] sm:$0xff]  ;;  %v1751_v4 = vld [vmem:[#allocation3 + $0x18] sm:$0xff]  ;;  %vm247_vm0 = vcmask 261120   ;;  %vm249_vm1 = vcmask 257024   ;;  %s1865_s25 = smov 0  }
  0x46   : > { %s1969_s13 = smov (!%p189_p9, %s1656_s13), 1  ;;  %v1753_v5 = vld [vmem:[#allocation3 + $0x20] sm:$0xff]  ;;  %v1755_v6 = vld [vmem:[#allocation3 + $0x28] sm:$0xff]  ;;  %v1757_v7 = vld [vmem:[#allocation3 + $0x30] sm:$0xff] }
  0x47   : > { %s1506_s16 = smul.u32 80, %s1969_s13  ;;  %v1759_v8 = vld [vmem:[#allocation3 + $0x38] sm:$0xff]  ;;  %v1761_v9 = vld [vmem:[#allocation3 + $0x40] sm:$0xff]  ;;  %v1763_v10 = vld [vmem:[#allocation3 + $0x48] sm:$0xff] }
  0x48   : > { %v1765_v11 = vld [vmem:[#allocation3 + $0x50] sm:$0xff]  ;;  %v1767_v12 = vld [vmem:[#allocation3 + $0x58] sm:$0xff]  ;;  %v1769_v13 = vld [vmem:[#allocation3 + $0x60] sm:$0xff]  ;;  %s1505_s22 = smul.u32 96, %s1969_s13 }
  0x49   : > { %s1747_s21 = scalar_lea.vmem %s1958_s3, %s1506_s16  ;;  %v1771_v14 = vld [vmem:[#allocation3 + $0x68] sm:$0xff]  ;;  %v1773_v15 = vld [vmem:[#allocation3 + $0x70] sm:$0xff]  ;;  %v1775_v16 = vld [vmem:[#allocation3 + $0x78] sm:$0xff] }
  0x4a   : > { %v1777_v17 = vld [vmem:[#allocation3 + $0x80] sm:$0xff]  ;;  %v1780_v18 = vld [vmem:[#allocation3 + $0x88] sm:$0xff]  ;;  %v1782_v19 = vld [vmem:[#allocation3 + $0x90] sm:$0xff]  ;;  %s1807_s24 = scalar_lea.vmem %s1955_s0, %s1505_s22 }
  0x4b   : > { %v1784_v20 = vld [vmem:[#allocation3 + $0x98] sm:$0xff]  ;;  %v1786_v21 = vld [vmem:[#allocation3 + $0xa0] sm:$0xff]  ;;  %v1788_v22 = vld [vmem:[#allocation3 + $0xa8] sm:$0xff] }
  0x4c   : > { %v1790_v23 = vld [vmem:[#allocation3 + $0xb0] sm:$0xff]  ;;  %v1792_v24 = vld [vmem:[#allocation3 + $0xb8] sm:$0xff]  ;;  %v1794_v25 = vld [vmem:[#allocation3 + $0xc0] sm:$0xff] }
  0x4d   : > { %v1796_v26 = vld [vmem:[#allocation3 + $0xc8] sm:$0xff]  ;;  %v1798_v27 = vld [vmem:[#allocation3 + $0xd0] sm:$0xff]  ;;  %v1800_v28 = vld [vmem:[#allocation3 + $0xd8] sm:$0xff] }
  0x4e   : > { %v1802_v29 = vld [vmem:[#allocation3 + $0xe0] sm:$0xff]  ;;  %v1809_v30 = vld [vmem:[#allocation3 + $0xe8] sm:$0xff]  ;;  %v1811_v31 = vld [vmem:[#allocation3 + $0xf0] sm:$0xff] }
  0x4f   : > { %v1813_v32 = vld [vmem:[#allocation3 + $0xf8] sm:$0xff]  ;;  %v1815_v33 = vld [vmem:[#allocation3 + $0x100] sm:$0xff]  ;;  %v1817_v34 = vld [vmem:[#allocation3 + $0x108] sm:$0xff] }
  0x50   : > { %v1819_v35 = vld [vmem:[#allocation3 + $0x110] sm:$0xff]  ;;  %v1821_v36 = vld [vmem:[#allocation3 + $0x118] sm:$0xff]  ;;  %v199_v37 = vld [vmem:[%s1807_s24] ss:$8 sps:$4 sm:$0xff]  }
  0x51   : > { %v200_v38 = vld [vmem:[%s1807_s24 + $0x4] sm:$0x3]  ;;  %v223_v39 = vunpack.c.l.bf16 %v199_v37  ;;  %v225_v41 = vunpack.c.h.bf16 %v199_v37  ;;  %v202_v42 = vld [vmem:[%s1807_s24 + $0xc] sm:$0x3]  ;;  %v203_v43 = vld [vmem:[%s1807_s24 + $0x10] ss:$8 sps:$4 sm:$0xff]  }
  0x52   : > { %v224_v40 = vunpack.c.l.bf16 %v200_v38  ;;  %v204_v44 = vld [vmem:[%s1807_s24 + $0x14] sm:$0x3]  ;;  %v226_v45 = vunpack.c.l.bf16 %v202_v42  ;;  %v227_v46 = vunpack.c.l.bf16 %v203_v43  ;;  %v229_v48 = vunpack.c.h.bf16 %v203_v43  ;;  %v206_v49 = vld [vmem:[%s1807_s24 + $0x1c] sm:$0x3]  ;;  %v207_v50 = vld [vmem:[%s1807_s24 + $0x20] ss:$8 sps:$4 sm:$0xff]  }
  0x53   : > { %v228_v47 = vunpack.c.l.bf16 %v204_v44  ;;  %v208_v51 = vld [vmem:[%s1807_s24 + $0x24] sm:$0x3]  ;;  %248 = vst.msk [vmem:[#allocation2] sm:$0xff] %vm247_vm0, %v223_v39  ;;  %251 = vst.msk [vmem:[#allocation2 + $0x10] sm:$0xff] %vm247_vm0, %v225_v41  ;;  %v230_v52 = vunpack.c.l.bf16 %v206_v49  ;;  %v231_v53 = vunpack.c.l.bf16 %v207_v50  ;;  %v233_v55 = vunpack.c.h.bf16 %v207_v50  ;;  %v210_v56 = vld [vmem:[%s1807_s24 + $0x2c] sm:$0x3] }
  0x54   : > { %250 = vst.msk [vmem:[#allocation2 + $0x8] sm:$0xf] %vm249_vm1, %v224_v40  ;;  %v232_v54 = vunpack.c.l.bf16 %v208_v51  ;;  %v211_v57 = vld [vmem:[%s1807_s24 + $0x30] ss:$8 sps:$4 sm:$0xff]   ;;  %v212_v58 = vld [vmem:[%s1807_s24 + $0x34] sm:$0x3]  ;;  %v234_v59 = vunpack.c.l.bf16 %v210_v56 }
  0x55   : > { %252 = vst.msk [vmem:[#allocation2 + $0x18] sm:$0xf] %vm249_vm1, %v226_v45  ;;  %254 = vst.msk [vmem:[#allocation2 + $0x28] sm:$0xf] %vm249_vm1, %v228_v47  ;;  %v235_v60 = vunpack.c.l.bf16 %v211_v57  ;;  %v236_v61 = vunpack.c.l.bf16 %v212_v58  ;;  %v237_v62 = vunpack.c.h.bf16 %v211_v57  ;;  %v214_v63 = vld [vmem:[%s1807_s24 + $0x3c] sm:$0x3] }
  0x56   : > { %253 = vst.msk [vmem:[#allocation2 + $0x20] sm:$0xff] %vm247_vm0, %v227_v46  ;;  %255 = vst.msk [vmem:[#allocation2 + $0x30] sm:$0xff] %vm247_vm0, %v229_v48  ;;  %v215_v37 = vld [vmem:[%s1807_s24 + $0x40] ss:$8 sps:$4 sm:$0xff]   ;;  %v216_v38 = vld [vmem:[%s1807_s24 + $0x44] sm:$0x3]  ;;  %v238_v39 = vunpack.c.l.bf16 %v214_v63 }
  0x57   : > { %256 = vst.msk [vmem:[#allocation2 + $0x38] sm:$0xf] %vm249_vm1, %v230_v52  ;;  %258 = vst.msk [vmem:[#allocation2 + $0x48] sm:$0xf] %vm249_vm1, %v232_v54  ;;  %v239_v40 = vunpack.c.l.bf16 %v215_v37  ;;  %v240_v41 = vunpack.c.l.bf16 %v216_v38  ;;  %v241_v42 = vunpack.c.h.bf16 %v215_v37  ;;  %v218_v43 = vld [vmem:[%s1807_s24 + $0x4c] sm:$0x3] }
  0x58   : > { %257 = vst.msk [vmem:[#allocation2 + $0x40] sm:$0xff] %vm247_vm0, %v231_v53  ;;  %259 = vst.msk [vmem:[#allocation2 + $0x50] sm:$0xff] %vm247_vm0, %v233_v55  ;;  %v219_v44 = vld [vmem:[%s1807_s24 + $0x50] ss:$8 sps:$4 sm:$0xff]   ;;  %v220_v45 = vld [vmem:[%s1807_s24 + $0x54] sm:$0x3]  ;;  %v242_v46 = vunpack.c.l.bf16 %v218_v43 }
  0x59   : > { %260 = vst.msk [vmem:[#allocation2 + $0x58] sm:$0xf] %vm249_vm1, %v234_v59  ;;  %262 = vst.msk [vmem:[#allocation2 + $0x68] sm:$0xf] %vm249_vm1, %v236_v61  ;;  %v243_v47 = vunpack.c.l.bf16 %v219_v44  ;;  %v244_v48 = vunpack.c.l.bf16 %v220_v45  ;;  %v245_v49 = vunpack.c.h.bf16 %v219_v44  ;;  %v222_v50 = vld [vmem:[%s1807_s24 + $0x5c] sm:$0x3] }
  0x5a   : > { %261 = vst.msk [vmem:[#allocation2 + $0x60] sm:$0xff] %vm247_vm0, %v235_v60  ;;  %263 = vst.msk [vmem:[#allocation2 + $0x70] sm:$0xff] %vm247_vm0, %v237_v62  ;;  %v246_v51 = vunpack.c.l.bf16 %v222_v50 }
  0x5b   : > { %264 = vst.msk [vmem:[#allocation2 + $0x78] sm:$0xf] %vm249_vm1, %v238_v39  ;;  %266 = vst.msk [vmem:[#allocation2 + $0x88] sm:$0xf] %vm249_vm1, %v240_v41 }
  0x5c   : > { %265 = vst.msk [vmem:[#allocation2 + $0x80] sm:$0xff] %vm247_vm0, %v239_v40  ;;  %267 = vst.msk [vmem:[#allocation2 + $0x90] sm:$0xff] %vm247_vm0, %v241_v42 }
  0x5d   : > { %268 = vst.msk [vmem:[#allocation2 + $0x98] sm:$0xf] %vm249_vm1, %v242_v46  ;;  %270 = vst.msk [vmem:[#allocation2 + $0xa8] sm:$0xf] %vm249_vm1, %v244_v48 }
  0x5e   : > { %269 = vst.msk [vmem:[#allocation2 + $0xa0] sm:$0xff] %vm247_vm0, %v243_v47  ;;  %271 = vst.msk [vmem:[#allocation2 + $0xb0] sm:$0xff] %vm247_vm0, %v245_v49 }
  0x5f   : > { %272 = vst.msk [vmem:[#allocation2 + $0xb8] sm:$0xf] %vm249_vm1, %v246_v51 }
  0x60 LB: >> { %v1417_v52 = vpack.c.bf16 %v1755_v6, %v1753_v5  ;;  %v1449_v53 = vpack.c.bf16 %v1780_v18, %v1777_v17  ;;  %v1421_v54 = vpack.c.bf16 %v1759_v8, %v1757_v7  ;;  %v1453_v55 = vpack.c.bf16 %v1784_v20, %v1782_v19  ;;  %s1221_s26 = sshll.u32 %s1624_s25, 4  ;;  %s1263_s28 = sshll.u32 %s1624_s25, 3  ;;  %s1624_s25 = sphi %s1865_s25, %s323_s25  }
  0x61   : >> { %s1879_s27 = scalar_lea.vmem [#allocation2], %s1221_s26  ;;  %v1425_v58 = vpack.c.bf16 %v1742_v2, %v1740_v1  ;;  %v1457_v59 = vpack.c.bf16 %v1788_v22, %v1786_v21  ;;  %v1429_v62 = vpack.c.bf16 %v1751_v4, %v1749_v3  ;;  %v1461_v63 = vpack.c.bf16 %v1792_v24, %v1790_v23  ;;  %s1113_s29 = scalar_lea.vmem %s1747_s21, %s1263_s28 }
  0x62   : >> { %1418 = vmatprep.subr.bf16.mxu1 %v1417_v52  ;;  %1450 = vmatprep.subr.bf16.mxu0 %v1449_v53  ;;  %v1433_v39 = vpack.c.bf16 %v1763_v10, %v1761_v9  ;;  %v1465_v40 = vpack.c.bf16 %v1796_v26, %v1794_v25  ;;  %v1437_v43 = vpack.c.bf16 %v1767_v12, %v1765_v11  ;;  %vm1116_vm2 = vcmask 516096   ;;  %s323_s25 = sadd.s32 1, %s1624_s25  }
  0x63   : >> { %1420 = vmatpush3.bf16.msra.mxu1 %v1417_v52  ;;  %1452 = vmatpush3.bf16.msra.mxu0 %v1449_v53  ;;  %v1469_v44 = vpack.c.bf16 %v1800_v28, %v1798_v27  ;;  %v1441_v47 = vpack.c.bf16 %v1771_v14, %v1769_v13  ;;  %v1473_v48 = vpack.c.bf16 %v1809_v30, %v1802_v29  ;;  %vm1114_vm3 = vcmask 519168   ;;  %p320_p5 = scmp.ge.s32.totalorder %s323_s25, 10  }
  0x64   : >> { %1422 = vmatprep.subr.bf16.mxu1 %v1421_v54  ;;  %1454 = vmatprep.subr.bf16.mxu0 %v1453_v55  ;;  %v1445_v51 = vpack.c.bf16 %v1775_v16, %v1773_v15  ;;  %v1477_v52 = vpack.c.bf16 %v1813_v32, %v1811_v31 }
  0x66   : >> { %v328_v56 = vld [vmem:[%s1879_s27 + $0x1] sm:$0xff]  ;;  %v1233_v57 = vld [vmem:[%s1879_s27 + $0x11] sm:$0xff]  ;;  %v329_v60 = vld [vmem:[%s1879_s27 + $0x9] sm:$0x3] }
  0x67   : >> { %1326 = vmatprep.mubr.msk.f32.mxu1 %vm247_vm0, %v328_v56  ;;  %1370 = vmatprep.mubr.msk.f32.mxu0 %vm247_vm0, %v1233_v57  ;;  %v1234_v61 = vld [vmem:[%s1879_s27 + $0x19] sm:$0x3]  ;;  %v326_v37 = vld [vmem:[%s1879_s27] sm:$0xff]  ;;  %v327_v41 = vld [vmem:[%s1879_s27 + $0x8] sm:$0x3] }
  0x68   : >> { %1424 = vmatpush3.bf16.msra.mxu1 %v1421_v54  ;;  %1456 = vmatpush3.bf16.msra.mxu0 %v1453_v55  ;;  %v1237_v38 = vld [vmem:[%s1879_s27 + $0x12] sm:$0xff]  ;;  %v1238_v42 = vld [vmem:[%s1879_s27 + $0x1a] sm:$0x3]  ;;  %v492_v45 = vld [vmem:[%s1879_s27 + $0x2] sm:$0xff]  ;;  %v1481_v55 = vpack.c.bf16 %v1817_v34, %v1815_v33 }
  0x69   : >> { %1426 = vmatprep.subr.bf16.mxu1 %v1425_v58  ;;  %1458 = vmatprep.subr.bf16.mxu0 %v1457_v59  ;;  %v1242_v46 = vld [vmem:[%s1879_s27 + $0x20] sm:$0xff]  ;;  %v493_v49 = vld [vmem:[%s1879_s27 + $0xa] sm:$0x3]  ;;  %v1243_v50 = vld [vmem:[%s1879_s27 + $0x28] sm:$0x3] }
  0x6a   : >> { %v1229_v53 = vld [vmem:[%s1879_s27 + $0x10] sm:$0xff]  ;;  %v1246_v54 = vld [vmem:[%s1879_s27 + $0x21] sm:$0xff]  ;;  %v1230_v56 = vld [vmem:[%s1879_s27 + $0x18] sm:$0x3] }
  0x6b   : >> { %1327 = vmatmul.mubr.msk.f32.vlgmr.msra.gmra.mrb[0].mxu1 %vm247_vm0, %v329_v60  ;;  %1371 = vmatmul.mubr.msk.f32.vlgmr.msra.gmra.mrb[0].mxu0 %vm247_vm0, %v1234_v61  ;;  %v1247_v57 = vld [vmem:[%s1879_s27 + $0x29] sm:$0x3] }
  0x6c   : >> { %1428 = vmatpush3.bf16.msra.mxu1 %v1425_v58  ;;  %1460 = vmatpush3.bf16.msra.mxu0 %v1457_v59  ;;  %v1485_v58 = vpack.c.bf16 %v1821_v36, %v1819_v35  ;;  %v1250_v59 = vld [vmem:[%s1879_s27 + $0x22] sm:$0xff]  ;;  %v1251_v60 = vld [vmem:[%s1879_s27 + $0x2a] sm:$0x3] }
  0x6d   : >> { %1430 = vmatprep.subr.bf16.mxu1 %v1429_v62  ;;  %1462 = vmatprep.subr.bf16.mxu0 %v1461_v63 }
  0x6e   : >> { %1337 = vmatprep.mubr.msk.f32.mxu1 %vm247_vm0, %v326_v37  ;;  %1381 = vmatprep.mubr.msk.f32.mxu0 %vm247_vm0, %v1237_v38 }
  0x70   : >> { %1432 = vmatpush3.bf16.msra.mxu1 %v1429_v62  ;;  %1464 = vmatpush3.bf16.msra.mxu0 %v1461_v63 }
  0x71   : >> { %1434 = vmatprep.subr.bf16.mxu1 %v1433_v39  ;;  %1466 = vmatprep.subr.bf16.mxu0 %v1465_v40 }
  0x73   : >> { %1338 = vmatmul.mubr.msk.f32.vlgmr.msra.gmra.mrb[0].mxu1 %vm247_vm0, %v327_v41  ;;  %1382 = vmatmul.mubr.msk.f32.vlgmr.msra.gmra.mrb[0].mxu0 %vm247_vm0, %v1238_v42 }
  0x74   : >> { %1436 = vmatpush3.bf16.msra.mxu1 %v1433_v39  ;;  %1468 = vmatpush3.bf16.msra.mxu0 %v1465_v40 }
  0x75   : >> { %1438 = vmatprep.subr.bf16.mxu1 %v1437_v43  ;;  %1470 = vmatprep.subr.bf16.mxu0 %v1469_v44 }
  0x76   : >> { %1348 = vmatprep.mubr.msk.f32.mxu1 %vm247_vm0, %v492_v45  ;;  %1392 = vmatprep.mubr.msk.f32.mxu0 %vm247_vm0, %v1242_v46 }
  0x78   : >> { %1440 = vmatpush3.bf16.msra.mxu1 %v1437_v43  ;;  %1472 = vmatpush3.bf16.msra.mxu0 %v1469_v44 }
  0x79   : >> { %1442 = vmatprep.subr.bf16.mxu1 %v1441_v47  ;;  %1474 = vmatprep.subr.bf16.mxu0 %v1473_v48 }
  0x7b   : >> { %1349 = vmatmul.mubr.msk.f32.vlgmr.msra.gmra.mrb[0].mxu1 %vm247_vm0, %v493_v49  ;;  %1393 = vmatmul.mubr.msk.f32.vlgmr.msra.gmra.mrb[0].mxu0 %vm247_vm0, %v1243_v50 }
  0x7c   : >> { %1444 = vmatpush3.bf16.msra.mxu1 %v1441_v47  ;;  %1476 = vmatpush3.bf16.msra.mxu0 %v1473_v48 }
  0x7d   : >> { %1446 = vmatprep.subr.bf16.mxu1 %v1445_v51  ;;  %1478 = vmatprep.subr.bf16.mxu0 %v1477_v52 }
  0x7e   : >> { %1359 = vmatprep.mubr.msk.f32.mxu1 %vm247_vm0, %v1229_v53  ;;  %1403 = vmatprep.mubr.msk.f32.mxu0 %vm247_vm0, %v1246_v54 }
  0x80   : >> { %1448 = vmatpush3.bf16.msra.mxu1 %v1445_v51  ;;  %1480 = vmatpush3.bf16.msra.mxu0 %v1477_v52 }
  0x81   : >> { %1482 = vmatprep.subr.bf16.mxu0 %v1481_v55 }
  0x83   : >> { %1360 = vmatmul.mubr.msk.f32.vlgmr.msra.gmra.mrb[0].mxu1 %vm247_vm0, %v1230_v56  ;;  %1404 = vmatmul.mubr.msk.f32.vlgmr.msra.gmra.mrb[0].mxu0 %vm247_vm0, %v1247_v57 }
  0x84   : >> { %1484 = vmatpush3.bf16.msra.mxu0 %v1481_v55  ;;  %1414 = vmatprep.mubr.msk.f32.mxu0 %vm247_vm0, %v1250_v59 }
  0x85   : >> { %1486 = vmatprep.subr.bf16.mxu0 %v1485_v58 }
  0x88   : >> { %1488 = vmatpush3.bf16.msra.mxu0 %v1485_v58 }
  0x8b   : >> { %1415 = vmatmul.mubr.msk.f32.vlgmr.msra.gmra.mrb[0].mxu0 %vm247_vm0, %v1251_v60 }
 0x156   : >> { %v1361_v61 = vpop.f32.mrb[0].mxu1 }
 0x157   : >> { %v654_v62 = vpop.f32.mrb[1].mxu1 }
 0x15e   : >> { %v1416_v63 = vpop.f32.mrb[0].mxu0 }
 0x15f   : >> { %v1489_v37 = vadd.f32 %v1416_v63, %v1361_v61  ;;  %v1082_v38 = vpop.f32.mrb[1].mxu0 }
 0x160   : >> { %v1490_v39 = vadd.f32 %v1082_v38, %v654_v62 }
 0x161   : >> { %v1100_v40 = vadd.f32 %v1489_v37, %v1738_v0 }
 0x162   : >> { %v1099_v41 = vadd.f32 %v1490_v39, %v1738_v0  ;;  %322 = sbr.rel (!%p320_p5) target bundleno = 96 (0x60), region = 90 }
 0x163   : >> { %v1102_v42 = vmax.f32 %v1100_v40, 0.0 }
 0x164   : >> { %v1101_v43 = vmax.f32 %v1099_v41, 0.0 }
 0x165   : >> { %v1262_v44 = vpack.c.bf16 %v1102_v42, %v1102_v42 }
 0x166   : >> { %v1261_v45 = vpack.c.bf16 %v1101_v43, %v1101_v43 }
 0x167   : >> { %1117 = vst.msk [vmem:[%s1113_s29 + $0x4] sm:$0x1] %vm1116_vm2, %v1262_v44 }
 0x168   : >> { %1115 = vst.msk [vmem:[%s1113_s29] sm:$0xf] %vm1114_vm3, %v1261_v45 }
 0x169 PF: > { %s15_s12 = sadd.s32 1, %s1620_s12  }
 0x16a   : > { %p12_p10 = scmp.ge.s32.totalorder %s15_s12, 4  }
 0x16c   :  { %14 = sbr.rel (!%p12_p10) target bundleno = 2 (0x2), region = 101 }
 0x173   :  { %1139 = vsyncpa [#allocation4], 1 }
 0x174   :  { %1141 = vsyncpa [#allocation4 + $0x1], 1 }
 0x175   :  { %1142 = vsyncpa [#allocation6], 1 }

// kernel: conv1_forward.7
= control target key start
LH: loop header
LB: loop body
LE: loop exit
PB: predicated region body
PF: predicated region fallthrough
CT: control target
= control target key end

     0   :  { %8 = vsyncpa [#allocation4], 0  ;;  %s1571_s0 = inlined_call_operand.vmem [shape: f32[2,28,28,1], index: 0, kind: input, shape index: {}]   ;;  %s1572_s1 = inlined_call_operand.hbm [shape: f32[9,1,16], index: 1, kind: input, shape index: {}]   ;;  %s1573_s2 = inlined_call_operand.hbm [shape: f32[1,16], index: 2, kind: input, shape index: {}]   ;;  %s1574_s3 = inlined_call_operand.vmem [shape: bf16[2,26,26,16], index: 3, kind: output, shape index: {}]  }
   0x1   :  { %9 = vsyncpa [#allocation6], 0  ;;  %s1140_s12 = smov 0  }
   0x2 LB: > { %s1146_s13 = sadd.s32 4294967295, %s1109_s12   ;;  %p932_p0 = scmp.ge.s32.totalorder %s1109_s12, 1  ;;  %s1109_s12 = sphi %s1140_s12, %s15_s12  }
   0x3   : > { %p114_p1 = scmp.lt.s32.totalorder %s1109_s12, 3  ;;  %s1115_s14 = smov [#allocation3]  }
   0x4   : > { %s126_s15 = sshll.u32 %s1115_s14, 4  ;;  %p1575_p3 = scmp.eq.s32.totalorder %s1146_s13, 0  ;;  %s127_s15 = int_to_ptr.vmem [resolvable:$true] %s126_s15 }
   0x5   : > { %p1150_p2 = pnand %p932_p0, %p114_p1  ;;  %s1116_s17 = smov [#allocation5]  }
   0x6   : > { %s140_s18 = sshll.u32 %s1116_s17, 4  ;;  %s1035_s22 = scalar_lea.hbm %s1572_s1, 144  ;;  %s1163_s18 = int_to_ptr.vmem [resolvable:$true] %s140_s18 }
   0x7   : > { %s1577_s16 = scalar_select %p1150_p2, 1, 0 }
   0x8   : > { %p1001_p4 = pneg %p1150_p2  ;;  %p1036_p6 = scmp.ne.s32.totalorder %s1572_s1, %s1035_s22 }
   0x9   : > { %p1042_p10 = scmp.lt.u32.totalorder %s1035_s22, %s1572_s1 }
   0xa   : > { %p1159_p5 = pnand %p1575_p3, %p1001_p4 }
   0xc   : > { %p1037_p7 = pneg %p1159_p5 }
   0xe   : > { %p1038_p8 = pnand %p1037_p7, %p1036_p6 }
  0x10   : > { %p1039_p9 = pneg %p1038_p8 }
  0x12   : > { %p1044_p11 = pnand %p1042_p10, %p1039_p9 }
  0x14   : > { %1047 = shalt.err (!%p1044_p11)
}
  0x15   : > { %s1048_s27 = scalar_lea.vmem %s127_s15, 144  ;;  %s1055_s28 = scalar_lea.vmem %s127_s15, 160 }
  0x16   : > { %p1049_p12 = scmp.ne.s32.totalorder %s127_s15, %s1048_s27  ;;  %p1056_p1 = scmp.lt.s32.totalorder %s127_s15, %s127_s15 }
  0x17   : > { %p1057_p4 = scmp.lt.s32.totalorder %s1055_s28, %s1048_s27 }
  0x18   : > { %p1051_p13 = pnand %p1049_p12, %p1037_p7 }
  0x19   : > { %p1058_p3 = por %p1057_p4, %p1056_p1 }
  0x1a   : > { %p1052_p0 = pneg %p1051_p13 }
  0x1c   : > { %p1059_p2 = pnand %p1058_p3, %p1052_p0 }
  0x1e   : > { %1062 = shalt.err (!%p1059_p2)
}
  0x1f   : > { %s1117_s29 = smov 16   ;;  %s1118_s30 = smov 1  }
  0x20   : > { %1004 = dma.hbm_to_vmem [thread:$0]  (!%p1159_p5), %s1572_s1, 144, %s127_s15, [#allocation4], %s1117_s29, %s1117_s29, %s1118_s30  }
  0x21   : > { %s1063_s8 = scalar_lea.hbm %s1573_s2, 16 }
  0x22   : > { %p1064_p6 = scmp.ne.s32.totalorder %s1573_s2, %s1063_s8  ;;  %p1070_p8 = scmp.lt.u32.totalorder %s1063_s8, %s1573_s2 }
  0x24   : > { %p1066_p2 = pnand %p1064_p6, %p1037_p7 }
  0x26   : > { %p1067_p3 = pneg %p1066_p2 }
  0x28   : > { %p1072_p9 = pnand %p1070_p8, %p1067_p3 }
  0x2a   : > { %1075 = shalt.err (!%p1072_p9)
}
  0x2b   : > { %s1076_s15 = scalar_lea.vmem %s1163_s18, 16  ;;  %s1083_s17 = scalar_lea.vmem %s1163_s18, 32 }
  0x2c   : > { %p1077_p10 = scmp.ne.s32.totalorder %s1163_s18, %s1076_s15  ;;  %p1084_p13 = scmp.lt.s32.totalorder %s1163_s18, %s1163_s18 }
  0x2d   : > { %p1085_p0 = scmp.lt.s32.totalorder %s1083_s17, %s1076_s15 }
  0x2e   : > { %p1079_p11 = pnand %p1077_p10, %p1037_p7 }
  0x2f   : > { %p1086_p1 = por %p1085_p0, %p1084_p13 }
  0x30   : > { %p1080_p12 = pneg %p1079_p11 }
  0x32   : > { %p1087_p4 = pnand %p1086_p1, %p1080_p12 }
  0x34   : > { %1090 = shalt.err (!%p1087_p4)
}
  0x35   : > { %1007 = dma.hbm_to_vmem [thread:$0]  (!%p1159_p5), %s1573_s2, 16, %s1163_s18, [#allocation6]  }
  0x36   : > { %p1579_p6 = scmp.ne.s32.totalorder %s1577_s16, 0 }
  0x37   : > { %p1580_p7 = scmp.eq.s32.totalorder (!%p1579_p6), %s1146_s13, 0 }
  0x38   : > { %161 = sbr.rel (%p1579_p6) target bundleno = 347 (0x15b), region = 32 }
  0x3f   : > { %1100 = dma.done.wait (%p1580_p7), [#allocation4], 144   ;;  %p1581_p2 = pmov %p1580_p7 }
  0x41   : > { %1102 = vsyncadd (%p1581_p2), [#allocation4], 4294967152  ;;  %p1582_p3 = pmov %p1581_p2 }
  0x42   : > { %p1583_p8 = pmov %p1581_p2 }
  0x43   : > { %1104 = dma.done.wait (%p1582_p3), [#allocation6], 16  }
  0x44   : > { %1106 = vsyncadd (%p1583_p8), [#allocation6], 4294967280  ;;  %p189_p9 = scmp.lt.s32.totalorder %s1146_s13, 1  ;;  %vm311_vm0 = vcmask 7168   ;;  %vm315_vm1 = vcmask 3072   ;;  %s1479_s26 = smov 0  }
  0x45   : > { %v1225_v0 = vld [vmem:[#allocation5] ss:$0 sm:$0xff]  ;;  %v1227_v1 = vld [vmem:[#allocation3] ss:$0 sm:$0xff]  ;;  %v1229_v2 = vld [vmem:[#allocation3 + $0x1] ss:$0 sm:$0xff] }
  0x46   : > { %s1585_s13 = smov (!%p189_p9, %s1146_s13), 1  ;;  %v1241_v3 = vld [vmem:[#allocation3 + $0x2] ss:$0 sm:$0xff]  ;;  %v1243_v4 = vld [vmem:[#allocation3 + $0x3] ss:$0 sm:$0xff] }
  0x47   : > { %s991_s18 = smul.u32 896, %s1585_s13  ;;  %v1245_v5 = vld [vmem:[#allocation3 + $0x4] ss:$0 sm:$0xff]  ;;  %v1247_v6 = vld [vmem:[#allocation3 + $0x5] ss:$0 sm:$0xff] }
  0x48   : > { %s992_s19 = smul.u32 416, %s1585_s13  ;;  %v1249_v7 = vld [vmem:[#allocation3 + $0x6] ss:$0 sm:$0xff]  ;;  %v1251_v8 = vld [vmem:[#allocation3 + $0x7] ss:$0 sm:$0xff] }
  0x49   : > { %s1234_s23 = scalar_lea.vmem %s1571_s0, %s991_s18  ;;  %v1253_v9 = vld [vmem:[#allocation3 + $0x8] ss:$0 sm:$0xff] }
  0x4a   : > { %s1239_s13 = scalar_lea.vmem %s1574_s3, %s992_s19  ;;  %v199_v10 = vld [vmem:[%s1234_s23] sm:$0xff]  ;;  %v200_v11 = vld [vmem:[%s1234_s23 + $0x8] sm:$0xff]  ;;  %v201_v12 = vld [vmem:[%s1234_s23 + $0x10] sm:$0xff] }
  0x4b   : > { %312 = vst.msk [vmem:[#allocation2] sm:$0xff] %vm311_vm0, %v199_v10  ;;  %313 = vst.msk [vmem:[#allocation2 + $0x8] sm:$0xff] %vm311_vm0, %v200_v11  ;;  %v202_v13 = vld [vmem:[%s1234_s23 + $0x18] sm:$0xf]  ;;  %v203_v14 = vld [vmem:[%s1234_s23 + $0x20] sm:$0xff] }
  0x4c   : > { %314 = vst.msk [vmem:[#allocation2 + $0x10] sm:$0xff] %vm311_vm0, %v201_v12  ;;  %317 = vst.msk [vmem:[#allocation2 + $0x20] sm:$0xff] %vm311_vm0, %v203_v14  ;;  %v204_v15 = vld [vmem:[%s1234_s23 + $0x28] sm:$0xff]  ;;  %v205_v16 = vld [vmem:[%s1234_s23 + $0x30] sm:$0xff] }
  0x4d   : > { %316 = vst.msk [vmem:[#allocation2 + $0x18] sm:$0xf] %vm315_vm1, %v202_v13  ;;  %v206_v17 = vld [vmem:[%s1234_s23 + $0x38] sm:$0xf]  ;;  %v207_v18 = vld [vmem:[%s1234_s23 + $0x40] sm:$0xff]  ;;  %v208_v19 = vld [vmem:[%s1234_s23 + $0x48] sm:$0xff] }
  0x4e   : > { %318 = vst.msk [vmem:[#allocation2 + $0x28] sm:$0xff] %vm311_vm0, %v204_v15  ;;  %319 = vst.msk [vmem:[#allocation2 + $0x30] sm:$0xff] %vm311_vm0, %v205_v16  ;;  %v209_v20 = vld [vmem:[%s1234_s23 + $0x50] sm:$0xff]  ;;  %v210_v21 = vld [vmem:[%s1234_s23 + $0x58] sm:$0xf] }
  0x4f   : > { %320 = vst.msk [vmem:[#allocation2 + $0x38] sm:$0xf] %vm315_vm1, %v206_v17  ;;  %v211_v22 = vld [vmem:[%s1234_s23 + $0x60] sm:$0xff]  ;;  %v212_v23 = vld [vmem:[%s1234_s23 + $0x68] sm:$0xff]  ;;  %324 = vst.msk [vmem:[#allocation2 + $0x58] sm:$0xf] %vm315_vm1, %v210_v21 }
  0x50   : > { %321 = vst.msk [vmem:[#allocation2 + $0x40] sm:$0xff] %vm311_vm0, %v207_v18  ;;  %322 = vst.msk [vmem:[#allocation2 + $0x48] sm:$0xff] %vm311_vm0, %v208_v19  ;;  %v213_v24 = vld [vmem:[%s1234_s23 + $0x70] sm:$0xff]  ;;  %v214_v25 = vld [vmem:[%s1234_s23 + $0x78] sm:$0xf] }
  0x51   : > { %323 = vst.msk [vmem:[#allocation2 + $0x50] sm:$0xff] %vm311_vm0, %v209_v20  ;;  %325 = vst.msk [vmem:[#allocation2 + $0x60] sm:$0xff] %vm311_vm0, %v211_v22  ;;  %v215_v26 = vld [vmem:[%s1234_s23 + $0x80] sm:$0xff]  ;;  %v216_v27 = vld [vmem:[%s1234_s23 + $0x88] sm:$0xff] }
  0x52   : > { %326 = vst.msk [vmem:[#allocation2 + $0x68] sm:$0xff] %vm311_vm0, %v212_v23  ;;  %327 = vst.msk [vmem:[#allocation2 + $0x70] sm:$0xff] %vm311_vm0, %v213_v24  ;;  %v217_v28 = vld [vmem:[%s1234_s23 + $0x90] sm:$0xff]  ;;  %v218_v29 = vld [vmem:[%s1234_s23 + $0x98] sm:$0xf] }
  0x53   : > { %328 = vst.msk [vmem:[#allocation2 + $0x78] sm:$0xf] %vm315_vm1, %v214_v25  ;;  %332 = vst.msk [vmem:[#allocation2 + $0x98] sm:$0xf] %vm315_vm1, %v218_v29  ;;  %v219_v30 = vld [vmem:[%s1234_s23 + $0xa0] sm:$0xff]  ;;  %v220_v31 = vld [vmem:[%s1234_s23 + $0xa8] sm:$0xff] }
  0x54   : > { %329 = vst.msk [vmem:[#allocation2 + $0x80] sm:$0xff] %vm311_vm0, %v215_v26  ;;  %330 = vst.msk [vmem:[#allocation2 + $0x88] sm:$0xff] %vm311_vm0, %v216_v27  ;;  %v221_v32 = vld [vmem:[%s1234_s23 + $0xb0] sm:$0xff]  ;;  %v222_v33 = vld [vmem:[%s1234_s23 + $0xb8] sm:$0xf] }
  0x55   : > { %331 = vst.msk [vmem:[#allocation2 + $0x90] sm:$0xff] %vm311_vm0, %v217_v28  ;;  %333 = vst.msk [vmem:[#allocation2 + $0xa0] sm:$0xff] %vm311_vm0, %v219_v30  ;;  %v223_v34 = vld [vmem:[%s1234_s23 + $0xc0] sm:$0xff]  ;;  %v224_v35 = vld [vmem:[%s1234_s23 + $0xc8] sm:$0xff] }
  0x56   : > { %334 = vst.msk [vmem:[#allocation2 + $0xa8] sm:$0xff] %vm311_vm0, %v220_v31  ;;  %335 = vst.msk [vmem:[#allocation2 + $0xb0] sm:$0xff] %vm311_vm0, %v221_v32  ;;  %v225_v36 = vld [vmem:[%s1234_s23 + $0xd0] sm:$0xff]  ;;  %v226_v37 = vld [vmem:[%s1234_s23 + $0xd8] sm:$0xf] }
  0x57   : > { %336 = vst.msk [vmem:[#allocation2 + $0xb8] sm:$0xf] %vm315_vm1, %v222_v33  ;;  %v227_v38 = vld [vmem:[%s1234_s23 + $0xe0] sm:$0xff]  ;;  %340 = vst.msk [vmem:[#allocation2 + $0xd8] sm:$0xf] %vm315_vm1, %v226_v37  ;;  %v228_v39 = vld [vmem:[%s1234_s23 + $0xe8] sm:$0xff] }
  0x58   : > { %337 = vst.msk [vmem:[#allocation2 + $0xc0] sm:$0xff] %vm311_vm0, %v223_v34  ;;  %338 = vst.msk [vmem:[#allocation2 + $0xc8] sm:$0xff] %vm311_vm0, %v224_v35  ;;  %v229_v40 = vld [vmem:[%s1234_s23 + $0xf0] sm:$0xff]  ;;  %v230_v41 = vld [vmem:[%s1234_s23 + $0xf8] sm:$0xf] }
  0x59   : > { %339 = vst.msk [vmem:[#allocation2 + $0xd0] sm:$0xff] %vm311_vm0, %v225_v36  ;;  %341 = vst.msk [vmem:[#allocation2 + $0xe0] sm:$0xff] %vm311_vm0, %v227_v38  ;;  %v231_v42 = vld [vmem:[%s1234_s23 + $0x100] sm:$0xff]  ;;  %v232_v43 = vld [vmem:[%s1234_s23 + $0x108] sm:$0xff] }
  0x5a   : > { %342 = vst.msk [vmem:[#allocation2 + $0xe8] sm:$0xff] %vm311_vm0, %v228_v39  ;;  %343 = vst.msk [vmem:[#allocation2 + $0xf0] sm:$0xff] %vm311_vm0, %v229_v40  ;;  %v233_v44 = vld [vmem:[%s1234_s23 + $0x110] sm:$0xff]  ;;  %v234_v45 = vld [vmem:[%s1234_s23 + $0x118] sm:$0xf] }
  0x5b   : > { %344 = vst.msk [vmem:[#allocation2 + $0xf8] sm:$0xf] %vm315_vm1, %v230_v41  ;;  %v235_v46 = vld [vmem:[%s1234_s23 + $0x120] sm:$0xff]  ;;  %v236_v47 = vld [vmem:[%s1234_s23 + $0x128] sm:$0xff]  ;;  %348 = vst.msk [vmem:[#allocation2 + $0x118] sm:$0xf] %vm315_vm1, %v234_v45 }
  0x5c   : > { %345 = vst.msk [vmem:[#allocation2 + $0x100] sm:$0xff] %vm311_vm0, %v231_v42  ;;  %346 = vst.msk [vmem:[#allocation2 + $0x108] sm:$0xff] %vm311_vm0, %v232_v43  ;;  %v237_v48 = vld [vmem:[%s1234_s23 + $0x130] sm:$0xff]  ;;  %v238_v49 = vld [vmem:[%s1234_s23 + $0x138] sm:$0xf] }
  0x5d   : > { %347 = vst.msk [vmem:[#allocation2 + $0x110] sm:$0xff] %vm311_vm0, %v233_v44  ;;  %349 = vst.msk [vmem:[#allocation2 + $0x120] sm:$0xff] %vm311_vm0, %v235_v46  ;;  %v239_v50 = vld [vmem:[%s1234_s23 + $0x140] sm:$0xff]  ;;  %v240_v51 = vld [vmem:[%s1234_s23 + $0x148] sm:$0xff] }
  0x5e   : > { %350 = vst.msk [vmem:[#allocation2 + $0x128] sm:$0xff] %vm311_vm0, %v236_v47  ;;  %351 = vst.msk [vmem:[#allocation2 + $0x130] sm:$0xff] %vm311_vm0, %v237_v48  ;;  %v241_v52 = vld [vmem:[%s1234_s23 + $0x150] sm:$0xff]  ;;  %v242_v53 = vld [vmem:[%s1234_s23 + $0x158] sm:$0xf] }
  0x5f   : > { %352 = vst.msk [vmem:[#allocation2 + $0x138] sm:$0xf] %vm315_vm1, %v238_v49  ;;  %356 = vst.msk [vmem:[#allocation2 + $0x158] sm:$0xf] %vm315_vm1, %v242_v53  ;;  %v243_v54 = vld [vmem:[%s1234_s23 + $0x160] sm:$0xff]  ;;  %v244_v55 = vld [vmem:[%s1234_s23 + $0x168] sm:$0xff] }
  0x60   : > { %353 = vst.msk [vmem:[#allocation2 + $0x140] sm:$0xff] %vm311_vm0, %v239_v50  ;;  %354 = vst.msk [vmem:[#allocation2 + $0x148] sm:$0xff] %vm311_vm0, %v240_v51  ;;  %v245_v56 = vld [vmem:[%s1234_s23 + $0x170] sm:$0xff]  ;;  %v246_v57 = vld [vmem:[%s1234_s23 + $0x178] sm:$0xf] }
  0x61   : > { %355 = vst.msk [vmem:[#allocation2 + $0x150] sm:$0xff] %vm311_vm0, %v241_v52  ;;  %357 = vst.msk [vmem:[#allocation2 + $0x160] sm:$0xff] %vm311_vm0, %v243_v54  ;;  %v247_v58 = vld [vmem:[%s1234_s23 + $0x180] sm:$0xff]  ;;  %v248_v59 = vld [vmem:[%s1234_s23 + $0x188] sm:$0xff] }
  0x62   : > { %358 = vst.msk [vmem:[#allocation2 + $0x168] sm:$0xff] %vm311_vm0, %v244_v55  ;;  %359 = vst.msk [vmem:[#allocation2 + $0x170] sm:$0xff] %vm311_vm0, %v245_v56  ;;  %v249_v60 = vld [vmem:[%s1234_s23 + $0x190] sm:$0xff]  ;;  %v250_v61 = vld [vmem:[%s1234_s23 + $0x198] sm:$0xf] }
  0x63   : > { %360 = vst.msk [vmem:[#allocation2 + $0x178] sm:$0xf] %vm315_vm1, %v246_v57  ;;  %v251_v62 = vld [vmem:[%s1234_s23 + $0x1a0] sm:$0xff]  ;;  %364 = vst.msk [vmem:[#allocation2 + $0x198] sm:$0xf] %vm315_vm1, %v250_v61  ;;  %v252_v63 = vld [vmem:[%s1234_s23 + $0x1a8] sm:$0xff] }
  0x64   : > { %361 = vst.msk [vmem:[#allocation2 + $0x180] sm:$0xff] %vm311_vm0, %v247_v58  ;;  %362 = vst.msk [vmem:[#allocation2 + $0x188] sm:$0xff] %vm311_vm0, %v248_v59  ;;  %v253_v10 = vld [vmem:[%s1234_s23 + $0x1b0] sm:$0xff]  ;;  %v254_v11 = vld [vmem:[%s1234_s23 + $0x1b8] sm:$0xf] }
  0x65   : > { %363 = vst.msk [vmem:[#allocation2 + $0x190] sm:$0xff] %vm311_vm0, %v249_v60  ;;  %365 = vst.msk [vmem:[#allocation2 + $0x1a0] sm:$0xff] %vm311_vm0, %v251_v62  ;;  %v255_v12 = vld [vmem:[%s1234_s23 + $0x1c0] sm:$0xff]  ;;  %v256_v13 = vld [vmem:[%s1234_s23 + $0x1c8] sm:$0xff] }
  0x66   : > { %366 = vst.msk [vmem:[#allocation2 + $0x1a8] sm:$0xff] %vm311_vm0, %v252_v63  ;;  %367 = vst.msk [vmem:[#allocation2 + $0x1b0] sm:$0xff] %vm311_vm0, %v253_v10  ;;  %v257_v14 = vld [vmem:[%s1234_s23 + $0x1d0] sm:$0xff]  ;;  %v258_v15 = vld [vmem:[%s1234_s23 + $0x1d8] sm:$0xf] }
  0x67   : > { %368 = vst.msk [vmem:[#allocation2 + $0x1b8] sm:$0xf] %vm315_vm1, %v254_v11  ;;  %v259_v16 = vld [vmem:[%s1234_s23 + $0x1e0] sm:$0xff]  ;;  %v260_v17 = vld [vmem:[%s1234_s23 + $0x1e8] sm:$0xff]  ;;  %372 = vst.msk [vmem:[#allocation2 + $0x1d8] sm:$0xf] %vm315_vm1, %v258_v15 }
  0x68   : > { %369 = vst.msk [vmem:[#allocation2 + $0x1c0] sm:$0xff] %vm311_vm0, %v255_v12  ;;  %370 = vst.msk [vmem:[#allocation2 + $0x1c8] sm:$0xff] %vm311_vm0, %v256_v13  ;;  %v261_v18 = vld [vmem:[%s1234_s23 + $0x1f0] sm:$0xff]  ;;  %v262_v19 = vld [vmem:[%s1234_s23 + $0x1f8] sm:$0xf] }
  0x69   : > { %371 = vst.msk [vmem:[#allocation2 + $0x1d0] sm:$0xff] %vm311_vm0, %v257_v14  ;;  %373 = vst.msk [vmem:[#allocation2 + $0x1e0] sm:$0xff] %vm311_vm0, %v259_v16  ;;  %v263_v20 = vld [vmem:[%s1234_s23 + $0x200] sm:$0xff]  ;;  %v264_v21 = vld [vmem:[%s1234_s23 + $0x208] sm:$0xff] }
  0x6a   : > { %374 = vst.msk [vmem:[#allocation2 + $0x1e8] sm:$0xff] %vm311_vm0, %v260_v17  ;;  %375 = vst.msk [vmem:[#allocation2 + $0x1f0] sm:$0xff] %vm311_vm0, %v261_v18  ;;  %v265_v22 = vld [vmem:[%s1234_s23 + $0x210] sm:$0xff]  ;;  %v266_v23 = vld [vmem:[%s1234_s23 + $0x218] sm:$0xf] }
  0x6b   : > { %376 = vst.msk [vmem:[#allocation2 + $0x1f8] sm:$0xf] %vm315_vm1, %v262_v19  ;;  %380 = vst.msk [vmem:[#allocation2 + $0x218] sm:$0xf] %vm315_vm1, %v266_v23  ;;  %v267_v24 = vld [vmem:[%s1234_s23 + $0x220] sm:$0xff]  ;;  %v268_v25 = vld [vmem:[%s1234_s23 + $0x228] sm:$0xff] }
  0x6c   : > { %377 = vst.msk [vmem:[#allocation2 + $0x200] sm:$0xff] %vm311_vm0, %v263_v20  ;;  %378 = vst.msk [vmem:[#allocation2 + $0x208] sm:$0xff] %vm311_vm0, %v264_v21  ;;  %v269_v26 = vld [vmem:[%s1234_s23 + $0x230] sm:$0xff]  ;;  %v270_v27 = vld [vmem:[%s1234_s23 + $0x238] sm:$0xf] }
  0x6d   : > { %379 = vst.msk [vmem:[#allocation2 + $0x210] sm:$0xff] %vm311_vm0, %v265_v22  ;;  %381 = vst.msk [vmem:[#allocation2 + $0x220] sm:$0xff] %vm311_vm0, %v267_v24  ;;  %v271_v28 = vld [vmem:[%s1234_s23 + $0x240] sm:$0xff]  ;;  %v272_v29 = vld [vmem:[%s1234_s23 + $0x248] sm:$0xff] }
  0x6e   : > { %382 = vst.msk [vmem:[#allocation2 + $0x228] sm:$0xff] %vm311_vm0, %v268_v25  ;;  %383 = vst.msk [vmem:[#allocation2 + $0x230] sm:$0xff] %vm311_vm0, %v269_v26  ;;  %v273_v30 = vld [vmem:[%s1234_s23 + $0x250] sm:$0xff]  ;;  %v274_v31 = vld [vmem:[%s1234_s23 + $0x258] sm:$0xf] }
  0x6f   : > { %384 = vst.msk [vmem:[#allocation2 + $0x238] sm:$0xf] %vm315_vm1, %v270_v27  ;;  %v275_v32 = vld [vmem:[%s1234_s23 + $0x260] sm:$0xff]  ;;  %388 = vst.msk [vmem:[#allocation2 + $0x258] sm:$0xf] %vm315_vm1, %v274_v31  ;;  %v276_v33 = vld [vmem:[%s1234_s23 + $0x268] sm:$0xff] }
  0x70   : > { %385 = vst.msk [vmem:[#allocation2 + $0x240] sm:$0xff] %vm311_vm0, %v271_v28  ;;  %386 = vst.msk [vmem:[#allocation2 + $0x248] sm:$0xff] %vm311_vm0, %v272_v29  ;;  %v277_v34 = vld [vmem:[%s1234_s23 + $0x270] sm:$0xff]  ;;  %v278_v35 = vld [vmem:[%s1234_s23 + $0x278] sm:$0xf] }
  0x71   : > { %387 = vst.msk [vmem:[#allocation2 + $0x250] sm:$0xff] %vm311_vm0, %v273_v30  ;;  %389 = vst.msk [vmem:[#allocation2 + $0x260] sm:$0xff] %vm311_vm0, %v275_v32  ;;  %v279_v36 = vld [vmem:[%s1234_s23 + $0x280] sm:$0xff]  ;;  %v280_v37 = vld [vmem:[%s1234_s23 + $0x288] sm:$0xff] }
  0x72   : > { %390 = vst.msk [vmem:[#allocation2 + $0x268] sm:$0xff] %vm311_vm0, %v276_v33  ;;  %391 = vst.msk [vmem:[#allocation2 + $0x270] sm:$0xff] %vm311_vm0, %v277_v34  ;;  %v281_v38 = vld [vmem:[%s1234_s23 + $0x290] sm:$0xff]  ;;  %v282_v39 = vld [vmem:[%s1234_s23 + $0x298] sm:$0xf] }
  0x73   : > { %392 = vst.msk [vmem:[#allocation2 + $0x278] sm:$0xf] %vm315_vm1, %v278_v35  ;;  %v283_v40 = vld [vmem:[%s1234_s23 + $0x2a0] sm:$0xff]  ;;  %v284_v41 = vld [vmem:[%s1234_s23 + $0x2a8] sm:$0xff]  ;;  %396 = vst.msk [vmem:[#allocation2 + $0x298] sm:$0xf] %vm315_vm1, %v282_v39 }
  0x74   : > { %393 = vst.msk [vmem:[#allocation2 + $0x280] sm:$0xff] %vm311_vm0, %v279_v36  ;;  %394 = vst.msk [vmem:[#allocation2 + $0x288] sm:$0xff] %vm311_vm0, %v280_v37  ;;  %v285_v42 = vld [vmem:[%s1234_s23 + $0x2b0] sm:$0xff]  ;;  %v286_v43 = vld [vmem:[%s1234_s23 + $0x2b8] sm:$0xf] }
  0x75   : > { %395 = vst.msk [vmem:[#allocation2 + $0x290] sm:$0xff] %vm311_vm0, %v281_v38  ;;  %397 = vst.msk [vmem:[#allocation2 + $0x2a0] sm:$0xff] %vm311_vm0, %v283_v40  ;;  %v287_v44 = vld [vmem:[%s1234_s23 + $0x2c0] sm:$0xff]  ;;  %v288_v45 = vld [vmem:[%s1234_s23 + $0x2c8] sm:$0xff] }
  0x76   : > { %398 = vst.msk [vmem:[#allocation2 + $0x2a8] sm:$0xff] %vm311_vm0, %v284_v41  ;;  %399 = vst.msk [vmem:[#allocation2 + $0x2b0] sm:$0xff] %vm311_vm0, %v285_v42  ;;  %v289_v46 = vld [vmem:[%s1234_s23 + $0x2d0] sm:$0xff]  ;;  %v290_v47 = vld [vmem:[%s1234_s23 + $0x2d8] sm:$0xf] }
  0x77   : > { %400 = vst.msk [vmem:[#allocation2 + $0x2b8] sm:$0xf] %vm315_vm1, %v286_v43  ;;  %404 = vst.msk [vmem:[#allocation2 + $0x2d8] sm:$0xf] %vm315_vm1, %v290_v47  ;;  %v291_v48 = vld [vmem:[%s1234_s23 + $0x2e0] sm:$0xff]  ;;  %v292_v49 = vld [vmem:[%s1234_s23 + $0x2e8] sm:$0xff] }
  0x78   : > { %401 = vst.msk [vmem:[#allocation2 + $0x2c0] sm:$0xff] %vm311_vm0, %v287_v44  ;;  %402 = vst.msk [vmem:[#allocation2 + $0x2c8] sm:$0xff] %vm311_vm0, %v288_v45  ;;  %v293_v50 = vld [vmem:[%s1234_s23 + $0x2f0] sm:$0xff]  ;;  %v294_v51 = vld [vmem:[%s1234_s23 + $0x2f8] sm:$0xf] }
  0x79   : > { %403 = vst.msk [vmem:[#allocation2 + $0x2d0] sm:$0xff] %vm311_vm0, %v289_v46  ;;  %405 = vst.msk [vmem:[#allocation2 + $0x2e0] sm:$0xff] %vm311_vm0, %v291_v48  ;;  %v295_v52 = vld [vmem:[%s1234_s23 + $0x300] sm:$0xff]  ;;  %v296_v53 = vld [vmem:[%s1234_s23 + $0x308] sm:$0xff] }
  0x7a   : > { %406 = vst.msk [vmem:[#allocation2 + $0x2e8] sm:$0xff] %vm311_vm0, %v292_v49  ;;  %407 = vst.msk [vmem:[#allocation2 + $0x2f0] sm:$0xff] %vm311_vm0, %v293_v50  ;;  %v297_v54 = vld [vmem:[%s1234_s23 + $0x310] sm:$0xff]  ;;  %v298_v55 = vld [vmem:[%s1234_s23 + $0x318] sm:$0xf] }
  0x7b   : > { %408 = vst.msk [vmem:[#allocation2 + $0x2f8] sm:$0xf] %vm315_vm1, %v294_v51  ;;  %v299_v56 = vld [vmem:[%s1234_s23 + $0x320] sm:$0xff]  ;;  %412 = vst.msk [vmem:[#allocation2 + $0x318] sm:$0xf] %vm315_vm1, %v298_v55  ;;  %v300_v57 = vld [vmem:[%s1234_s23 + $0x328] sm:$0xff] }
  0x7c   : > { %409 = vst.msk [vmem:[#allocation2 + $0x300] sm:$0xff] %vm311_vm0, %v295_v52  ;;  %410 = vst.msk [vmem:[#allocation2 + $0x308] sm:$0xff] %vm311_vm0, %v296_v53  ;;  %v301_v58 = vld [vmem:[%s1234_s23 + $0x330] sm:$0xff]  ;;  %v302_v59 = vld [vmem:[%s1234_s23 + $0x338] sm:$0xf] }
  0x7d   : > { %411 = vst.msk [vmem:[#allocation2 + $0x310] sm:$0xff] %vm311_vm0, %v297_v54  ;;  %413 = vst.msk [vmem:[#allocation2 + $0x320] sm:$0xff] %vm311_vm0, %v299_v56  ;;  %v303_v60 = vld [vmem:[%s1234_s23 + $0x340] sm:$0xff]  ;;  %v304_v61 = vld [vmem:[%s1234_s23 + $0x348] sm:$0xff] }
  0x7e   : > { %414 = vst.msk [vmem:[#allocation2 + $0x328] sm:$0xff] %vm311_vm0, %v300_v57  ;;  %415 = vst.msk [vmem:[#allocation2 + $0x330] sm:$0xff] %vm311_vm0, %v301_v58  ;;  %v305_v62 = vld [vmem:[%s1234_s23 + $0x350] sm:$0xff]  ;;  %v306_v63 = vld [vmem:[%s1234_s23 + $0x358] sm:$0xf] }
  0x7f   : > { %416 = vst.msk [vmem:[#allocation2 + $0x338] sm:$0xf] %vm315_vm1, %v302_v59  ;;  %v307_v10 = vld [vmem:[%s1234_s23 + $0x360] sm:$0xff]  ;;  %v308_v11 = vld [vmem:[%s1234_s23 + $0x368] sm:$0xff]  ;;  %420 = vst.msk [vmem:[#allocation2 + $0x358] sm:$0xf] %vm315_vm1, %v306_v63 }
  0x80   : > { %417 = vst.msk [vmem:[#allocation2 + $0x340] sm:$0xff] %vm311_vm0, %v303_v60  ;;  %418 = vst.msk [vmem:[#allocation2 + $0x348] sm:$0xff] %vm311_vm0, %v304_v61  ;;  %v309_v12 = vld [vmem:[%s1234_s23 + $0x370] sm:$0xff]  ;;  %v310_v13 = vld [vmem:[%s1234_s23 + $0x378] sm:$0xf] }
  0x81   : > { %419 = vst.msk [vmem:[#allocation2 + $0x350] sm:$0xff] %vm311_vm0, %v305_v62  ;;  %421 = vst.msk [vmem:[#allocation2 + $0x360] sm:$0xff] %vm311_vm0, %v307_v10 }
  0x82   : > { %422 = vst.msk [vmem:[#allocation2 + $0x368] sm:$0xff] %vm311_vm0, %v308_v11  ;;  %423 = vst.msk [vmem:[#allocation2 + $0x370] sm:$0xff] %vm311_vm0, %v309_v12 }
  0x83   : > { %424 = vst.msk [vmem:[#allocation2 + $0x378] sm:$0xf] %vm315_vm1, %v310_v13 }
  0x84 LB: >> { %v1119_v14 = vmov 0   ;;  %s941_s27 = sshll.u32 %s1113_s26, 5  ;;  %s990_s29 = sshll.u32 %s1113_s26, 4  ;;  %vm832_vm2 = vcmask 125952   ;;  %vm836_vm3 = vcmask 122880   ;;  %s1113_s26 = sphi %s1479_s26, %s448_s26  }
  0x85   : >> { %1034 = vset.pattern.permute.xlu1 %v1119_v14  ;;  %1033 = vset.pattern.permute.xlu0 %v1119_v14  ;;  %s1485_s28 = scalar_lea.vmem [#allocation2], %s941_s27  ;;  %s831_s30 = scalar_lea.vmem %s1239_s13, %s990_s29 }
  0x86   : >> { %s448_s26 = sadd.s32 1, %s1113_s26  }
  0x87   : >> { %p445_p5 = scmp.ge.s32.totalorder %s448_s26, 26  }
  0x8a   : >> { %v453_v15 = vld [vmem:[%s1485_s28 + $0x10] sm:$0xff]  ;;  %v451_v16 = vld [vmem:[%s1485_s28] sm:$0xff]  ;;  %v454_v17 = vld [vmem:[%s1485_s28 + $0x18] sm:$0x3] }
  0x8b   : >> { %467 = vperm.xlu1 %1034, %v453_v15   ;;  %457 = vperm.xlu0 %1033, %v451_v16   ;;  %v452_v18 = vld [vmem:[%s1485_s28 + $0x8] sm:$0xff]  ;;  %v492_v21 = vld [vmem:[%s1485_s28 + $0x19] sm:$0x3]  ;;  %v491_v22 = vld [vmem:[%s1485_s28 + $0x11] sm:$0xff] }
  0x8c   : >> { %v490_v19 = vld [vmem:[%s1485_s28 + $0x9] sm:$0xff]  ;;  %v489_v20 = vld [vmem:[%s1485_s28 + $0x1] sm:$0xff]  ;;  %v530_v25 = vld [vmem:[%s1485_s28 + $0x1a] sm:$0x3] }
  0x8d   : >> { %v528_v23 = vld [vmem:[%s1485_s28 + $0xa] sm:$0xff]  ;;  %v527_v24 = vld [vmem:[%s1485_s28 + $0x2] sm:$0xff]  ;;  %v529_v26 = vld [vmem:[%s1485_s28 + $0x12] sm:$0xff] }
  0x8e   : >> { %v947_v27 = vld [vmem:[%s1485_s28 + $0x28] sm:$0xff]  ;;  %v946_v28 = vld [vmem:[%s1485_s28 + $0x20] sm:$0xff]  ;;  %v949_v29 = vld [vmem:[%s1485_s28 + $0x38] sm:$0x3] }
  0x8f   : >> { %472 = vperm.xlu1 %1034, %v454_v17   ;;  %462 = vperm.xlu0 %1033, %v452_v18   ;;  %v948_v30 = vld [vmem:[%s1485_s28 + $0x30] sm:$0xff]  ;;  %v951_v32 = vld [vmem:[%s1485_s28 + $0x21] sm:$0xff]  ;;  %v954_v33 = vld [vmem:[%s1485_s28 + $0x39] sm:$0x3] }
  0x90   : >> { %v952_v31 = vld [vmem:[%s1485_s28 + $0x29] sm:$0xff]  ;;  %v953_v34 = vld [vmem:[%s1485_s28 + $0x31] sm:$0xff]  ;;  %v959_v37 = vld [vmem:[%s1485_s28 + $0x3a] sm:$0x3] }
  0x91   : >> { %v957_v35 = vld [vmem:[%s1485_s28 + $0x2a] sm:$0xff]  ;;  %v956_v36 = vld [vmem:[%s1485_s28 + $0x22] sm:$0xff]  ;;  %v958_v38 = vld [vmem:[%s1485_s28 + $0x32] sm:$0xff] }
  0x92   : >> { %v963_v39 = vld [vmem:[%s1485_s28 + $0x48] sm:$0xff]  ;;  %v962_v40 = vld [vmem:[%s1485_s28 + $0x40] sm:$0xff]  ;;  %v965_v41 = vld [vmem:[%s1485_s28 + $0x58] sm:$0x3] }
  0x93   : >> { %500 = vperm.xlu1 %1034, %v490_v19   ;;  %495 = vperm.xlu0 %1033, %v489_v20   ;;  %v964_v42 = vld [vmem:[%s1485_s28 + $0x50] sm:$0xff]  ;;  %v967_v44 = vld [vmem:[%s1485_s28 + $0x41] sm:$0xff]  ;;  %v970_v45 = vld [vmem:[%s1485_s28 + $0x59] sm:$0x3] }
  0x94   : >> { %v968_v43 = vld [vmem:[%s1485_s28 + $0x49] sm:$0xff]  ;;  %v969_v46 = vld [vmem:[%s1485_s28 + $0x51] sm:$0xff]  ;;  %v975_v49 = vld [vmem:[%s1485_s28 + $0x5a] sm:$0x3] }
  0x95   : >> { %v973_v47 = vld [vmem:[%s1485_s28 + $0x4a] sm:$0xff]  ;;  %v972_v48 = vld [vmem:[%s1485_s28 + $0x42] sm:$0xff]  ;;  %v974_v50 = vld [vmem:[%s1485_s28 + $0x52] sm:$0xff] }
  0x97   : >> { %510 = vperm.xlu1 %1034, %v492_v21   ;;  %505 = vperm.xlu0 %1033, %v491_v22  }
  0x9b   : >> { %538 = vperm.xlu1 %1034, %v528_v23   ;;  %533 = vperm.xlu0 %1033, %v527_v24  }
  0x9f   : >> { %548 = vperm.xlu1 %1034, %v530_v25   ;;  %543 = vperm.xlu0 %1033, %v529_v26  }
  0xa3   : >> { %579 = vperm.xlu1 %1034, %v947_v27   ;;  %574 = vperm.xlu0 %1033, %v946_v28  }
  0xa7   : >> { %589 = vperm.xlu1 %1034, %v949_v29   ;;  %584 = vperm.xlu0 %1033, %v948_v30  }
  0xab   : >> { %617 = vperm.xlu1 %1034, %v952_v31   ;;  %612 = vperm.xlu0 %1033, %v951_v32  }
  0xaf   : >> { %627 = vperm.xlu1 %1034, %v954_v33   ;;  %622 = vperm.xlu0 %1033, %v953_v34  }
  0xb3   : >> { %655 = vperm.xlu1 %1034, %v957_v35   ;;  %650 = vperm.xlu0 %1033, %v956_v36  }
  0xb7   : >> { %665 = vperm.xlu1 %1034, %v959_v37   ;;  %660 = vperm.xlu0 %1033, %v958_v38  }
  0xbb   : >> { %696 = vperm.xlu1 %1034, %v963_v39   ;;  %691 = vperm.xlu0 %1033, %v962_v40  }
  0xbf   : >> { %706 = vperm.xlu1 %1034, %v965_v41   ;;  %701 = vperm.xlu0 %1033, %v964_v42  }
  0xc3   : >> { %734 = vperm.xlu1 %1034, %v968_v43   ;;  %729 = vperm.xlu0 %1033, %v967_v44  }
  0xc7   : >> { %744 = vperm.xlu1 %1034, %v970_v45   ;;  %739 = vperm.xlu0 %1033, %v969_v46  }
  0xcb   : >> { %772 = vperm.xlu1 %1034, %v973_v47   ;;  %767 = vperm.xlu0 %1033, %v972_v48  }
  0xcf   : >> { %782 = vperm.xlu1 %1034, %v975_v49   ;;  %777 = vperm.xlu0 %1033, %v974_v50  }
 0x10a   : >> { %v468_v51 = vpop.permute.xlu1 %467  ;;  %v458_v52 = vpop.permute.xlu0 %457 }
 0x10b   : >> { %v481_v25 = vmul.f32 %v1227_v1, %v458_v52  ;;  %v483_v37 = vmul.f32 %v1227_v1, %v468_v51 }
 0x10e   : >> { %v473_v53 = vpop.permute.xlu1 %472  ;;  %v463_v54 = vpop.permute.xlu0 %462 }
 0x10f   : >> { %v482_v26 = vmul.f32 %v1227_v1, %v463_v54  ;;  %v484_v38 = vmul.f32 %v1227_v1, %v473_v53 }
 0x112   : >> { %v501_v55 = vpop.permute.xlu1 %500  ;;  %v496_v56 = vpop.permute.xlu0 %495 }
 0x113   : >> { %v520_v23 = vmul.f32 %v1229_v2, %v501_v55  ;;  %v519_v24 = vmul.f32 %v1229_v2, %v496_v56 }
 0x115   : >> { %v524_v33 = vadd.f32 %v520_v23, %v482_v26  ;;  %v523_v34 = vadd.f32 %v519_v24, %v481_v25 }
 0x116   : >> { %v511_v57 = vpop.permute.xlu1 %510  ;;  %v506_v58 = vpop.permute.xlu0 %505 }
 0x117   : >> { %v522_v29 = vmul.f32 %v1229_v2, %v511_v57  ;;  %v521_v30 = vmul.f32 %v1229_v2, %v506_v58 }
 0x119   : >> { %v526_v45 = vadd.f32 %v522_v29, %v484_v38  ;;  %v525_v46 = vadd.f32 %v521_v30, %v483_v37 }
 0x11a   : >> { %v539_v59 = vpop.permute.xlu1 %538  ;;  %v534_v60 = vpop.permute.xlu0 %533 }
 0x11b   : >> { %v558_v27 = vmul.f32 %v1241_v3, %v539_v59  ;;  %v557_v28 = vmul.f32 %v1241_v3, %v534_v60 }
 0x11d   : >> { %v562_v41 = vadd.f32 %v558_v27, %v524_v33  ;;  %v561_v42 = vadd.f32 %v557_v28, %v523_v34 }
 0x11e   : >> { %v549_v61 = vpop.permute.xlu1 %548  ;;  %v544_v62 = vpop.permute.xlu0 %543 }
 0x11f   : >> { %v560_v39 = vmul.f32 %v1241_v3, %v549_v61  ;;  %v559_v40 = vmul.f32 %v1241_v3, %v544_v62 }
 0x121   : >> { %v564_v55 = vadd.f32 %v560_v39, %v526_v45  ;;  %v563_v56 = vadd.f32 %v559_v40, %v525_v46 }
 0x122   : >> { %v580_v63 = vpop.permute.xlu1 %579  ;;  %v575_v10 = vpop.permute.xlu0 %574 }
 0x123   : >> { %v599_v35 = vmul.f32 %v1243_v4, %v580_v63  ;;  %v598_v36 = vmul.f32 %v1243_v4, %v575_v10 }
 0x125   : >> { %v603_v51 = vadd.f32 %v599_v35, %v562_v41  ;;  %v602_v52 = vadd.f32 %v598_v36, %v561_v42 }
 0x126   : >> { %v590_v11 = vpop.permute.xlu1 %589  ;;  %v585_v12 = vpop.permute.xlu0 %584 }
 0x127   : >> { %v601_v47 = vmul.f32 %v1243_v4, %v590_v11  ;;  %v600_v48 = vmul.f32 %v1243_v4, %v585_v12 }
 0x129   : >> { %v605_v63 = vadd.f32 %v601_v47, %v564_v55  ;;  %v604_v10 = vadd.f32 %v600_v48, %v563_v56 }
 0x12a   : >> { %v618_v13 = vpop.permute.xlu1 %617  ;;  %v613_v14 = vpop.permute.xlu0 %612 }
 0x12b   : >> { %v637_v43 = vmul.f32 %v1245_v5, %v618_v13  ;;  %v636_v44 = vmul.f32 %v1245_v5, %v613_v14 }
 0x12d   : >> { %v641_v59 = vadd.f32 %v637_v43, %v603_v51  ;;  %v640_v60 = vadd.f32 %v636_v44, %v602_v52 }
 0x12e   : >> { %v628_v15 = vpop.permute.xlu1 %627  ;;  %v623_v16 = vpop.permute.xlu0 %622 }
 0x12f   : >> { %v639_v57 = vmul.f32 %v1245_v5, %v628_v15  ;;  %v638_v58 = vmul.f32 %v1245_v5, %v623_v16 }
 0x131   : >> { %v643_v23 = vadd.f32 %v639_v57, %v605_v63  ;;  %v642_v24 = vadd.f32 %v638_v58, %v604_v10 }
 0x132   : >> { %v656_v17 = vpop.permute.xlu1 %655  ;;  %v651_v18 = vpop.permute.xlu0 %650 }
 0x133   : >> { %v675_v53 = vmul.f32 %v1247_v6, %v656_v17  ;;  %v674_v54 = vmul.f32 %v1247_v6, %v651_v18 }
 0x135   : >> { %v679_v17 = vadd.f32 %v675_v53, %v641_v59  ;;  %v678_v18 = vadd.f32 %v674_v54, %v640_v60 }
 0x136   : >> { %v666_v19 = vpop.permute.xlu1 %665  ;;  %v661_v20 = vpop.permute.xlu0 %660 }
 0x137   : >> { %v677_v11 = vmul.f32 %v1247_v6, %v666_v19  ;;  %v676_v12 = vmul.f32 %v1247_v6, %v661_v20 }
 0x139   : >> { %v681_v27 = vadd.f32 %v677_v11, %v643_v23  ;;  %v680_v19 = vadd.f32 %v676_v12, %v642_v24 }
 0x13a   : >> { %v697_v21 = vpop.permute.xlu1 %696  ;;  %v692_v22 = vpop.permute.xlu0 %691 }
 0x13b   : >> { %v716_v61 = vmul.f32 %v1249_v7, %v697_v21  ;;  %v715_v62 = vmul.f32 %v1249_v7, %v692_v22 }
 0x13d   : >> { %v720_v25 = vadd.f32 %v716_v61, %v679_v17  ;;  %v719_v26 = vadd.f32 %v715_v62, %v678_v18 }
 0x13e   : >> { %v707_v31 = vpop.permute.xlu1 %706  ;;  %v702_v32 = vpop.permute.xlu0 %701 }
 0x13f   : >> { %v718_v21 = vmul.f32 %v1249_v7, %v707_v31  ;;  %v717_v22 = vmul.f32 %v1249_v7, %v702_v32 }
 0x141   : >> { %v722_v31 = vadd.f32 %v718_v21, %v681_v27  ;;  %v721_v37 = vadd.f32 %v717_v22, %v680_v19 }
 0x142   : >> { %v735_v49 = vpop.permute.xlu1 %734  ;;  %v730_v50 = vpop.permute.xlu0 %729 }
 0x143   : >> { %v754_v15 = vmul.f32 %v1251_v8, %v735_v49  ;;  %v753_v16 = vmul.f32 %v1251_v8, %v730_v50 }
 0x145   : >> { %v758_v33 = vadd.f32 %v754_v15, %v720_v25  ;;  %v757_v34 = vadd.f32 %v753_v16, %v719_v26 }
 0x146   : >> { %v745_v13 = vpop.permute.xlu1 %744  ;;  %v740_v14 = vpop.permute.xlu0 %739 }
 0x147   : >> { %v756_v20 = vmul.f32 %v1251_v8, %v745_v13  ;;  %v755_v28 = vmul.f32 %v1251_v8, %v740_v14 }
 0x149   : >> { %v760_v39 = vadd.f32 %v756_v20, %v722_v31  ;;  %v759_v40 = vadd.f32 %v755_v28, %v721_v37 }
 0x14a   : >> { %v773_v29 = vpop.permute.xlu1 %772  ;;  %v768_v30 = vpop.permute.xlu0 %767 }
 0x14b   : >> { %v792_v35 = vmul.f32 %v1253_v9, %v773_v29  ;;  %v791_v36 = vmul.f32 %v1253_v9, %v768_v30 }
 0x14d   : >> { %v796_v32 = vadd.f32 %v792_v35, %v758_v33  ;;  %v795_v38 = vadd.f32 %v791_v36, %v757_v34 }
 0x14e   : >> { %v783_v41 = vpop.permute.xlu1 %782  ;;  %v778_v42 = vpop.permute.xlu0 %777 }
 0x14f   : >> { %v806_v43 = vadd.f32 %v1225_v0, %v796_v32  ;;  %v805_v44 = vadd.f32 %v1225_v0, %v795_v38  ;;  %v794_v45 = vmul.f32 %v1253_v9, %v783_v41  ;;  %v793_v46 = vmul.f32 %v1253_v9, %v778_v42 }
 0x151   : >> { %v810_v47 = vmax.f32 %v806_v43, 0.0  ;;  %v809_v48 = vmax.f32 %v805_v44, 0.0  ;;  %v798_v49 = vadd.f32 %v794_v45, %v760_v39  ;;  %v797_v50 = vadd.f32 %v793_v46, %v759_v40 }
 0x153   : >> { %v987_v51 = vpack.c.bf16 %v810_v47, %v810_v47  ;;  %v986_v52 = vpack.c.bf16 %v809_v48, %v809_v48  ;;  %v808_v53 = vadd.f32 %v1225_v0, %v798_v49  ;;  %v807_v54 = vadd.f32 %v1225_v0, %v797_v50 }
 0x154   : > { %447 = sbr.rel (!%p445_p5) target bundleno = 132 (0x84), region = 90 }
 0x155   : >> { %834 = vst.msk [vmem:[%s831_s30 + $0x4] sm:$0xf] %vm832_vm2, %v987_v51  ;;  %833 = vst.msk [vmem:[%s831_s30] sm:$0xf] %vm832_vm2, %v986_v52  ;;  %v812_v55 = vmax.f32 %v808_v53, 0.0  ;;  %v811_v56 = vmax.f32 %v807_v54, 0.0 }
 0x157   : >> { %v989_v57 = vpack.c.bf16 %v812_v55, %v812_v55  ;;  %v988_v58 = vpack.c.bf16 %v811_v56, %v811_v56 }
 0x159   : >> { %837 = vst.msk [vmem:[%s831_s30 + $0xc] sm:$0x1] %vm836_vm3, %v989_v57 }
 0x15a   : >> { %835 = vst.msk [vmem:[%s831_s30 + $0x8] sm:$0xf] %vm832_vm2, %v988_v58 }
 0x15b PF: > { %s15_s12 = sadd.s32 1, %s1109_s12  }
 0x15c   : > { %p12_p10 = scmp.ge.s32.totalorder %s15_s12, 4  }
 0x15e   :  { %14 = sbr.rel (!%p12_p10) target bundleno = 2 (0x2), region = 101 }
 0x165   :  { %859 = vsyncpa [#allocation4], 1 }
 0x166   :  { %861 = vsyncpa [#allocation4 + $0x1], 1 }
 0x167   :  { %862 = vsyncpa [#allocation6], 1 }

// kernel: conv1_forward.8
= control target key start
LH: loop header
LB: loop body
LE: loop exit
PB: predicated region body
PF: predicated region fallthrough
CT: control target
= control target key end

     0   :  { %8 = vsyncpa [#allocation5], 0  ;;  %s3727_s0 = inlined_call_operand.vmem [shape: bf16[2,26,26,16], index: 0, kind: input, shape index: {}]   ;;  %s3728_s1 = inlined_call_operand.hbm [shape: f32[9,16,32], index: 1, kind: input, shape index: {}]   ;;  %s3729_s2 = inlined_call_operand.hbm [shape: f32[1,32], index: 2, kind: input, shape index: {}]   ;;  %s3730_s3 = inlined_call_operand.vmem [shape: bf16[2,12,12,32], index: 3, kind: output, shape index: {}]  }
   0x1   :  { %9 = vsyncpa [#allocation7], 0  ;;  %s3101_s12 = smov 0  }
   0x2 LB: > { %s3107_s13 = sadd.s32 4294967295, %s3068_s12   ;;  %p2332_p0 = scmp.ge.s32.totalorder %s3068_s12, 1  ;;  %s3068_s12 = sphi %s3101_s12, %s15_s12  }
   0x3   : > { %p114_p1 = scmp.lt.s32.totalorder %s3068_s12, 3  ;;  %s3074_s14 = smov [#allocation4]  }
   0x4   : > { %s126_s15 = sshll.u32 %s3074_s14, 4  ;;  %p3731_p3 = scmp.eq.s32.totalorder %s3107_s13, 0  ;;  %s127_s15 = int_to_ptr.vmem [resolvable:$true] %s126_s15 }
   0x5   : > { %p3111_p2 = pnand %p2332_p0, %p114_p1  ;;  %s3075_s17 = smov [#allocation6]  }
   0x6   : > { %s140_s18 = sshll.u32 %s3075_s17, 4  ;;  %s2994_s22 = scalar_lea.hbm %s3728_s1, 2304  ;;  %s3124_s18 = int_to_ptr.vmem [resolvable:$true] %s140_s18 }
   0x7   : > { %s3733_s16 = scalar_select %p3111_p2, 1, 0 }
   0x8   : > { %p2960_p4 = pneg %p3111_p2  ;;  %p2995_p6 = scmp.ne.s32.totalorder %s3728_s1, %s2994_s22 }
   0x9   : > { %p3001_p10 = scmp.lt.u32.totalorder %s2994_s22, %s3728_s1 }
   0xa   : > { %p3120_p5 = pnand %p3731_p3, %p2960_p4 }
   0xc   : > { %p2996_p7 = pneg %p3120_p5 }
   0xe   : > { %p2997_p8 = pnand %p2996_p7, %p2995_p6 }
  0x10   : > { %p2998_p9 = pneg %p2997_p8 }
  0x12   : > { %p3003_p11 = pnand %p3001_p10, %p2998_p9 }
  0x14   : > { %3006 = shalt.err (!%p3003_p11)
}
  0x15   : > { %s3007_s27 = scalar_lea.vmem %s127_s15, 2304  ;;  %p3015_p1 = scmp.lt.s32.totalorder %s127_s15, %s127_s15 }
  0x16   : > { %p3008_p12 = scmp.ne.s32.totalorder %s127_s15, %s3007_s27  ;;  %p3016_p4 = scmp.lt.s32.totalorder %s3007_s27, %s3007_s27 }
  0x18   : > { %p3010_p13 = pnand %p3008_p12, %p2996_p7  ;;  %p3017_p3 = por %p3016_p4, %p3015_p1 }
  0x1a   : > { %p3011_p0 = pneg %p3010_p13 }
  0x1c   : > { %p3018_p2 = pnand %p3017_p3, %p3011_p0 }
  0x1e   : > { %3021 = shalt.err (!%p3018_p2)
}
  0x1f   : > { %s3076_s28 = smov 128   ;;  %s3077_s29 = smov 8  }
  0x20   : > { %2963 = dma.hbm_to_vmem [thread:$0]  (!%p3120_p5), %s3728_s1, 2304, %s127_s15, [#allocation5], %s3076_s28, %s3076_s28, %s3077_s29  }
  0x21   : > { %s3022_s7 = scalar_lea.hbm %s3729_s2, 16 }
  0x22   : > { %p3023_p6 = scmp.ne.s32.totalorder %s3729_s2, %s3022_s7  ;;  %p3029_p8 = scmp.lt.u32.totalorder %s3022_s7, %s3729_s2 }
  0x24   : > { %p3025_p2 = pnand %p3023_p6, %p2996_p7 }
  0x26   : > { %p3026_p3 = pneg %p3025_p2 }
  0x28   : > { %p3031_p9 = pnand %p3029_p8, %p3026_p3 }
  0x2a   : > { %3034 = shalt.err (!%p3031_p9)
}
  0x2b   : > { %s3035_s14 = scalar_lea.vmem %s3124_s18, 16  ;;  %s3042_s15 = scalar_lea.vmem %s3124_s18, 32 }
  0x2c   : > { %p3036_p10 = scmp.ne.s32.totalorder %s3124_s18, %s3035_s14  ;;  %p3043_p13 = scmp.lt.s32.totalorder %s3124_s18, %s3124_s18 }
  0x2d   : > { %p3044_p0 = scmp.lt.s32.totalorder %s3042_s15, %s3035_s14 }
  0x2e   : > { %p3038_p11 = pnand %p3036_p10, %p2996_p7 }
  0x2f   : > { %p3045_p1 = por %p3044_p0, %p3043_p13 }
  0x30   : > { %p3039_p12 = pneg %p3038_p11 }
  0x32   : > { %p3046_p4 = pnand %p3045_p1, %p3039_p12 }
  0x34   : > { %3049 = shalt.err (!%p3046_p4)
}
  0x35   : > { %2966 = dma.hbm_to_vmem [thread:$0]  (!%p3120_p5), %s3729_s2, 16, %s3124_s18, [#allocation7]  }
  0x36   : > { %p3735_p6 = scmp.ne.s32.totalorder %s3733_s16, 0 }
  0x37   : > { %p3736_p7 = scmp.eq.s32.totalorder (!%p3735_p6), %s3107_s13, 0 }
  0x38   : > { %161 = sbr.rel (%p3735_p6) target bundleno = 476 (0x1dc), region = 32 }
  0x3f   : > { %3059 = dma.done.wait (%p3736_p7), [#allocation5], 2304   ;;  %p3737_p2 = pmov %p3736_p7 }
  0x41   : > { %3061 = vsyncadd (%p3737_p2), [#allocation5], 4294964992  ;;  %p3738_p3 = pmov %p3737_p2 }
  0x42   : > { %p3739_p8 = pmov %p3737_p2 }
  0x43   : > { %3063 = dma.done.wait (%p3738_p3), [#allocation7], 16  }
  0x44   : > { %3065 = vsyncadd (%p3739_p8), [#allocation7], 4294967280  ;;  %p189_p9 = scmp.lt.s32.totalorder %s3107_s13, 1  ;;  %v3186_v0 = vld [vmem:[#allocation6] ss:$0 sm:$0xff]  ;;  %v3188_v1 = vld [vmem:[#allocation4] sm:$0xff] }
  0x45   : > { %v3190_v2 = vld [vmem:[#allocation4 + $0x8] sm:$0xff]  ;;  %v3197_v3 = vld [vmem:[#allocation4 + $0x10] sm:$0xff]  ;;  %v3199_v4 = vld [vmem:[#allocation4 + $0x18] sm:$0xff]  ;;  %vm407_vm0 = vcmask 130048   ;;  %vm411_vm1 = vcmask 123904   ;;  %s3403_s25 = smov 0  }
  0x46   : > { %s3741_s13 = smov (!%p189_p9, %s3107_s13), 1  ;;  %v3201_v5 = vld [vmem:[#allocation4 + $0x20] sm:$0xff]  ;;  %v3203_v6 = vld [vmem:[#allocation4 + $0x28] sm:$0xff]  ;;  %v3205_v7 = vld [vmem:[#allocation4 + $0x30] sm:$0xff] }
  0x47   : > { %s2951_s18 = smul.u32 96, %s3741_s13  ;;  %v3207_v8 = vld [vmem:[#allocation4 + $0x38] sm:$0xff]  ;;  %v3209_v9 = vld [vmem:[#allocation4 + $0x40] sm:$0xff]  ;;  %v3211_v10 = vld [vmem:[#allocation4 + $0x48] sm:$0xff] }
  0x48   : > { %s2950_s19 = smul.u32 416, %s3741_s13  ;;  %v3213_v11 = vld [vmem:[#allocation4 + $0x50] sm:$0xff]  ;;  %v3220_v12 = vld [vmem:[#allocation4 + $0x58] sm:$0xff]  ;;  %v3222_v13 = vld [vmem:[#allocation4 + $0x60] sm:$0xff] }
  0x49   : > { %s3195_s22 = scalar_lea.vmem %s3730_s3, %s2951_s18  ;;  %v3224_v14 = vld [vmem:[#allocation4 + $0x68] sm:$0xff]  ;;  %v3226_v15 = vld [vmem:[#allocation4 + $0x70] sm:$0xff]  ;;  %v3228_v16 = vld [vmem:[#allocation4 + $0x78] sm:$0xff] }
  0x4a   : > { %s3218_s24 = scalar_lea.vmem %s3727_s0, %s2950_s19  ;;  %v3230_v17 = vld [vmem:[#allocation4 + $0x80] sm:$0xff]  ;;  %v3232_v18 = vld [vmem:[#allocation4 + $0x88] sm:$0xff] }
  0x4b   : > { %v2444_v19 = vld [vmem:[%s3218_s24] sm:$0xff]   ;;  %v201_v20 = vld [vmem:[%s3218_s24 + $0x8] ss:$16 sps:$4 sm:$0xff]   ;;  %v202_v24 = vld [vmem:[%s3218_s24 + $0xc] sm:$0x1] }
  0x4c   : > { %v2445_v21 = vunpack.c.l.bf16 %v2444_v19  ;;  %v2446_v22 = vunpack.c.h.bf16 %v2444_v19  ;;  %v305_v23 = vunpack.c.l.bf16 %v201_v20  ;;  %v2547_v25 = vld [vmem:[%s3218_s24 + $0x10] sm:$0xff]   ;;  %v309_v26 = vunpack.c.h.bf16 %v201_v20  ;;  %v206_v27 = vld [vmem:[%s3218_s24 + $0x1c] sm:$0x1]  ;;  %v2548_v32 = vld [vmem:[%s3218_s24 + $0x20] sm:$0xff]  }
  0x4d   : > { %v306_v28 = vunpack.c.l.bf16 %v202_v24  ;;  %v2449_v29 = vunpack.c.l.bf16 %v2547_v25  ;;  %v2450_v30 = vunpack.c.h.bf16 %v2547_v25  ;;  %v310_v31 = vunpack.c.l.bf16 %v206_v27  ;;  %v209_v33 = vld [vmem:[%s3218_s24 + $0x28] ss:$16 sps:$4 sm:$0xff]   ;;  %v210_v34 = vld [vmem:[%s3218_s24 + $0x2c] sm:$0x1]  ;;  %v2549_v39 = vld [vmem:[%s3218_s24 + $0x30] sm:$0xff]  }
  0x4e   : > { %408 = vst.msk [vmem:[#allocation2] sm:$0xff] %vm407_vm0, %v2445_v21  ;;  %409 = vst.msk [vmem:[#allocation2 + $0x8] sm:$0xff] %vm407_vm0, %v2446_v22  ;;  %v2453_v35 = vunpack.c.l.bf16 %v2548_v32  ;;  %v2454_v36 = vunpack.c.h.bf16 %v2548_v32  ;;  %v313_v37 = vunpack.c.l.bf16 %v209_v33  ;;  %v314_v38 = vunpack.c.l.bf16 %v210_v34  ;;  %v214_v40 = vld [vmem:[%s3218_s24 + $0x3c] sm:$0x1]  ;;  %v2550_v41 = vld [vmem:[%s3218_s24 + $0x40] sm:$0xff]  }
  0x4f   : > { %410 = vst.msk [vmem:[#allocation2 + $0x10] sm:$0xff] %vm407_vm0, %v305_v23  ;;  %415 = vst.msk [vmem:[#allocation2 + $0x30] sm:$0xff] %vm407_vm0, %v309_v26  ;;  %v2457_v42 = vunpack.c.l.bf16 %v2549_v39  ;;  %v2458_v43 = vunpack.c.h.bf16 %v2549_v39  ;;  %v317_v44 = vunpack.c.h.bf16 %v209_v33  ;;  %v318_v45 = vunpack.c.l.bf16 %v214_v40  ;;  %v217_v46 = vld [vmem:[%s3218_s24 + $0x48] ss:$16 sps:$4 sm:$0xff]   ;;  %v218_v47 = vld [vmem:[%s3218_s24 + $0x4c] sm:$0x1] }
  0x50   : > { %412 = vst.msk [vmem:[#allocation2 + $0x18] sm:$0x3] %vm411_vm1, %v306_v28  ;;  %416 = vst.msk [vmem:[#allocation2 + $0x38] sm:$0x3] %vm411_vm1, %v310_v31  ;;  %v2551_v48 = vld [vmem:[%s3218_s24 + $0x50] sm:$0xff]   ;;  %v2461_v49 = vunpack.c.l.bf16 %v2550_v41  ;;  %v2462_v50 = vunpack.c.h.bf16 %v2550_v41  ;;  %v321_v51 = vunpack.c.l.bf16 %v217_v46  ;;  %v322_v52 = vunpack.c.l.bf16 %v218_v47  ;;  %v2552_v54 = vld [vmem:[%s3218_s24 + $0x60] sm:$0xff]  }
  0x51   : > { %413 = vst.msk [vmem:[#allocation2 + $0x20] sm:$0xff] %vm407_vm0, %v2449_v29  ;;  %414 = vst.msk [vmem:[#allocation2 + $0x28] sm:$0xff] %vm407_vm0, %v2450_v30  ;;  %v222_v53 = vld [vmem:[%s3218_s24 + $0x5c] sm:$0x1]  ;;  %v225_v55 = vld [vmem:[%s3218_s24 + $0x68] ss:$16 sps:$4 sm:$0xff]   ;;  %v2465_v56 = vunpack.c.l.bf16 %v2551_v48  ;;  %v2466_v57 = vunpack.c.h.bf16 %v2551_v48  ;;  %v325_v58 = vunpack.c.h.bf16 %v217_v46  ;;  %v2469_v63 = vunpack.c.l.bf16 %v2552_v54 }
  0x52   : > { %417 = vst.msk [vmem:[#allocation2 + $0x40] sm:$0xff] %vm407_vm0, %v2453_v35  ;;  %418 = vst.msk [vmem:[#allocation2 + $0x48] sm:$0xff] %vm407_vm0, %v2454_v36  ;;  %v326_v59 = vunpack.c.l.bf16 %v222_v53  ;;  %v226_v60 = vld [vmem:[%s3218_s24 + $0x6c] sm:$0x1]  ;;  %v2553_v61 = vld [vmem:[%s3218_s24 + $0x70] sm:$0xff]   ;;  %v2470_v19 = vunpack.c.h.bf16 %v2552_v54  ;;  %v329_v20 = vunpack.c.l.bf16 %v225_v55  ;;  %v333_v27 = vunpack.c.h.bf16 %v225_v55 }
  0x53   : > { %419 = vst.msk [vmem:[#allocation2 + $0x50] sm:$0xff] %vm407_vm0, %v313_v37  ;;  %421 = vst.msk [vmem:[#allocation2 + $0x60] sm:$0xff] %vm407_vm0, %v2457_v42  ;;  %v230_v62 = vld [vmem:[%s3218_s24 + $0x7c] sm:$0x1]  ;;  %v330_v21 = vunpack.c.l.bf16 %v226_v60  ;;  %v2554_v22 = vld [vmem:[%s3218_s24 + $0x80] sm:$0xff]   ;;  %v2473_v25 = vunpack.c.l.bf16 %v2553_v61  ;;  %v2474_v26 = vunpack.c.h.bf16 %v2553_v61 }
  0x54   : > { %420 = vst.msk [vmem:[#allocation2 + $0x58] sm:$0x3] %vm411_vm1, %v314_v38  ;;  %424 = vst.msk [vmem:[#allocation2 + $0x78] sm:$0x3] %vm411_vm1, %v318_v45  ;;  %v233_v23 = vld [vmem:[%s3218_s24 + $0x88] ss:$16 sps:$4 sm:$0xff]   ;;  %v334_v28 = vunpack.c.l.bf16 %v230_v62  ;;  %v2477_v32 = vunpack.c.l.bf16 %v2554_v22  ;;  %v2478_v33 = vunpack.c.h.bf16 %v2554_v22 }
  0x55   : > { %422 = vst.msk [vmem:[#allocation2 + $0x68] sm:$0xff] %vm407_vm0, %v2458_v43  ;;  %423 = vst.msk [vmem:[#allocation2 + $0x70] sm:$0xff] %vm407_vm0, %v317_v44  ;;  %v234_v24 = vld [vmem:[%s3218_s24 + $0x8c] sm:$0x1]  ;;  %v2555_v29 = vld [vmem:[%s3218_s24 + $0x90] sm:$0xff]   ;;  %v337_v34 = vunpack.c.l.bf16 %v233_v23  ;;  %v341_v41 = vunpack.c.h.bf16 %v233_v23 }
  0x56   : > { %425 = vst.msk [vmem:[#allocation2 + $0x80] sm:$0xff] %vm407_vm0, %v2461_v49  ;;  %426 = vst.msk [vmem:[#allocation2 + $0x88] sm:$0xff] %vm407_vm0, %v2462_v50  ;;  %v238_v30 = vld [vmem:[%s3218_s24 + $0x9c] sm:$0x1]  ;;  %v2556_v31 = vld [vmem:[%s3218_s24 + $0xa0] sm:$0xff]   ;;  %v338_v35 = vunpack.c.l.bf16 %v234_v24  ;;  %v2481_v39 = vunpack.c.l.bf16 %v2555_v29  ;;  %v2482_v40 = vunpack.c.h.bf16 %v2555_v29 }
  0x57   : > { %427 = vst.msk [vmem:[#allocation2 + $0x90] sm:$0xff] %vm407_vm0, %v321_v51  ;;  %429 = vst.msk [vmem:[#allocation2 + $0xa0] sm:$0xff] %vm407_vm0, %v2465_v56  ;;  %v241_v36 = vld [vmem:[%s3218_s24 + $0xa8] ss:$16 sps:$4 sm:$0xff]   ;;  %v242_v37 = vld [vmem:[%s3218_s24 + $0xac] sm:$0x1]  ;;  %v342_v42 = vunpack.c.l.bf16 %v238_v30  ;;  %v2485_v46 = vunpack.c.l.bf16 %v2556_v31  ;;  %v2486_v47 = vunpack.c.h.bf16 %v2556_v31 }
  0x58   : > { %428 = vst.msk [vmem:[#allocation2 + $0x98] sm:$0x3] %vm411_vm1, %v322_v52  ;;  %432 = vst.msk [vmem:[#allocation2 + $0xb8] sm:$0x3] %vm411_vm1, %v326_v59  ;;  %v2557_v38 = vld [vmem:[%s3218_s24 + $0xb0] sm:$0xff]   ;;  %v2558_v44 = vld [vmem:[%s3218_s24 + $0xc0] sm:$0xff]   ;;  %v345_v48 = vunpack.c.l.bf16 %v241_v36  ;;  %v346_v49 = vunpack.c.l.bf16 %v242_v37  ;;  %v349_v55 = vunpack.c.h.bf16 %v241_v36 }
  0x59   : > { %430 = vst.msk [vmem:[#allocation2 + $0xa8] sm:$0xff] %vm407_vm0, %v2466_v57  ;;  %431 = vst.msk [vmem:[#allocation2 + $0xb0] sm:$0xff] %vm407_vm0, %v325_v58  ;;  %v246_v43 = vld [vmem:[%s3218_s24 + $0xbc] sm:$0x1]  ;;  %v249_v45 = vld [vmem:[%s3218_s24 + $0xc8] ss:$16 sps:$4 sm:$0xff]   ;;  %v2489_v53 = vunpack.c.l.bf16 %v2557_v38  ;;  %v2490_v54 = vunpack.c.h.bf16 %v2557_v38  ;;  %v2493_v60 = vunpack.c.l.bf16 %v2558_v44  ;;  %v2494_v61 = vunpack.c.h.bf16 %v2558_v44 }
  0x5a   : > { %433 = vst.msk [vmem:[#allocation2 + $0xc0] sm:$0xff] %vm407_vm0, %v2469_v63  ;;  %434 = vst.msk [vmem:[#allocation2 + $0xc8] sm:$0xff] %vm407_vm0, %v2470_v19  ;;  %v250_v50 = vld [vmem:[%s3218_s24 + $0xcc] sm:$0x1]  ;;  %v2559_v51 = vld [vmem:[%s3218_s24 + $0xd0] sm:$0xff]   ;;  %v350_v56 = vunpack.c.l.bf16 %v246_v43  ;;  %v353_v62 = vunpack.c.l.bf16 %v249_v45  ;;  %v357_v23 = vunpack.c.h.bf16 %v249_v45 }
  0x5b   : > { %435 = vst.msk [vmem:[#allocation2 + $0xd0] sm:$0xff] %vm407_vm0, %v329_v20  ;;  %437 = vst.msk [vmem:[#allocation2 + $0xe0] sm:$0xff] %vm407_vm0, %v2473_v25  ;;  %v254_v52 = vld [vmem:[%s3218_s24 + $0xdc] sm:$0x1]  ;;  %v2560_v57 = vld [vmem:[%s3218_s24 + $0xe0] sm:$0xff]   ;;  %v354_v63 = vunpack.c.l.bf16 %v250_v50  ;;  %v2498_v22 = vunpack.c.h.bf16 %v2559_v51 }
  0x5c   : > { %436 = vst.msk [vmem:[#allocation2 + $0xd8] sm:$0x3] %vm411_vm1, %v330_v21  ;;  %440 = vst.msk [vmem:[#allocation2 + $0xf8] sm:$0x3] %vm411_vm1, %v334_v28  ;;  %v257_v58 = vld [vmem:[%s3218_s24 + $0xe8] ss:$16 sps:$4 sm:$0xff]   ;;  %v2497_v21 = vunpack.c.l.bf16 %v2559_v51  ;;  %v358_v24 = vunpack.c.l.bf16 %v254_v52  ;;  %v2501_v28 = vunpack.c.l.bf16 %v2560_v57  ;;  %v2502_v29 = vunpack.c.h.bf16 %v2560_v57 }
  0x5d   : > { %438 = vst.msk [vmem:[#allocation2 + $0xe8] sm:$0xff] %vm407_vm0, %v2474_v26  ;;  %439 = vst.msk [vmem:[#allocation2 + $0xf0] sm:$0xff] %vm407_vm0, %v333_v27  ;;  %v258_v59 = vld [vmem:[%s3218_s24 + $0xec] sm:$0x1]  ;;  %v2561_v19 = vld [vmem:[%s3218_s24 + $0xf0] sm:$0xff]   ;;  %v361_v30 = vunpack.c.l.bf16 %v257_v58  ;;  %v365_v36 = vunpack.c.h.bf16 %v257_v58 }
  0x5e   : > { %441 = vst.msk [vmem:[#allocation2 + $0x100] sm:$0xff] %vm407_vm0, %v2477_v32  ;;  %442 = vst.msk [vmem:[#allocation2 + $0x108] sm:$0xff] %vm407_vm0, %v2478_v33  ;;  %v262_v20 = vld [vmem:[%s3218_s24 + $0xfc] sm:$0x1]  ;;  %v2562_v25 = vld [vmem:[%s3218_s24 + $0x100] sm:$0xff]   ;;  %v362_v31 = vunpack.c.l.bf16 %v258_v59 }
  0x5f   : > { %443 = vst.msk [vmem:[#allocation2 + $0x110] sm:$0xff] %vm407_vm0, %v337_v34  ;;  %445 = vst.msk [vmem:[#allocation2 + $0x120] sm:$0xff] %vm407_vm0, %v2481_v39  ;;  %v265_v26 = vld [vmem:[%s3218_s24 + $0x108] ss:$16 sps:$4 sm:$0xff]   ;;  %v266_v27 = vld [vmem:[%s3218_s24 + $0x10c] sm:$0x1]  ;;  %v2505_v34 = vunpack.c.l.bf16 %v2561_v19  ;;  %v366_v37 = vunpack.c.l.bf16 %v262_v20 }
  0x60   : > { %444 = vst.msk [vmem:[#allocation2 + $0x118] sm:$0x3] %vm411_vm1, %v338_v35  ;;  %448 = vst.msk [vmem:[#allocation2 + $0x138] sm:$0x3] %vm411_vm1, %v342_v42  ;;  %v2563_v32 = vld [vmem:[%s3218_s24 + $0x110] sm:$0xff]   ;;  %v2506_v35 = vunpack.c.h.bf16 %v2561_v19  ;;  %v2564_v38 = vld [vmem:[%s3218_s24 + $0x120] sm:$0xff]   ;;  %v2510_v42 = vunpack.c.h.bf16 %v2562_v25  ;;  %v369_v43 = vunpack.c.l.bf16 %v265_v26  ;;  %v370_v44 = vunpack.c.l.bf16 %v266_v27 }
  0x61   : > { %446 = vst.msk [vmem:[#allocation2 + $0x128] sm:$0xff] %vm407_vm0, %v2482_v40  ;;  %447 = vst.msk [vmem:[#allocation2 + $0x130] sm:$0xff] %vm407_vm0, %v341_v41  ;;  %v270_v33 = vld [vmem:[%s3218_s24 + $0x11c] sm:$0x1]  ;;  %v273_v39 = vld [vmem:[%s3218_s24 + $0x128] ss:$16 sps:$4 sm:$0xff]   ;;  %v2509_v41 = vunpack.c.l.bf16 %v2562_v25 }
  0x62   : > { %449 = vst.msk [vmem:[#allocation2 + $0x140] sm:$0xff] %vm407_vm0, %v2485_v46  ;;  %450 = vst.msk [vmem:[#allocation2 + $0x148] sm:$0xff] %vm407_vm0, %v2486_v47  ;;  %v274_v40 = vld [vmem:[%s3218_s24 + $0x12c] sm:$0x1]  ;;  %v2565_v45 = vld [vmem:[%s3218_s24 + $0x130] sm:$0xff]   ;;  %v2513_v47 = vunpack.c.l.bf16 %v2563_v32  ;;  %v374_v50 = vunpack.c.l.bf16 %v270_v33 }
  0x63   : > { %451 = vst.msk [vmem:[#allocation2 + $0x150] sm:$0xff] %vm407_vm0, %v345_v48  ;;  %453 = vst.msk [vmem:[#allocation2 + $0x160] sm:$0xff] %vm407_vm0, %v2489_v53  ;;  %v278_v46 = vld [vmem:[%s3218_s24 + $0x13c] sm:$0x1]  ;;  %v2514_v48 = vunpack.c.h.bf16 %v2563_v32  ;;  %v2566_v51 = vld [vmem:[%s3218_s24 + $0x140] sm:$0xff]   ;;  %v378_v57 = vunpack.c.l.bf16 %v274_v40 }
  0x64   : > { %452 = vst.msk [vmem:[#allocation2 + $0x158] sm:$0x3] %vm411_vm1, %v346_v49  ;;  %456 = vst.msk [vmem:[#allocation2 + $0x178] sm:$0x3] %vm411_vm1, %v350_v56  ;;  %v373_v49 = vunpack.c.h.bf16 %v265_v26  ;;  %v281_v52 = vld [vmem:[%s3218_s24 + $0x148] ss:$16 sps:$4 sm:$0xff]   ;;  %v377_v56 = vunpack.c.l.bf16 %v273_v39 }
  0x65   : > { %454 = vst.msk [vmem:[#allocation2 + $0x168] sm:$0xff] %vm407_vm0, %v2490_v54  ;;  %455 = vst.msk [vmem:[#allocation2 + $0x170] sm:$0xff] %vm407_vm0, %v349_v55  ;;  %v282_v53 = vld [vmem:[%s3218_s24 + $0x14c] sm:$0x1]  ;;  %v2517_v54 = vunpack.c.l.bf16 %v2564_v38  ;;  %v2518_v55 = vunpack.c.h.bf16 %v2564_v38  ;;  %v2567_v58 = vld [vmem:[%s3218_s24 + $0x150] sm:$0xff]  }
  0x66   : > { %457 = vst.msk [vmem:[#allocation2 + $0x180] sm:$0xff] %vm407_vm0, %v2493_v60  ;;  %458 = vst.msk [vmem:[#allocation2 + $0x188] sm:$0xff] %vm407_vm0, %v2494_v61  ;;  %v286_v59 = vld [vmem:[%s3218_s24 + $0x15c] sm:$0x1]  ;;  %v2521_v60 = vunpack.c.l.bf16 %v2565_v45  ;;  %v2522_v61 = vunpack.c.h.bf16 %v2565_v45  ;;  %v2568_v19 = vld [vmem:[%s3218_s24 + $0x160] sm:$0xff]   ;;  %v386_v25 = vunpack.c.l.bf16 %v282_v53 }
  0x67   : > { %459 = vst.msk [vmem:[#allocation2 + $0x190] sm:$0xff] %vm407_vm0, %v353_v62  ;;  %461 = vst.msk [vmem:[#allocation2 + $0x1a0] sm:$0xff] %vm407_vm0, %v2497_v21  ;;  %v381_v62 = vunpack.c.h.bf16 %v273_v39  ;;  %v289_v20 = vld [vmem:[%s3218_s24 + $0x168] ss:$16 sps:$4 sm:$0xff]   ;;  %v290_v21 = vld [vmem:[%s3218_s24 + $0x16c] sm:$0x1] }
  0x68   : > { %460 = vst.msk [vmem:[#allocation2 + $0x198] sm:$0x3] %vm411_vm1, %v354_v63  ;;  %464 = vst.msk [vmem:[#allocation2 + $0x1b8] sm:$0x3] %vm411_vm1, %v358_v24  ;;  %v382_v63 = vunpack.c.l.bf16 %v278_v46  ;;  %v385_v24 = vunpack.c.l.bf16 %v281_v52  ;;  %v2569_v26 = vld [vmem:[%s3218_s24 + $0x170] sm:$0xff]   ;;  %v2570_v32 = vld [vmem:[%s3218_s24 + $0x180] sm:$0xff]   ;;  %v394_v38 = vunpack.c.l.bf16 %v290_v21 }
  0x69   : > { %462 = vst.msk [vmem:[#allocation2 + $0x1a8] sm:$0xff] %vm407_vm0, %v2498_v22  ;;  %463 = vst.msk [vmem:[#allocation2 + $0x1b0] sm:$0xff] %vm407_vm0, %v357_v23  ;;  %v2525_v22 = vunpack.c.l.bf16 %v2566_v51  ;;  %v2526_v23 = vunpack.c.h.bf16 %v2566_v51  ;;  %v294_v27 = vld [vmem:[%s3218_s24 + $0x17c] sm:$0x1]  ;;  %v297_v33 = vld [vmem:[%s3218_s24 + $0x188] ss:$16 sps:$4 sm:$0xff]   ;;  %v2541_v45 = vunpack.c.l.bf16 %v2570_v32  ;;  %v2542_v46 = vunpack.c.h.bf16 %v2570_v32 }
  0x6a   : > { %465 = vst.msk [vmem:[#allocation2 + $0x1c0] sm:$0xff] %vm407_vm0, %v2501_v28  ;;  %466 = vst.msk [vmem:[#allocation2 + $0x1c8] sm:$0xff] %vm407_vm0, %v2502_v29  ;;  %v2529_v28 = vunpack.c.l.bf16 %v2567_v58  ;;  %v2530_v29 = vunpack.c.h.bf16 %v2567_v58  ;;  %v2571_v39 = vld [vmem:[%s3218_s24 + $0x190] sm:$0xff]   ;;  %v302_v40 = vld [vmem:[%s3218_s24 + $0x19c] sm:$0x1]  ;;  %v405_v51 = vunpack.c.h.bf16 %v297_v33 }
  0x6b   : > { %467 = vst.msk [vmem:[#allocation2 + $0x1d0] sm:$0xff] %vm407_vm0, %v361_v30  ;;  %469 = vst.msk [vmem:[#allocation2 + $0x1e0] sm:$0xff] %vm407_vm0, %v2505_v34  ;;  %v389_v30 = vunpack.c.h.bf16 %v281_v52  ;;  %v298_v34 = vld [vmem:[%s3218_s24 + $0x18c] sm:$0x1]  ;;  %v406_v52 = vunpack.c.l.bf16 %v302_v40 }
  0x6c   : > { %468 = vst.msk [vmem:[#allocation2 + $0x1d8] sm:$0x3] %vm411_vm1, %v362_v31  ;;  %472 = vst.msk [vmem:[#allocation2 + $0x1f8] sm:$0x3] %vm411_vm1, %v366_v37  ;;  %v390_v31 = vunpack.c.l.bf16 %v286_v59  ;;  %v393_v37 = vunpack.c.l.bf16 %v289_v20 }
  0x6d   : > { %470 = vst.msk [vmem:[#allocation2 + $0x1e8] sm:$0xff] %vm407_vm0, %v2506_v35  ;;  %471 = vst.msk [vmem:[#allocation2 + $0x1f0] sm:$0xff] %vm407_vm0, %v365_v36  ;;  %v2533_v35 = vunpack.c.l.bf16 %v2568_v19  ;;  %v2534_v36 = vunpack.c.h.bf16 %v2568_v19 }
  0x6e   : > { %473 = vst.msk [vmem:[#allocation2 + $0x200] sm:$0xff] %vm407_vm0, %v2509_v41  ;;  %474 = vst.msk [vmem:[#allocation2 + $0x208] sm:$0xff] %vm407_vm0, %v2510_v42  ;;  %v2537_v41 = vunpack.c.l.bf16 %v2569_v26  ;;  %v2538_v42 = vunpack.c.h.bf16 %v2569_v26 }
  0x6f   : > { %475 = vst.msk [vmem:[#allocation2 + $0x210] sm:$0xff] %vm407_vm0, %v369_v43  ;;  %477 = vst.msk [vmem:[#allocation2 + $0x220] sm:$0xff] %vm407_vm0, %v2513_v47  ;;  %v397_v43 = vunpack.c.h.bf16 %v289_v20  ;;  %v401_v47 = vunpack.c.l.bf16 %v297_v33 }
  0x70   : > { %476 = vst.msk [vmem:[#allocation2 + $0x218] sm:$0x3] %vm411_vm1, %v370_v44  ;;  %480 = vst.msk [vmem:[#allocation2 + $0x238] sm:$0x3] %vm411_vm1, %v374_v50  ;;  %v398_v44 = vunpack.c.l.bf16 %v294_v27  ;;  %v2546_v50 = vunpack.c.h.bf16 %v2571_v39 }
  0x71   : > { %478 = vst.msk [vmem:[#allocation2 + $0x228] sm:$0xff] %vm407_vm0, %v2514_v48  ;;  %479 = vst.msk [vmem:[#allocation2 + $0x230] sm:$0xff] %vm407_vm0, %v373_v49  ;;  %v402_v48 = vunpack.c.l.bf16 %v298_v34  ;;  %v2545_v49 = vunpack.c.l.bf16 %v2571_v39 }
  0x72   : > { %481 = vst.msk [vmem:[#allocation2 + $0x240] sm:$0xff] %vm407_vm0, %v2517_v54  ;;  %482 = vst.msk [vmem:[#allocation2 + $0x248] sm:$0xff] %vm407_vm0, %v2518_v55 }
  0x73   : > { %483 = vst.msk [vmem:[#allocation2 + $0x250] sm:$0xff] %vm407_vm0, %v377_v56  ;;  %485 = vst.msk [vmem:[#allocation2 + $0x260] sm:$0xff] %vm407_vm0, %v2521_v60 }
  0x74   : > { %484 = vst.msk [vmem:[#allocation2 + $0x258] sm:$0x3] %vm411_vm1, %v378_v57  ;;  %488 = vst.msk [vmem:[#allocation2 + $0x278] sm:$0x3] %vm411_vm1, %v382_v63 }
  0x75   : > { %486 = vst.msk [vmem:[#allocation2 + $0x268] sm:$0xff] %vm407_vm0, %v2522_v61  ;;  %487 = vst.msk [vmem:[#allocation2 + $0x270] sm:$0xff] %vm407_vm0, %v381_v62 }
  0x76   : > { %489 = vst.msk [vmem:[#allocation2 + $0x280] sm:$0xff] %vm407_vm0, %v2525_v22  ;;  %490 = vst.msk [vmem:[#allocation2 + $0x288] sm:$0xff] %vm407_vm0, %v2526_v23 }
  0x77   : > { %491 = vst.msk [vmem:[#allocation2 + $0x290] sm:$0xff] %vm407_vm0, %v385_v24  ;;  %493 = vst.msk [vmem:[#allocation2 + $0x2a0] sm:$0xff] %vm407_vm0, %v2529_v28 }
  0x78   : > { %492 = vst.msk [vmem:[#allocation2 + $0x298] sm:$0x3] %vm411_vm1, %v386_v25  ;;  %496 = vst.msk [vmem:[#allocation2 + $0x2b8] sm:$0x3] %vm411_vm1, %v390_v31 }
  0x79   : > { %494 = vst.msk [vmem:[#allocation2 + $0x2a8] sm:$0xff] %vm407_vm0, %v2530_v29  ;;  %495 = vst.msk [vmem:[#allocation2 + $0x2b0] sm:$0xff] %vm407_vm0, %v389_v30 }
  0x7a   : > { %497 = vst.msk [vmem:[#allocation2 + $0x2c0] sm:$0xff] %vm407_vm0, %v2533_v35  ;;  %498 = vst.msk [vmem:[#allocation2 + $0x2c8] sm:$0xff] %vm407_vm0, %v2534_v36 }
  0x7b   : > { %499 = vst.msk [vmem:[#allocation2 + $0x2d0] sm:$0xff] %vm407_vm0, %v393_v37  ;;  %501 = vst.msk [vmem:[#allocation2 + $0x2e0] sm:$0xff] %vm407_vm0, %v2537_v41 }
  0x7c   : > { %500 = vst.msk [vmem:[#allocation2 + $0x2d8] sm:$0x3] %vm411_vm1, %v394_v38  ;;  %504 = vst.msk [vmem:[#allocation2 + $0x2f8] sm:$0x3] %vm411_vm1, %v398_v44 }
  0x7d   : > { %502 = vst.msk [vmem:[#allocation2 + $0x2e8] sm:$0xff] %vm407_vm0, %v2538_v42  ;;  %503 = vst.msk [vmem:[#allocation2 + $0x2f0] sm:$0xff] %vm407_vm0, %v397_v43 }
  0x7e   : > { %505 = vst.msk [vmem:[#allocation2 + $0x300] sm:$0xff] %vm407_vm0, %v2541_v45  ;;  %506 = vst.msk [vmem:[#allocation2 + $0x308] sm:$0xff] %vm407_vm0, %v2542_v46 }
  0x7f   : > { %507 = vst.msk [vmem:[#allocation2 + $0x310] sm:$0xff] %vm407_vm0, %v401_v47  ;;  %509 = vst.msk [vmem:[#allocation2 + $0x320] sm:$0xff] %vm407_vm0, %v2545_v49 }
  0x80   : > { %508 = vst.msk [vmem:[#allocation2 + $0x318] sm:$0x3] %vm411_vm1, %v402_v48  ;;  %512 = vst.msk [vmem:[#allocation2 + $0x338] sm:$0x3] %vm411_vm1, %v406_v52 }
  0x81   : > { %510 = vst.msk [vmem:[#allocation2 + $0x328] sm:$0xff] %vm407_vm0, %v2546_v50  ;;  %511 = vst.msk [vmem:[#allocation2 + $0x330] sm:$0xff] %vm407_vm0, %v405_v51 }
  0x82 LB: >> { %v3410_v53 = vpack.c.bf16 %v3199_v4, %v3197_v3  ;;  %v3414_v54 = vpack.c.bf16 %v3190_v2, %v3188_v1  ;;  %v3078_v55 = vmov 0.0|0.0   ;;  %s2436_s26 = sshll.u32 %s3072_s25, 6  ;;  %v3423_v56 = vpack.c.bf16 %v3203_v6, %v3201_v5  ;;  %s2442_s28 = sshll.u32 %s3072_s25, 3  ;;  %s3072_s25 = sphi %s3403_s25, %s545_s25  }
  0x83   : >> { %2896 = vmatprep.subr.bf16.mxu0 %v3078_v55  ;;  %2899 = vmatprep.subr.bf16.mxu1 %v3078_v55  ;;  %vm3079_vm2 = vmmov 0   ;;  %v3080_v57 = vmov 0.0   ;;  %v3431_v58 = vpack.c.bf16 %v3207_v8, %v3205_v7  ;;  %s3433_s27 = scalar_lea.vmem [#allocation2], %s2436_s26  ;;  %v3468_v21 = vpack.c.bf16 %v3211_v10, %v3209_v9  ;;  %s2227_s29 = scalar_lea.vmem %s3195_s22, %s2442_s28 }
  0x84   : >> { %2898 = vmatpush3.bf16.msra.mxu0 %v3410_v53  ;;  %2901 = vmatpush3.bf16.msra.mxu1 %v3414_v54  ;;  %v3475_v23 = vpack.c.bf16 %v3220_v12, %v3213_v11  ;;  %v3513_v29 = vpack.c.bf16 %v3224_v14, %v3222_v13  ;;  %v3520_v31 = vpack.c.bf16 %v3228_v16, %v3226_v15  ;;  %vm2205_vm3 = vcmask 261120   ;;  %s545_s25 = sadd.s32 1, %s3072_s25  }
  0x85   : >> { %2666 = vmatprep.mubr.msk.f32.mxu0 %vm3079_vm2, %v3080_v57  ;;  %2679 = vmatprep.mubr.msk.f32.mxu1 %vm3079_vm2, %v3080_v57  ;;  %v3555_v37 = vpack.c.bf16 %v3232_v18, %v3230_v17  ;;  %vm2228_vm4 = vcmask 257024   ;;  %vm2230_vm5 = vcmask 254976   ;;  %p542_p5 = scmp.ge.s32.totalorder %s545_s25, 12  }
  0x86   : >> { %2902 = vmatprep.subr.bf16.mxu0 %v3078_v55  ;;  %2905 = vmatprep.subr.bf16.mxu1 %v3078_v55 }
  0x88   : >> { %v552_v59 = vld [vmem:[%s3433_s27 + $0x1] sm:$0xff]  ;;  %v553_v61 = vld [vmem:[%s3433_s27 + $0x9] sm:$0xff]  ;;  %v554_v63 = vld [vmem:[%s3433_s27 + $0x11] sm:$0xff] }
  0x89   : >> { %v549_v60 = vld [vmem:[%s3433_s27] sm:$0xff]  ;;  %2667 = vmatmul.mubr.msk.f32.vlgmr.msra.gmra.mrb[0].mxu0 %vm407_vm0, %v552_v59  ;;  %v550_v62 = vld [vmem:[%s3433_s27 + $0x8] sm:$0xff]  ;;  %v551_v19 = vld [vmem:[%s3433_s27 + $0x10] sm:$0xff] }
  0x8a   : >> { %2680 = vmatmul.mubr.msk.f32.vlgmr.msra.gmra.mrb[0].mxu1 %vm407_vm0, %v549_v60  ;;  %2904 = vmatpush3.bf16.msra.mxu0 %v3423_v56  ;;  %v733_v20 = vld [vmem:[%s3433_s27 + $0x2] sm:$0xff]  ;;  %v734_v24 = vld [vmem:[%s3433_s27 + $0xa] sm:$0xff]  ;;  %v735_v26 = vld [vmem:[%s3433_s27 + $0x12] sm:$0xff] }
  0x8b   : >> { %2669 = vmatprep.mubr.msk.f32.mxu0 %vm3079_vm2, %v3080_v57  ;;  %2907 = vmatpush3.bf16.msra.mxu1 %v3431_v58  ;;  %v3471_v22 = vld [vmem:[%s3433_s27 + $0x20] sm:$0xff]  ;;  %v3485_v25 = vld [vmem:[%s3433_s27 + $0x28] sm:$0xff]  ;;  %v3501_v27 = vld [vmem:[%s3433_s27 + $0x30] sm:$0xff] }
  0x8c   : >> { %2682 = vmatprep.mubr.msk.f32.mxu1 %vm3079_vm2, %v3080_v57  ;;  %2908 = vmatprep.subr.bf16.mxu0 %v3078_v55  ;;  %v2360_v28 = vld [vmem:[%s3433_s27 + $0x21] sm:$0xff]  ;;  %v2361_v32 = vld [vmem:[%s3433_s27 + $0x29] sm:$0xff]  ;;  %v2362_v34 = vld [vmem:[%s3433_s27 + $0x31] sm:$0xff] }
  0x8d   : >> { %2911 = vmatprep.subr.bf16.mxu1 %v3078_v55  ;;  %2670 = vmatmul.mubr.msk.f32.gmra.mrb[2].mxu0 %vm407_vm0, %v553_v61  ;;  %v3516_v30 = vld [vmem:[%s3433_s27 + $0x22] sm:$0xff]  ;;  %v3530_v33 = vld [vmem:[%s3433_s27 + $0x2a] sm:$0xff]  ;;  %v2368_v35 = vld [vmem:[%s3433_s27 + $0x32] sm:$0xff] }
  0x8e   : >> { %2683 = vmatmul.mubr.msk.f32.gmra.mrb[2].mxu1 %vm407_vm0, %v550_v62  ;;  %2672 = vmatprep.mubr.msk.f32.mxu0 %vm3079_vm2, %v3080_v57  ;;  %v2374_v36 = vld [vmem:[%s3433_s27 + $0x40] sm:$0xff]  ;;  %v2375_v39 = vld [vmem:[%s3433_s27 + $0x48] sm:$0xff]  ;;  %v2376_v41 = vld [vmem:[%s3433_s27 + $0x50] sm:$0xff] }
  0x8f   : >> { %2685 = vmatprep.mubr.msk.f32.mxu1 %vm3079_vm2, %v3080_v57  ;;  %v2380_v38 = vld [vmem:[%s3433_s27 + $0x41] sm:$0xff]  ;;  %v2381_v40 = vld [vmem:[%s3433_s27 + $0x49] sm:$0xff]  ;;  %v2382_v42 = vld [vmem:[%s3433_s27 + $0x51] sm:$0xff] }
  0x90   : >> { %v2386_v43 = vld [vmem:[%s3433_s27 + $0x42] sm:$0xff]  ;;  %v2387_v44 = vld [vmem:[%s3433_s27 + $0x4a] sm:$0xff]  ;;  %v2388_v45 = vld [vmem:[%s3433_s27 + $0x52] sm:$0xff] }
  0x91   : >> { %2673 = vmatmul.mubr.msk.f32.gmra.mrb[4].mxu0 %vm407_vm0, %v554_v63  ;;  %v2413_v46 = vld [vmem:[%s3433_s27 + $0x60] sm:$0xff]  ;;  %v2414_v47 = vld [vmem:[%s3433_s27 + $0x68] sm:$0xff]  ;;  %v2415_v48 = vld [vmem:[%s3433_s27 + $0x70] sm:$0xff] }
  0x92   : >> { %2686 = vmatmul.mubr.msk.f32.gmra.mrb[4].mxu1 %vm407_vm0, %v551_v19  ;;  %2692 = vmatprep.mubr.msk.f32.mxu0 %vm3079_vm2, %v3080_v57  ;;  %v2419_v49 = vld [vmem:[%s3433_s27 + $0x61] sm:$0xff]  ;;  %v2420_v51 = vld [vmem:[%s3433_s27 + $0x69] sm:$0xff] }
  0x93   : >> { %2705 = vmatprep.mubr.msk.f32.mxu1 %vm3079_vm2, %v3080_v57  ;;  %v2425_v50 = vld [vmem:[%s3433_s27 + $0x62] sm:$0xff]  ;;  %v2426_v52 = vld [vmem:[%s3433_s27 + $0x6a] sm:$0xff] }
  0x95   : >> { %2693 = vmatmul.mubr.msk.f32.vlgmr.msra.gmra.mrb[6].mxu0 %vm407_vm0, %v733_v20 }
  0x96   : >> { %2706 = vmatmul.mubr.msk.f32.vlgmr.msra.gmra.mrb[6].mxu1 %vm407_vm0, %v3471_v22  ;;  %2910 = vmatpush3.bf16.msra.mxu0 %v3468_v21 }
  0x97   : >> { %2695 = vmatprep.mubr.msk.f32.mxu0 %vm3079_vm2, %v3080_v57  ;;  %2913 = vmatpush3.bf16.msra.mxu1 %v3475_v23 }
  0x98   : >> { %2708 = vmatprep.mubr.msk.f32.mxu1 %vm3079_vm2, %v3080_v57  ;;  %2914 = vmatprep.subr.bf16.mxu0 %v3078_v55 }
  0x99   : >> { %2917 = vmatprep.subr.bf16.mxu1 %v3078_v55  ;;  %2696 = vmatmul.mubr.msk.f32.gmra.mrb[8].mxu0 %vm407_vm0, %v734_v24 }
  0x9a   : >> { %2709 = vmatmul.mubr.msk.f32.gmra.mrb[8].mxu1 %vm407_vm0, %v3485_v25  ;;  %2698 = vmatprep.mubr.msk.f32.mxu0 %vm3079_vm2, %v3080_v57 }
  0x9b   : >> { %2711 = vmatprep.mubr.msk.f32.mxu1 %vm3079_vm2, %v3080_v57 }
  0x9d   : >> { %2699 = vmatmul.mubr.msk.f32.gmra.mrb[10].mxu0 %vm407_vm0, %v735_v26 }
  0x9e   : >> { %2712 = vmatmul.mubr.msk.f32.gmra.mrb[10].mxu1 %vm407_vm0, %v3501_v27  ;;  %2718 = vmatprep.mubr.msk.f32.mxu0 %vm3079_vm2, %v3080_v57 }
  0x9f   : >> { %2731 = vmatprep.mubr.msk.f32.mxu1 %vm3079_vm2, %v3080_v57 }
  0xa1   : >> { %2719 = vmatmul.mubr.msk.f32.vlgmr.msra.gmra.mrb[12].mxu0 %vm407_vm0, %v2360_v28 }
  0xa2   : >> { %2732 = vmatmul.mubr.msk.f32.vlgmr.msra.gmra.mrb[12].mxu1 %vm407_vm0, %v3516_v30  ;;  %2916 = vmatpush3.bf16.msra.mxu0 %v3513_v29 }
  0xa3   : >> { %2721 = vmatprep.mubr.msk.f32.mxu0 %vm3079_vm2, %v3080_v57  ;;  %2919 = vmatpush3.bf16.msra.mxu1 %v3520_v31 }
  0xa4   : >> { %2734 = vmatprep.mubr.msk.f32.mxu1 %vm3079_vm2, %v3080_v57  ;;  %2920 = vmatprep.subr.bf16.mxu0 %v3078_v55 }
  0xa5   : >> { %2923 = vmatprep.subr.bf16.mxu1 %v3078_v55  ;;  %2722 = vmatmul.mubr.msk.f32.gmra.mrb[14].mxu0 %vm407_vm0, %v2361_v32 }
  0xa6   : >> { %2735 = vmatmul.mubr.msk.f32.gmra.mrb[14].mxu1 %vm407_vm0, %v3530_v33  ;;  %2724 = vmatprep.mubr.msk.f32.mxu0 %vm3079_vm2, %v3080_v57 }
  0xa7   : >> { %2737 = vmatprep.mubr.msk.f32.mxu1 %vm3079_vm2, %v3080_v57 }
  0xa9   : >> { %2725 = vmatmul.mubr.msk.f32.gmra.mrb[16].mxu0 %vm407_vm0, %v2362_v34 }
  0xaa   : >> { %2738 = vmatmul.mubr.msk.f32.gmra.mrb[16].mxu1 %vm407_vm0, %v2368_v35  ;;  %2744 = vmatprep.mubr.msk.f32.mxu0 %vm3079_vm2, %v3080_v57 }
  0xab   : >> { %2757 = vmatprep.mubr.msk.f32.mxu1 %vm3079_vm2, %v3080_v57 }
  0xad   : >> { %2745 = vmatmul.mubr.msk.f32.vlgmr.msra.gmra.mrb[18].mxu0 %vm407_vm0, %v2374_v36 }
  0xae   : >> { %2758 = vmatmul.mubr.msk.f32.vlgmr.msra.gmra.mrb[18].mxu1 %vm407_vm0, %v2380_v38  ;;  %2922 = vmatpush3.bf16.msra.mxu0 %v3555_v37 }
  0xaf   : >> { %2747 = vmatprep.mubr.msk.f32.mxu0 %vm3079_vm2, %v3080_v57  ;;  %2925 = vmatpush3.bf16.msra.mxu1 %v3410_v53  ;;  %v2421_v53 = vld [vmem:[%s3433_s27 + $0x71] sm:$0xff] }
  0xb0   : >> { %2760 = vmatprep.mubr.msk.f32.mxu1 %vm3079_vm2, %v3080_v57  ;;  %2926 = vmatprep.subr.bf16.mxu0 %v3078_v55 }
  0xb1   : >> { %2929 = vmatprep.subr.bf16.mxu1 %v3078_v55  ;;  %2748 = vmatmul.mubr.msk.f32.gmra.mrb[20].mxu0 %vm407_vm0, %v2375_v39 }
  0xb2   : >> { %2761 = vmatmul.mubr.msk.f32.gmra.mrb[20].mxu1 %vm407_vm0, %v2381_v40  ;;  %2750 = vmatprep.mubr.msk.f32.mxu0 %vm3079_vm2, %v3080_v57 }
  0xb3   : >> { %2763 = vmatprep.mubr.msk.f32.mxu1 %vm3079_vm2, %v3080_v57 }
  0xb5   : >> { %2751 = vmatmul.mubr.msk.f32.gmra.mrb[22].mxu0 %vm407_vm0, %v2376_v41 }
  0xb6   : >> { %2764 = vmatmul.mubr.msk.f32.gmra.mrb[22].mxu1 %vm407_vm0, %v2382_v42  ;;  %2770 = vmatprep.mubr.msk.f32.mxu0 %vm3079_vm2, %v3080_v57 }
  0xb7   : >> { %2783 = vmatprep.mubr.msk.f32.mxu1 %vm3079_vm2, %v3080_v57 }
  0xb9   : >> { %2771 = vmatmul.mubr.msk.f32.vlgmr.msra.gmra.mrb[24].mxu0 %vm407_vm0, %v2386_v43 }
  0xba   : >> { %2784 = vmatmul.mubr.msk.f32.vlgmr.msra.gmra.mrb[24].mxu1 %vm407_vm0, %v2360_v28  ;;  %2928 = vmatpush3.bf16.msra.mxu0 %v3414_v54  ;;  %v2427_v54 = vld [vmem:[%s3433_s27 + $0x72] sm:$0xff] }
  0xbb   : >> { %2773 = vmatprep.mubr.msk.f32.mxu0 %vm3079_vm2, %v3080_v57  ;;  %2931 = vmatpush3.bf16.msra.mxu1 %v3423_v56 }
  0xbc   : >> { %2786 = vmatprep.mubr.msk.f32.mxu1 %vm3079_vm2, %v3080_v57  ;;  %2932 = vmatprep.subr.bf16.mxu0 %v3078_v55 }
  0xbd   : >> { %2935 = vmatprep.subr.bf16.mxu1 %v3078_v55  ;;  %2774 = vmatmul.mubr.msk.f32.gmra.mrb[26].mxu0 %vm407_vm0, %v2387_v44 }
  0xbe   : >> { %2787 = vmatmul.mubr.msk.f32.gmra.mrb[26].mxu1 %vm407_vm0, %v2361_v32  ;;  %2776 = vmatprep.mubr.msk.f32.mxu0 %vm3079_vm2, %v3080_v57 }
  0xbf   : >> { %2789 = vmatprep.mubr.msk.f32.mxu1 %vm3079_vm2, %v3080_v57 }
  0xc1   : >> { %2777 = vmatmul.mubr.msk.f32.gmra.mrb[28].mxu0 %vm407_vm0, %v2388_v45 }
  0xc2   : >> { %2790 = vmatmul.mubr.msk.f32.gmra.mrb[28].mxu1 %vm407_vm0, %v2362_v34  ;;  %2796 = vmatprep.mubr.msk.f32.mxu0 %vm3079_vm2, %v3080_v57 }
  0xc3   : >> { %2809 = vmatprep.mubr.msk.f32.mxu1 %vm3079_vm2, %v3080_v57 }
  0xc5   : >> { %2797 = vmatmul.mubr.msk.f32.vlgmr.msra.gmra.mrb[30].mxu0 %vm407_vm0, %v3471_v22 }
  0xc6   : >> { %2810 = vmatmul.mubr.msk.f32.vlgmr.msra.gmra.mrb[30].mxu1 %vm407_vm0, %v3516_v30  ;;  %2934 = vmatpush3.bf16.msra.mxu0 %v3431_v58 }
  0xc7   : >> { %2799 = vmatprep.mubr.msk.f32.mxu0 %vm3079_vm2, %v3080_v57  ;;  %2937 = vmatpush3.bf16.msra.mxu1 %v3468_v21 }
  0xc8   : >> { %2812 = vmatprep.mubr.msk.f32.mxu1 %vm3079_vm2, %v3080_v57  ;;  %2938 = vmatprep.subr.bf16.mxu0 %v3078_v55 }
  0xc9   : >> { %2941 = vmatprep.subr.bf16.mxu1 %v3078_v55  ;;  %2800 = vmatmul.mubr.msk.f32.gmra.mrb[32].mxu0 %vm407_vm0, %v3485_v25 }
  0xca   : >> { %2813 = vmatmul.mubr.msk.f32.gmra.mrb[32].mxu1 %vm407_vm0, %v3530_v33  ;;  %2802 = vmatprep.mubr.msk.f32.mxu0 %vm3079_vm2, %v3080_v57 }
  0xcb   : >> { %2815 = vmatprep.mubr.msk.f32.mxu1 %vm3079_vm2, %v3080_v57 }
  0xcd   : >> { %2803 = vmatmul.mubr.msk.f32.gmra.mrb[34].mxu0 %vm407_vm0, %v3501_v27 }
  0xce   : >> { %2816 = vmatmul.mubr.msk.f32.gmra.mrb[34].mxu1 %vm407_vm0, %v2368_v35  ;;  %2822 = vmatprep.mubr.msk.f32.mxu0 %vm3079_vm2, %v3080_v57 }
  0xcf   : >> { %2835 = vmatprep.mubr.msk.f32.mxu1 %vm3079_vm2, %v3080_v57 }
  0xd1   : >> { %2823 = vmatmul.mubr.msk.f32.vlgmr.msra.gmra.mrb[36].mxu0 %vm407_vm0, %v2374_v36 }
  0xd2   : >> { %2836 = vmatmul.mubr.msk.f32.vlgmr.msra.gmra.mrb[36].mxu1 %vm407_vm0, %v2380_v38  ;;  %2940 = vmatpush3.bf16.msra.mxu0 %v3475_v23 }
  0xd3   : >> { %2825 = vmatprep.mubr.msk.f32.mxu0 %vm3079_vm2, %v3080_v57  ;;  %2943 = vmatpush3.bf16.msra.mxu1 %v3513_v29 }
  0xd4   : >> { %2838 = vmatprep.mubr.msk.f32.mxu1 %vm3079_vm2, %v3080_v57  ;;  %2944 = vmatprep.subr.bf16.mxu0 %v3078_v55 }
  0xd5   : >> { %2947 = vmatprep.subr.bf16.mxu1 %v3078_v55  ;;  %2826 = vmatmul.mubr.msk.f32.gmra.mrb[38].mxu0 %vm407_vm0, %v2375_v39 }
  0xd6   : >> { %2839 = vmatmul.mubr.msk.f32.gmra.mrb[38].mxu1 %vm407_vm0, %v2381_v40  ;;  %2828 = vmatprep.mubr.msk.f32.mxu0 %vm3079_vm2, %v3080_v57 }
  0xd7   : >> { %2841 = vmatprep.mubr.msk.f32.mxu1 %vm3079_vm2, %v3080_v57 }
  0xd9   : >> { %2829 = vmatmul.mubr.msk.f32.gmra.mrb[40].mxu0 %vm407_vm0, %v2376_v41 }
  0xda   : >> { %2842 = vmatmul.mubr.msk.f32.gmra.mrb[40].mxu1 %vm407_vm0, %v2382_v42  ;;  %2848 = vmatprep.mubr.msk.f32.mxu0 %vm3079_vm2, %v3080_v57 }
  0xdb   : >> { %2861 = vmatprep.mubr.msk.f32.mxu1 %vm3079_vm2, %v3080_v57 }
  0xdd   : >> { %2849 = vmatmul.mubr.msk.f32.vlgmr.msra.gmra.mrb[42].mxu0 %vm407_vm0, %v2386_v43 }
  0xde   : >> { %2862 = vmatmul.mubr.msk.f32.vlgmr.msra.gmra.mrb[42].mxu1 %vm407_vm0, %v2413_v46  ;;  %2946 = vmatpush3.bf16.msra.mxu0 %v3520_v31 }
  0xdf   : >> { %2851 = vmatprep.mubr.msk.f32.mxu0 %vm3079_vm2, %v3080_v57  ;;  %2949 = vmatpush3.bf16.msra.mxu1 %v3555_v37 }
  0xe0   : >> { %2864 = vmatprep.mubr.msk.f32.mxu1 %vm3079_vm2, %v3080_v57 }
  0xe1   : >> { %2852 = vmatmul.mubr.msk.f32.gmra.mrb[44].mxu0 %vm407_vm0, %v2387_v44 }
  0xe2   : >> { %2865 = vmatmul.mubr.msk.f32.gmra.mrb[44].mxu1 %vm407_vm0, %v2414_v47  ;;  %2854 = vmatprep.mubr.msk.f32.mxu0 %vm3079_vm2, %v3080_v57 }
  0xe3   : >> { %2867 = vmatprep.mubr.msk.f32.mxu1 %vm3079_vm2, %v3080_v57 }
  0xe5   : >> { %2855 = vmatmul.mubr.msk.f32.gmra.mrb[46].mxu0 %vm407_vm0, %v2388_v45 }
  0xe6   : >> { %2868 = vmatmul.mubr.msk.f32.gmra.mrb[46].mxu1 %vm407_vm0, %v2415_v48  ;;  %2874 = vmatprep.mubr.msk.f32.mxu0 %vm3079_vm2, %v3080_v57 }
  0xe7   : >> { %2887 = vmatprep.mubr.msk.f32.mxu1 %vm3079_vm2, %v3080_v57 }
  0xe9   : >> { %2875 = vmatmul.mubr.msk.f32.vlgmr.msra.gmra.mrb[48].mxu0 %vm407_vm0, %v2419_v49 }
  0xea   : >> { %2888 = vmatmul.mubr.msk.f32.vlgmr.msra.gmra.mrb[48].mxu1 %vm407_vm0, %v2425_v50  ;;  %2877 = vmatprep.mubr.msk.f32.mxu0 %vm3079_vm2, %v3080_v57 }
  0xeb   : >> { %2890 = vmatprep.mubr.msk.f32.mxu1 %vm3079_vm2, %v3080_v57 }
  0xed   : >> { %2878 = vmatmul.mubr.msk.f32.gmra.mrb[50].mxu0 %vm407_vm0, %v2420_v51 }
  0xee   : >> { %2891 = vmatmul.mubr.msk.f32.gmra.mrb[50].mxu1 %vm407_vm0, %v2426_v52  ;;  %2880 = vmatprep.mubr.msk.f32.mxu0 %vm3079_vm2, %v3080_v57 }
  0xef   : >> { %2893 = vmatprep.mubr.msk.f32.mxu1 %vm3079_vm2, %v3080_v57 }
  0xf1   : >> { %2881 = vmatmul.mubr.msk.f32.gmra.mrb[52].mxu0 %vm407_vm0, %v2421_v53 }
  0xf2   : >> { %2894 = vmatmul.mubr.msk.f32.gmra.mrb[52].mxu1 %vm407_vm0, %v2427_v54 }
 0x15c   : >> { %v630_v55 = vpop.f32.mrb[0].mxu0 }
 0x15d   : >> { %v719_v56 = vpop.f32.mrb[0].mxu1  ;;  %v2668_v58 = vpop.f32.mrb[1].mxu0 }
 0x15e   : >> { %v720_v59 = vadd.f32 %v719_v56, %v630_v55  ;;  %v2681_v60 = vpop.f32.mrb[1].mxu1 }
 0x160   : >> { %v635_v61 = vpop.f32.mrb[2].mxu0 }
 0x161   : >> { %v724_v62 = vpop.f32.mrb[2].mxu1  ;;  %v2671_v63 = vpop.f32.mrb[3].mxu0 }
 0x162   : >> { %v725_v19 = vadd.f32 %v724_v62, %v635_v61  ;;  %v2684_v20 = vpop.f32.mrb[3].mxu1 }
 0x164   : >> { %v640_v21 = vpop.f32.mrb[4].mxu0 }
 0x165   : >> { %v729_v22 = vpop.f32.mrb[4].mxu1  ;;  %v2674_v23 = vpop.f32.mrb[5].mxu0 }
 0x166   : >> { %v730_v24 = vadd.f32 %v729_v22, %v640_v21  ;;  %v2687_v57 = vpop.f32.mrb[5].mxu1 }
 0x168   : >> { %v811_v25 = vpop.f32.mrb[6].mxu0 }
 0x169   : >> { %v909_v26 = vpop.f32.mrb[6].mxu1  ;;  %v825_v27 = vadd.f32 %v811_v25, %v720_v59  ;;  %v2694_v28 = vpop.f32.mrb[7].mxu0 }
 0x16a   : >> { %v2707_v29 = vpop.f32.mrb[7].mxu1 }
 0x16b   : >> { %v923_v30 = vadd.f32 %v909_v26, %v825_v27 }
 0x16c   : >> { %v816_v31 = vpop.f32.mrb[8].mxu0 }
 0x16d   : >> { %v914_v32 = vpop.f32.mrb[8].mxu1  ;;  %v826_v33 = vadd.f32 %v816_v31, %v725_v19  ;;  %v2697_v34 = vpop.f32.mrb[9].mxu0 }
 0x16e   : >> { %v2710_v35 = vpop.f32.mrb[9].mxu1 }
 0x16f   : >> { %v924_v36 = vadd.f32 %v914_v32, %v826_v33 }
 0x170   : >> { %v821_v37 = vpop.f32.mrb[10].mxu0 }
 0x171   : >> { %v919_v38 = vpop.f32.mrb[10].mxu1  ;;  %v827_v39 = vadd.f32 %v821_v37, %v730_v24  ;;  %v2700_v40 = vpop.f32.mrb[11].mxu0 }
 0x172   : >> { %v2713_v41 = vpop.f32.mrb[11].mxu1 }
 0x173   : >> { %v925_v42 = vadd.f32 %v919_v38, %v827_v39 }
 0x174   : >> { %v1004_v43 = vpop.f32.mrb[12].mxu0 }
 0x175   : >> { %v1099_v44 = vpop.f32.mrb[12].mxu1  ;;  %v1018_v45 = vadd.f32 %v1004_v43, %v923_v30  ;;  %v2720_v46 = vpop.f32.mrb[13].mxu0 }
 0x176   : >> { %v2733_v47 = vpop.f32.mrb[13].mxu1 }
 0x177   : >> { %v1113_v48 = vadd.f32 %v1099_v44, %v1018_v45 }
 0x178   : >> { %v1009_v49 = vpop.f32.mrb[14].mxu0 }
 0x179   : >> { %v1104_v50 = vpop.f32.mrb[14].mxu1  ;;  %v1019_v51 = vadd.f32 %v1009_v49, %v924_v36  ;;  %v2723_v52 = vpop.f32.mrb[15].mxu0 }
 0x17a   : >> { %v2736_v53 = vpop.f32.mrb[15].mxu1 }
 0x17b   : >> { %v1114_v54 = vadd.f32 %v1104_v50, %v1019_v51 }
 0x17c   : >> { %v1014_v55 = vpop.f32.mrb[16].mxu0 }
 0x17d   : >> { %v1109_v56 = vpop.f32.mrb[16].mxu1  ;;  %v1020_v58 = vadd.f32 %v1014_v55, %v925_v42  ;;  %v2726_v59 = vpop.f32.mrb[17].mxu0 }
 0x17e   : >> { %v2739_v60 = vpop.f32.mrb[17].mxu1 }
 0x17f   : >> { %v1115_v61 = vadd.f32 %v1109_v56, %v1020_v58 }
 0x180   : >> { %v1197_v62 = vpop.f32.mrb[18].mxu0 }
 0x181   : >> { %v1292_v63 = vpop.f32.mrb[18].mxu1  ;;  %v1211_v19 = vadd.f32 %v1197_v62, %v1113_v48  ;;  %v2746_v20 = vpop.f32.mrb[19].mxu0 }
 0x182   : >> { %v2759_v21 = vpop.f32.mrb[19].mxu1 }
 0x183   : >> { %v1306_v22 = vadd.f32 %v1292_v63, %v1211_v19 }
 0x184   : >> { %v1202_v23 = vpop.f32.mrb[20].mxu0 }
 0x185   : >> { %v1297_v24 = vpop.f32.mrb[20].mxu1  ;;  %v1212_v57 = vadd.f32 %v1202_v23, %v1114_v54  ;;  %v2749_v25 = vpop.f32.mrb[21].mxu0 }
 0x186   : >> { %v2762_v26 = vpop.f32.mrb[21].mxu1 }
 0x187   : >> { %v1307_v27 = vadd.f32 %v1297_v24, %v1212_v57 }
 0x188   : >> { %v1207_v28 = vpop.f32.mrb[22].mxu0 }
 0x189   : >> { %v1302_v29 = vpop.f32.mrb[22].mxu1  ;;  %v1213_v30 = vadd.f32 %v1207_v28, %v1115_v61  ;;  %v2752_v31 = vpop.f32.mrb[23].mxu0 }
 0x18a   : >> { %v2765_v32 = vpop.f32.mrb[23].mxu1 }
 0x18b   : >> { %v1308_v33 = vadd.f32 %v1302_v29, %v1213_v30 }
 0x18c   : >> { %v1387_v34 = vpop.f32.mrb[24].mxu0 }
 0x18d   : >> { %v1482_v35 = vpop.f32.mrb[24].mxu1  ;;  %v3701_v36 = vadd.f32 %v1387_v34, %v1306_v22  ;;  %v2772_v37 = vpop.f32.mrb[25].mxu0 }
 0x18e   : >> { %v2785_v38 = vpop.f32.mrb[25].mxu1 }
 0x190   : >> { %v1392_v39 = vpop.f32.mrb[26].mxu0 }
 0x191   : >> { %v1487_v40 = vpop.f32.mrb[26].mxu1  ;;  %v3703_v41 = vadd.f32 %v1392_v39, %v1307_v27  ;;  %v2775_v42 = vpop.f32.mrb[27].mxu0 }
 0x192   : >> { %v2788_v43 = vpop.f32.mrb[27].mxu1 }
 0x194   : >> { %v1397_v44 = vpop.f32.mrb[28].mxu0 }
 0x195   : >> { %v1492_v45 = vpop.f32.mrb[28].mxu1  ;;  %v3705_v46 = vadd.f32 %v1397_v44, %v1308_v33  ;;  %v2778_v47 = vpop.f32.mrb[29].mxu0 }
 0x196   : >> { %v2791_v48 = vpop.f32.mrb[29].mxu1 }
 0x198   : >> { %v1562_v49 = vpop.f32.mrb[30].mxu0 }
 0x199   : >> { %v1642_v50 = vpop.f32.mrb[30].mxu1  ;;  %v1563_v51 = vadd.f32 %v1562_v49, %v1482_v35  ;;  %v2798_v52 = vpop.f32.mrb[31].mxu0 }
 0x19a   : >> { %v2811_v53 = vpop.f32.mrb[31].mxu1 }
 0x19b   : >> { %v1656_v54 = vadd.f32 %v1642_v50, %v1563_v51 }
 0x19c   : >> { %v1567_v55 = vpop.f32.mrb[32].mxu0 }
 0x19d   : >> { %v1647_v56 = vpop.f32.mrb[32].mxu1  ;;  %v1568_v58 = vadd.f32 %v1567_v55, %v1487_v40  ;;  %v2801_v59 = vpop.f32.mrb[33].mxu0 }
 0x19e   : >> { %v2814_v60 = vpop.f32.mrb[33].mxu1 }
 0x19f   : >> { %v1657_v61 = vadd.f32 %v1647_v56, %v1568_v58 }
 0x1a0   : >> { %v1572_v62 = vpop.f32.mrb[34].mxu0 }
 0x1a1   : >> { %v1652_v63 = vpop.f32.mrb[34].mxu1  ;;  %v1573_v19 = vadd.f32 %v1572_v62, %v1492_v45  ;;  %v2804_v20 = vpop.f32.mrb[35].mxu0 }
 0x1a2   : >> { %v2817_v21 = vpop.f32.mrb[35].mxu1 }
 0x1a3   : >> { %v1658_v22 = vadd.f32 %v1652_v63, %v1573_v19 }
 0x1a4   : >> { %v1725_v23 = vpop.f32.mrb[36].mxu0 }
 0x1a5   : >> { %v1808_v24 = vpop.f32.mrb[36].mxu1  ;;  %v1739_v57 = vadd.f32 %v1725_v23, %v1656_v54  ;;  %v2824_v25 = vpop.f32.mrb[37].mxu0 }
 0x1a6   : >> { %v2837_v26 = vpop.f32.mrb[37].mxu1 }
 0x1a7   : >> { %v1822_v27 = vadd.f32 %v1808_v24, %v1739_v57 }
 0x1a8   : >> { %v1730_v28 = vpop.f32.mrb[38].mxu0 }
 0x1a9   : >> { %v1813_v29 = vpop.f32.mrb[38].mxu1  ;;  %v1740_v30 = vadd.f32 %v1730_v28, %v1657_v61  ;;  %v2827_v31 = vpop.f32.mrb[39].mxu0 }
 0x1aa   : >> { %v2840_v32 = vpop.f32.mrb[39].mxu1 }
 0x1ab   : >> { %v1823_v33 = vadd.f32 %v1813_v29, %v1740_v30  ;;  %v1411_v30 = vadd.f32 %v3186_v0, %v3703_v41 }
 0x1ac   : >> { %v1735_v34 = vpop.f32.mrb[40].mxu0 }
 0x1ad   : >> { %v1818_v35 = vpop.f32.mrb[40].mxu1  ;;  %v1741_v37 = vadd.f32 %v1735_v34, %v1658_v22  ;;  %v2830_v38 = vpop.f32.mrb[41].mxu0  ;;  %v1410_v22 = vadd.f32 %v3186_v0, %v3701_v36 }
 0x1ae   : >> { %v2843_v39 = vpop.f32.mrb[41].mxu1 }
 0x1af   : >> { %v1824_v40 = vadd.f32 %v1818_v35, %v1741_v37  ;;  %v1413_v29 = vmax.f32 %v1410_v22, 0.0 }
 0x1b0   : >> { %v1891_v42 = vpop.f32.mrb[42].mxu0 }
 0x1b1   : >> { %v1989_v43 = vpop.f32.mrb[42].mxu1  ;;  %v1905_v44 = vadd.f32 %v1891_v42, %v1822_v27  ;;  %v2850_v45 = vpop.f32.mrb[43].mxu0  ;;  %v1412_v42 = vadd.f32 %v3186_v0, %v3705_v46 }
 0x1b2   : >> { %v2863_v47 = vpop.f32.mrb[43].mxu1 }
 0x1b3   : >> { %v2003_v48 = vadd.f32 %v1989_v43, %v1905_v44  ;;  %v1415_v47 = vmax.f32 %v1412_v42, 0.0 }
 0x1b4   : >> { %v1896_v49 = vpop.f32.mrb[44].mxu0 }
 0x1b5   : >> { %v1994_v50 = vpop.f32.mrb[44].mxu1  ;;  %v1906_v51 = vadd.f32 %v1896_v49, %v1823_v33  ;;  %v2853_v52 = vpop.f32.mrb[45].mxu0 }
 0x1b6   : >> { %v2866_v53 = vpop.f32.mrb[45].mxu1 }
 0x1b7   : >> { %v2004_v54 = vadd.f32 %v1994_v50, %v1906_v51 }
 0x1b8   : >> { %v1901_v55 = vpop.f32.mrb[46].mxu0 }
 0x1b9   : >> { %v1999_v56 = vpop.f32.mrb[46].mxu1  ;;  %v1907_v58 = vadd.f32 %v1901_v55, %v1824_v40  ;;  %v2856_v59 = vpop.f32.mrb[47].mxu0  ;;  %v1414_v40 = vmax.f32 %v1411_v30, 0.0 }
 0x1ba   : >> { %v2869_v60 = vpop.f32.mrb[47].mxu1 }
 0x1bb   : >> { %v2005_v61 = vadd.f32 %v1999_v56, %v1907_v58 }
 0x1bc   : >> { %v2084_v62 = vpop.f32.mrb[48].mxu0 }
 0x1bd   : >> { %v2179_v63 = vpop.f32.mrb[48].mxu1  ;;  %v2098_v19 = vadd.f32 %v2084_v62, %v2003_v48  ;;  %v2876_v20 = vpop.f32.mrb[49].mxu0 }
 0x1be   : >> { %v2889_v21 = vpop.f32.mrb[49].mxu1 }
 0x1bf   : >> { %v2193_v23 = vadd.f32 %v2179_v63, %v2098_v19 }
 0x1c0   : >> { %v2089_v24 = vpop.f32.mrb[50].mxu0 }
 0x1c1   : >> { %v2184_v57 = vpop.f32.mrb[50].mxu1  ;;  %v2196_v25 = vadd.f32 %v3186_v0, %v2193_v23  ;;  %v2099_v26 = vadd.f32 %v2089_v24, %v2004_v54  ;;  %v2879_v27 = vpop.f32.mrb[51].mxu0 }
 0x1c2   : >> { %v2892_v28 = vpop.f32.mrb[51].mxu1 }
 0x1c3   : >> { %v2199_v31 = vmax.f32 %v2196_v25, 0.0  ;;  %v2194_v32 = vadd.f32 %v2184_v57, %v2099_v26 }
 0x1c4   : >> { %v2094_v33 = vpop.f32.mrb[52].mxu0 }
 0x1c5   : >> { %v2189_v34 = vpop.f32.mrb[52].mxu1  ;;  %v2202_v35 = vmax.f32 %v1413_v29, %v2199_v31  ;;  %v2197_v36 = vadd.f32 %v3186_v0, %v2194_v32  ;;  %v2100_v37 = vadd.f32 %v2094_v33, %v2005_v61  ;;  %v2882_v38 = vpop.f32.mrb[53].mxu0 }
 0x1c6   : >> { %v2895_v39 = vpop.f32.mrb[53].mxu1 }
 0x1c7   : >> { %2206 = vst.msk [vmem:[#allocation3] sm:$0xff] %vm2205_vm3, %v2202_v35  ;;  %v2200_v41 = vmax.f32 %v2197_v36, 0.0  ;;  %v2195_v43 = vadd.f32 %v2189_v34, %v2100_v37 }
 0x1c9   : >> { %v2203_v44 = vmax.f32 %v1414_v40, %v2200_v41  ;;  %v2198_v45 = vadd.f32 %v3186_v0, %v2195_v43 }
 0x1cb   : >> { %2207 = vst.msk [vmem:[#allocation3 + $0x8] sm:$0xff] %vm2205_vm3, %v2203_v44  ;;  %v2201_v48 = vmax.f32 %v2198_v45, 0.0 }
 0x1cd   : >> { %v2204_v49 = vmax.f32 %v1415_v47, %v2201_v48 }
 0x1cf   : >> { %2208 = vst.msk [vmem:[#allocation3 + $0x10] sm:$0xff] %vm2205_vm3, %v2204_v49 }
 0x1d2   : >> { %v2209_v50 = vld [vmem:[#allocation3] ss:$2 sm:$0xff]  ;;  %v2213_v51 = vld [vmem:[#allocation3 + $0x1] ss:$2 sm:$0xff] }
 0x1d3   : >> { %v2216_v52 = vmax.f32 %v2209_v50, %v2213_v51 }
 0x1d5   : >> { %v2440_v46 = vpack.c.bf16 %v2216_v52, %v2216_v52  ;;  %544 = sbr.rel (!%p542_p5) target bundleno = 130 (0x82), region = 94 }
 0x1d6   : >> { %v2211_v53 = vld [vmem:[#allocation3 + $0x10] ss:$2 sm:$0xf]  ;;  %v2215_v54 = vld [vmem:[#allocation3 + $0x11] ss:$2 sm:$0xf] }
 0x1d7   : >> { %2229 = vst.msk [vmem:[%s2227_s29] sm:$0xf] %vm2228_vm4, %v2440_v46  ;;  %v2217_v55 = vmax.f32 %v2211_v53, %v2215_v54 }
 0x1d9   : >> { %v2441_v56 = vpack.c.bf16 %v2217_v55, %v2217_v55 }
 0x1db   : >> { %2231 = vst.msk [vmem:[%s2227_s29 + $0x4] sm:$0x3] %vm2230_vm5, %v2441_v56 }
 0x1dc PF: > { %s15_s12 = sadd.s32 1, %s3068_s12  }
 0x1dd   : > { %p12_p10 = scmp.ge.s32.totalorder %s15_s12, 4  }
 0x1df   :  { %14 = sbr.rel (!%p12_p10) target bundleno = 2 (0x2), region = 105 }
 0x1e6   :  { %2253 = vsyncpa [#allocation5], 1 }
 0x1e7   :  { %2255 = vsyncpa [#allocation5 + $0x1], 1 }
 0x1e8   :  { %2256 = vsyncpa [#allocation7], 1 }

// kernel: conv1_forward.10
= control target key start
LH: loop header
LB: loop body
LE: loop exit
PB: predicated region body
PF: predicated region fallthrough
CT: control target
= control target key end

     0   :  { %8 = vsyncpa [#allocation5], 0  ;;  %s3398_s0 = inlined_call_operand.vmem [shape: bf16[2,10,10,64], index: 0, kind: input, shape index: {}]   ;;  %s3399_s1 = inlined_call_operand.hbm [shape: f32[9,64,128], index: 1, kind: input, shape index: {}]   ;;  %s3400_s2 = inlined_call_operand.hbm [shape: f32[1,128], index: 2, kind: input, shape index: {}]   ;;  %s3401_s3 = inlined_call_operand.vmem [shape: bf16[2,4,4,128], index: 3, kind: output, shape index: {}]  }
   0x1   :  { %9 = vsyncpa [#allocation7], 0  ;;  %s2726_s12 = smov 0  }
   0x2 LB: > { %s2732_s13 = sadd.s32 4294967295, %s2693_s12   ;;  %p1802_p0 = scmp.ge.s32.totalorder %s2693_s12, 1  ;;  %s2693_s12 = sphi %s2726_s12, %s15_s12  }
   0x3   : > { %p114_p1 = scmp.lt.s32.totalorder %s2693_s12, 3  ;;  %s2699_s14 = smov [#allocation4]  }
   0x4   : > { %s126_s15 = sshll.u32 %s2699_s14, 4  ;;  %p3402_p3 = scmp.eq.s32.totalorder %s2732_s13, 0  ;;  %s127_s15 = int_to_ptr.vmem [resolvable:$true] %s126_s15 }
   0x5   : > { %p2736_p2 = pnand %p1802_p0, %p114_p1  ;;  %s2700_s17 = smov [#allocation6]  }
   0x6   : > { %s140_s18 = sshll.u32 %s2700_s17, 4  ;;  %s2619_s22 = scalar_lea.hbm %s3399_s1, 9216  ;;  %s2749_s18 = int_to_ptr.vmem [resolvable:$true] %s140_s18 }
   0x7   : > { %s3407_s16 = scalar_select %p2736_p2, 1, 0 }
   0x8   : > { %p2585_p4 = pneg %p2736_p2  ;;  %p2620_p6 = scmp.ne.s32.totalorder %s3399_s1, %s2619_s22 }
   0x9   : > { %p2626_p10 = scmp.lt.u32.totalorder %s2619_s22, %s3399_s1 }
   0xa   : > { %p2745_p5 = pnand %p3402_p3, %p2585_p4 }
   0xc   : > { %p2621_p7 = pneg %p2745_p5 }
   0xe   : > { %p2622_p8 = pnand %p2621_p7, %p2620_p6 }
  0x10   : > { %p2623_p9 = pneg %p2622_p8 }
  0x12   : > { %p2628_p11 = pnand %p2626_p10, %p2623_p9 }
  0x14   : > { %2631 = shalt.err (!%p2628_p11)
}
  0x15   : > { %s2632_s27 = scalar_lea.vmem %s127_s15, 9216  ;;  %p2640_p1 = scmp.lt.s32.totalorder %s127_s15, %s127_s15 }
  0x16   : > { %p2633_p12 = scmp.ne.s32.totalorder %s127_s15, %s2632_s27  ;;  %p2641_p4 = scmp.lt.s32.totalorder %s2632_s27, %s2632_s27 }
  0x18   : > { %p2635_p13 = pnand %p2633_p12, %p2621_p7  ;;  %p2642_p3 = por %p2641_p4, %p2640_p1 }
  0x1a   : > { %p2636_p0 = pneg %p2635_p13 }
  0x1c   : > { %p2643_p2 = pnand %p2642_p3, %p2636_p0 }
  0x1e   : > { %2646 = shalt.err (!%p2643_p2)
}
  0x1f   : > { %s2701_s28 = smov 128   ;;  %s2702_s29 = smov 8  }
  0x20   : > { %2588 = dma.hbm_to_vmem [thread:$0]  (!%p2745_p5), %s3399_s1, 9216, %s127_s15, [#allocation5], %s2701_s28, %s2701_s28, %s2702_s29  }
  0x21   : > { %s2647_s7 = scalar_lea.hbm %s3400_s2, 16 }
  0x22   : > { %p2648_p6 = scmp.ne.s32.totalorder %s3400_s2, %s2647_s7  ;;  %p2654_p8 = scmp.lt.u32.totalorder %s2647_s7, %s3400_s2 }
  0x24   : > { %p2650_p2 = pnand %p2648_p6, %p2621_p7 }
  0x26   : > { %p2651_p3 = pneg %p2650_p2 }
  0x28   : > { %p2656_p9 = pnand %p2654_p8, %p2651_p3 }
  0x2a   : > { %2659 = shalt.err (!%p2656_p9)
}
  0x2b   : > { %s2660_s14 = scalar_lea.vmem %s2749_s18, 16  ;;  %s2667_s15 = scalar_lea.vmem %s2749_s18, 32 }
  0x2c   : > { %p2661_p10 = scmp.ne.s32.totalorder %s2749_s18, %s2660_s14  ;;  %p2668_p13 = scmp.lt.s32.totalorder %s2749_s18, %s2749_s18 }
  0x2d   : > { %p2669_p0 = scmp.lt.s32.totalorder %s2667_s15, %s2660_s14 }
  0x2e   : > { %p2663_p11 = pnand %p2661_p10, %p2621_p7 }
  0x2f   : > { %p2670_p1 = por %p2669_p0, %p2668_p13 }
  0x30   : > { %p2664_p12 = pneg %p2663_p11 }
  0x32   : > { %p2671_p4 = pnand %p2670_p1, %p2664_p12 }
  0x34   : > { %2674 = shalt.err (!%p2671_p4)
}
  0x35   : > { %2591 = dma.hbm_to_vmem [thread:$0]  (!%p2745_p5), %s3400_s2, 16, %s2749_s18, [#allocation7]  }
  0x36   : > { %p3409_p6 = scmp.ne.s32.totalorder %s3407_s16, 0 }
  0x37   : > { %p3410_p7 = scmp.eq.s32.totalorder (!%p3409_p6), %s2732_s13, 0 }
  0x38   : > { %161 = sbr.rel (%p3409_p6) target bundleno = 496 (0x1f0), region = 32 }
  0x3f   : > { %2684 = dma.done.wait (%p3410_p7), [#allocation5], 9216   ;;  %p3411_p2 = pmov %p3410_p7 }
  0x41   : > { %2686 = vsyncadd (%p3411_p2), [#allocation5], 4294958080  ;;  %p3412_p3 = pmov %p3411_p2 }
  0x42   : > { %p3413_p8 = pmov %p3411_p2 }
  0x43   : > { %2688 = dma.done.wait (%p3412_p3), [#allocation7], 16  }
  0x44   : > { %2690 = vsyncadd (%p3413_p8), [#allocation7], 4294967280  ;;  %p189_p9 = scmp.lt.s32.totalorder %s2732_s13, 1  ;;  %v2819_v0 = vld [vmem:[#allocation6] ss:$0 sm:$0xff]  ;;  %v2823_v2 = vld [vmem:[#allocation4 + $0x8] sm:$0xff] }
  0x45   : > { %3414 = vst [vmem:[#allocation10_spill] sm:$0xff] %v2819_v0  ;;  %v2821_v1 = vld [vmem:[#allocation4] sm:$0xff]  ;;  %3416 = vst [vmem:[#allocation12_spill] sm:$0xff] %v2823_v2  ;;  %v2825_v3 = vld [vmem:[#allocation4 + $0x10] sm:$0xff]  ;;  %vm239_vm0 = vcmask 523264   ;;  %vm241_vm1 = vcmask 517120  }
  0x46   : > { %s3526_s13 = smov (!%p189_p9, %s2732_s13), 1  ;;  %3415 = vst [vmem:[#allocation11_spill] sm:$0xff] %v2821_v1  ;;  %3417 = vst [vmem:[#allocation13_spill] sm:$0xff] %v2825_v3  ;;  %v2827_v4 = vld [vmem:[#allocation4 + $0x18] sm:$0xff]  ;;  %v2829_v5 = vld [vmem:[#allocation4 + $0x20] sm:$0xff]  ;;  %s3006_s25 = smov 0  }
  0x47   : > { %s1851_s16 = sshll.u32 %s3526_s13, 3  ;;  %3418 = vst [vmem:[#allocation14_spill] sm:$0xff] %v2827_v4  ;;  %3419 = vst [vmem:[#allocation15_spill] sm:$0xff] %v2829_v5  ;;  %v2831_v6 = vld [vmem:[#allocation4 + $0x28] sm:$0xff]  ;;  %v2833_v7 = vld [vmem:[#allocation4 + $0x30] sm:$0xff]  ;;  %s2576_s22 = smul.u32 80, %s3526_s13 }
  0x48   : > { %s2817_s21 = scalar_lea.vmem %s3401_s3, %s1851_s16  ;;  %3420 = vst [vmem:[#allocation16_spill] sm:$0xff] %v2831_v6  ;;  %3421 = vst [vmem:[#allocation17_spill] sm:$0xff] %v2833_v7  ;;  %v2835_v8 = vld [vmem:[#allocation4 + $0x38] sm:$0xff]  ;;  %v2837_v9 = vld [vmem:[#allocation4 + $0x40] sm:$0xff] }
  0x49   : > { %3422 = vst [vmem:[#allocation18_spill] sm:$0xff] %v2835_v8  ;;  %3423 = vst [vmem:[#allocation19_spill] sm:$0xff] %v2837_v9  ;;  %v2839_v10 = vld [vmem:[#allocation4 + $0x48] sm:$0xff]  ;;  %v2841_v11 = vld [vmem:[#allocation4 + $0x50] sm:$0xff]  ;;  %s2955_s24 = scalar_lea.vmem %s3398_s0, %s2576_s22 }
  0x4a   : > { %3424 = vst [vmem:[#allocation20_spill] sm:$0xff] %v2839_v10  ;;  %3425 = vst [vmem:[#allocation21_spill] sm:$0xff] %v2841_v11  ;;  %v2843_v12 = vld [vmem:[#allocation4 + $0x58] sm:$0xff]  ;;  %v2845_v13 = vld [vmem:[#allocation4 + $0x60] sm:$0xff] }
  0x4b   : > { %3426 = vst [vmem:[#allocation22_spill] sm:$0xff] %v2843_v12  ;;  %3427 = vst [vmem:[#allocation23_spill] sm:$0xff] %v2845_v13  ;;  %v2847_v14 = vld [vmem:[#allocation4 + $0x68] sm:$0xff]  ;;  %v2849_v15 = vld [vmem:[#allocation4 + $0x70] sm:$0xff] }
  0x4c   : > { %3428 = vst [vmem:[#allocation24_spill] sm:$0xff] %v2847_v14  ;;  %3429 = vst [vmem:[#allocation25_spill] sm:$0xff] %v2849_v15  ;;  %v2851_v16 = vld [vmem:[#allocation4 + $0x78] sm:$0xff]  ;;  %v2853_v17 = vld [vmem:[#allocation4 + $0x80] sm:$0xff] }
  0x4d   : > { %3430 = vst [vmem:[#allocation26_spill] sm:$0xff] %v2851_v16  ;;  %3431 = vst [vmem:[#allocation27_spill] sm:$0xff] %v2853_v17  ;;  %v2855_v18 = vld [vmem:[#allocation4 + $0x88] sm:$0xff]  ;;  %v2857_v19 = vld [vmem:[#allocation4 + $0x90] sm:$0xff] }
  0x4e   : > { %3432 = vst [vmem:[#allocation28_spill] sm:$0xff] %v2855_v18  ;;  %3433 = vst [vmem:[#allocation29_spill] sm:$0xff] %v2857_v19  ;;  %v2859_v20 = vld [vmem:[#allocation4 + $0x98] sm:$0xff]  ;;  %v2861_v21 = vld [vmem:[#allocation4 + $0xa0] sm:$0xff] }
  0x4f   : > { %3434 = vst [vmem:[#allocation30_spill] sm:$0xff] %v2859_v20  ;;  %3435 = vst [vmem:[#allocation31_spill] sm:$0xff] %v2861_v21  ;;  %v2863_v22 = vld [vmem:[#allocation4 + $0xa8] sm:$0xff]  ;;  %v2865_v23 = vld [vmem:[#allocation4 + $0xb0] sm:$0xff] }
  0x50   : > { %3436 = vst [vmem:[#allocation32_spill] sm:$0xff] %v2863_v22  ;;  %3437 = vst [vmem:[#allocation33_spill] sm:$0xff] %v2865_v23  ;;  %v2867_v24 = vld [vmem:[#allocation4 + $0xb8] sm:$0xff]  ;;  %v2869_v25 = vld [vmem:[#allocation4 + $0xc0] sm:$0xff] }
  0x51   : > { %3438 = vst [vmem:[#allocation34_spill] sm:$0xff] %v2867_v24  ;;  %3439 = vst [vmem:[#allocation35_spill] sm:$0xff] %v2869_v25  ;;  %v2871_v26 = vld [vmem:[#allocation4 + $0xc8] sm:$0xff]  ;;  %v2873_v27 = vld [vmem:[#allocation4 + $0xd0] sm:$0xff] }
  0x52   : > { %3440 = vst [vmem:[#allocation36_spill] sm:$0xff] %v2871_v26  ;;  %3441 = vst [vmem:[#allocation37_spill] sm:$0xff] %v2873_v27  ;;  %v2875_v28 = vld [vmem:[#allocation4 + $0xd8] sm:$0xff]  ;;  %v2877_v29 = vld [vmem:[#allocation4 + $0xe0] sm:$0xff] }
  0x53   : > { %v2879_v30 = vld [vmem:[#allocation4 + $0xe8] sm:$0xff]  ;;  %v2881_v31 = vld [vmem:[#allocation4 + $0xf0] sm:$0xff]  ;;  %v2883_v32 = vld [vmem:[#allocation4 + $0xf8] sm:$0xff] }
  0x54   : > { %v2885_v33 = vld [vmem:[#allocation4 + $0x100] sm:$0xff]  ;;  %v2887_v34 = vld [vmem:[#allocation4 + $0x108] sm:$0xff]  ;;  %v2889_v35 = vld [vmem:[#allocation4 + $0x110] sm:$0xff] }
  0x55   : > { %v2891_v36 = vld [vmem:[#allocation4 + $0x118] sm:$0xff]  ;;  %v2893_v37 = vld [vmem:[#allocation4 + $0x120] sm:$0xff]  ;;  %v2895_v38 = vld [vmem:[#allocation4 + $0x128] sm:$0xff] }
  0x56   : > { %v2897_v39 = vld [vmem:[#allocation4 + $0x130] sm:$0xff]  ;;  %v2899_v40 = vld [vmem:[#allocation4 + $0x138] sm:$0xff]  ;;  %v2901_v41 = vld [vmem:[#allocation4 + $0x140] sm:$0xff] }
  0x57   : > { %3442 = vst [vmem:[#allocation38_spill] sm:$0xff] %v2899_v40  ;;  %v2903_v42 = vld [vmem:[#allocation4 + $0x148] sm:$0xff]  ;;  %v2905_v43 = vld [vmem:[#allocation4 + $0x150] sm:$0xff]  ;;  %v2907_v44 = vld [vmem:[#allocation4 + $0x158] sm:$0xff] }
  0x58   : > { %v2909_v45 = vld [vmem:[#allocation4 + $0x160] sm:$0xff]  ;;  %v2911_v46 = vld [vmem:[#allocation4 + $0x168] sm:$0xff]  ;;  %v2913_v47 = vld [vmem:[#allocation4 + $0x170] sm:$0xff] }
  0x59   : > { %3443 = vst [vmem:[#allocation39_spill] sm:$0xff] %v2913_v47  ;;  %v2915_v48 = vld [vmem:[#allocation4 + $0x178] sm:$0xff]  ;;  %v2917_v49 = vld [vmem:[#allocation4 + $0x180] sm:$0xff]  ;;  %v2919_v50 = vld [vmem:[#allocation4 + $0x188] sm:$0xff] }
  0x5a   : > { %3444 = vst [vmem:[#allocation40_spill] sm:$0xff] %v2915_v48  ;;  %3445 = vst [vmem:[#allocation41_spill] sm:$0xff] %v2917_v49  ;;  %v2921_v51 = vld [vmem:[#allocation4 + $0x190] sm:$0xff]  ;;  %v2923_v52 = vld [vmem:[#allocation4 + $0x198] sm:$0xff] }
  0x5b   : > { %3446 = vst [vmem:[#allocation42_spill] sm:$0xff] %v2919_v50  ;;  %3447 = vst [vmem:[#allocation43_spill] sm:$0xff] %v2921_v51  ;;  %v2925_v53 = vld [vmem:[#allocation4 + $0x1a0] sm:$0xff]  ;;  %v2928_v54 = vld [vmem:[#allocation4 + $0x1a8] sm:$0xff] }
  0x5c   : > { %3448 = vst [vmem:[#allocation44_spill] sm:$0xff] %v2923_v52  ;;  %3449 = vst [vmem:[#allocation45_spill] sm:$0xff] %v2925_v53  ;;  %v2930_v55 = vld [vmem:[#allocation4 + $0x1b0] sm:$0xff]  ;;  %v2932_v56 = vld [vmem:[#allocation4 + $0x1b8] sm:$0xff] }
  0x5d   : > { %3450 = vst [vmem:[#allocation46_spill] sm:$0xff] %v2928_v54  ;;  %3451 = vst [vmem:[#allocation47_spill] sm:$0xff] %v2930_v55  ;;  %v2934_v57 = vld [vmem:[#allocation4 + $0x1c0] sm:$0xff]  ;;  %v2936_v58 = vld [vmem:[#allocation4 + $0x1c8] sm:$0xff] }
  0x5e   : > { %3452 = vst [vmem:[#allocation48_spill] sm:$0xff] %v2932_v56  ;;  %3453 = vst [vmem:[#allocation49_spill] sm:$0xff] %v2934_v57  ;;  %v2938_v59 = vld [vmem:[#allocation4 + $0x1d0] sm:$0xff]  ;;  %v2940_v60 = vld [vmem:[#allocation4 + $0x1d8] sm:$0xff] }
  0x5f   : > { %3454 = vst [vmem:[#allocation50_spill] sm:$0xff] %v2936_v58  ;;  %3455 = vst [vmem:[#allocation51_spill] sm:$0xff] %v2938_v59  ;;  %v2942_v61 = vld [vmem:[#allocation4 + $0x1e0] sm:$0xff]  ;;  %v2944_v62 = vld [vmem:[#allocation4 + $0x1e8] sm:$0xff] }
  0x60   : > { %3456 = vst [vmem:[#allocation52_spill] sm:$0xff] %v2940_v60  ;;  %3457 = vst [vmem:[#allocation53_spill] sm:$0xff] %v2942_v61  ;;  %v2946_v63 = vld [vmem:[#allocation4 + $0x1f0] sm:$0xff]  ;;  %v2948_v0 = vld [vmem:[#allocation4 + $0x1f8] sm:$0xff] }
  0x61   : > { %3458 = vst [vmem:[#allocation54_spill] sm:$0xff] %v2944_v62  ;;  %3459 = vst [vmem:[#allocation55_spill] sm:$0xff] %v2946_v63  ;;  %v2950_v54 = vld [vmem:[#allocation4 + $0x200] sm:$0xff]  ;;  %v2957_v56 = vld [vmem:[#allocation4 + $0x208] sm:$0xff] }
  0x62   : > { %3460 = vst [vmem:[#allocation56_spill] sm:$0xff] %v2948_v0  ;;  %3461 = vst [vmem:[#allocation57_spill] sm:$0xff] %v2950_v54  ;;  %v2959_v55 = vld [vmem:[#allocation4 + $0x210] sm:$0xff]  ;;  %v2961_v62 = vld [vmem:[#allocation4 + $0x218] sm:$0xff] }
  0x63   : > { %3462 = vst [vmem:[#allocation58_spill] sm:$0xff] %v2957_v56  ;;  %3463 = vst [vmem:[#allocation59_spill] sm:$0xff] %v2959_v55  ;;  %v2963_v63 = vld [vmem:[#allocation4 + $0x220] sm:$0xff]  ;;  %v2965_v0 = vld [vmem:[#allocation4 + $0x228] sm:$0xff] }
  0x64   : > { %3464 = vst [vmem:[#allocation60_spill] sm:$0xff] %v2961_v62  ;;  %3465 = vst [vmem:[#allocation61_spill] sm:$0xff] %v2963_v63  ;;  %v2967_v54 = vld [vmem:[#allocation4 + $0x230] sm:$0xff]  ;;  %v2969_v61 = vld [vmem:[#allocation4 + $0x238] sm:$0xff] }
  0x65   : > { %3466 = vst [vmem:[#allocation62_spill] sm:$0xff] %v2965_v0  ;;  %3467 = vst [vmem:[#allocation63_spill] sm:$0xff] %v2967_v54  ;;  %v199_v53 = vld [vmem:[%s2955_s24] ss:$8 sps:$4 sm:$0xff]   ;;  %v200_v60 = vld [vmem:[%s2955_s24 + $0x4] sm:$0x1] }
  0x66   : > { %3468 = vst [vmem:[#allocation64_spill] sm:$0xff] %v2969_v61  ;;  %v219_v56 = vunpack.c.l.bf16 %v199_v53  ;;  %v220_v59 = vunpack.c.l.bf16 %v200_v60  ;;  %v221_v55 = vunpack.c.h.bf16 %v199_v53  ;;  %v202_v52 = vld [vmem:[%s2955_s24 + $0xc] sm:$0x1]  ;;  %v203_v62 = vld [vmem:[%s2955_s24 + $0x10] ss:$8 sps:$4 sm:$0xff]  }
  0x67   : > { %v204_v63 = vld [vmem:[%s2955_s24 + $0x14] sm:$0x1]  ;;  %v222_v0 = vunpack.c.l.bf16 %v202_v52  ;;  %v223_v54 = vunpack.c.l.bf16 %v203_v62  ;;  %v225_v58 = vunpack.c.h.bf16 %v203_v62  ;;  %v206_v57 = vld [vmem:[%s2955_s24 + $0x1c] sm:$0x1]  ;;  %v207_v50 = vld [vmem:[%s2955_s24 + $0x20] ss:$8 sps:$4 sm:$0xff]  }
  0x68   : > { %v224_v51 = vunpack.c.l.bf16 %v204_v63  ;;  %v208_v61 = vld [vmem:[%s2955_s24 + $0x24] sm:$0x1]  ;;  %240 = vst.msk [vmem:[#allocation2] sm:$0xff] %vm239_vm0, %v219_v56  ;;  %243 = vst.msk [vmem:[#allocation2 + $0x10] sm:$0xff] %vm239_vm0, %v221_v55  ;;  %v226_v53 = vunpack.c.l.bf16 %v206_v57  ;;  %v227_v60 = vunpack.c.l.bf16 %v207_v50  ;;  %v229_v52 = vunpack.c.h.bf16 %v207_v50  ;;  %v210_v48 = vld [vmem:[%s2955_s24 + $0x2c] sm:$0x1] }
  0x69   : > { %242 = vst.msk [vmem:[#allocation2 + $0x8] sm:$0x3] %vm241_vm1, %v220_v59  ;;  %v228_v49 = vunpack.c.l.bf16 %v208_v61  ;;  %v211_v47 = vld [vmem:[%s2955_s24 + $0x30] ss:$8 sps:$4 sm:$0xff]   ;;  %v212_v63 = vld [vmem:[%s2955_s24 + $0x34] sm:$0x1]  ;;  %v230_v55 = vunpack.c.l.bf16 %v210_v48 }
  0x6a   : > { %244 = vst.msk [vmem:[#allocation2 + $0x18] sm:$0x3] %vm241_vm1, %v222_v0  ;;  %246 = vst.msk [vmem:[#allocation2 + $0x28] sm:$0x3] %vm241_vm1, %v224_v51  ;;  %v231_v56 = vunpack.c.l.bf16 %v211_v47  ;;  %v232_v57 = vunpack.c.l.bf16 %v212_v63  ;;  %v233_v59 = vunpack.c.h.bf16 %v211_v47  ;;  %v214_v62 = vld [vmem:[%s2955_s24 + $0x3c] sm:$0x1] }
  0x6b   : > { %245 = vst.msk [vmem:[#allocation2 + $0x20] sm:$0xff] %vm239_vm0, %v223_v54  ;;  %247 = vst.msk [vmem:[#allocation2 + $0x30] sm:$0xff] %vm239_vm0, %v225_v58  ;;  %v215_v40 = vld [vmem:[%s2955_s24 + $0x40] ss:$8 sps:$4 sm:$0xff]   ;;  %v216_v61 = vld [vmem:[%s2955_s24 + $0x44] sm:$0x1]  ;;  %v234_v0 = vunpack.c.l.bf16 %v214_v62 }
  0x6c   : > { %248 = vst.msk [vmem:[#allocation2 + $0x38] sm:$0x3] %vm241_vm1, %v226_v53  ;;  %250 = vst.msk [vmem:[#allocation2 + $0x48] sm:$0x3] %vm241_vm1, %v228_v49  ;;  %v235_v50 = vunpack.c.l.bf16 %v215_v40  ;;  %v236_v51 = vunpack.c.l.bf16 %v216_v61  ;;  %v237_v54 = vunpack.c.h.bf16 %v215_v40  ;;  %v218_v58 = vld [vmem:[%s2955_s24 + $0x4c] sm:$0x1] }
  0x6d   : > { %249 = vst.msk [vmem:[#allocation2 + $0x40] sm:$0xff] %vm239_vm0, %v227_v60  ;;  %251 = vst.msk [vmem:[#allocation2 + $0x50] sm:$0xff] %vm239_vm0, %v229_v52  ;;  %v238_v47 = vunpack.c.l.bf16 %v218_v58 }
  0x6e   : > { %252 = vst.msk [vmem:[#allocation2 + $0x58] sm:$0x3] %vm241_vm1, %v230_v55  ;;  %254 = vst.msk [vmem:[#allocation2 + $0x68] sm:$0x3] %vm241_vm1, %v232_v57 }
  0x6f   : > { %253 = vst.msk [vmem:[#allocation2 + $0x60] sm:$0xff] %vm239_vm0, %v231_v56  ;;  %255 = vst.msk [vmem:[#allocation2 + $0x70] sm:$0xff] %vm239_vm0, %v233_v59 }
  0x70   : > { %256 = vst.msk [vmem:[#allocation2 + $0x78] sm:$0x3] %vm241_vm1, %v234_v0  ;;  %258 = vst.msk [vmem:[#allocation2 + $0x88] sm:$0x3] %vm241_vm1, %v236_v51 }
  0x71   : > { %257 = vst.msk [vmem:[#allocation2 + $0x80] sm:$0xff] %vm239_vm0, %v235_v50  ;;  %259 = vst.msk [vmem:[#allocation2 + $0x90] sm:$0xff] %vm239_vm0, %v237_v54 }
  0x72   : > { %260 = vst.msk [vmem:[#allocation2 + $0x98] sm:$0x3] %vm241_vm1, %v238_v47 }
  0x73 LB: >> { %v3469_v9 = vld [vmem:[#allocation19_spill] sm:$0xff]  ;;  %v3470_v10 = vld [vmem:[#allocation20_spill] sm:$0xff]  ;;  %v2703_v49 = vmov 0.0|0.0   ;;  %v3473_v11 = vld [vmem:[#allocation21_spill] sm:$0xff]  ;;  %vm2704_vm2 = vmmov 0   ;;  %v3405_v52 = vmov 0.0   ;;  %v3104_v58 = vpack.c.bf16 %v2879_v30, %v2877_v29  ;;  %s2697_s25 = sphi %s3006_s25, %s347_s25  }
  0x74   : >> { %v3013_v40 = vpack.c.bf16 %v3470_v10, %v3469_v9  ;;  %v3471_v1 = vld [vmem:[#allocation11_spill] sm:$0xff]  ;;  %v3472_v2 = vld [vmem:[#allocation12_spill] sm:$0xff]  ;;  %2360 = vmatprep.subr.bf16.mxu0 %v2703_v49  ;;  %2372 = vmatprep.subr.bf16.mxu1 %v2703_v49  ;;  %v3474_v12 = vld [vmem:[#allocation22_spill] sm:$0xff]  ;;  %s1852_s26 = sshll.u32 %s2697_s25, 5  ;;  %s1848_s28 = sshll.u32 %s2697_s25, 1 }
  0x75   : >> { %v3017_v48 = vpack.c.bf16 %v3472_v2, %v3471_v1  ;;  %v3025_v53 = vpack.c.bf16 %v3474_v12, %v3473_v11  ;;  %v3475_v3 = vld [vmem:[#allocation13_spill] sm:$0xff]  ;;  %v3476_v4 = vld [vmem:[#allocation14_spill] sm:$0xff]  ;;  %2034 = vmatprep.mubr.msk.f32.mxu0 %vm2704_vm2, %v3405_v52  ;;  %2053 = vmatprep.mubr.msk.f32.mxu1 %vm2704_vm2, %v3405_v52  ;;  %v3477_v13 = vld [vmem:[#allocation23_spill] sm:$0xff]  ;;  %s3064_s27 = scalar_lea.vmem [#allocation2], %s1852_s26  ;;  %v3132_v2 = vpack.c.bf16 %v2903_v42, %v2901_v41  ;;  %s1700_s29 = scalar_lea.vmem %s2817_s21, %s1848_s28 }
  0x76   : >> { %2362 = vmatpush3.bf16.msra.mxu0 %v3013_v40  ;;  %v3029_v60 = vpack.c.bf16 %v3476_v4, %v3475_v3  ;;  %v3478_v14 = vld [vmem:[#allocation24_spill] sm:$0xff]  ;;  %v3479_v5 = vld [vmem:[#allocation15_spill] sm:$0xff]  ;;  %v3481_v15 = vld [vmem:[#allocation25_spill] sm:$0xff]  ;;  %v3143_v3 = vpack.c.bf16 %v2891_v36, %v2889_v35  ;;  %v3147_v4 = vpack.c.bf16 %v2907_v44, %v2905_v43  ;;  %s347_s25 = sadd.s32 1, %s2697_s25  }
  0x77   : >> { %2374 = vmatpush3.bf16.msra.mxu1 %v3017_v48  ;;  %2363 = vmatprep.subr.bf16.mxu0 %v2703_v49  ;;  %v3041_v63 = vpack.c.bf16 %v3478_v14, %v3477_v13  ;;  %v3480_v6 = vld [vmem:[#allocation16_spill] sm:$0xff]  ;;  %v3482_v16 = vld [vmem:[#allocation26_spill] sm:$0xff]  ;;  %v3483_v7 = vld [vmem:[#allocation17_spill] sm:$0xff]  ;;  %p344_p5 = scmp.ge.s32.totalorder %s347_s25, 4  }
  0x78   : >> { %2375 = vmatprep.subr.bf16.mxu1 %v2703_v49  ;;  %v3045_v55 = vpack.c.bf16 %v3480_v6, %v3479_v5  ;;  %v3054_v56 = vpack.c.bf16 %v3482_v16, %v3481_v15  ;;  %v3484_v8 = vld [vmem:[#allocation18_spill] sm:$0xff]  ;;  %v3485_v17 = vld [vmem:[#allocation27_spill] sm:$0xff]  ;;  %v3486_v18 = vld [vmem:[#allocation28_spill] sm:$0xff]  ;;  %v3159_v5 = vpack.c.bf16 %v2895_v38, %v2893_v37  ;;  %v3163_v6 = vpack.c.bf16 %v2911_v46, %v2909_v45 }
  0x79   : >> { %v3058_v57 = vpack.c.bf16 %v3484_v8, %v3483_v7  ;;  %v352_v59 = vld [vmem:[%s3064_s27 + $0x1] sm:$0xff]  ;;  %v3070_v61 = vpack.c.bf16 %v3486_v18, %v3485_v17  ;;  %v3487_v25 = vld [vmem:[#allocation35_spill] sm:$0xff]  ;;  %v3490_v20 = vld [vmem:[#allocation30_spill] sm:$0xff] }
  0x7a   : >> { %2365 = vmatpush3.bf16.msra.mxu0 %v3025_v53  ;;  %v351_v62 = vld [vmem:[%s3064_s27] sm:$0xff]  ;;  %v3492_v21 = vld [vmem:[#allocation31_spill] sm:$0xff]  ;;  %v3495_v24 = vld [vmem:[#allocation34_spill] sm:$0xff] }
  0x7b   : >> { %2377 = vmatpush3.bf16.msra.mxu1 %v3029_v60  ;;  %2366 = vmatprep.subr.bf16.mxu0 %v2703_v49  ;;  %v3488_v26 = vld [vmem:[#allocation36_spill] sm:$0xff]  ;;  %v3489_v19 = vld [vmem:[#allocation29_spill] sm:$0xff]  ;;  %v3128_v1 = vld [vmem:[%s3064_s27 + $0x10] sm:$0xff] }
  0x7c   : >> { %2378 = vmatprep.subr.bf16.mxu1 %v2703_v49  ;;  %v3074_v0 = vpack.c.bf16 %v3488_v26, %v3487_v25  ;;  %v3084_v50 = vpack.c.bf16 %v3490_v20, %v3489_v19  ;;  %v3491_v27 = vld [vmem:[#allocation37_spill] sm:$0xff]  ;;  %v3493_v22 = vld [vmem:[#allocation32_spill] sm:$0xff]  ;;  %v3497_v7 = vld [vmem:[#allocation38_spill] sm:$0xff] }
  0x7d   : >> { %v3088_v51 = vpack.c.bf16 %v2875_v28, %v3491_v27  ;;  %v3100_v54 = vpack.c.bf16 %v3493_v22, %v3492_v21  ;;  %v3494_v23 = vld [vmem:[#allocation33_spill] sm:$0xff]  ;;  %v3171_v8 = vpack.c.bf16 %v3497_v7, %v2897_v39  ;;  %v3498_v9 = vld [vmem:[#allocation39_spill] sm:$0xff]  ;;  %v3499_v10 = vld [vmem:[#allocation40_spill] sm:$0xff] }
  0x7e   : >> { %2368 = vmatpush3.bf16.msra.mxu0 %v3041_v63  ;;  %v3112_v47 = vpack.c.bf16 %v3495_v24, %v3494_v23  ;;  %v3175_v11 = vpack.c.bf16 %v3499_v10, %v3498_v9  ;;  %v1821_v12 = vld [vmem:[%s3064_s27 + $0x11] sm:$0xff]  ;;  %v3500_v13 = vld [vmem:[#allocation41_spill] sm:$0xff]  ;;  %v3505_v10 = vld [vmem:[#allocation44_spill] sm:$0xff] }
  0x7f   : >> { %2380 = vmatpush3.bf16.msra.mxu1 %v3045_v55  ;;  %2369 = vmatprep.subr.bf16.mxu0 %v2703_v49  ;;  %v3501_v14 = vld [vmem:[#allocation42_spill] sm:$0xff]  ;;  %v3187_v16 = vld [vmem:[%s3064_s27 + $0x12] sm:$0xff]  ;;  %v3502_v7 = vld [vmem:[#allocation49_spill] sm:$0xff] }
  0x80   : >> { %2381 = vmatprep.subr.bf16.mxu1 %v2703_v49  ;;  %v3184_v15 = vpack.c.bf16 %v3501_v14, %v3500_v13  ;;  %v3503_v17 = vld [vmem:[#allocation50_spill] sm:$0xff]  ;;  %v3504_v9 = vld [vmem:[#allocation43_spill] sm:$0xff]  ;;  %v3513_v22 = vld [vmem:[#allocation48_spill] sm:$0xff] }
  0x81   : >> { %v3191_v18 = vpack.c.bf16 %v3503_v17, %v3502_v7  ;;  %v3202_v13 = vpack.c.bf16 %v3505_v10, %v3504_v9  ;;  %v3506_v14 = vld [vmem:[#allocation51_spill] sm:$0xff]  ;;  %v3507_v17 = vld [vmem:[#allocation52_spill] sm:$0xff]  ;;  %v3508_v9 = vld [vmem:[#allocation45_spill] sm:$0xff] }
  0x82   : >> { %2371 = vmatpush3.bf16.msra.mxu0 %v3054_v56  ;;  %v3206_v7 = vpack.c.bf16 %v3507_v17, %v3506_v14  ;;  %v3509_v10 = vld [vmem:[#allocation46_spill] sm:$0xff]  ;;  %v3510_v17 = vld [vmem:[#allocation53_spill] sm:$0xff]  ;;  %v3512_v21 = vld [vmem:[#allocation47_spill] sm:$0xff] }
  0x83   : >> { %2383 = vmatpush3.bf16.msra.mxu1 %v3058_v57  ;;  %2384 = vmatprep.subr.bf16.mxu0 %v2703_v49  ;;  %v3218_v14 = vpack.c.bf16 %v3509_v10, %v3508_v9  ;;  %v3511_v19 = vld [vmem:[#allocation54_spill] sm:$0xff]  ;;  %v3230_v23 = vpack.c.bf16 %v3513_v22, %v3512_v21  ;;  %v3514_v24 = vld [vmem:[#allocation55_spill] sm:$0xff]  ;;  %v3515_v25 = vld [vmem:[#allocation56_spill] sm:$0xff] }
  0x84   : >> { %2396 = vmatprep.subr.bf16.mxu1 %v2703_v49  ;;  %v3222_v20 = vpack.c.bf16 %v3511_v19, %v3510_v17  ;;  %v3234_v9 = vpack.c.bf16 %v3515_v25, %v3514_v24  ;;  %v3241_v19 = vld [vmem:[%s3064_s27 + $0x20] sm:$0xff]  ;;  %v3517_v17 = vld [vmem:[#allocation58_spill] sm:$0xff]  ;;  %v3518_v22 = vld [vmem:[#allocation59_spill] sm:$0xff] }
  0x85   : >> { %2035 = vmatmul.mubr.msk.f32.vlgmr.msra.gmra.mrb[0].mxu0 %vm239_vm0, %v352_v59  ;;  %v3116_v59 = vpack.c.bf16 %v2883_v32, %v2881_v31  ;;  %v3516_v10 = vld [vmem:[#allocation57_spill] sm:$0xff]  ;;  %v3519_v24 = vld [vmem:[#allocation60_spill] sm:$0xff] }
  0x86   : >> { %2054 = vmatmul.mubr.msk.f32.vlgmr.msra.gmra.mrb[0].mxu1 %vm239_vm0, %v351_v62  ;;  %2386 = vmatpush3.bf16.msra.mxu0 %v3070_v61  ;;  %v499_v62 = vld [vmem:[%s3064_s27 + $0x2] sm:$0xff]  ;;  %v3245_v26 = vpack.c.bf16 %v3517_v17, %v3516_v10  ;;  %v3260_v25 = vpack.c.bf16 %v3519_v24, %v3518_v22  ;;  %v3521_v10 = vld [vmem:[#allocation62_spill] sm:$0xff]  ;;  %v3522_v22 = vld [vmem:[#allocation63_spill] sm:$0xff] }
  0x87   : >> { %2398 = vmatpush3.bf16.msra.mxu1 %v3074_v0  ;;  %2387 = vmatprep.subr.bf16.mxu0 %v2703_v49  ;;  %v3248_v21 = vld [vmem:[%s3064_s27 + $0x21] sm:$0xff] }
  0x88   : >> { %2399 = vmatprep.subr.bf16.mxu1 %v2703_v49  ;;  %2072 = vmatprep.mubr.msk.f32.mxu0 %vm2704_vm2, %v3405_v52  ;;  %v3523_v24 = vld [vmem:[#allocation64_spill] sm:$0xff] }
  0x89   : >> { %2091 = vmatprep.mubr.msk.f32.mxu1 %vm2704_vm2, %v3405_v52  ;;  %v3125_v52 = vpack.c.bf16 %v2887_v34, %v2885_v33  ;;  %v3280_v27 = vpack.c.bf16 %v3523_v24, %v3522_v22 }
  0x8a   : >> { %2389 = vmatpush3.bf16.msra.mxu0 %v3084_v50 }
  0x8b   : >> { %2401 = vmatpush3.bf16.msra.mxu1 %v3088_v51  ;;  %2390 = vmatprep.subr.bf16.mxu0 %v2703_v49 }
  0x8c   : >> { %2402 = vmatprep.subr.bf16.mxu1 %v2703_v49 }
  0x8e   : >> { %2392 = vmatpush3.bf16.msra.mxu0 %v3100_v54 }
  0x8f   : >> { %2404 = vmatpush3.bf16.msra.mxu1 %v3104_v58  ;;  %2393 = vmatprep.subr.bf16.mxu0 %v2703_v49 }
  0x90   : >> { %2405 = vmatprep.subr.bf16.mxu1 %v2703_v49 }
  0x92   : >> { %2395 = vmatpush3.bf16.msra.mxu0 %v3112_v47 }
  0x93   : >> { %2407 = vmatpush3.bf16.msra.mxu1 %v3116_v59  ;;  %2408 = vmatprep.subr.bf16.mxu0 %v2703_v49 }
  0x94   : >> { %2420 = vmatprep.subr.bf16.mxu1 %v2703_v49 }
  0x95   : >> { %2073 = vmatmul.mubr.msk.f32.vlgmr.msra.gmra.mrb[2].mxu0 %vm239_vm0, %v499_v62  ;;  %v3496_v62 = vmov 0.0  }
  0x96   : >> { %2092 = vmatmul.mubr.msk.f32.vlgmr.msra.gmra.mrb[2].mxu1 %vm239_vm0, %v3128_v1  ;;  %2410 = vmatpush3.bf16.msra.mxu0 %v3125_v52 }
  0x97   : >> { %2422 = vmatpush3.bf16.msra.mxu1 %v3132_v2  ;;  %2411 = vmatprep.subr.bf16.mxu0 %v2703_v49 }
  0x98   : >> { %2423 = vmatprep.subr.bf16.mxu1 %v2703_v49  ;;  %2110 = vmatprep.mubr.msk.f32.mxu0 %vm2704_vm2, %v3496_v62 }
  0x99   : >> { %2129 = vmatprep.mubr.msk.f32.mxu1 %vm2704_vm2, %v3496_v62 }
  0x9a   : >> { %2413 = vmatpush3.bf16.msra.mxu0 %v3143_v3 }
  0x9b   : >> { %2425 = vmatpush3.bf16.msra.mxu1 %v3147_v4  ;;  %2414 = vmatprep.subr.bf16.mxu0 %v2703_v49 }
  0x9c   : >> { %2426 = vmatprep.subr.bf16.mxu1 %v2703_v49 }
  0x9e   : >> { %2416 = vmatpush3.bf16.msra.mxu0 %v3159_v5 }
  0x9f   : >> { %2428 = vmatpush3.bf16.msra.mxu1 %v3163_v6  ;;  %2417 = vmatprep.subr.bf16.mxu0 %v2703_v49 }
  0xa0   : >> { %2429 = vmatprep.subr.bf16.mxu1 %v2703_v49 }
  0xa2   : >> { %2419 = vmatpush3.bf16.msra.mxu0 %v3171_v8 }
  0xa3   : >> { %2431 = vmatpush3.bf16.msra.mxu1 %v3175_v11  ;;  %2432 = vmatprep.subr.bf16.mxu0 %v2703_v49 }
  0xa4   : >> { %2444 = vmatprep.subr.bf16.mxu1 %v2703_v49 }
  0xa5   : >> { %2111 = vmatmul.mubr.msk.f32.vlgmr.msra.gmra.mrb[4].mxu0 %vm239_vm0, %v1821_v12 }
  0xa6   : >> { %2130 = vmatmul.mubr.msk.f32.vlgmr.msra.gmra.mrb[4].mxu1 %vm239_vm0, %v3187_v16  ;;  %2434 = vmatpush3.bf16.msra.mxu0 %v3184_v15 }
  0xa7   : >> { %2446 = vmatpush3.bf16.msra.mxu1 %v3191_v18  ;;  %2435 = vmatprep.subr.bf16.mxu0 %v2703_v49 }
  0xa8   : >> { %2447 = vmatprep.subr.bf16.mxu1 %v2703_v49  ;;  %2148 = vmatprep.mubr.msk.f32.mxu0 %vm2704_vm2, %v3496_v62 }
  0xa9   : >> { %2167 = vmatprep.mubr.msk.f32.mxu1 %vm2704_vm2, %v3496_v62 }
  0xaa   : >> { %2437 = vmatpush3.bf16.msra.mxu0 %v3202_v13 }
  0xab   : >> { %2449 = vmatpush3.bf16.msra.mxu1 %v3206_v7  ;;  %2438 = vmatprep.subr.bf16.mxu0 %v2703_v49 }
  0xac   : >> { %2450 = vmatprep.subr.bf16.mxu1 %v2703_v49 }
  0xae   : >> { %2440 = vmatpush3.bf16.msra.mxu0 %v3218_v14 }
  0xaf   : >> { %2452 = vmatpush3.bf16.msra.mxu1 %v3222_v20  ;;  %2441 = vmatprep.subr.bf16.mxu0 %v2703_v49 }
  0xb0   : >> { %2453 = vmatprep.subr.bf16.mxu1 %v2703_v49 }
  0xb2   : >> { %2443 = vmatpush3.bf16.msra.mxu0 %v3230_v23 }
  0xb3   : >> { %2455 = vmatpush3.bf16.msra.mxu1 %v3234_v9  ;;  %2456 = vmatprep.subr.bf16.mxu0 %v2703_v49 }
  0xb4   : >> { %2468 = vmatprep.subr.bf16.mxu1 %v2703_v49 }
  0xb5   : >> { %2149 = vmatmul.mubr.msk.f32.vlgmr.msra.gmra.mrb[6].mxu0 %vm239_vm0, %v3241_v19 }
  0xb6   : >> { %2168 = vmatmul.mubr.msk.f32.vlgmr.msra.gmra.mrb[6].mxu1 %vm239_vm0, %v3248_v21  ;;  %2458 = vmatpush3.bf16.msra.mxu0 %v3245_v26 }
  0xb7   : >> { %2470 = vmatpush3.bf16.msra.mxu1 %v3013_v40  ;;  %2459 = vmatprep.subr.bf16.mxu0 %v2703_v49  ;;  %v3520_v40 = vld [vmem:[#allocation61_spill] sm:$0xff] }
  0xb8   : >> { %2471 = vmatprep.subr.bf16.mxu1 %v2703_v49  ;;  %2186 = vmatprep.mubr.msk.f32.mxu0 %vm2704_vm2, %v3496_v62  ;;  %v3272_v17 = vpack.c.bf16 %v3521_v10, %v3520_v40 }
  0xb9   : >> { %2205 = vmatprep.mubr.msk.f32.mxu1 %vm2704_vm2, %v3496_v62 }
  0xba   : >> { %2461 = vmatpush3.bf16.msra.mxu0 %v3260_v25 }
  0xbb   : >> { %2473 = vmatpush3.bf16.msra.mxu1 %v3025_v53  ;;  %2462 = vmatprep.subr.bf16.mxu0 %v2703_v49  ;;  %v3287_v53 = vld [vmem:[%s3064_s27 + $0x22] sm:$0xff] }
  0xbc   : >> { %2474 = vmatprep.subr.bf16.mxu1 %v2703_v49 }
  0xbe   : >> { %2464 = vmatpush3.bf16.msra.mxu0 %v3272_v17 }
  0xbf   : >> { %2476 = vmatpush3.bf16.msra.mxu1 %v3041_v63  ;;  %2465 = vmatprep.subr.bf16.mxu0 %v2703_v49 }
  0xc0   : >> { %2477 = vmatprep.subr.bf16.mxu1 %v2703_v49 }
  0xc2   : >> { %2467 = vmatpush3.bf16.msra.mxu0 %v3280_v27 }
  0xc3   : >> { %2479 = vmatpush3.bf16.msra.mxu1 %v3054_v56  ;;  %2480 = vmatprep.subr.bf16.mxu0 %v2703_v49 }
  0xc4   : >> { %2492 = vmatprep.subr.bf16.mxu1 %v2703_v49 }
  0xc5   : >> { %2187 = vmatmul.mubr.msk.f32.vlgmr.msra.gmra.mrb[8].mxu0 %vm239_vm0, %v3287_v53 }
  0xc6   : >> { %2206 = vmatmul.mubr.msk.f32.vlgmr.msra.gmra.mrb[8].mxu1 %vm239_vm0, %v1821_v12  ;;  %2482 = vmatpush3.bf16.msra.mxu0 %v3017_v48 }
  0xc7   : >> { %2494 = vmatpush3.bf16.msra.mxu1 %v3070_v61  ;;  %2483 = vmatprep.subr.bf16.mxu0 %v2703_v49 }
  0xc8   : >> { %2495 = vmatprep.subr.bf16.mxu1 %v2703_v49  ;;  %2224 = vmatprep.mubr.msk.f32.mxu0 %vm2704_vm2, %v3496_v62 }
  0xc9   : >> { %2243 = vmatprep.mubr.msk.f32.mxu1 %vm2704_vm2, %v3496_v62 }
  0xca   : >> { %2485 = vmatpush3.bf16.msra.mxu0 %v3029_v60 }
  0xcb   : >> { %2497 = vmatpush3.bf16.msra.mxu1 %v3084_v50  ;;  %2486 = vmatprep.subr.bf16.mxu0 %v2703_v49 }
  0xcc   : >> { %2498 = vmatprep.subr.bf16.mxu1 %v2703_v49 }
  0xce   : >> { %2488 = vmatpush3.bf16.msra.mxu0 %v3045_v55 }
  0xcf   : >> { %2500 = vmatpush3.bf16.msra.mxu1 %v3100_v54  ;;  %2489 = vmatprep.subr.bf16.mxu0 %v2703_v49 }
  0xd0   : >> { %2501 = vmatprep.subr.bf16.mxu1 %v2703_v49 }
  0xd2   : >> { %2491 = vmatpush3.bf16.msra.mxu0 %v3058_v57 }
  0xd3   : >> { %2503 = vmatpush3.bf16.msra.mxu1 %v3112_v47  ;;  %2504 = vmatprep.subr.bf16.mxu0 %v2703_v49 }
  0xd4   : >> { %2516 = vmatprep.subr.bf16.mxu1 %v2703_v49 }
  0xd5   : >> { %2225 = vmatmul.mubr.msk.f32.vlgmr.msra.gmra.mrb[10].mxu0 %vm239_vm0, %v3128_v1  ;;  %v1842_v1 = vld [vmem:[%s3064_s27 + $0x30] sm:$0xff] }
  0xd6   : >> { %2244 = vmatmul.mubr.msk.f32.vlgmr.msra.gmra.mrb[10].mxu1 %vm239_vm0, %v3187_v16  ;;  %2506 = vmatpush3.bf16.msra.mxu0 %v3074_v0 }
  0xd7   : >> { %2518 = vmatpush3.bf16.msra.mxu1 %v3125_v52  ;;  %2507 = vmatprep.subr.bf16.mxu0 %v2703_v49 }
  0xd8   : >> { %2519 = vmatprep.subr.bf16.mxu1 %v2703_v49  ;;  %2262 = vmatprep.mubr.msk.f32.mxu0 %vm2704_vm2, %v3496_v62 }
  0xd9   : >> { %2281 = vmatprep.mubr.msk.f32.mxu1 %vm2704_vm2, %v3496_v62 }
  0xda   : >> { %2509 = vmatpush3.bf16.msra.mxu0 %v3088_v51 }
  0xdb   : >> { %2521 = vmatpush3.bf16.msra.mxu1 %v3143_v3  ;;  %2510 = vmatprep.subr.bf16.mxu0 %v2703_v49  ;;  %v1846_v3 = vld [vmem:[%s3064_s27 + $0x32] sm:$0xff] }
  0xdc   : >> { %2522 = vmatprep.subr.bf16.mxu1 %v2703_v49 }
  0xde   : >> { %2512 = vmatpush3.bf16.msra.mxu0 %v3104_v58 }
  0xdf   : >> { %2524 = vmatpush3.bf16.msra.mxu1 %v3159_v5  ;;  %2513 = vmatprep.subr.bf16.mxu0 %v2703_v49 }
  0xe0   : >> { %2525 = vmatprep.subr.bf16.mxu1 %v2703_v49 }
  0xe2   : >> { %2515 = vmatpush3.bf16.msra.mxu0 %v3116_v59 }
  0xe3   : >> { %2527 = vmatpush3.bf16.msra.mxu1 %v3171_v8  ;;  %2528 = vmatprep.subr.bf16.mxu0 %v2703_v49 }
  0xe4   : >> { %2540 = vmatprep.subr.bf16.mxu1 %v2703_v49 }
  0xe5   : >> { %2263 = vmatmul.mubr.msk.f32.vlgmr.msra.gmra.mrb[12].mxu0 %vm239_vm0, %v3241_v19 }
  0xe6   : >> { %2282 = vmatmul.mubr.msk.f32.vlgmr.msra.gmra.mrb[12].mxu1 %vm239_vm0, %v3248_v21  ;;  %2530 = vmatpush3.bf16.msra.mxu0 %v3132_v2  ;;  %v1844_v2 = vld [vmem:[%s3064_s27 + $0x31] sm:$0xff] }
  0xe7   : >> { %2542 = vmatpush3.bf16.msra.mxu1 %v3184_v15  ;;  %2531 = vmatprep.subr.bf16.mxu0 %v2703_v49 }
  0xe8   : >> { %2543 = vmatprep.subr.bf16.mxu1 %v2703_v49  ;;  %2300 = vmatprep.mubr.msk.f32.mxu0 %vm2704_vm2, %v3496_v62 }
  0xe9   : >> { %2319 = vmatprep.mubr.msk.f32.mxu1 %vm2704_vm2, %v3496_v62 }
  0xea   : >> { %2533 = vmatpush3.bf16.msra.mxu0 %v3147_v4 }
  0xeb   : >> { %2545 = vmatpush3.bf16.msra.mxu1 %v3202_v13  ;;  %2534 = vmatprep.subr.bf16.mxu0 %v2703_v49 }
  0xec   : >> { %2546 = vmatprep.subr.bf16.mxu1 %v2703_v49 }
  0xee   : >> { %2536 = vmatpush3.bf16.msra.mxu0 %v3163_v6 }
  0xef   : >> { %2548 = vmatpush3.bf16.msra.mxu1 %v3218_v14  ;;  %2537 = vmatprep.subr.bf16.mxu0 %v2703_v49 }
  0xf0   : >> { %2549 = vmatprep.subr.bf16.mxu1 %v2703_v49 }
  0xf2   : >> { %2539 = vmatpush3.bf16.msra.mxu0 %v3175_v11 }
  0xf3   : >> { %2551 = vmatpush3.bf16.msra.mxu1 %v3230_v23  ;;  %2552 = vmatprep.subr.bf16.mxu0 %v2703_v49 }
  0xf4   : >> { %2564 = vmatprep.subr.bf16.mxu1 %v2703_v49 }
  0xf5   : >> { %2301 = vmatmul.mubr.msk.f32.vlgmr.msra.gmra.mrb[14].mxu0 %vm239_vm0, %v3287_v53 }
  0xf6   : >> { %2320 = vmatmul.mubr.msk.f32.vlgmr.msra.gmra.mrb[14].mxu1 %vm239_vm0, %v1842_v1  ;;  %2554 = vmatpush3.bf16.msra.mxu0 %v3191_v18 }
  0xf7   : >> { %2566 = vmatpush3.bf16.msra.mxu1 %v3245_v26  ;;  %2555 = vmatprep.subr.bf16.mxu0 %v2703_v49 }
  0xf8   : >> { %2567 = vmatprep.subr.bf16.mxu1 %v2703_v49  ;;  %2338 = vmatprep.mubr.msk.f32.mxu0 %vm2704_vm2, %v3496_v62 }
  0xf9   : >> { %2357 = vmatprep.mubr.msk.f32.mxu1 %vm2704_vm2, %v3496_v62 }
  0xfa   : >> { %2557 = vmatpush3.bf16.msra.mxu0 %v3206_v7 }
  0xfb   : >> { %2569 = vmatpush3.bf16.msra.mxu1 %v3260_v25  ;;  %2558 = vmatprep.subr.bf16.mxu0 %v2703_v49 }
  0xfc   : >> { %2570 = vmatprep.subr.bf16.mxu1 %v2703_v49 }
  0xfe   : >> { %2560 = vmatpush3.bf16.msra.mxu0 %v3222_v20 }
  0xff   : >> { %2572 = vmatpush3.bf16.msra.mxu1 %v3272_v17  ;;  %2561 = vmatprep.subr.bf16.mxu0 %v2703_v49 }
 0x100   : >> { %2573 = vmatprep.subr.bf16.mxu1 %v2703_v49 }
 0x102   : >> { %2563 = vmatpush3.bf16.msra.mxu0 %v3234_v9 }
 0x103   : >> { %2575 = vmatpush3.bf16.msra.mxu1 %v3280_v27 }
 0x105   : >> { %2339 = vmatmul.mubr.msk.f32.vlgmr.msra.gmra.mrb[16].mxu0 %vm239_vm0, %v1844_v2 }
 0x106   : >> { %2358 = vmatmul.mubr.msk.f32.vlgmr.msra.gmra.mrb[16].mxu1 %vm239_vm0, %v1846_v3 }
 0x158   : >> { %v422_v4 = vpop.f32.mrb[0].mxu0 }
 0x159   : >> { %v495_v5 = vpop.f32.mrb[0].mxu1  ;;  %v2036_v6 = vpop.f32.mrb[1].mxu0 }
 0x15a   : >> { %v496_v8 = vadd.f32 %v495_v5, %v422_v4  ;;  %v2055_v11 = vpop.f32.mrb[1].mxu1 }
 0x168   : >> { %v569_v12 = vpop.f32.mrb[2].mxu0 }
 0x169   : >> { %v647_v15 = vpop.f32.mrb[2].mxu1  ;;  %v573_v16 = vadd.f32 %v569_v12, %v496_v8  ;;  %v2074_v18 = vpop.f32.mrb[3].mxu0  ;;  %v3524_v12 = vld [vmem:[#allocation10_spill] sm:$0xff] }
 0x16a   : >> { %v2093_v20 = vpop.f32.mrb[3].mxu1 }
 0x16b   : >> { %v651_v23 = vadd.f32 %v647_v15, %v573_v16 }
 0x178   : >> { %v722_v26 = vpop.f32.mrb[4].mxu0 }
 0x179   : >> { %v797_v48 = vpop.f32.mrb[4].mxu1  ;;  %v726_v27 = vadd.f32 %v722_v26, %v651_v23  ;;  %v2112_v49 = vpop.f32.mrb[5].mxu0 }
 0x17a   : >> { %v2131_v60 = vpop.f32.mrb[5].mxu1 }
 0x17b   : >> { %v801_v52 = vadd.f32 %v797_v48, %v726_v27 }
 0x188   : >> { %v875_v63 = vpop.f32.mrb[6].mxu0 }
 0x189   : >> { %v950_v55 = vpop.f32.mrb[6].mxu1  ;;  %v879_v56 = vadd.f32 %v875_v63, %v801_v52  ;;  %v2150_v57 = vpop.f32.mrb[7].mxu0 }
 0x18a   : >> { %v2169_v61 = vpop.f32.mrb[7].mxu1 }
 0x18b   : >> { %v954_v0 = vadd.f32 %v950_v55, %v879_v56 }
 0x198   : >> { %v1025_v50 = vpop.f32.mrb[8].mxu0 }
 0x199   : >> { %v1104_v51 = vpop.f32.mrb[8].mxu1  ;;  %v1029_v54 = vadd.f32 %v1025_v50, %v954_v0  ;;  %v2188_v58 = vpop.f32.mrb[9].mxu0 }
 0x19a   : >> { %v2207_v47 = vpop.f32.mrb[9].mxu1 }
 0x19b   : >> { %v1036_v15 = vadd.f32 %v3524_v12, %v1029_v54 }
 0x19d   : >> { %v1037_v20 = vmax.f32 %v1036_v15, 0.0 }
 0x1a8   : >> { %v1174_v59 = vpop.f32.mrb[10].mxu0 }
 0x1a9   : >> { %v1244_v62 = vpop.f32.mrb[10].mxu1  ;;  %v1175_v13 = vadd.f32 %v1174_v59, %v1104_v51  ;;  %v2226_v7 = vpop.f32.mrb[11].mxu0 }
 0x1aa   : >> { %v2245_v14 = vpop.f32.mrb[11].mxu1 }
 0x1ab   : >> { %v1248_v9 = vadd.f32 %v1244_v62, %v1175_v13 }
 0x1b8   : >> { %v1315_v19 = vpop.f32.mrb[12].mxu0 }
 0x1b9   : >> { %v1386_v21 = vpop.f32.mrb[12].mxu1  ;;  %v1319_v25 = vadd.f32 %v1315_v19, %v1248_v9  ;;  %v2264_v40 = vpop.f32.mrb[13].mxu0 }
 0x1ba   : >> { %v2283_v10 = vpop.f32.mrb[13].mxu1 }
 0x1bb   : >> { %v1390_v17 = vadd.f32 %v1386_v21, %v1319_v25 }
 0x1c8   : >> { %v1457_v22 = vpop.f32.mrb[14].mxu0 }
 0x1c9   : >> { %v1535_v24 = vpop.f32.mrb[14].mxu1  ;;  %v1461_v53 = vadd.f32 %v1457_v22, %v1390_v17  ;;  %v2302_v1 = vpop.f32.mrb[15].mxu0 }
 0x1ca   : >> { %v2321_v2 = vpop.f32.mrb[15].mxu1 }
 0x1cb   : >> { %v1539_v3 = vadd.f32 %v1535_v24, %v1461_v53 }
 0x1d8   : >> { %v1610_v4 = vpop.f32.mrb[16].mxu0 }
 0x1d9   : >> { %v1685_v5 = vpop.f32.mrb[16].mxu1  ;;  %v1614_v6 = vadd.f32 %v1610_v4, %v1539_v3  ;;  %v2340_v8 = vpop.f32.mrb[17].mxu0 }
 0x1da   : >> { %v2359_v11 = vpop.f32.mrb[17].mxu1 }
 0x1db   : >> { %v1689_v16 = vadd.f32 %v1685_v5, %v1614_v6 }
 0x1dd   : >> { %v1690_v18 = vadd.f32 %v3524_v12, %v1689_v16 }
 0x1df   : >> { %v1691_v23 = vmax.f32 %v1690_v18, 0.0 }
 0x1e1   : >> { %v1692_v26 = vmax.f32 %v1037_v20, %v1691_v23 }
 0x1e3   : >> { %1693 = vst [vmem:[#allocation3] sm:$0xff] %v1692_v26 }
 0x1e9   : > { %346 = sbr.rel (!%p344_p5) target bundleno = 115 (0x73), region = 92 }
 0x1ea   : >> { %v1694_v48 = vld [vmem:[#allocation3] ss:$2 sm:$0xf]  ;;  %v1696_v27 = vld [vmem:[#allocation3 + $0x1] ss:$2 sm:$0xf] }
 0x1eb   : >> { %v1697_v49 = vmax.f32 %v1694_v48, %v1696_v27 }
 0x1ed   : >> { %v1698_v60 = vpack.c.bf16 %v1697_v49, %v1697_v49 }
 0x1ef   : >> { %1701 = vst [vmem:[%s1700_s29] sm:$0x3] %v1698_v60 }
 0x1f0 PF: > { %s15_s12 = sadd.s32 1, %s2693_s12  }
 0x1f1   : > { %p12_p10 = scmp.ge.s32.totalorder %s15_s12, 4  }
 0x1f3   :  { %14 = sbr.rel (!%p12_p10) target bundleno = 2 (0x2), region = 103 }
 0x1fa   :  { %1723 = vsyncpa [#allocation5], 1 }
 0x1fb   :  { %1725 = vsyncpa [#allocation5 + $0x1], 1 }
 0x1fc   :  { %1726 = vsyncpa [#allocation7], 1 }

// kernel: conv1_forward.12
= control target key start
LH: loop header
LB: loop body
LE: loop exit
PB: predicated region body
PF: predicated region fallthrough
CT: control target
= control target key end

     0   :  { %v978_v22 = vmov 1966171168   ;;  %v156_v24 = vlaneseq  ;;  %s1213_s1 = inlined_call_operand.vmem [shape: bf16[1024,128], index: 1, kind: input, shape index: {}]   ;;  %s1214_s0 = inlined_call_operand.vmem [shape: bf16[2,1024], index: 0, kind: input, shape index: {}]   ;;  %s1215_s2 = inlined_call_operand.vmem [shape: f32[1,128], index: 2, kind: input, shape index: {}]   ;;  %s1216_s3 = inlined_call_operand.vmem [shape: bf16[2,128], index: 3, kind: output, shape index: {}]  }
   0x1   :  { %v913_v0 = vld [vmem:[%s1213_s1 + $0x40] sm:$0xff]   ;;  %v917_v4 = vld [vmem:[%s1213_s1 + $0x48] sm:$0xff]   ;;  %v921_v8 = vld [vmem:[%s1213_s1 + $0x50] sm:$0xff]   ;;  %v154_v23 = vunpack.c.l.s4 %v978_v22 }
   0x2   :  { %v914_v1 = vld [vmem:[%s1213_s1 + $0xc0] sm:$0xff]   ;;  %824 = vmatprep.subr.bf16.mxu0 %v913_v0  ;;  %v918_v5 = vld [vmem:[%s1213_s1 + $0xc8] sm:$0xff]   ;;  %v922_v9 = vld [vmem:[%s1213_s1 + $0xd0] sm:$0xff]   ;;  %v157_v30 = vshrl.u32 %v156_v24, 7 }
   0x3   :  { %v915_v2 = vld [vmem:[%s1213_s1] sm:$0xff]   ;;  %846 = vmatprep.subr.bf16.mxu1 %v914_v1  ;;  %v919_v6 = vld [vmem:[%s1213_s1 + $0x8] sm:$0xff]   ;;  %v923_v10 = vld [vmem:[%s1213_s1 + $0x10] sm:$0xff]   ;;  %v155_v29 = vunpack.c.0.s8 %v154_v23 }
   0x4   :  { %v916_v3 = vld [vmem:[%s1213_s1 + $0x80] sm:$0xff]   ;;  %825 = vmatpush3.bf16.msra.mxu0 %v915_v2  ;;  %v920_v7 = vld [vmem:[%s1213_s1 + $0x88] sm:$0xff]   ;;  %v924_v11 = vld [vmem:[%s1213_s1 + $0x90] sm:$0xff]  }
   0x5   :  { %847 = vmatpush3.bf16.msra.mxu1 %v916_v3  ;;  %826 = vmatprep.subr.bf16.mxu0 %v917_v4  ;;  %v925_v12 = vld [vmem:[%s1213_s1 + $0x58] sm:$0xff]   ;;  %v929_v16 = vld [vmem:[%s1213_s1 + $0x60] sm:$0xff]   ;;  %v933_v20 = vld [vmem:[%s1213_s1 + $0x68] sm:$0xff]   ;;  %v1089_v35 = vsub.s32 %v155_v29, %v157_v30 }
   0x6   :  { %848 = vmatprep.subr.bf16.mxu1 %v918_v5  ;;  %v926_v13 = vld [vmem:[%s1213_s1 + $0xd8] sm:$0xff]   ;;  %v930_v17 = vld [vmem:[%s1213_s1 + $0xe0] sm:$0xff]   ;;  %v934_v21 = vld [vmem:[%s1213_s1 + $0xe8] sm:$0xff]  }
   0x7   :  { %v927_v14 = vld [vmem:[%s1213_s1 + $0x18] sm:$0xff]   ;;  %v931_v18 = vld [vmem:[%s1213_s1 + $0x20] sm:$0xff]   ;;  %v935_v25 = vld [vmem:[%s1213_s1 + $0x28] sm:$0xff]  }
   0x8   :  { %827 = vmatpush3.bf16.msra.mxu0 %v919_v6  ;;  %v928_v15 = vld [vmem:[%s1213_s1 + $0x98] sm:$0xff]   ;;  %v932_v19 = vld [vmem:[%s1213_s1 + $0xa0] sm:$0xff]   ;;  %v936_v26 = vld [vmem:[%s1213_s1 + $0xa8] sm:$0xff]  }
   0x9   :  { %849 = vmatpush3.bf16.msra.mxu1 %v920_v7  ;;  %828 = vmatprep.subr.bf16.mxu0 %v921_v8  ;;  %v937_v27 = vld [vmem:[%s1213_s1 + $0x70] sm:$0xff]   ;;  %v941_v33 = vld [vmem:[%s1213_s1 + $0x78] sm:$0xff]   ;;  %v15_v38 = vld [vmem:[%s1214_s0] sm:$0xff] }
   0xa   :  { %850 = vmatprep.subr.bf16.mxu1 %v922_v9  ;;  %v938_v28 = vld [vmem:[%s1213_s1 + $0xf0] sm:$0xff]   ;;  %v942_v34 = vld [vmem:[%s1213_s1 + $0xf8] sm:$0xff]   ;;  %v152_v39 = vcombine.high %v15_v38, %v15_v38  ;;  %v159_v40 = vrot.slane %v15_v38, %v1089_v35  ;;  %v946_v41 = vld [vmem:[%s1213_s1 + $0x140] sm:$0xff]  }
   0xb   :  { %v939_v31 = vld [vmem:[%s1213_s1 + $0x30] sm:$0xff]   ;;  %v943_v36 = vld [vmem:[%s1213_s1 + $0x38] sm:$0xff]   ;;  %v947_v42 = vld [vmem:[%s1213_s1 + $0x1c0] sm:$0xff]  }
   0xc   :  { %829 = vmatpush3.bf16.msra.mxu0 %v923_v10  ;;  %v940_v32 = vld [vmem:[%s1213_s1 + $0xb0] sm:$0xff]   ;;  %v944_v37 = vld [vmem:[%s1213_s1 + $0xb8] sm:$0xff]   ;;  %v167_v43 = vcombine.high %v159_v40, %v159_v40  ;;  %v175_v44 = vrot.slane %v159_v40, %v1089_v35  ;;  %v1109_v45 = vrot.slane %v152_v39, %v1089_v35  ;;  %v948_v47 = vld [vmem:[%s1213_s1 + $0x100] sm:$0xff]  }
   0xd   :  { %851 = vmatpush3.bf16.msra.mxu1 %v924_v11  ;;  %830 = vmatprep.subr.bf16.mxu0 %v925_v12  ;;  %v950_v50 = vld [vmem:[%s1213_s1 + $0x148] sm:$0xff]   ;;  %v949_v52 = vld [vmem:[%s1213_s1 + $0x180] sm:$0xff]   ;;  %v954_v57 = vld [vmem:[%s1213_s1 + $0x150] sm:$0xff]  }
   0xe   :  { %852 = vmatprep.subr.bf16.mxu1 %v926_v13  ;;  %v189_v46 = vrot.slane %v167_v43, %v1089_v35  ;;  %v168_v48 = vcombine.high %v1109_v45, %v1109_v45  ;;  %v197_v49 = vcombine.high %v175_v44, %v175_v44  ;;  %v951_v54 = vld [vmem:[%s1213_s1 + $0x1c8] sm:$0xff]   ;;  %v955_v59 = vld [vmem:[%s1213_s1 + $0x1d0] sm:$0xff]   ;;  %v958_v61 = vld [vmem:[%s1213_s1 + $0x158] sm:$0xff]  }
   0xf   :  { %v952_v55 = vld [vmem:[%s1213_s1 + $0x108] sm:$0xff]   ;;  %v956_v60 = vld [vmem:[%s1213_s1 + $0x110] sm:$0xff]   ;;  %v959_v63 = vld [vmem:[%s1213_s1 + $0x1d8] sm:$0xff]  }
  0x10   :  { %831 = vmatpush3.bf16.msra.mxu0 %v927_v14  ;;  %625 = vmatprep.mubr.bf16.mxu0 %v189_v46  ;;  %v199_v51 = vcombine.high %v189_v46, %v189_v46  ;;  %v196_v53 = vrot.slane %v168_v48, %v1089_v35  ;;  %v953_v58 = vld [vmem:[%s1213_s1 + $0x188] sm:$0xff]   ;;  %v957_v62 = vld [vmem:[%s1213_s1 + $0x190] sm:$0xff]   ;;  %v960_v0 = vld [vmem:[%s1213_s1 + $0x118] sm:$0xff]  }
  0x11   :  { %853 = vmatpush3.bf16.msra.mxu1 %v928_v15  ;;  %832 = vmatprep.subr.bf16.mxu0 %v929_v16  ;;  %v962_v1 = vld [vmem:[%s1213_s1 + $0x160] sm:$0xff]   ;;  %v961_v2 = vld [vmem:[%s1213_s1 + $0x198] sm:$0xff]   ;;  %v966_v5 = vld [vmem:[%s1213_s1 + $0x168] sm:$0xff]  }
  0x12   :  { %854 = vmatprep.subr.bf16.mxu1 %v930_v17  ;;  %665 = vmatprep.mubr.bf16.mxu1 %v199_v51  ;;  %v200_v56 = vcombine.high %v196_v53, %v196_v53  ;;  %v963_v3 = vld [vmem:[%s1213_s1 + $0x1e0] sm:$0xff]   ;;  %v967_v7 = vld [vmem:[%s1213_s1 + $0x1e8] sm:$0xff]   ;;  %v970_v9 = vld [vmem:[%s1213_s1 + $0x170] sm:$0xff]   ;;  %v182_v17 = vrot.slane %v1109_v45, %v1089_v35 }
  0x13   :  { %v964_v4 = vld [vmem:[%s1213_s1 + $0x120] sm:$0xff]   ;;  %v968_v8 = vld [vmem:[%s1213_s1 + $0x128] sm:$0xff]   ;;  %v971_v11 = vld [vmem:[%s1213_s1 + $0x1f0] sm:$0xff]  }
  0x14   :  { %833 = vmatpush3.bf16.msra.mxu0 %v931_v18  ;;  %v965_v6 = vld [vmem:[%s1213_s1 + $0x1a0] sm:$0xff]   ;;  %v969_v10 = vld [vmem:[%s1213_s1 + $0x1a8] sm:$0xff]   ;;  %v972_v12 = vld [vmem:[%s1213_s1 + $0x130] sm:$0xff]  }
  0x15   :  { %855 = vmatpush3.bf16.msra.mxu1 %v932_v19  ;;  %834 = vmatprep.subr.bf16.mxu0 %v933_v20  ;;  %v974_v13 = vld [vmem:[%s1213_s1 + $0x178] sm:$0xff]   ;;  %v973_v14 = vld [vmem:[%s1213_s1 + $0x1b0] sm:$0xff]   ;;  %v198_v19 = vcombine.high %v182_v17, %v182_v17 }
  0x16   :  { %856 = vmatprep.subr.bf16.mxu1 %v934_v21  ;;  %v975_v15 = vld [vmem:[%s1213_s1 + $0x1f8] sm:$0xff]   ;;  %v759_v21 = vld [vmem:[%s1215_s2] ss:$0 sm:$0xff] }
  0x17   :  { %v976_v16 = vld [vmem:[%s1213_s1 + $0x138] sm:$0xff]  }
  0x18   :  { %835 = vmatpush3.bf16.msra.mxu0 %v935_v25  ;;  %v977_v18 = vld [vmem:[%s1213_s1 + $0x1b8] sm:$0xff]  }
  0x19   :  { %857 = vmatpush3.bf16.msra.mxu1 %v936_v26  ;;  %836 = vmatprep.subr.bf16.mxu0 %v937_v27 }
  0x1a   :  { %858 = vmatprep.subr.bf16.mxu1 %v938_v28 }
  0x1c   :  { %837 = vmatpush3.bf16.msra.mxu0 %v939_v31 }
  0x1d   :  { %859 = vmatpush3.bf16.msra.mxu1 %v940_v32  ;;  %838 = vmatprep.subr.bf16.mxu0 %v941_v33 }
  0x1e   :  { %860 = vmatprep.subr.bf16.mxu1 %v942_v34 }
  0x20   :  { %839 = vmatpush3.bf16.msra.mxu0 %v943_v36 }
  0x21   :  { %861 = vmatpush3.bf16.msra.mxu1 %v944_v37  ;;  %868 = vmatprep.subr.bf16.mxu0 %v946_v41 }
  0x22   :  { %890 = vmatprep.subr.bf16.mxu1 %v947_v42 }
  0x23   :  { %626 = vmatmul.mubr.bf16.vlgmr.msra.gmra.mrb[0].mxu0 %v175_v44 }
  0x24   :  { %869 = vmatpush3.bf16.msra.mxu0 %v948_v47  ;;  %666 = vmatmul.mubr.bf16.vlgmr.msra.gmra.mrb[0].mxu1 %v197_v49 }
  0x25   :  { %870 = vmatprep.subr.bf16.mxu0 %v950_v50  ;;  %891 = vmatpush3.bf16.msra.mxu1 %v949_v52 }
  0x26   :  { %705 = vmatprep.mubr.bf16.mxu0 %v196_v53  ;;  %892 = vmatprep.subr.bf16.mxu1 %v951_v54 }
  0x27   :  { %745 = vmatprep.mubr.bf16.mxu1 %v200_v56 }
  0x28   :  { %871 = vmatpush3.bf16.msra.mxu0 %v952_v55 }
  0x29   :  { %872 = vmatprep.subr.bf16.mxu0 %v954_v57  ;;  %893 = vmatpush3.bf16.msra.mxu1 %v953_v58 }
  0x2a   :  { %894 = vmatprep.subr.bf16.mxu1 %v955_v59 }
  0x2c   :  { %873 = vmatpush3.bf16.msra.mxu0 %v956_v60 }
  0x2d   :  { %874 = vmatprep.subr.bf16.mxu0 %v958_v61  ;;  %895 = vmatpush3.bf16.msra.mxu1 %v957_v62 }
  0x2e   :  { %896 = vmatprep.subr.bf16.mxu1 %v959_v63 }
  0x30   :  { %875 = vmatpush3.bf16.msra.mxu0 %v960_v0 }
  0x31   :  { %876 = vmatprep.subr.bf16.mxu0 %v962_v1  ;;  %897 = vmatpush3.bf16.msra.mxu1 %v961_v2 }
  0x32   :  { %898 = vmatprep.subr.bf16.mxu1 %v963_v3 }
  0x34   :  { %877 = vmatpush3.bf16.msra.mxu0 %v964_v4 }
  0x35   :  { %878 = vmatprep.subr.bf16.mxu0 %v966_v5  ;;  %899 = vmatpush3.bf16.msra.mxu1 %v965_v6 }
  0x36   :  { %900 = vmatprep.subr.bf16.mxu1 %v967_v7 }
  0x38   :  { %879 = vmatpush3.bf16.msra.mxu0 %v968_v8 }
  0x39   :  { %880 = vmatprep.subr.bf16.mxu0 %v970_v9  ;;  %901 = vmatpush3.bf16.msra.mxu1 %v969_v10 }
  0x3a   :  { %902 = vmatprep.subr.bf16.mxu1 %v971_v11 }
  0x3c   :  { %881 = vmatpush3.bf16.msra.mxu0 %v972_v12 }
  0x3d   :  { %882 = vmatprep.subr.bf16.mxu0 %v974_v13  ;;  %903 = vmatpush3.bf16.msra.mxu1 %v973_v14 }
  0x3e   :  { %904 = vmatprep.subr.bf16.mxu1 %v975_v15 }
  0x40   :  { %883 = vmatpush3.bf16.msra.mxu0 %v976_v16 }
  0x41   :  { %905 = vmatpush3.bf16.msra.mxu1 %v977_v18 }
  0x43   :  { %706 = vmatmul.mubr.bf16.vlgmr.msra.gmra.mrb[4].mxu0 %v182_v17 }
  0x44   :  { %746 = vmatmul.mubr.bf16.vlgmr.msra.gmra.mrb[4].mxu1 %v198_v19 }
  0xf6   :  { %v840_v20 = vpop.f32.mrb[0].mxu0 }
  0xf7   :  { %v841_v22 = vpop.f32.mrb[1].mxu0  ;;  %v862_v23 = vpop.f32.mrb[0].mxu1 }
  0xf8   :  { %v842_v24 = vadd.f32 %v841_v22, %v840_v20  ;;  %v843_v25 = vpop.f32.mrb[2].mxu0  ;;  %v863_v26 = vpop.f32.mrb[1].mxu1 }
  0xf9   :  { %v844_v27 = vpop.f32.mrb[3].mxu0  ;;  %v864_v29 = vadd.f32 %v863_v26, %v862_v23  ;;  %v865_v30 = vpop.f32.mrb[2].mxu1 }
  0xfa   :  { %v628_v28 = vadd.f32 %v842_v24, %v759_v21  ;;  %v866_v31 = vpop.f32.mrb[3].mxu1 }
  0xfc   :  { %v668_v32 = vadd.f32 %v864_v29, %v628_v28 }
 0x116   :  { %v884_v33 = vpop.f32.mrb[4].mxu0 }
 0x117   :  { %v885_v34 = vpop.f32.mrb[5].mxu0  ;;  %v906_v35 = vpop.f32.mrb[4].mxu1 }
 0x118   :  { %v886_v36 = vadd.f32 %v885_v34, %v884_v33  ;;  %v887_v37 = vpop.f32.mrb[6].mxu0  ;;  %v907_v38 = vpop.f32.mrb[5].mxu1 }
 0x119   :  { %v888_v39 = vpop.f32.mrb[7].mxu0  ;;  %v908_v41 = vadd.f32 %v907_v38, %v906_v35  ;;  %v909_v42 = vpop.f32.mrb[6].mxu1 }
 0x11a   :  { %v708_v40 = vadd.f32 %v886_v36, %v668_v32  ;;  %v910_v43 = vpop.f32.mrb[7].mxu1 }
 0x11c   :  { %v748_v44 = vadd.f32 %v908_v41, %v708_v40 }
 0x11e   :  { %v753_v45 = vpack.c.bf16 %v748_v44, %v748_v44 }
 0x120   :  { %754 = vst [vmem:[%s1216_s3] sm:$0x1] %v753_v45 }

// kernel: conv1_forward.13
= control target key start
LH: loop header
LB: loop body
LE: loop exit
PB: predicated region body
PF: predicated region fallthrough
CT: control target
= control target key end

     0   :  { %v217_v1 = vmov 0.0   ;;  %vm218_vm0 = vmmov 0   ;;  %s282_s0 = inlined_call_operand.vmem [shape: bf16[2,128], index: 0, kind: input, shape index: {}]   ;;  %s283_s1 = inlined_call_operand.vmem [shape: bf16[128,10], index: 1, kind: input, shape index: {}]   ;;  %s284_s2 = inlined_call_operand.vmem [shape: f32[1,10], index: 2, kind: input, shape index: {}]   ;;  %s285_s3 = inlined_call_operand.hbm [shape: f32[2,10], index: 3, kind: output, shape index: {}]  }
   0x1   :  { %v185_v0 = vld [vmem:[%s283_s1] sm:$0xff]   ;;  %162 = vmatprep.subr.bf16.mxu0 %v217_v1  ;;  %v186_v2 = vld [vmem:[%s283_s1 + $0x8] sm:$0xff]   ;;  %178 = vmatprep.mubr.msk.bf16.mxu0 %vm218_vm0, %v217_v1  ;;  %v187_v3 = vld [vmem:[%s283_s1 + $0x10] sm:$0xff]  }
   0x2   :  { %163 = vmatpush3.bf16.msra.mxu0 %v185_v0 }
   0x3   :  { %164 = vmatprep.subr.bf16.mxu0 %v217_v1 }
   0x6   :  { %165 = vmatpush3.bf16.msra.mxu0 %v186_v2 }
   0x7   :  { %166 = vmatprep.subr.bf16.mxu0 %v217_v1 }
   0x8   :  { %8 = vsyncpa [#allocation3], 0  ;;  %v188_v4 = vld [vmem:[%s283_s1 + $0x18] sm:$0xff]   ;;  %v189_v5 = vld [vmem:[%s283_s1 + $0x20] sm:$0xff]   ;;  %s219_s5 = smov [#allocation2]   ;;  %vm128_vm1 = vcmask 74752  }
   0x9   :  { %v190_v6 = vld [vmem:[%s283_s1 + $0x28] sm:$0xff]   ;;  %v191_v7 = vld [vmem:[%s283_s1 + $0x30] sm:$0xff]   ;;  %v192_v8 = vld [vmem:[%s283_s1 + $0x38] sm:$0xff]   ;;  %s136_s6 = sshll.u32 %s219_s5, 4  ;;  %s137_s6 = int_to_ptr.vmem [resolvable:$true] %s136_s6 }
   0xa   :  { %167 = vmatpush3.bf16.msra.mxu0 %v187_v3  ;;  %v16_v9 = vld [vmem:[%s282_s0] sm:$0x1]  ;;  %s193_s1 = scalar_lea.vmem %s137_s6, 32  ;;  %p198_p1 = scmp.lt.s32.totalorder %s137_s6, %s137_s6 }
   0xb   :  { %168 = vmatprep.subr.bf16.mxu0 %v217_v1  ;;  %v144_v10 = vld [vmem:[%s284_s2] ss:$0 sm:$0xff]  ;;  %p194_p0 = scmp.ne.s32.totalorder %s137_s6, %s193_s1  ;;  %p199_p2 = scmp.lt.s32.totalorder %s193_s1, %s193_s1 }
   0xd   :  { %p200_p3 = por %p199_p2, %p198_p1 }
   0xe   :  { %169 = vmatpush3.bf16.msra.mxu0 %v188_v4 }
   0xf   :  { %170 = vmatprep.subr.bf16.mxu0 %v217_v1  ;;  %p201_p4 = pnand %p200_p3, %p194_p0 }
  0x12   :  { %171 = vmatpush3.bf16.msra.mxu0 %v189_v5 }
  0x13   :  { %172 = vmatprep.subr.bf16.mxu0 %v217_v1 }
  0x16   :  { %173 = vmatpush3.bf16.msra.mxu0 %v190_v6 }
  0x17   :  { %174 = vmatprep.subr.bf16.mxu0 %v217_v1 }
  0x1a   :  { %175 = vmatpush3.bf16.msra.mxu0 %v191_v7 }
  0x1b   :  { %176 = vmatprep.subr.bf16.mxu0 %v217_v1 }
  0x1e   :  { %177 = vmatpush3.bf16.msra.mxu0 %v192_v8 }
  0x21   :  { %179 = vmatmul.mubr.bf16.vlgmr.msra.gmra.mrb[0].mxu0 %v16_v9 }
  0xf4   :  { %v122_v11 = vpop.f32.mrb[0].mxu0 }
  0xf5   :  { %v123_v12 = vadd.f32 %v144_v10, %v122_v11  ;;  %v180_v13 = vpop.f32.mrb[1].mxu0 }
  0xf6   :  { %v125_v14 = vpop.f32.mrb[2].mxu0 }
  0xf7   :  { %v181_v15 = vpop.f32.mrb[3].mxu0  ;;  %129 = vst.msk [vmem:[#allocation2] sm:$0x3] %vm128_vm1, %v123_v12 }
  0xf8   :  { %204 = shalt.err (!%p201_p4)
}
  0xf9   :  { %s205_s2 = scalar_lea.hbm %s285_s3, 32 }
  0xfa   :  { %p206_p5 = scmp.ne.s32.totalorder %s285_s3, %s205_s2  ;;  %p209_p6 = scmp.lt.u32.totalorder %s205_s2, %s285_s3 }
  0xfc   :  { %p211_p7 = pnand %p209_p6, %p206_p5 }
  0xfe   :  { %214 = shalt.err (!%p211_p7)
}
  0xff   :  { %139 = dma.vmem_to_hbm [thread:$0]  %s137_s6, 32, %s285_s3, [#allocation3]  }
 0x100   :  { %215 = dma.done.wait [#allocation3], 32  }
 0x101   :  { %216 = vsyncadd [#allocation3], 4294967264 }
 0x102   :  { %143 = vsyncpa [#allocation3], 1 }

// kernel: conv1_forward.11
= control target key start
LH: loop header
LB: loop body
LE: loop exit
PB: predicated region body
PF: predicated region fallthrough
CT: control target
= control target key end

     0   :  { %8 = vsyncpa [#allocation3], 0  ;;  %s3677_s0 = inlined_call_operand.vmem [shape: bf16[2,2048], index: 0, kind: input, shape index: {}]   ;;  %s3678_s1 = inlined_call_operand.hbm [shape: bf16[2048,1024], index: 1, kind: input, shape index: {}]   ;;  %s3679_s2 = inlined_call_operand.hbm [shape: f32[1,1024], index: 2, kind: input, shape index: {}]   ;;  %s3680_s3 = inlined_call_operand.vmem [shape: bf16[2,1024], index: 3, kind: output, shape index: {}]  }
   0x1   :  { %10 = vsyncpa [#allocation3 + $0x1], 0 }
   0x2   :  { %11 = vsyncpa [#allocation5], 0 }
   0x3   :  { %13 = vsyncpa [#allocation5 + $0x1], 0  ;;  %s3195_s12 = smov 0   ;;  %s3197_s13 = smov 0  }
   0x4   :  { %s3199_s14 = smov 0   ;;  %s3201_s15 = smov 0  }
   0x5 LB: > { %s2331_s16 = sadd.s32 4294967295, %s3167_s15   ;;  %s3215_s17 = sadd.s32 1, %s3167_s15   ;;  %s3167_s15 = sphi %s3201_s15, %s3690_s15   ;;  %s3163_s14 = sphi %s3199_s14, %s3689_s14   ;;  %s3159_s13 = sphi %s3197_s13, %s3688_s13   ;;  %s3155_s12 = sphi %s3195_s12, %s3687_s12  }
   0x6   : > { %s44_s18 = ssub.s32 %s3167_s15, %s3215_s17  ;;  %s47_s19 = sadd.s32 1, %s3163_s14 }
   0x7   : > { %p45_p0 = scmp.eq.s32.totalorder %s44_s18, 0  ;;  %p54_p1 = scmp.ne.s32.totalorder %s3163_s14, %s3159_s13 }
   0x8   : > { %p55_p2 = scmp.eq.s32.totalorder %s3167_s15, 0  ;;  %p60_p3 = scmp.ne.s32.totalorder %s3159_s13, %s3155_s12 }
   0x9   : > { %s3225_s20 = scalar_select %p45_p0, %s3163_s14, %s47_s19  }
   0xa   : > { %p56_p4 = por %p55_p2, %p54_p1  ;;  %p61_p5 = scmp.eq.s32.totalorder %s2331_s16, 0 }
   0xb   : > { %p2646_p6 = scmp.lt.s32.totalorder %s3167_s15, 4  ;;  %s3235_s22 = sand.u32 1, %s3163_s14  }
   0xc   : > { %p3230_p7 = por %p61_p5, %p60_p3  ;;  %s2335_s23 = sshll.u32 %s3235_s22, 11 }
   0xd   : > { %s2605_s24 = sshll.u32 %s3167_s15, 7  ;;  %s143_s28 = scalar_lea.vmem [#allocation2], %s2335_s23 }
   0xe   : > { %s3682_s21 = scalar_select %p3230_p7, 1, 0 }
   0xf   : > { %s3242_s27 = scalar_lea.hbm %s3678_s1, %s2605_s24  ;;  %s150_s29 = sshll.u32 %s143_s28, 4  ;;  %s3244_s29 = int_to_ptr.vmem [resolvable:$true] %s150_s29 }
  0x10   : > { %p3246_p8 = pnand %p2646_p6, %p56_p4  ;;  %s140_s4 = scalar_lea.sflag [#allocation3], %s3235_s22 }
  0x11   : > { %s3069_s5 = scalar_lea.hbm %s3242_s27, 32768  ;;  %s3074_s8 = scalar_lea.hbm %s3678_s1, 131072 }
  0x12   : > { %p3070_p9 = scmp.ne.s32.totalorder %s3242_s27, %s3069_s5  ;;  %p3071_p10 = pneg %p3246_p8 }
  0x13   : > { %p3075_p13 = scmp.lt.u32.totalorder %s3242_s27, %s3678_s1  ;;  %p3076_p0 = scmp.lt.u32.totalorder %s3074_s8, %s3069_s5 }
  0x14   : > { %p3072_p11 = pnand %p3071_p10, %p3070_p9  ;;  %p3078_p2 = scmp.lt.u32.totalorder %s3069_s5, %s3242_s27 }
  0x15   : > { %p3077_p1 = por %p3076_p0, %p3075_p13 }
  0x16   : > { %p3073_p12 = pneg %p3072_p11 }
  0x17   : > { %p3079_p3 = por %p3078_p2, %p3077_p1 }
  0x19   : > { %p3080_p4 = pnand %p3079_p3, %p3073_p12 }
  0x1b   : > { %3083 = shalt.err (!%p3080_p4)
}
  0x1c   : > { %s3084_s11 = scalar_lea.vmem %s3244_s29, 32768  ;;  %s3169_s12 = smov [#allocation2]  }
  0x1d   : > { %p3085_p5 = scmp.ne.s32.totalorder %s3244_s29, %s3084_s11  ;;  %s3089_s18 = sshll.u32 %s3169_s12, 4  ;;  %s3090_s18 = int_to_ptr.vmem [resolvable:$false] %s3089_s18 }
  0x1e   : > { %s3091_s19 = scalar_lea.vmem %s3090_s18, 65536  ;;  %p3092_p11 = scmp.lt.s32.totalorder %s3244_s29, %s3090_s18 }
  0x1f   : > { %p3087_p6 = pnand %p3085_p5, %p3071_p10  ;;  %p3093_p13 = scmp.lt.s32.totalorder %s3091_s19, %s3084_s11 }
  0x21   : > { %p3088_p9 = pneg %p3087_p6  ;;  %p3094_p0 = por %p3093_p13, %p3092_p11 }
  0x23   : > { %p3095_p1 = pnand %p3094_p0, %p3088_p9 }
  0x25   : > { %3098 = shalt.err (!%p3095_p1)
}
  0x26   : > { %s3170_s23 = smov 512   ;;  %s3171_s24 = smov 128  }
  0x27   : > { %s3172_s25 = smov 8   ;;  %p2341_p12 = scmp.ge.s32.totalorder %s3167_s15, 1 }
  0x28   : > { %2642 = dma.hbm_to_vmem [thread:$0]  (!%p3246_p8), %s3242_s27, 32768, %s3244_s29, %s140_s4, %s3170_s23, %s3171_s24, %s3172_s25  }
  0x29   : > { %p177_p2 = scmp.lt.s32.totalorder %s3167_s15, 5  ;;  %s2338_s26 = sshll.u32 %s3235_s22, 1 }
  0x2a   : > { %s2606_s5 = sshll.u32 %s3167_s15, 5  ;;  %s164_s6 = scalar_lea.vmem [#allocation4], %s2338_s26 }
  0x2b   : > { %p3281_p3 = pnand %p2341_p12, %p177_p2  ;;  %s172_s7 = sshll.u32 %s164_s6, 4  ;;  %s173_s7 = int_to_ptr.vmem [resolvable:$true] %s172_s7 }
  0x2c   : > { %s3289_s10 = scalar_lea.hbm %s3679_s2, %s2606_s5  ;;  %s161_s27 = scalar_lea.sflag [#allocation5], %s3235_s22 }
  0x2d   : > { %s3684_s28 = scalar_select %p3281_p3, 1, 0 }
  0x2e   : > { %s3099_s29 = scalar_lea.hbm %s3289_s10, 32  ;;  %s3104_s12 = scalar_lea.hbm %s3679_s2, 128 }
  0x2f   : > { %p3100_p4 = scmp.ne.s32.totalorder %s3289_s10, %s3099_s29  ;;  %p3105_p9 = scmp.lt.u32.totalorder %s3289_s10, %s3679_s2 }
  0x30   : > { %p3106_p11 = scmp.lt.u32.totalorder %s3104_s12, %s3099_s29  ;;  %p3108_p0 = scmp.lt.u32.totalorder %s3099_s29, %s3289_s10 }
  0x31   : > { %p3102_p5 = pnand %p3100_p4, %p3071_p10 }
  0x32   : > { %p3107_p13 = por %p3106_p11, %p3105_p9 }
  0x33   : > { %p3103_p6 = pneg %p3102_p5 }
  0x34   : > { %p3109_p1 = por %p3108_p0, %p3107_p13 }
  0x36   : > { %p3110_p12 = pnand %p3109_p1, %p3103_p6 }
  0x38   : > { %3113 = shalt.err (!%p3110_p12)
}
  0x39   : > { %s3114_s22 = scalar_lea.vmem %s173_s7, 32  ;;  %s3173_s23 = smov [#allocation4]  }
  0x3a   : > { %p3115_p2 = scmp.ne.s32.totalorder %s173_s7, %s3114_s22  ;;  %s3119_s24 = sshll.u32 %s3173_s23, 4  ;;  %s3120_s24 = int_to_ptr.vmem [resolvable:$false] %s3119_s24 }
  0x3b   : > { %s3121_s25 = scalar_lea.vmem %s3120_s24, 64  ;;  %p3122_p7 = scmp.lt.s32.totalorder %s173_s7, %s3120_s24 }
  0x3c   : > { %p3117_p4 = pnand %p3115_p2, %p3071_p10  ;;  %p3123_p3 = scmp.lt.s32.totalorder %s3121_s25, %s3114_s22 }
  0x3e   : > { %p3118_p5 = pneg %p3117_p4  ;;  %p3124_p9 = por %p3123_p3, %p3122_p7 }
  0x40   : > { %p3125_p11 = pnand %p3124_p9, %p3118_p5 }
  0x42   : > { %3128 = shalt.err (!%p3125_p11)
}
  0x43   : > { %2645 = dma.hbm_to_vmem [thread:$0]  (!%p3246_p8), %s3289_s10, 32, %s173_s7, %s161_s27  }
  0x44   : > { %p3685_p6 = scmp.ne.s32.totalorder %s3684_s28, 0 }
  0x45   : > { %s183_s26 = sand.u32 (!%p3685_p6), 1, %s3159_s13   ;;  %p3686_p10 = scmp.ne.s32.totalorder (!%p3685_p6), %s3682_s21, 0 }
  0x46   : > { %181 = sbr.rel (%p3685_p6) target bundleno = 562 (0x232), region = 32  ;;  %s2342_s5 = sshll.u32 (!%p3685_p6), %s183_s26, 11 }
  0x47   : > { %s184_s6 = scalar_lea.sflag (!%p3685_p6), [#allocation3], %s183_s26  ;;  %s3314_s8 = scalar_lea.vmem (!%p3685_p6), [#allocation2], %s2342_s5 }
  0x4d   : > { %3146 = dma.done.wait (%p3686_p10), %s184_s6, 32768  }
  0x4e   : > { %3148 = vsyncadd (%p3686_p10), %s184_s6, 4294934528  ;;  %s2343_s9 = sshll.u32 %s183_s26, 1  ;;  %s193_s30 = scalar_lea.sflag [#allocation5], %s183_s26 }
  0x4f   : > { %s3320_s29 = scalar_lea.vmem [#allocation4], %s2343_s9 }
  0x50   : > { %3150 = dma.done.wait (%p3686_p10), %s193_s30, 32  }
  0x51   : > { %3152 = vsyncadd (%p3686_p10), %s193_s30, 4294967264  ;;  %v2683_v0 = vld [vmem:[%s3314_s8 + $0x4] ss:$8 sps:$4 sm:$0xff]   ;;  %v2687_v2 = vld [vmem:[%s3314_s8] ss:$8 sps:$4 sm:$0xff]   ;;  %v490_v36 = vlaneseq  ;;  %s2344_s27 = sshll.u32 %s2331_s16, 1 }
  0x52   : > { %v2685_v1 = vld [vmem:[%s3314_s8 + $0x404] ss:$8 sps:$4 sm:$0xff]   ;;  %1896 = vmatprep.subr.bf16.mxu1 %v2683_v0  ;;  %v2688_v3 = vld [vmem:[%s3314_s8 + $0x400] ss:$8 sps:$4 sm:$0xff]   ;;  %v2689_v4 = vld [vmem:[%s3314_s8 + $0x14] ss:$8 sps:$4 sm:$0xff]  }
  0x53   : > { %2060 = vmatprep.subr.bf16.mxu0 %v2685_v1  ;;  %1897 = vmatpush1.bf16.msra.mxu1 %v2687_v2  ;;  %v2691_v5 = vld [vmem:[%s3314_s8 + $0x414] ss:$8 sps:$4 sm:$0xff]   ;;  %v2693_v6 = vld [vmem:[%s3314_s8 + $0x10] ss:$8 sps:$4 sm:$0xff]   ;;  %v2695_v8 = vld [vmem:[%s3314_s8 + $0x24] ss:$8 sps:$4 sm:$0xff]  }
  0x54   : > { %2061 = vmatpush1.bf16.msra.mxu0 %v2688_v3  ;;  %1898 = vmatprep.subr.bf16.mxu1 %v2689_v4  ;;  %v2694_v7 = vld [vmem:[%s3314_s8 + $0x410] ss:$8 sps:$4 sm:$0xff]   ;;  %v2697_v9 = vld [vmem:[%s3314_s8 + $0x424] ss:$8 sps:$4 sm:$0xff]   ;;  %v2699_v10 = vld [vmem:[%s3314_s8 + $0x20] ss:$8 sps:$4 sm:$0xff]  }
  0x55   : > { %2062 = vmatprep.subr.bf16.mxu0 %v2691_v5  ;;  %v2700_v11 = vld [vmem:[%s3314_s8 + $0x420] ss:$8 sps:$4 sm:$0xff]   ;;  %v2701_v12 = vld [vmem:[%s3314_s8 + $0x34] ss:$8 sps:$4 sm:$0xff]   ;;  %v2705_v14 = vld [vmem:[%s3314_s8 + $0x30] ss:$8 sps:$4 sm:$0xff]  }
  0x56   : > { %v2703_v13 = vld [vmem:[%s3314_s8 + $0x434] ss:$8 sps:$4 sm:$0xff]   ;;  %v2706_v15 = vld [vmem:[%s3314_s8 + $0x430] ss:$8 sps:$4 sm:$0xff]   ;;  %v2707_v16 = vld [vmem:[%s3314_s8 + $0x44] ss:$8 sps:$4 sm:$0xff]  }
  0x57   : > { %1899 = vmatpush1.bf16.msra.mxu1 %v2693_v6  ;;  %v2709_v17 = vld [vmem:[%s3314_s8 + $0x444] ss:$8 sps:$4 sm:$0xff]   ;;  %v2711_v18 = vld [vmem:[%s3314_s8 + $0x40] ss:$8 sps:$4 sm:$0xff]   ;;  %v2713_v20 = vld [vmem:[%s3314_s8 + $0x54] ss:$8 sps:$4 sm:$0xff]  }
  0x58   : > { %2063 = vmatpush1.bf16.msra.mxu0 %v2694_v7  ;;  %1900 = vmatprep.subr.bf16.mxu1 %v2695_v8  ;;  %v2712_v19 = vld [vmem:[%s3314_s8 + $0x440] ss:$8 sps:$4 sm:$0xff]   ;;  %v2715_v21 = vld [vmem:[%s3314_s8 + $0x454] ss:$8 sps:$4 sm:$0xff]   ;;  %v2717_v22 = vld [vmem:[%s3314_s8 + $0x50] ss:$8 sps:$4 sm:$0xff]  }
  0x59   : > { %2064 = vmatprep.subr.bf16.mxu0 %v2697_v9  ;;  %v2718_v23 = vld [vmem:[%s3314_s8 + $0x450] ss:$8 sps:$4 sm:$0xff]   ;;  %v2719_v24 = vld [vmem:[%s3314_s8 + $0x64] ss:$8 sps:$4 sm:$0xff]   ;;  %v2723_v26 = vld [vmem:[%s3314_s8 + $0x60] ss:$8 sps:$4 sm:$0xff]  }
  0x5a   : > { %v2721_v25 = vld [vmem:[%s3314_s8 + $0x464] ss:$8 sps:$4 sm:$0xff]   ;;  %v2724_v27 = vld [vmem:[%s3314_s8 + $0x460] ss:$8 sps:$4 sm:$0xff]   ;;  %v2725_v28 = vld [vmem:[%s3314_s8 + $0x74] ss:$8 sps:$4 sm:$0xff]  }
  0x5b   : > { %1901 = vmatpush1.bf16.msra.mxu1 %v2699_v10  ;;  %v2727_v29 = vld [vmem:[%s3314_s8 + $0x474] ss:$8 sps:$4 sm:$0xff]   ;;  %v2729_v30 = vld [vmem:[%s3314_s8 + $0x70] ss:$8 sps:$4 sm:$0xff]   ;;  %v2731_v32 = vld [vmem:[%s3314_s8 + $0x84] ss:$8 sps:$4 sm:$0xff]  }
  0x5c   : > { %2065 = vmatpush1.bf16.msra.mxu0 %v2700_v11  ;;  %1902 = vmatprep.subr.bf16.mxu1 %v2701_v12  ;;  %v2730_v31 = vld [vmem:[%s3314_s8 + $0x470] ss:$8 sps:$4 sm:$0xff]   ;;  %v2733_v33 = vld [vmem:[%s3314_s8 + $0x484] ss:$8 sps:$4 sm:$0xff]   ;;  %v2735_v34 = vld [vmem:[%s3314_s8 + $0x80] ss:$8 sps:$4 sm:$0xff]  }
  0x5d   : > { %2066 = vmatprep.subr.bf16.mxu0 %v2703_v13  ;;  %v2736_v35 = vld [vmem:[%s3314_s8 + $0x480] ss:$8 sps:$4 sm:$0xff]   ;;  %v3174_v37 = vmov 1966171168   ;;  %v2737_v39 = vld [vmem:[%s3314_s8 + $0x94] ss:$8 sps:$4 sm:$0xff]  }
  0x5e   : > { %v504_v38 = vunpack.c.l.s4 %v3174_v37  ;;  %v2739_v40 = vld [vmem:[%s3314_s8 + $0x494] ss:$8 sps:$4 sm:$0xff]   ;;  %v2741_v41 = vld [vmem:[%s3314_s8 + $0x90] ss:$8 sps:$4 sm:$0xff]   ;;  %v3365_v42 = vshrl.u32 %v490_v36, 7  ;;  %v3380_v52 = vld [vmem:[%s3677_s0] sm:$0xff] }
  0x5f   : > { %1903 = vmatpush1.bf16.msra.mxu1 %v2705_v14  ;;  %v2742_v44 = vld [vmem:[%s3314_s8 + $0x490] ss:$8 sps:$4 sm:$0xff]   ;;  %v2743_v45 = vld [vmem:[%s3314_s8 + $0xa4] ss:$8 sps:$4 sm:$0xff]   ;;  %v2747_v47 = vld [vmem:[%s3314_s8 + $0xa0] ss:$8 sps:$4 sm:$0xff]  }
  0x60   : > { %2067 = vmatpush1.bf16.msra.mxu0 %v2706_v15  ;;  %1904 = vmatprep.subr.bf16.mxu1 %v2707_v16  ;;  %v505_v43 = vunpack.c.0.s8 %v504_v38  ;;  %v2745_v46 = vld [vmem:[%s3314_s8 + $0x4a4] ss:$8 sps:$4 sm:$0xff]   ;;  %v2748_v48 = vld [vmem:[%s3314_s8 + $0x4a0] ss:$8 sps:$4 sm:$0xff]   ;;  %v2749_v50 = vld [vmem:[%s3314_s8 + $0xb4] ss:$8 sps:$4 sm:$0xff]  }
  0x61   : > { %2068 = vmatprep.subr.bf16.mxu0 %v2709_v17  ;;  %v2751_v51 = vld [vmem:[%s3314_s8 + $0x4b4] ss:$8 sps:$4 sm:$0xff]   ;;  %v2753_v53 = vld [vmem:[%s3314_s8 + $0xb0] ss:$8 sps:$4 sm:$0xff]   ;;  %v3389_v56 = vld [vmem:[%s3677_s0 + $0x8] sm:$0xff]  ;;  %p226_p7 = scmp.lt.s32.totalorder %s2344_s27, 7 }
  0x62   : > { %v3373_v49 = vsub.s32 %v505_v43, %v3365_v42  ;;  %v2754_v55 = vld [vmem:[%s3314_s8 + $0x4b0] ss:$8 sps:$4 sm:$0xff]   ;;  %v2755_v57 = vld [vmem:[%s3314_s8 + $0xc4] ss:$8 sps:$4 sm:$0xff]   ;;  %v2759_v63 = vld [vmem:[%s3314_s8 + $0xc0] ss:$8 sps:$4 sm:$0xff]  }
  0x63   : > { %1905 = vmatpush1.bf16.msra.mxu1 %v2711_v18  ;;  %v2757_v58 = vld [vmem:[%s3314_s8 + $0x4c4] ss:$8 sps:$4 sm:$0xff]   ;;  %v2760_v0 = vld [vmem:[%s3314_s8 + $0x4c0] ss:$8 sps:$4 sm:$0xff]   ;;  %v2761_v1 = vld [vmem:[%s3314_s8 + $0xd4] ss:$8 sps:$4 sm:$0xff]  }
  0x64   : > { %2069 = vmatpush1.bf16.msra.mxu0 %v2712_v19  ;;  %1906 = vmatprep.subr.bf16.mxu1 %v2713_v20  ;;  %v509_v54 = vrot.slane %v3380_v52, %v3373_v49  ;;  %v558_v60 = vrot.slane %v3389_v56, %v3373_v49  ;;  %v2763_v2 = vld [vmem:[%s3314_s8 + $0x4d4] ss:$8 sps:$4 sm:$0xff]   ;;  %v2765_v4 = vld [vmem:[%s3314_s8 + $0xd0] ss:$8 sps:$4 sm:$0xff]   ;;  %v2767_v6 = vld [vmem:[%s3314_s8 + $0xe4] ss:$8 sps:$4 sm:$0xff]  }
  0x65   : > { %2070 = vmatprep.subr.bf16.mxu0 %v2715_v21  ;;  %v2766_v5 = vld [vmem:[%s3314_s8 + $0x4d0] ss:$8 sps:$4 sm:$0xff]   ;;  %v2769_v7 = vld [vmem:[%s3314_s8 + $0x4e4] ss:$8 sps:$4 sm:$0xff]   ;;  %v2771_v8 = vld [vmem:[%s3314_s8 + $0xe0] ss:$8 sps:$4 sm:$0xff]  }
  0x66   : > { %v517_v59 = vcombine.high %v509_v54, %v509_v54  ;;  %v566_v62 = vcombine.high %v558_v60, %v558_v60  ;;  %v2772_v9 = vld [vmem:[%s3314_s8 + $0x4e0] ss:$8 sps:$4 sm:$0xff]   ;;  %v2773_v10 = vld [vmem:[%s3314_s8 + $0xf4] ss:$8 sps:$4 sm:$0xff]   ;;  %v2777_v12 = vld [vmem:[%s3314_s8 + $0xf0] ss:$8 sps:$4 sm:$0xff]   ;;  %v3414_v16 = vrot.slane %v509_v54, %v3373_v49  ;;  %v3417_v17 = vrot.slane %v558_v60, %v3373_v49 }
  0x67   : > { %1907 = vmatpush1.bf16.msra.mxu1 %v2717_v22  ;;  %v2775_v11 = vld [vmem:[%s3314_s8 + $0x4f4] ss:$8 sps:$4 sm:$0xff]   ;;  %v2778_v13 = vld [vmem:[%s3314_s8 + $0x4f0] ss:$8 sps:$4 sm:$0xff]   ;;  %v2782_v14 = vld [vmem:[%s3314_s8 + $0x104] ss:$8 sps:$4 sm:$0xff]  }
  0x68   : > { %2071 = vmatpush1.bf16.msra.mxu0 %v2718_v23  ;;  %1908 = vmatprep.subr.bf16.mxu1 %v2719_v24  ;;  %v539_v61 = vrot.slane %v517_v59, %v3373_v49  ;;  %v588_v3 = vrot.slane %v566_v62, %v3373_v49  ;;  %v2786_v15 = vld [vmem:[%s3314_s8 + $0x504] ss:$8 sps:$4 sm:$0xff]   ;;  %v2780_v18 = vld [vmem:[%s3314_s8 + $0x100] ss:$8 sps:$4 sm:$0xff]   ;;  %v2789_v20 = vld [vmem:[%s3314_s8 + $0x114] ss:$8 sps:$4 sm:$0xff]  }
  0x69   : > { %2072 = vmatprep.subr.bf16.mxu0 %v2721_v25  ;;  %v2784_v19 = vld [vmem:[%s3314_s8 + $0x500] ss:$8 sps:$4 sm:$0xff]   ;;  %v2792_v21 = vld [vmem:[%s3314_s8 + $0x514] ss:$8 sps:$4 sm:$0xff]   ;;  %v2787_v24 = vld [vmem:[%s3314_s8 + $0x110] ss:$8 sps:$4 sm:$0xff]  }
  0x6a   : > { %1928 = vmatprep.mubr.bf16.mxu1 %v539_v61  ;;  %2092 = vmatprep.mubr.bf16.mxu0 %v588_v3  ;;  %v549_v22 = vcombine.high %v539_v61, %v539_v61  ;;  %v598_v23 = vcombine.high %v588_v3, %v588_v3  ;;  %v2790_v25 = vld [vmem:[%s3314_s8 + $0x510] ss:$8 sps:$4 sm:$0xff]   ;;  %v2805_v36 = vld [vmem:[%s3314_s8 + $0x140] ss:$8 sps:$4 sm:$0xff]   ;;  %v2813_v38 = vld [vmem:[%s3314_s8 + $0x154] ss:$8 sps:$4 sm:$0xff]  }
  0x6b   : > { %1909 = vmatpush1.bf16.msra.mxu1 %v2723_v26  ;;  %v2795_v26 = vld [vmem:[%s3314_s8 + $0x124] ss:$8 sps:$4 sm:$0xff]   ;;  %v2808_v37 = vld [vmem:[%s3314_s8 + $0x540] ss:$8 sps:$4 sm:$0xff]   ;;  %v2840_v59 = vld [vmem:[%s3314_s8 + $0x594] ss:$8 sps:$4 sm:$0xff]  }
  0x6c   : > { %2073 = vmatpush1.bf16.msra.mxu0 %v2724_v27  ;;  %1910 = vmatprep.subr.bf16.mxu1 %v2725_v28  ;;  %v2798_v27 = vld [vmem:[%s3314_s8 + $0x524] ss:$8 sps:$4 sm:$0xff]   ;;  %v2793_v28 = vld [vmem:[%s3314_s8 + $0x120] ss:$8 sps:$4 sm:$0xff]   ;;  %v2835_v60 = vld [vmem:[%s3314_s8 + $0x190] ss:$8 sps:$4 sm:$0xff]  }
  0x6d   : > { %2074 = vmatprep.subr.bf16.mxu0 %v2727_v29  ;;  %v2796_v29 = vld [vmem:[%s3314_s8 + $0x520] ss:$8 sps:$4 sm:$0xff]   ;;  %v2819_v43 = vld [vmem:[%s3314_s8 + $0x164] ss:$8 sps:$4 sm:$0xff]   ;;  %v2838_v61 = vld [vmem:[%s3314_s8 + $0x590] ss:$8 sps:$4 sm:$0xff]  }
  0x6e   : > { %v2834_v54 = vld [vmem:[%s3314_s8 + $0x584] ss:$8 sps:$4 sm:$0xff]   ;;  %v2852_v3 = vld [vmem:[%s3314_s8 + $0x5b4] ss:$8 sps:$4 sm:$0xff]   ;;  %s3692_s27 = smov (!%p226_p7, %s2344_s27), 7 }
  0x6f   : > { %1911 = vmatpush1.bf16.msra.mxu1 %v2729_v30  ;;  %v2801_v30 = vld [vmem:[%s3314_s8 + $0x134] ss:$8 sps:$4 sm:$0xff]   ;;  %v2843_v62 = vld [vmem:[%s3314_s8 + $0x1a4] ss:$8 sps:$4 sm:$0xff]   ;;  %s228_s16 = scalar_lea.vmem %s3680_s3, %s3692_s27 }
  0x70   : > { %2075 = vmatpush1.bf16.msra.mxu0 %v2730_v31  ;;  %1912 = vmatprep.subr.bf16.mxu1 %v2731_v32  ;;  %v2804_v31 = vld [vmem:[%s3314_s8 + $0x534] ss:$8 sps:$4 sm:$0xff]   ;;  %v2799_v32 = vld [vmem:[%s3314_s8 + $0x130] ss:$8 sps:$4 sm:$0xff]  }
  0x71   : > { %2076 = vmatprep.subr.bf16.mxu0 %v2733_v33  ;;  %v2802_v33 = vld [vmem:[%s3314_s8 + $0x530] ss:$8 sps:$4 sm:$0xff]  }
  0x73   : > { %1913 = vmatpush1.bf16.msra.mxu1 %v2735_v34  ;;  %v2807_v34 = vld [vmem:[%s3314_s8 + $0x144] ss:$8 sps:$4 sm:$0xff]  }
  0x74   : > { %2077 = vmatpush1.bf16.msra.mxu0 %v2736_v35  ;;  %1914 = vmatprep.subr.bf16.mxu1 %v2737_v39  ;;  %v2810_v35 = vld [vmem:[%s3314_s8 + $0x544] ss:$8 sps:$4 sm:$0xff]   ;;  %v2816_v39 = vld [vmem:[%s3314_s8 + $0x554] ss:$8 sps:$4 sm:$0xff]  }
  0x75   : > { %2078 = vmatprep.subr.bf16.mxu0 %v2739_v40  ;;  %v2811_v40 = vld [vmem:[%s3314_s8 + $0x150] ss:$8 sps:$4 sm:$0xff]  }
  0x77   : > { %1915 = vmatpush1.bf16.msra.mxu1 %v2741_v41  ;;  %v2814_v41 = vld [vmem:[%s3314_s8 + $0x550] ss:$8 sps:$4 sm:$0xff]  }
  0x78   : > { %2079 = vmatpush1.bf16.msra.mxu0 %v2742_v44  ;;  %1916 = vmatprep.subr.bf16.mxu1 %v2743_v45  ;;  %v2822_v44 = vld [vmem:[%s3314_s8 + $0x564] ss:$8 sps:$4 sm:$0xff]   ;;  %v2817_v45 = vld [vmem:[%s3314_s8 + $0x160] ss:$8 sps:$4 sm:$0xff]  }
  0x79   : > { %2080 = vmatprep.subr.bf16.mxu0 %v2745_v46  ;;  %v2820_v46 = vld [vmem:[%s3314_s8 + $0x560] ss:$8 sps:$4 sm:$0xff]  }
  0x7b   : > { %1917 = vmatpush1.bf16.msra.mxu1 %v2747_v47  ;;  %v2825_v47 = vld [vmem:[%s3314_s8 + $0x174] ss:$8 sps:$4 sm:$0xff]  }
  0x7c   : > { %2081 = vmatpush1.bf16.msra.mxu0 %v2748_v48  ;;  %1918 = vmatprep.subr.bf16.mxu1 %v2749_v50  ;;  %v2828_v48 = vld [vmem:[%s3314_s8 + $0x574] ss:$8 sps:$4 sm:$0xff]   ;;  %v2823_v50 = vld [vmem:[%s3314_s8 + $0x170] ss:$8 sps:$4 sm:$0xff]  }
  0x7d   : > { %2082 = vmatprep.subr.bf16.mxu0 %v2751_v51  ;;  %v2826_v51 = vld [vmem:[%s3314_s8 + $0x570] ss:$8 sps:$4 sm:$0xff]  }
  0x7f   : > { %1919 = vmatpush1.bf16.msra.mxu1 %v2753_v53  ;;  %v2831_v53 = vld [vmem:[%s3314_s8 + $0x184] ss:$8 sps:$4 sm:$0xff]  }
  0x80   : > { %2083 = vmatpush1.bf16.msra.mxu0 %v2754_v55  ;;  %1920 = vmatprep.subr.bf16.mxu1 %v2755_v57  ;;  %v2829_v55 = vld [vmem:[%s3314_s8 + $0x180] ss:$8 sps:$4 sm:$0xff]  }
  0x81   : > { %2084 = vmatprep.subr.bf16.mxu0 %v2757_v58  ;;  %v2832_v57 = vld [vmem:[%s3314_s8 + $0x580] ss:$8 sps:$4 sm:$0xff]   ;;  %v2837_v58 = vld [vmem:[%s3314_s8 + $0x194] ss:$8 sps:$4 sm:$0xff]  }
  0x83   : > { %1921 = vmatpush1.bf16.msra.mxu1 %v2759_v63  ;;  %v2846_v63 = vld [vmem:[%s3314_s8 + $0x5a4] ss:$8 sps:$4 sm:$0xff]  }
  0x84   : > { %2085 = vmatpush1.bf16.msra.mxu0 %v2760_v0  ;;  %1922 = vmatprep.subr.bf16.mxu1 %v2761_v1  ;;  %v2841_v0 = vld [vmem:[%s3314_s8 + $0x1a0] ss:$8 sps:$4 sm:$0xff]  }
  0x85   : > { %2086 = vmatprep.subr.bf16.mxu0 %v2763_v2  ;;  %v2844_v1 = vld [vmem:[%s3314_s8 + $0x5a0] ss:$8 sps:$4 sm:$0xff]   ;;  %v2849_v2 = vld [vmem:[%s3314_s8 + $0x1b4] ss:$8 sps:$4 sm:$0xff]  }
  0x87   : > { %1923 = vmatpush1.bf16.msra.mxu1 %v2765_v4  ;;  %v2847_v4 = vld [vmem:[%s3314_s8 + $0x1b0] ss:$8 sps:$4 sm:$0xff]  }
  0x88   : > { %2087 = vmatpush1.bf16.msra.mxu0 %v2766_v5  ;;  %1924 = vmatprep.subr.bf16.mxu1 %v2767_v6  ;;  %v2850_v5 = vld [vmem:[%s3314_s8 + $0x5b0] ss:$8 sps:$4 sm:$0xff]   ;;  %v2855_v6 = vld [vmem:[%s3314_s8 + $0x1c4] ss:$8 sps:$4 sm:$0xff]  }
  0x89   : > { %2088 = vmatprep.subr.bf16.mxu0 %v2769_v7  ;;  %v2858_v7 = vld [vmem:[%s3314_s8 + $0x5c4] ss:$8 sps:$4 sm:$0xff]  }
  0x8b   : > { %1925 = vmatpush1.bf16.msra.mxu1 %v2771_v8  ;;  %v2853_v8 = vld [vmem:[%s3314_s8 + $0x1c0] ss:$8 sps:$4 sm:$0xff]  }
  0x8c   : > { %2089 = vmatpush1.bf16.msra.mxu0 %v2772_v9  ;;  %1926 = vmatprep.subr.bf16.mxu1 %v2773_v10  ;;  %v2856_v9 = vld [vmem:[%s3314_s8 + $0x5c0] ss:$8 sps:$4 sm:$0xff]   ;;  %v2861_v10 = vld [vmem:[%s3314_s8 + $0x1d4] ss:$8 sps:$4 sm:$0xff]  }
  0x8d   : > { %2090 = vmatprep.subr.bf16.mxu0 %v2775_v11  ;;  %v2864_v11 = vld [vmem:[%s3314_s8 + $0x5d4] ss:$8 sps:$4 sm:$0xff]  }
  0x8f   : > { %1927 = vmatpush1.bf16.msra.mxu1 %v2777_v12  ;;  %v2859_v12 = vld [vmem:[%s3314_s8 + $0x1d0] ss:$8 sps:$4 sm:$0xff]  }
  0x90   : > { %2091 = vmatpush1.bf16.msra.mxu0 %v2778_v13  ;;  %1937 = vmatprep.subr.bf16.mxu1 %v2782_v14  ;;  %v2862_v13 = vld [vmem:[%s3314_s8 + $0x5d0] ss:$8 sps:$4 sm:$0xff]   ;;  %v2867_v14 = vld [vmem:[%s3314_s8 + $0x1e4] ss:$8 sps:$4 sm:$0xff]  }
  0x91   : > { %2101 = vmatprep.subr.bf16.mxu0 %v2786_v15  ;;  %v2870_v15 = vld [vmem:[%s3314_s8 + $0x5e4] ss:$8 sps:$4 sm:$0xff]  }
  0x92   : > { %1929 = vmatmul.mubr.bf16.vlgmr.msra.gmra.mrb[0].mxu1 %v3414_v16 }
  0x93   : > { %2093 = vmatmul.mubr.bf16.vlgmr.msra.gmra.mrb[0].mxu0 %v3417_v17  ;;  %1938 = vmatpush1.bf16.msra.mxu1 %v2780_v18  ;;  %v502_v18 = vcombine.high %v3380_v52, %v3380_v52  ;;  %v2871_v52 = vld [vmem:[%s3314_s8 + $0x1f0] ss:$8 sps:$4 sm:$0xff]  }
  0x94   : > { %2102 = vmatpush1.bf16.msra.mxu0 %v2784_v19  ;;  %1939 = vmatprep.subr.bf16.mxu1 %v2789_v20  ;;  %v551_v19 = vcombine.high %v3389_v56, %v3389_v56  ;;  %v2865_v20 = vld [vmem:[%s3314_s8 + $0x1e0] ss:$8 sps:$4 sm:$0xff]   ;;  %v2874_v56 = vld [vmem:[%s3314_s8 + $0x5f0] ss:$8 sps:$4 sm:$0xff]  }
  0x95   : > { %2103 = vmatprep.subr.bf16.mxu0 %v2792_v21  ;;  %1969 = vmatprep.mubr.bf16.mxu1 %v549_v22  ;;  %v2868_v21 = vld [vmem:[%s3314_s8 + $0x5e0] ss:$8 sps:$4 sm:$0xff]   ;;  %v2873_v22 = vld [vmem:[%s3314_s8 + $0x1f4] ss:$8 sps:$4 sm:$0xff]  }
  0x96   : > { %2133 = vmatprep.mubr.bf16.mxu0 %v598_v23  ;;  %v2876_v23 = vld [vmem:[%s3314_s8 + $0x5f4] ss:$8 sps:$4 sm:$0xff]  }
  0x97   : > { %1940 = vmatpush1.bf16.msra.mxu1 %v2787_v24  ;;  %v3486_v24 = vrot.slane %v502_v18, %v3373_v49  ;;  %v2943_v18 = vld [vmem:[%s3314_s8 + $0x2b0] ss:$8 sps:$4 sm:$0xff]  }
  0x98   : > { %2104 = vmatpush1.bf16.msra.mxu0 %v2790_v25  ;;  %1941 = vmatprep.subr.bf16.mxu1 %v2795_v26  ;;  %v3489_v25 = vrot.slane %v551_v19, %v3373_v49  ;;  %v2879_v26 = vld [vmem:[%s3314_s8 + $0x204] ss:$8 sps:$4 sm:$0xff]   ;;  %v2946_v19 = vld [vmem:[%s3314_s8 + $0x6b0] ss:$8 sps:$4 sm:$0xff]  }
  0x99   : > { %2105 = vmatprep.subr.bf16.mxu0 %v2798_v27  ;;  %v2882_v27 = vld [vmem:[%s3314_s8 + $0x604] ss:$8 sps:$4 sm:$0xff]  }
  0x9b   : > { %1942 = vmatpush1.bf16.msra.mxu1 %v2793_v28  ;;  %v518_v28 = vcombine.high %v3486_v24, %v3486_v24 }
  0x9c   : > { %2106 = vmatpush1.bf16.msra.mxu0 %v2796_v29  ;;  %1943 = vmatprep.subr.bf16.mxu1 %v2801_v30  ;;  %v567_v29 = vcombine.high %v3489_v25, %v3489_v25  ;;  %v547_v30 = vcombine.high %v3414_v16, %v3414_v16 }
  0x9d   : > { %2107 = vmatprep.subr.bf16.mxu0 %v2804_v31  ;;  %v596_v31 = vcombine.high %v3417_v17, %v3417_v17  ;;  %v2883_v17 = vld [vmem:[%s3314_s8 + $0x210] ss:$8 sps:$4 sm:$0xff]  }
  0x9e   : > { %v3511_v16 = vrot.slane %v567_v29, %v3373_v49  ;;  %v2966_v29 = vld [vmem:[%s3314_s8 + $0x6e4] ss:$8 sps:$4 sm:$0xff]  }
  0x9f   : > { %1944 = vmatpush1.bf16.msra.mxu1 %v2799_v32  ;;  %v2877_v32 = vld [vmem:[%s3314_s8 + $0x200] ss:$8 sps:$4 sm:$0xff]  }
  0xa0   : > { %2108 = vmatpush1.bf16.msra.mxu0 %v2802_v33  ;;  %1945 = vmatprep.subr.bf16.mxu1 %v2807_v34  ;;  %v2880_v33 = vld [vmem:[%s3314_s8 + $0x600] ss:$8 sps:$4 sm:$0xff]   ;;  %v2885_v34 = vld [vmem:[%s3314_s8 + $0x214] ss:$8 sps:$4 sm:$0xff]  }
  0xa1   : > { %2109 = vmatprep.subr.bf16.mxu0 %v2810_v35  ;;  %v2888_v35 = vld [vmem:[%s3314_s8 + $0x614] ss:$8 sps:$4 sm:$0xff]  }
  0xa3   : > { %1946 = vmatpush1.bf16.msra.mxu1 %v2805_v36  ;;  %v3508_v36 = vrot.slane %v518_v28, %v3373_v49  ;;  %v2963_v28 = vld [vmem:[%s3314_s8 + $0x2e4] ss:$8 sps:$4 sm:$0xff]  }
  0xa4   : > { %2110 = vmatpush1.bf16.msra.mxu0 %v2808_v37  ;;  %1947 = vmatprep.subr.bf16.mxu1 %v2813_v38  ;;  %v2886_v37 = vld [vmem:[%s3314_s8 + $0x610] ss:$8 sps:$4 sm:$0xff]   ;;  %v2891_v38 = vld [vmem:[%s3314_s8 + $0x224] ss:$8 sps:$4 sm:$0xff]  }
  0xa5   : > { %2111 = vmatprep.subr.bf16.mxu0 %v2816_v39  ;;  %v2894_v39 = vld [vmem:[%s3314_s8 + $0x624] ss:$8 sps:$4 sm:$0xff]  }
  0xa7   : > { %1948 = vmatpush1.bf16.msra.mxu1 %v2811_v40  ;;  %v2889_v40 = vld [vmem:[%s3314_s8 + $0x220] ss:$8 sps:$4 sm:$0xff]  }
  0xa8   : > { %2112 = vmatpush1.bf16.msra.mxu0 %v2814_v41  ;;  %1949 = vmatprep.subr.bf16.mxu1 %v2819_v43  ;;  %v2892_v41 = vld [vmem:[%s3314_s8 + $0x620] ss:$8 sps:$4 sm:$0xff]   ;;  %v2897_v43 = vld [vmem:[%s3314_s8 + $0x234] ss:$8 sps:$4 sm:$0xff]  }
  0xa9   : > { %2113 = vmatprep.subr.bf16.mxu0 %v2822_v44  ;;  %v2900_v44 = vld [vmem:[%s3314_s8 + $0x634] ss:$8 sps:$4 sm:$0xff]  }
  0xab   : > { %1950 = vmatpush1.bf16.msra.mxu1 %v2817_v45  ;;  %v2895_v45 = vld [vmem:[%s3314_s8 + $0x230] ss:$8 sps:$4 sm:$0xff]  }
  0xac   : > { %2114 = vmatpush1.bf16.msra.mxu0 %v2820_v46  ;;  %1951 = vmatprep.subr.bf16.mxu1 %v2825_v47  ;;  %v2898_v46 = vld [vmem:[%s3314_s8 + $0x630] ss:$8 sps:$4 sm:$0xff]   ;;  %v2903_v47 = vld [vmem:[%s3314_s8 + $0x244] ss:$8 sps:$4 sm:$0xff]  }
  0xad   : > { %2115 = vmatprep.subr.bf16.mxu0 %v2828_v48  ;;  %v2906_v48 = vld [vmem:[%s3314_s8 + $0x644] ss:$8 sps:$4 sm:$0xff]  }
  0xaf   : > { %1952 = vmatpush1.bf16.msra.mxu1 %v2823_v50  ;;  %v2901_v50 = vld [vmem:[%s3314_s8 + $0x240] ss:$8 sps:$4 sm:$0xff]  }
  0xb0   : > { %2116 = vmatpush1.bf16.msra.mxu0 %v2826_v51  ;;  %1953 = vmatprep.subr.bf16.mxu1 %v2831_v53  ;;  %v2904_v51 = vld [vmem:[%s3314_s8 + $0x640] ss:$8 sps:$4 sm:$0xff]   ;;  %v2909_v53 = vld [vmem:[%s3314_s8 + $0x254] ss:$8 sps:$4 sm:$0xff]  }
  0xb1   : > { %2117 = vmatprep.subr.bf16.mxu0 %v2834_v54  ;;  %v2912_v54 = vld [vmem:[%s3314_s8 + $0x654] ss:$8 sps:$4 sm:$0xff]  }
  0xb3   : > { %1954 = vmatpush1.bf16.msra.mxu1 %v2829_v55  ;;  %v2907_v55 = vld [vmem:[%s3314_s8 + $0x250] ss:$8 sps:$4 sm:$0xff]  }
  0xb4   : > { %2118 = vmatpush1.bf16.msra.mxu0 %v2832_v57  ;;  %1955 = vmatprep.subr.bf16.mxu1 %v2837_v58  ;;  %v2910_v57 = vld [vmem:[%s3314_s8 + $0x650] ss:$8 sps:$4 sm:$0xff]   ;;  %v2915_v58 = vld [vmem:[%s3314_s8 + $0x264] ss:$8 sps:$4 sm:$0xff]  }
  0xb5   : > { %2119 = vmatprep.subr.bf16.mxu0 %v2840_v59  ;;  %v2918_v59 = vld [vmem:[%s3314_s8 + $0x664] ss:$8 sps:$4 sm:$0xff]  }
  0xb7   : > { %1956 = vmatpush1.bf16.msra.mxu1 %v2835_v60  ;;  %v2913_v60 = vld [vmem:[%s3314_s8 + $0x260] ss:$8 sps:$4 sm:$0xff]  }
  0xb8   : > { %2120 = vmatpush1.bf16.msra.mxu0 %v2838_v61  ;;  %1957 = vmatprep.subr.bf16.mxu1 %v2843_v62  ;;  %v2916_v61 = vld [vmem:[%s3314_s8 + $0x660] ss:$8 sps:$4 sm:$0xff]   ;;  %v2921_v62 = vld [vmem:[%s3314_s8 + $0x274] ss:$8 sps:$4 sm:$0xff]  }
  0xb9   : > { %2121 = vmatprep.subr.bf16.mxu0 %v2846_v63  ;;  %v2924_v63 = vld [vmem:[%s3314_s8 + $0x674] ss:$8 sps:$4 sm:$0xff]  }
  0xbb   : > { %1958 = vmatpush1.bf16.msra.mxu1 %v2841_v0  ;;  %v2919_v0 = vld [vmem:[%s3314_s8 + $0x270] ss:$8 sps:$4 sm:$0xff]  }
  0xbc   : > { %2122 = vmatpush1.bf16.msra.mxu0 %v2844_v1  ;;  %1959 = vmatprep.subr.bf16.mxu1 %v2849_v2  ;;  %v2922_v1 = vld [vmem:[%s3314_s8 + $0x670] ss:$8 sps:$4 sm:$0xff]   ;;  %v2927_v2 = vld [vmem:[%s3314_s8 + $0x284] ss:$8 sps:$4 sm:$0xff]  }
  0xbd   : > { %2123 = vmatprep.subr.bf16.mxu0 %v2852_v3  ;;  %v2930_v3 = vld [vmem:[%s3314_s8 + $0x684] ss:$8 sps:$4 sm:$0xff]  }
  0xbf   : > { %1960 = vmatpush1.bf16.msra.mxu1 %v2847_v4  ;;  %v2925_v4 = vld [vmem:[%s3314_s8 + $0x280] ss:$8 sps:$4 sm:$0xff]  }
  0xc0   : > { %2124 = vmatpush1.bf16.msra.mxu0 %v2850_v5  ;;  %1961 = vmatprep.subr.bf16.mxu1 %v2855_v6  ;;  %v2928_v5 = vld [vmem:[%s3314_s8 + $0x680] ss:$8 sps:$4 sm:$0xff]   ;;  %v2933_v6 = vld [vmem:[%s3314_s8 + $0x294] ss:$8 sps:$4 sm:$0xff]  }
  0xc1   : > { %2125 = vmatprep.subr.bf16.mxu0 %v2858_v7  ;;  %v2936_v7 = vld [vmem:[%s3314_s8 + $0x694] ss:$8 sps:$4 sm:$0xff]  }
  0xc3   : > { %1962 = vmatpush1.bf16.msra.mxu1 %v2853_v8  ;;  %v2931_v8 = vld [vmem:[%s3314_s8 + $0x290] ss:$8 sps:$4 sm:$0xff]  }
  0xc4   : > { %2126 = vmatpush1.bf16.msra.mxu0 %v2856_v9  ;;  %1963 = vmatprep.subr.bf16.mxu1 %v2861_v10  ;;  %v2934_v9 = vld [vmem:[%s3314_s8 + $0x690] ss:$8 sps:$4 sm:$0xff]   ;;  %v2939_v10 = vld [vmem:[%s3314_s8 + $0x2a4] ss:$8 sps:$4 sm:$0xff]  }
  0xc5   : > { %2127 = vmatprep.subr.bf16.mxu0 %v2864_v11  ;;  %v2942_v11 = vld [vmem:[%s3314_s8 + $0x6a4] ss:$8 sps:$4 sm:$0xff]  }
  0xc7   : > { %1964 = vmatpush1.bf16.msra.mxu1 %v2859_v12  ;;  %v2937_v12 = vld [vmem:[%s3314_s8 + $0x2a0] ss:$8 sps:$4 sm:$0xff]  }
  0xc8   : > { %2128 = vmatpush1.bf16.msra.mxu0 %v2862_v13  ;;  %1965 = vmatprep.subr.bf16.mxu1 %v2867_v14  ;;  %v2940_v13 = vld [vmem:[%s3314_s8 + $0x6a0] ss:$8 sps:$4 sm:$0xff]   ;;  %v2945_v14 = vld [vmem:[%s3314_s8 + $0x2b4] ss:$8 sps:$4 sm:$0xff]  }
  0xc9   : > { %2129 = vmatprep.subr.bf16.mxu0 %v2870_v15  ;;  %v2948_v15 = vld [vmem:[%s3314_s8 + $0x6b4] ss:$8 sps:$4 sm:$0xff]  }
  0xcb   : > { %1966 = vmatpush1.bf16.msra.mxu1 %v2865_v20  ;;  %v2951_v20 = vld [vmem:[%s3314_s8 + $0x2c4] ss:$8 sps:$4 sm:$0xff]  }
  0xcc   : > { %2130 = vmatpush1.bf16.msra.mxu0 %v2868_v21  ;;  %1967 = vmatprep.subr.bf16.mxu1 %v2873_v22  ;;  %v2954_v21 = vld [vmem:[%s3314_s8 + $0x6c4] ss:$8 sps:$4 sm:$0xff]   ;;  %v2949_v22 = vld [vmem:[%s3314_s8 + $0x2c0] ss:$8 sps:$4 sm:$0xff]  }
  0xcd   : > { %2131 = vmatprep.subr.bf16.mxu0 %v2876_v23  ;;  %v2952_v23 = vld [vmem:[%s3314_s8 + $0x6c0] ss:$8 sps:$4 sm:$0xff]  }
  0xcf   : > { %1968 = vmatpush1.bf16.msra.mxu1 %v2871_v52  ;;  %v2957_v52 = vld [vmem:[%s3314_s8 + $0x2d4] ss:$8 sps:$4 sm:$0xff]  }
  0xd0   : > { %2132 = vmatpush1.bf16.msra.mxu0 %v2874_v56  ;;  %1978 = vmatprep.subr.bf16.mxu1 %v2879_v26  ;;  %v2960_v56 = vld [vmem:[%s3314_s8 + $0x6d4] ss:$8 sps:$4 sm:$0xff]   ;;  %v2955_v26 = vld [vmem:[%s3314_s8 + $0x2d0] ss:$8 sps:$4 sm:$0xff]  }
  0xd1   : > { %2142 = vmatprep.subr.bf16.mxu0 %v2882_v27  ;;  %v2958_v27 = vld [vmem:[%s3314_s8 + $0x6d0] ss:$8 sps:$4 sm:$0xff]  }
  0xd2   : > { %1970 = vmatmul.mubr.bf16.vlgmr.msra.gmra.mrb[0].mxu1 %v547_v30  ;;  %v2961_v30 = vld [vmem:[%s3314_s8 + $0x2e0] ss:$8 sps:$4 sm:$0xff]  }
  0xd3   : > { %2134 = vmatmul.mubr.bf16.vlgmr.msra.gmra.mrb[0].mxu0 %v596_v31  ;;  %1979 = vmatpush1.bf16.msra.mxu1 %v2877_v32  ;;  %v2964_v31 = vld [vmem:[%s3314_s8 + $0x6e0] ss:$8 sps:$4 sm:$0xff]   ;;  %v2969_v32 = vld [vmem:[%s3314_s8 + $0x2f4] ss:$8 sps:$4 sm:$0xff]  }
  0xd4   : > { %2143 = vmatpush1.bf16.msra.mxu0 %v2880_v33  ;;  %1980 = vmatprep.subr.bf16.mxu1 %v2885_v34  ;;  %v2972_v33 = vld [vmem:[%s3314_s8 + $0x6f4] ss:$8 sps:$4 sm:$0xff]   ;;  %v2967_v34 = vld [vmem:[%s3314_s8 + $0x2f0] ss:$8 sps:$4 sm:$0xff]  }
  0xd5   : > { %2144 = vmatprep.subr.bf16.mxu0 %v2888_v35  ;;  %2010 = vmatprep.mubr.bf16.mxu1 %v3508_v36  ;;  %v2970_v35 = vld [vmem:[%s3314_s8 + $0x6f0] ss:$8 sps:$4 sm:$0xff]  }
  0xd6   : > { %2174 = vmatprep.mubr.bf16.mxu0 %v3511_v16 }
  0xd7   : > { %1981 = vmatpush1.bf16.msra.mxu1 %v2883_v17  ;;  %v2975_v17 = vld [vmem:[%s3314_s8 + $0x304] ss:$8 sps:$4 sm:$0xff]  }
  0xd8   : > { %2145 = vmatpush1.bf16.msra.mxu0 %v2886_v37  ;;  %1982 = vmatprep.subr.bf16.mxu1 %v2891_v38  ;;  %v2978_v37 = vld [vmem:[%s3314_s8 + $0x704] ss:$8 sps:$4 sm:$0xff]   ;;  %v3577_v38 = vrot.slane %v3486_v24, %v3373_v49  ;;  %v550_v24 = vcombine.high %v3508_v36, %v3508_v36 }
  0xd9   : > { %2146 = vmatprep.subr.bf16.mxu0 %v2894_v39  ;;  %v3581_v39 = vrot.slane %v3489_v25, %v3373_v49  ;;  %v2979_v25 = vld [vmem:[%s3314_s8 + $0x310] ss:$8 sps:$4 sm:$0xff]   ;;  %v2987_v36 = vld [vmem:[%s3314_s8 + $0x324] ss:$8 sps:$4 sm:$0xff]  }
  0xdb   : > { %1983 = vmatpush1.bf16.msra.mxu1 %v2889_v40  ;;  %v2973_v40 = vld [vmem:[%s3314_s8 + $0x300] ss:$8 sps:$4 sm:$0xff]  }
  0xdc   : > { %2147 = vmatpush1.bf16.msra.mxu0 %v2892_v41  ;;  %1984 = vmatprep.subr.bf16.mxu1 %v2897_v43  ;;  %v2976_v41 = vld [vmem:[%s3314_s8 + $0x700] ss:$8 sps:$4 sm:$0xff]   ;;  %v2981_v43 = vld [vmem:[%s3314_s8 + $0x314] ss:$8 sps:$4 sm:$0xff]  }
  0xdd   : > { %2148 = vmatprep.subr.bf16.mxu0 %v2900_v44  ;;  %v2984_v44 = vld [vmem:[%s3314_s8 + $0x714] ss:$8 sps:$4 sm:$0xff]  }
  0xdf   : > { %1985 = vmatpush1.bf16.msra.mxu1 %v2895_v45  ;;  %v599_v45 = vcombine.high %v3511_v16, %v3511_v16  ;;  %v2985_v16 = vld [vmem:[%s3314_s8 + $0x320] ss:$8 sps:$4 sm:$0xff]  }
  0xe0   : > { %2149 = vmatpush1.bf16.msra.mxu0 %v2898_v46  ;;  %1986 = vmatprep.subr.bf16.mxu1 %v2903_v47  ;;  %v2982_v46 = vld [vmem:[%s3314_s8 + $0x710] ss:$8 sps:$4 sm:$0xff]   ;;  %v2990_v47 = vld [vmem:[%s3314_s8 + $0x724] ss:$8 sps:$4 sm:$0xff]  }
  0xe1   : > { %2150 = vmatprep.subr.bf16.mxu0 %v2906_v48  ;;  %v2988_v48 = vld [vmem:[%s3314_s8 + $0x720] ss:$8 sps:$4 sm:$0xff]  }
  0xe3   : > { %1987 = vmatpush1.bf16.msra.mxu1 %v2901_v50  ;;  %v2993_v50 = vld [vmem:[%s3314_s8 + $0x334] ss:$8 sps:$4 sm:$0xff]  }
  0xe4   : > { %2151 = vmatpush1.bf16.msra.mxu0 %v2904_v51  ;;  %1988 = vmatprep.subr.bf16.mxu1 %v2909_v53  ;;  %v2996_v51 = vld [vmem:[%s3314_s8 + $0x734] ss:$8 sps:$4 sm:$0xff]   ;;  %v2991_v53 = vld [vmem:[%s3314_s8 + $0x330] ss:$8 sps:$4 sm:$0xff]  }
  0xe5   : > { %2152 = vmatprep.subr.bf16.mxu0 %v2912_v54  ;;  %v2994_v54 = vld [vmem:[%s3314_s8 + $0x730] ss:$8 sps:$4 sm:$0xff]  }
  0xe7   : > { %1989 = vmatpush1.bf16.msra.mxu1 %v2907_v55  ;;  %v2999_v55 = vld [vmem:[%s3314_s8 + $0x344] ss:$8 sps:$4 sm:$0xff]  }
  0xe8   : > { %2153 = vmatpush1.bf16.msra.mxu0 %v2910_v57  ;;  %1990 = vmatprep.subr.bf16.mxu1 %v2915_v58  ;;  %v3002_v57 = vld [vmem:[%s3314_s8 + $0x744] ss:$8 sps:$4 sm:$0xff]   ;;  %v2997_v58 = vld [vmem:[%s3314_s8 + $0x340] ss:$8 sps:$4 sm:$0xff]  }
  0xe9   : > { %2154 = vmatprep.subr.bf16.mxu0 %v2918_v59  ;;  %v3000_v59 = vld [vmem:[%s3314_s8 + $0x740] ss:$8 sps:$4 sm:$0xff]  }
  0xeb   : > { %1991 = vmatpush1.bf16.msra.mxu1 %v2913_v60  ;;  %v3005_v60 = vld [vmem:[%s3314_s8 + $0x354] ss:$8 sps:$4 sm:$0xff]  }
  0xec   : > { %2155 = vmatpush1.bf16.msra.mxu0 %v2916_v61  ;;  %1992 = vmatprep.subr.bf16.mxu1 %v2921_v62  ;;  %v3008_v61 = vld [vmem:[%s3314_s8 + $0x754] ss:$8 sps:$4 sm:$0xff]   ;;  %v3003_v62 = vld [vmem:[%s3314_s8 + $0x350] ss:$8 sps:$4 sm:$0xff]  }
  0xed   : > { %2156 = vmatprep.subr.bf16.mxu0 %v2924_v63  ;;  %v3006_v63 = vld [vmem:[%s3314_s8 + $0x750] ss:$8 sps:$4 sm:$0xff]  }
  0xef   : > { %1993 = vmatpush1.bf16.msra.mxu1 %v2919_v0  ;;  %v3011_v0 = vld [vmem:[%s3314_s8 + $0x364] ss:$8 sps:$4 sm:$0xff]  }
  0xf0   : > { %2157 = vmatpush1.bf16.msra.mxu0 %v2922_v1  ;;  %1994 = vmatprep.subr.bf16.mxu1 %v2927_v2  ;;  %v3014_v1 = vld [vmem:[%s3314_s8 + $0x764] ss:$8 sps:$4 sm:$0xff]   ;;  %v3009_v2 = vld [vmem:[%s3314_s8 + $0x360] ss:$8 sps:$4 sm:$0xff]  }
  0xf1   : > { %2158 = vmatprep.subr.bf16.mxu0 %v2930_v3  ;;  %v3012_v3 = vld [vmem:[%s3314_s8 + $0x760] ss:$8 sps:$4 sm:$0xff]  }
  0xf3   : > { %1995 = vmatpush1.bf16.msra.mxu1 %v2925_v4  ;;  %v3017_v4 = vld [vmem:[%s3314_s8 + $0x374] ss:$8 sps:$4 sm:$0xff]  }
  0xf4   : > { %2159 = vmatpush1.bf16.msra.mxu0 %v2928_v5  ;;  %1996 = vmatprep.subr.bf16.mxu1 %v2933_v6  ;;  %v3020_v5 = vld [vmem:[%s3314_s8 + $0x774] ss:$8 sps:$4 sm:$0xff]   ;;  %v3015_v6 = vld [vmem:[%s3314_s8 + $0x370] ss:$8 sps:$4 sm:$0xff]  }
  0xf5   : > { %2160 = vmatprep.subr.bf16.mxu0 %v2936_v7  ;;  %v3018_v7 = vld [vmem:[%s3314_s8 + $0x770] ss:$8 sps:$4 sm:$0xff]  }
  0xf7   : > { %1997 = vmatpush1.bf16.msra.mxu1 %v2931_v8  ;;  %v3023_v8 = vld [vmem:[%s3314_s8 + $0x384] ss:$8 sps:$4 sm:$0xff]  }
  0xf8   : > { %2161 = vmatpush1.bf16.msra.mxu0 %v2934_v9  ;;  %1998 = vmatprep.subr.bf16.mxu1 %v2939_v10  ;;  %v3026_v9 = vld [vmem:[%s3314_s8 + $0x784] ss:$8 sps:$4 sm:$0xff]   ;;  %v3021_v10 = vld [vmem:[%s3314_s8 + $0x380] ss:$8 sps:$4 sm:$0xff]  }
  0xf9   : > { %2162 = vmatprep.subr.bf16.mxu0 %v2942_v11  ;;  %v3024_v11 = vld [vmem:[%s3314_s8 + $0x780] ss:$8 sps:$4 sm:$0xff]  }
  0xfb   : > { %1999 = vmatpush1.bf16.msra.mxu1 %v2937_v12  ;;  %v3029_v12 = vld [vmem:[%s3314_s8 + $0x394] ss:$8 sps:$4 sm:$0xff]  }
  0xfc   : > { %2163 = vmatpush1.bf16.msra.mxu0 %v2940_v13  ;;  %2000 = vmatprep.subr.bf16.mxu1 %v2945_v14  ;;  %v3032_v13 = vld [vmem:[%s3314_s8 + $0x794] ss:$8 sps:$4 sm:$0xff]   ;;  %v3027_v14 = vld [vmem:[%s3314_s8 + $0x390] ss:$8 sps:$4 sm:$0xff]  }
  0xfd   : > { %2164 = vmatprep.subr.bf16.mxu0 %v2948_v15  ;;  %v3030_v15 = vld [vmem:[%s3314_s8 + $0x790] ss:$8 sps:$4 sm:$0xff]  }
  0xff   : > { %2001 = vmatpush1.bf16.msra.mxu1 %v2943_v18  ;;  %v3035_v18 = vld [vmem:[%s3314_s8 + $0x3a4] ss:$8 sps:$4 sm:$0xff]  }
 0x100   : > { %2165 = vmatpush1.bf16.msra.mxu0 %v2946_v19  ;;  %2002 = vmatprep.subr.bf16.mxu1 %v2951_v20  ;;  %v3038_v19 = vld [vmem:[%s3314_s8 + $0x7a4] ss:$8 sps:$4 sm:$0xff]   ;;  %v3033_v20 = vld [vmem:[%s3314_s8 + $0x3a0] ss:$8 sps:$4 sm:$0xff]  }
 0x101   : > { %2166 = vmatprep.subr.bf16.mxu0 %v2954_v21  ;;  %v3036_v21 = vld [vmem:[%s3314_s8 + $0x7a0] ss:$8 sps:$4 sm:$0xff]  }
 0x103   : > { %2003 = vmatpush1.bf16.msra.mxu1 %v2949_v22  ;;  %v3041_v22 = vld [vmem:[%s3314_s8 + $0x3b4] ss:$8 sps:$4 sm:$0xff]  }
 0x104   : > { %2167 = vmatpush1.bf16.msra.mxu0 %v2952_v23  ;;  %2004 = vmatprep.subr.bf16.mxu1 %v2957_v52  ;;  %v3044_v23 = vld [vmem:[%s3314_s8 + $0x7b4] ss:$8 sps:$4 sm:$0xff]   ;;  %v3039_v52 = vld [vmem:[%s3314_s8 + $0x3b0] ss:$8 sps:$4 sm:$0xff]  }
 0x105   : > { %2168 = vmatprep.subr.bf16.mxu0 %v2960_v56  ;;  %v3042_v56 = vld [vmem:[%s3314_s8 + $0x7b0] ss:$8 sps:$4 sm:$0xff]  }
 0x107   : > { %2005 = vmatpush1.bf16.msra.mxu1 %v2955_v26  ;;  %v3047_v26 = vld [vmem:[%s3314_s8 + $0x3c4] ss:$8 sps:$4 sm:$0xff]  }
 0x108   : > { %2169 = vmatpush1.bf16.msra.mxu0 %v2958_v27  ;;  %2006 = vmatprep.subr.bf16.mxu1 %v2963_v28  ;;  %v3050_v27 = vld [vmem:[%s3314_s8 + $0x7c4] ss:$8 sps:$4 sm:$0xff]   ;;  %v3045_v28 = vld [vmem:[%s3314_s8 + $0x3c0] ss:$8 sps:$4 sm:$0xff]  }
 0x109   : > { %2170 = vmatprep.subr.bf16.mxu0 %v2966_v29  ;;  %v3048_v29 = vld [vmem:[%s3314_s8 + $0x7c0] ss:$8 sps:$4 sm:$0xff]  }
 0x10b   : > { %2007 = vmatpush1.bf16.msra.mxu1 %v2961_v30  ;;  %v3053_v30 = vld [vmem:[%s3314_s8 + $0x3d4] ss:$8 sps:$4 sm:$0xff]  }
 0x10c   : > { %2171 = vmatpush1.bf16.msra.mxu0 %v2964_v31  ;;  %2008 = vmatprep.subr.bf16.mxu1 %v2969_v32  ;;  %v3056_v31 = vld [vmem:[%s3314_s8 + $0x7d4] ss:$8 sps:$4 sm:$0xff]   ;;  %v3051_v32 = vld [vmem:[%s3314_s8 + $0x3d0] ss:$8 sps:$4 sm:$0xff]  }
 0x10d   : > { %2172 = vmatprep.subr.bf16.mxu0 %v2972_v33  ;;  %v3054_v33 = vld [vmem:[%s3314_s8 + $0x7d0] ss:$8 sps:$4 sm:$0xff]  }
 0x10f   : > { %2009 = vmatpush1.bf16.msra.mxu1 %v2967_v34  ;;  %v3059_v34 = vld [vmem:[%s3314_s8 + $0x3e4] ss:$8 sps:$4 sm:$0xff]  }
 0x110   : > { %2173 = vmatpush1.bf16.msra.mxu0 %v2970_v35  ;;  %2019 = vmatprep.subr.bf16.mxu1 %v2975_v17  ;;  %v3062_v35 = vld [vmem:[%s3314_s8 + $0x7e4] ss:$8 sps:$4 sm:$0xff]   ;;  %v3057_v17 = vld [vmem:[%s3314_s8 + $0x3e0] ss:$8 sps:$4 sm:$0xff]  }
 0x111   : > { %2183 = vmatprep.subr.bf16.mxu0 %v2978_v37  ;;  %v3060_v37 = vld [vmem:[%s3314_s8 + $0x7e0] ss:$8 sps:$4 sm:$0xff]  }
 0x112   : > { %2011 = vmatmul.mubr.bf16.vlgmr.msra.gmra.mrb[0].mxu1 %v3577_v38 }
 0x113   : > { %2175 = vmatmul.mubr.bf16.vlgmr.msra.gmra.mrb[0].mxu0 %v3581_v39  ;;  %2020 = vmatpush1.bf16.msra.mxu1 %v2973_v40  ;;  %v3065_v40 = vld [vmem:[%s3314_s8 + $0x3f4] ss:$8 sps:$4 sm:$0xff]  }
 0x114   : > { %2184 = vmatpush1.bf16.msra.mxu0 %v2976_v41  ;;  %2021 = vmatprep.subr.bf16.mxu1 %v2981_v43  ;;  %v3068_v41 = vld [vmem:[%s3314_s8 + $0x7f4] ss:$8 sps:$4 sm:$0xff]   ;;  %v3063_v43 = vld [vmem:[%s3314_s8 + $0x3f0] ss:$8 sps:$4 sm:$0xff]  }
 0x115   : > { %2185 = vmatprep.subr.bf16.mxu0 %v2984_v44  ;;  %2051 = vmatprep.mubr.bf16.mxu1 %v550_v24  ;;  %v3066_v44 = vld [vmem:[%s3314_s8 + $0x7f0] ss:$8 sps:$4 sm:$0xff]   ;;  %v548_v24 = vcombine.high %v3577_v38, %v3577_v38 }
 0x116   : > { %2215 = vmatprep.mubr.bf16.mxu0 %v599_v45  ;;  %v597_v45 = vcombine.high %v3581_v39, %v3581_v39 }
 0x117   : > { %2022 = vmatpush1.bf16.msra.mxu1 %v2979_v25  ;;  %v492_v25 = vsub.s32 0, %v3365_v42 }
 0x118   : > { %2186 = vmatpush1.bf16.msra.mxu0 %v2982_v46  ;;  %2023 = vmatprep.subr.bf16.mxu1 %v2987_v36  ;;  %v488_v46 = vld [vmem:[%s3320_s29] sm:$0x3]  ;;  %v496_v36 = vsub.s32 1, %v3365_v42 }
 0x119   : > { %2187 = vmatprep.subr.bf16.mxu0 %v2990_v47  ;;  %v493_v47 = vrot.slane %v488_v46, %v492_v25 }
 0x11b   : > { %2024 = vmatpush1.bf16.msra.mxu1 %v2985_v16  ;;  %v497_v16 = vrot.slane %v488_v46, %v496_v36 }
 0x11c   : > { %2188 = vmatpush1.bf16.msra.mxu0 %v2988_v48  ;;  %2025 = vmatprep.subr.bf16.mxu1 %v2993_v50 }
 0x11d   : > { %2189 = vmatprep.subr.bf16.mxu0 %v2996_v51 }
 0x11f   : > { %2026 = vmatpush1.bf16.msra.mxu1 %v2991_v53 }
 0x120   : > { %2190 = vmatpush1.bf16.msra.mxu0 %v2994_v54  ;;  %2027 = vmatprep.subr.bf16.mxu1 %v2999_v55 }
 0x121   : > { %2191 = vmatprep.subr.bf16.mxu0 %v3002_v57 }
 0x123   : > { %2028 = vmatpush1.bf16.msra.mxu1 %v2997_v58 }
 0x124   : > { %2192 = vmatpush1.bf16.msra.mxu0 %v3000_v59  ;;  %2029 = vmatprep.subr.bf16.mxu1 %v3005_v60 }
 0x125   : > { %2193 = vmatprep.subr.bf16.mxu0 %v3008_v61 }
 0x127   : > { %2030 = vmatpush1.bf16.msra.mxu1 %v3003_v62 }
 0x128   : > { %2194 = vmatpush1.bf16.msra.mxu0 %v3006_v63  ;;  %2031 = vmatprep.subr.bf16.mxu1 %v3011_v0 }
 0x129   : > { %2195 = vmatprep.subr.bf16.mxu0 %v3014_v1 }
 0x12b   : > { %2032 = vmatpush1.bf16.msra.mxu1 %v3009_v2 }
 0x12c   : > { %2196 = vmatpush1.bf16.msra.mxu0 %v3012_v3  ;;  %2033 = vmatprep.subr.bf16.mxu1 %v3017_v4 }
 0x12d   : > { %2197 = vmatprep.subr.bf16.mxu0 %v3020_v5 }
 0x12f   : > { %2034 = vmatpush1.bf16.msra.mxu1 %v3015_v6 }
 0x130   : > { %2198 = vmatpush1.bf16.msra.mxu0 %v3018_v7  ;;  %2035 = vmatprep.subr.bf16.mxu1 %v3023_v8 }
 0x131   : > { %2199 = vmatprep.subr.bf16.mxu0 %v3026_v9 }
 0x133   : > { %2036 = vmatpush1.bf16.msra.mxu1 %v3021_v10 }
 0x134   : > { %2200 = vmatpush1.bf16.msra.mxu0 %v3024_v11  ;;  %2037 = vmatprep.subr.bf16.mxu1 %v3029_v12 }
 0x135   : > { %2201 = vmatprep.subr.bf16.mxu0 %v3032_v13 }
 0x137   : > { %2038 = vmatpush1.bf16.msra.mxu1 %v3027_v14 }
 0x138   : > { %2202 = vmatpush1.bf16.msra.mxu0 %v3030_v15  ;;  %2039 = vmatprep.subr.bf16.mxu1 %v3035_v18 }
 0x139   : > { %2203 = vmatprep.subr.bf16.mxu0 %v3038_v19 }
 0x13b   : > { %2040 = vmatpush1.bf16.msra.mxu1 %v3033_v20 }
 0x13c   : > { %2204 = vmatpush1.bf16.msra.mxu0 %v3036_v21  ;;  %2041 = vmatprep.subr.bf16.mxu1 %v3041_v22 }
 0x13d   : > { %2205 = vmatprep.subr.bf16.mxu0 %v3044_v23 }
 0x13f   : > { %2042 = vmatpush1.bf16.msra.mxu1 %v3039_v52 }
 0x140   : > { %2206 = vmatpush1.bf16.msra.mxu0 %v3042_v56  ;;  %2043 = vmatprep.subr.bf16.mxu1 %v3047_v26 }
 0x141   : > { %2207 = vmatprep.subr.bf16.mxu0 %v3050_v27 }
 0x143   : > { %2044 = vmatpush1.bf16.msra.mxu1 %v3045_v28 }
 0x144   : > { %2208 = vmatpush1.bf16.msra.mxu0 %v3048_v29  ;;  %2045 = vmatprep.subr.bf16.mxu1 %v3053_v30 }
 0x145   : > { %2209 = vmatprep.subr.bf16.mxu0 %v3056_v31 }
 0x147   : > { %2046 = vmatpush1.bf16.msra.mxu1 %v3051_v32 }
 0x148   : > { %2210 = vmatpush1.bf16.msra.mxu0 %v3054_v33  ;;  %2047 = vmatprep.subr.bf16.mxu1 %v3059_v34 }
 0x149   : > { %2211 = vmatprep.subr.bf16.mxu0 %v3062_v35 }
 0x14b   : > { %2048 = vmatpush1.bf16.msra.mxu1 %v3057_v17 }
 0x14c   : > { %2212 = vmatpush1.bf16.msra.mxu0 %v3060_v37  ;;  %2049 = vmatprep.subr.bf16.mxu1 %v3065_v40 }
 0x14d   : > { %2213 = vmatprep.subr.bf16.mxu0 %v3068_v41 }
 0x14f   : > { %2050 = vmatpush1.bf16.msra.mxu1 %v3063_v43 }
 0x150   : > { %2214 = vmatpush1.bf16.msra.mxu0 %v3066_v44 }
 0x152   : > { %2052 = vmatmul.mubr.bf16.vlgmr.msra.gmra.mrb[0].mxu1 %v548_v24 }
 0x153   : > { %2216 = vmatmul.mubr.bf16.vlgmr.msra.gmra.mrb[0].mxu0 %v597_v45 }
 0x225   : > { %v2053_v48 = vpop.f32.mrb[0].mxu1 }
 0x226   : > { %v2217_v50 = vpop.f32.mrb[0].mxu0  ;;  %v2607_v51 = vadd.f32 %v2053_v48, %v493_v47  ;;  %v2055_v38 = vpop.f32.mrb[1].mxu1 }
 0x227   : > { %v2219_v53 = vpop.f32.mrb[1].mxu0  ;;  %v2609_v39 = vadd.f32 %v2055_v38, %v497_v16  ;;  %v2057_v54 = vpop.f32.mrb[2].mxu1 }
 0x228   : > { %v2221_v55 = vpop.f32.mrb[2].mxu0  ;;  %v2608_v57 = vadd.f32 %v2607_v51, %v2217_v50  ;;  %v2058_v58 = vpop.f32.mrb[3].mxu1 }
 0x229   : > { %v2222_v59 = vpop.f32.mrb[3].mxu0  ;;  %v2610_v60 = vadd.f32 %v2609_v39, %v2219_v53 }
 0x22a   : > { %v2224_v61 = vmax.f32 %v2608_v57, 0.0 }
 0x22b   : > { %v2225_v42 = vmax.f32 %v2610_v60, 0.0 }
 0x22d   : > { %v2601_v62 = vpack.c.bf16 %v2225_v42, %v2224_v61 }
 0x22f   : > { %v2237_v63 = vrot.slane %v2601_v62, %v3373_v49 }
 0x231   : > { %2602 = vst.sshfl [vmem:[%s228_s16] sm:$0x5 pattern:$0x73625140] %v2237_v63 }
 0x232 PF: > { %p16_p8 = scmp.ge.s32.totalorder %s3215_s17, 6   ;;  %s3687_s12 = smov %s3159_s13 }
 0x233   : > { %s3688_s13 = smov %s3163_s14  ;;  %s3689_s14 = smov %s3225_s20 }
 0x234   : > { %s3690_s15 = smov %s3215_s17  ;;  %18 = sbr.rel (!%p16_p8) target bundleno = 5 (0x5), region = 85 }
 0x23b   :  { %2267 = vsyncpa [#allocation3], 1 }
 0x23c   :  { %2269 = vsyncpa [#allocation3 + $0x1], 1 }
 0x23d   :  { %2270 = vsyncpa [#allocation5], 1 }
 0x23e   :  { %2272 = vsyncpa [#allocation5 + $0x1], 1 }

</bundles_post_ra>
